<compile_context>
chip_gen: v7x
topology: tpu7x:2x2x1
jax: 0.10.0
libtpu: 0.0.40
codegen_flags: <defaults>
</compile_context>

<pallas_src>
import functools

import jax
import jax.numpy as jnp
from jax import lax
from jax.experimental import pallas as pl
from jax.experimental.pallas import tpu as pltpu


# ----------------------------------------------------------------------------
# Hardware-derived tiling knobs
# ----------------------------------------------------------------------------
def _detect_num_tensorcores():
    """Best-effort TensorCore-per-chip count (v7x has 2; v5e/v6e have 1)."""
    try:
        info = pltpu.get_tpu_info()
        for name in ("num_cores", "num_tensorcores", "tensorcore_count",
                     "cores_per_chip", "num_cores_per_chip"):
            val = getattr(info, name, None)
            if isinstance(val, int) and val > 0:
                return val
    except Exception:
        pass
    try:
        kind = jax.devices()[0].device_kind.lower()
        if "v7" in kind:
            return 2
    except Exception:
        pass
    return 1


_NUM_TC = _detect_num_tensorcores()

# Per-grid-step operand budget.  Conservative for v7x (64 MiB physical / 32 MiB
# default scoped VMEM) once inputs are double-buffered; v5e/v6e have 128 MiB.
_VMEM_BLOCK_BUDGET = 8 * 1024 * 1024


def _vmem_limit(block_bytes):
    # Headroom for double buffering + in-flight intermediates; clamped so the
    # scoped limit stays safe on v7x's 64 MiB physical VMEM.
    return int(min(48 * 1024 * 1024, max(32 * 1024 * 1024, 4 * int(block_bytes))))


# ----------------------------------------------------------------------------
# Pallas kernels
# ----------------------------------------------------------------------------
def _coarse_kernel(q_ref, k_ref, v_ref, m_ref, ti_ref, *, temp, topk):
    # q: [bh_t, L, d], k/v: [bh_t, S, d]  (batch-heads fused into the block)
    q = q_ref[...].astype(jnp.float32) * temp          # fold temperature into q (small)
    k = k_ref[...].astype(jnp.float32)
    v = v_ref[...].astype(jnp.float32)
    # batched MXU contraction over d
    s = jnp.einsum('bld,bsd->bls', q, k, preferred_element_type=jnp.float32)
    s = s - jnp.max(s, axis=-1, keepdims=True)
    e = jnp.exp(s)
    z = jnp.sum(e, axis=-1, keepdims=True)
    r = pl.reciprocal(z, approx=True)                  # EUP slot
    r = r * (2.0 - z * r)                              # one Newton step: near-exact
    a = e * r
    # Message emitted lane-dense as [bh_t, d, L] (L on the lane axis).
    m_ref[...] = jnp.einsum('bsd,bls->bdl', v, a,
                            preferred_element_type=jnp.float32).astype(m_ref.dtype)
    # Fused top-k over the key axis: indices only (values unused downstream).
    S = a.shape[-1]
    iota_s = lax.broadcasted_iota(jnp.int32, a.shape, 2)
    work = a
    idxs = []
    for _ in range(topk):
        mj = jnp.max(work, axis=-1, keepdims=True)
        idx = jnp.min(jnp.where(work == mj, iota_s, S), axis=-1).astype(jnp.int32)
        idxs.append(idx)
        work = jnp.where(iota_s == idx[..., None], -jnp.inf, work)
    ti_ref[...] = jnp.stack(idxs, axis=1)              # [bh_t, topk, L]


def coarse_attention(q, k, v, temp, topk):
    """q: [BH, L, d], k/v: [BH, S, d] -> (msg [BH, d, L] f32, topk_idx [BH, topk, L] i32)."""
    BH, L, d = q.shape
    S = k.shape[1]
    # TODO(synk): tile over L (online softmax) for very large coarse feature maps; at
    # module-typical coarse sizes the whole [bh_t, L, S] score block fits VMEM.
    per_bh = 4 * (L * d + 2 * S * d + d * L + topk * L + 3 * L * S)
    limit = max(1, _VMEM_BLOCK_BUDGET // max(per_bh, 1))
    min_steps = min(_NUM_TC, BH)
    divisors = [t for t in range(1, BH + 1) if BH % t == 0]
    bh_t = None
    for t in sorted(divisors, reverse=True):
        if t <= limit and BH // t >= min_steps:
            bh_t = t
            break
    if bh_t is None:
        fits = [t for t in divisors if t <= limit]
        bh_t = max(fits) if fits else 1
    grid = (BH // bh_t,)
    block_bytes = per_bh * bh_t
    kern = functools.partial(_coarse_kernel, temp=temp, topk=topk)
    return pl.pallas_call(
        kern,
        out_shape=(jax.ShapeDtypeStruct((BH, d, L), jnp.float32),
                   jax.ShapeDtypeStruct((BH, topk, L), jnp.int32)),
        grid=grid,
        in_specs=[pl.BlockSpec((bh_t, L, d), lambda i: (i, 0, 0)),
                  pl.BlockSpec((bh_t, S, d), lambda i: (i, 0, 0)),
                  pl.BlockSpec((bh_t, S, d), lambda i: (i, 0, 0))],
        out_specs=(pl.BlockSpec((bh_t, d, L), lambda i: (i, 0, 0)),
                   pl.BlockSpec((bh_t, topk, L), lambda i: (i, 0, 0))),
        compiler_params=pltpu.CompilerParams(
            dimension_semantics=("parallel",),
            vmem_limit_bytes=_vmem_limit(block_bytes)),
    )(q, k, v)


def _fine_kernel(q_ref, k_ref, v_ref, m_ref, ti_ref, *, temp, topk):
    # Rows-on-lanes layout (fused row axis R = B*nhead*l0 on the 128-lane axis):
    #   q: [d, 4, rt], k: [d, t2, rt], v: [t2, d, rt]
    q = q_ref[...].astype(jnp.float32) * temp
    k = k_ref[...].astype(jnp.float32)
    v = v_ref[...].astype(jnp.float32)
    d = q.shape[0]
    t2 = k.shape[1]

    # QK^T: unrolled VPU multiply-accumulate over the small head dim (no tiny MXU matmuls).
    s = q[0, :, None, :] * k[0, None, :, :]            # [4, t2, rt]
    for dd in range(1, d):
        s = s + q[dd, :, None, :] * k[dd, None, :, :]

    # softmax over the candidate axis t2
    s = s - jnp.max(s, axis=1, keepdims=True)
    e = jnp.exp(s)
    z = jnp.sum(e, axis=1, keepdims=True)
    r = pl.reciprocal(z, approx=True)
    r = r * (2.0 - z * r)                              # Newton step: near-exact
    a = e * r                                          # [4, t2, rt]

    # A @ V: unrolled accumulate over t2; message emitted lane-dense as [4, d, rt].
    msg = a[:, 0, None, :] * v[0][None, :, :]          # [4, d, rt]
    for t in range(1, t2):
        msg = msg + a[:, t, None, :] * v[t][None, :, :]
    m_ref[...] = msg.astype(m_ref.dtype)

    # Fused top-k over the candidate axis: indices only.
    iota_t = lax.broadcasted_iota(jnp.int32, a.shape, 1)
    work = a
    idxs = []
    for _ in range(topk):
        mj = jnp.max(work, axis=1, keepdims=True)
        idx = jnp.min(jnp.where(work == mj, iota_t, t2), axis=1).astype(jnp.int32)  # [4, rt]
        idxs.append(idx)
        work = jnp.where(iota_t == idx[:, None, :], -jnp.inf, work)
    ti_ref[...] = jnp.stack(idxs, axis=1)              # [4, topk, rt]


def _fine_row_tile(R, d, t2, topk, min_steps):
    """Largest row tile that (a) divides R, (b) is a multiple of 128 (or = R),
    (c) fits the VMEM block budget, (d) keeps >= min_steps grid steps if possible."""
    per_row = 4 * (4 * d + 2 * t2 * d + 4 * d + 4 * topk + 3 * 4 * t2)
    target = max(128, _VMEM_BLOCK_BUDGET // max(per_row, 1))
    cands = sorted({R, *[t for t in range(128, R, 128) if R % t == 0]}, reverse=True)
    for t in cands:
        if t <= target and R // t >= min_steps:
            return t
    fits = [t for t in cands if t <= target]
    return max(fits) if fits else R


def fine_attention(qT, kT, vT, temp, topk):
    """qT: [d, 4, R], kT: [d, t2, R], vT: [t2, d, R]
       -> (msg [4, d, R] f32, topk_idx [4, topk, R] i32), R = B*nhead*l0."""
    d, _, R = qT.shape
    t2 = kT.shape[1]
    min_steps = min(_NUM_TC, max(R // 128, 1))
    rt = _fine_row_tile(R, d, t2, topk, min_steps)
    grid = (R // rt,)
    block_bytes = rt * 4 * (4 * d + 2 * t2 * d + 4 * d + 4 * topk + 3 * 4 * t2)
    kern = functools.partial(_fine_kernel, temp=temp, topk=topk)
    return pl.pallas_call(
        kern,
        out_shape=(jax.ShapeDtypeStruct((4, d, R), jnp.float32),
                   jax.ShapeDtypeStruct((4, topk, R), jnp.int32)),
        grid=grid,
        in_specs=[pl.BlockSpec((d, 4, rt), lambda i: (0, 0, i)),
                  pl.BlockSpec((d, t2, rt), lambda i: (0, 0, i)),
                  pl.BlockSpec((t2, d, rt), lambda i: (0, 0, i))],
        out_specs=(pl.BlockSpec((4, d, rt), lambda i: (0, 0, i)),
                   pl.BlockSpec((4, topk, rt), lambda i: (0, 0, i))),
        compiler_params=pltpu.CompilerParams(
            dimension_semantics=("parallel",),
            vmem_limit_bytes=_vmem_limit(block_bytes)),
    )(qT, kT, vT)


# ----------------------------------------------------------------------------
# Host-side glue (layout, index arithmetic, gathers, pyramid merge)
# ----------------------------------------------------------------------------
def _nchw_to_bh_l_d(x, nhead):
    """[b, nhead*d, h, w] -> [b*nhead, h*w, d]  (channel split is head-major)."""
    b, c, h, w = x.shape
    d = c // nhead
    return x.reshape(b, nhead, d, h * w).transpose(0, 1, 3, 2).reshape(b * nhead, h * w, d)


def process_coarse_level(query, key, value, topk, nhead):
    b, c, _, _ = key.shape
    d = c // nhead
    L = query.shape[2] * query.shape[3]
    q = _nchw_to_bh_l_d(query, nhead)                                  # [BH, L, d]
    k = _nchw_to_bh_l_d(key, nhead)                                    # [BH, S, d]
    v = _nchw_to_bh_l_d(value, nhead)
    temp = 1.0 / (d ** 0.5)
    msg, ti = coarse_attention(q, k, v, temp, topk)                    # [BH,d,L], [BH,topk,L]
    message = msg.reshape(b, nhead, d, L).transpose(0, 3, 1, 2)        # [b, L, nh, d]
    topk_idx = ti.reshape(b, nhead, topk, L).transpose(0, 3, 2, 1)     # [b, L, topk, nh]
    return message, topk_idx


def process_fine_level(query, key, value, topk_pos, topk_prev, topk, nhead):
    b, c, h0, w0 = query.shape
    _, _, h1, w1 = key.shape
    d = c // nhead
    hh, ww = h0 // 2, w0 // 2
    l0 = hh * ww
    t2 = topk_prev * 4
    R = b * nhead * l0

    # keys / values as [b, nhead, L1, d]
    k_bnld = key.reshape(b, nhead, d, h1 * w1).transpose(0, 1, 3, 2)
    v_bnld = value.reshape(b, nhead, d, h1 * w1).transpose(0, 1, 3, 2)

    # queries grouped into 2x2 blocks: [b, nhead, l0, 4, d]
    q = query.reshape(b, nhead, d, hh, 2, ww, 2)
    q = q.transpose(0, 1, 3, 5, 4, 6, 2).reshape(b, nhead, l0, 4, d)

    # candidate key indices from the previous (coarser) level's top-k positions.
    # NOTE: matches the reference exactly — the loop variable x offsets the row
    # (pos_y) and y the column (pos_x); candidate ordering along t2 is
    # (prev-topk major, 2x2-child minor), identical to the PyTorch module.
    pos_y = topk_pos[0] * 2                                            # [b, l0, topk_prev, nh]
    pos_x = topk_pos[1] * 2
    idx_list = []
    for x in (0, 1):
        for y in (0, 1):
            idx_list.append((pos_y + x) * w1 + pos_x + y)
    idx_base = jnp.stack(idx_list, axis=3).reshape(b, l0, t2, nhead)   # [b, l0, t2, nh]

    # Gather candidate keys/values (single fused XLA gather).
    # TODO(synk): for large pyramids move this gather in-kernel (PrefetchScalarGridSpec
    # + per-parent DMA of the contiguous child pairs); at these sizes one gather wins.
    idx_bn = idx_base.transpose(0, 3, 1, 2).reshape(b, nhead, l0 * t2)  # [b, nh, l0*t2]
    k_cand = jnp.take_along_axis(k_bnld, idx_bn[..., None], axis=2).reshape(b, nhead, l0, t2, d)
    v_cand = jnp.take_along_axis(v_bnld, idx_bn[..., None], axis=2).reshape(b, nhead, l0, t2, d)

    # Lane-dense rows-on-lanes layout for the fine kernel (layout plumbing only).
    qT = q.transpose(4, 3, 0, 1, 2).reshape(d, 4, R)                   # [d, 4, R]
    kT = k_cand.transpose(4, 3, 0, 1, 2).reshape(d, t2, R)             # [d, t2, R]
    vT = v_cand.transpose(3, 4, 0, 1, 2).reshape(t2, d, R)             # [t2, d, R]

    temp = 1.0 / (d ** 0.5)
    msg, ti = fine_attention(qT, kT, vT, temp, topk)                   # [4,d,R], [4,topk,R]

    message = msg.reshape(4, d, b, nhead, l0).transpose(2, 4, 0, 3, 1)     # [b, l0, 4, nh, d]
    loc_idx = ti.reshape(4, topk, b, nhead, l0).transpose(2, 4, 0, 1, 3)   # [b, l0, 4, topk, nh]

    # map local candidate index -> global key index
    idx5 = jnp.broadcast_to(idx_base[:, :, None, :, :], (b, l0, 4, t2, nhead))
    glob_idx = jnp.take_along_axis(idx5, loc_idx, axis=-2)             # [b, l0, 4, topk, nh]

    # rearrange 'b (h w) (t1 t2) k nh -> b (h t1 w t2) k nh'
    topk_idx = glob_idx.reshape(b, hh, ww, 2, 2, topk, nhead)
    topk_idx = topk_idx.transpose(0, 1, 3, 2, 4, 5, 6).reshape(b, h0 * w0, topk, nhead)
    return message, topk_idx


def qtattb_forward(queries, keys, values, weight_param, nhead, topks):
    """Quadtree multi-head attention forward (lepe=False path)."""
    messages = []
    topk = topks[0]
    topk_pos = None
    for i, (query, key, value) in enumerate(
            zip(reversed(queries), reversed(keys), reversed(values))):
        b, c, h, w = key.shape
        if i == 0:
            message, topk_idx = process_coarse_level(query, key, value, topk, nhead)
        else:
            topk_prev = topk
            topk = topks[i]
            message, topk_idx = process_fine_level(
                query, key, value, topk_pos, topk_prev, topk, nhead)
        messages.append(message)
        topk_pos = jnp.stack([topk_idx // w, topk_idx % w])

    weight = jax.nn.softmax(weight_param)
    d = queries[0].shape[1] // nhead
    final_message = None
    for i, m in enumerate(messages):
        # TODO(synk): lepe=True depthwise-conv positional branch not implemented (default lepe=False).
        if i == 0:
            final_message = m * weight[i]
        else:
            final_message = final_message[:, :, None, :, :] + m * weight[i]
            H = queries[-i].shape[2]
            W = queries[-i].shape[3]
            bsz = final_message.shape[0]
            final_message = final_message.reshape(bsz, H, W, 2, 2, nhead, d)
            final_message = final_message.transpose(0, 1, 3, 2, 4, 5, 6)
            final_message = final_message.reshape(bsz, H * 2 * W * 2, nhead, d)
    return final_message


# ----------------------------------------------------------------------------
# Example run
# ----------------------------------------------------------------------------
if __name__ == "__main__":
    key0 = jax.random.PRNGKey(0)
    bs, nhead, d = 2, 2, 8
    c = nhead * d
    scale = 3
    topks = (4, 4, 4)
    # pyramid: finest -> coarsest (as the PyTorch module expects)
    sizes = [(16, 16), (8, 8), (4, 4)]

    ks = jax.random.split(key0, 3 * scale + 1)
    queries, keys_p, values = [], [], []
    ki = 0
    for (h, w) in sizes:
        queries.append(jax.random.normal(ks[ki], (bs, c, h, w), jnp.float32)); ki += 1
        keys_p.append(jax.random.normal(ks[ki], (bs, c, h, w), jnp.float32)); ki += 1
        values.append(jax.random.normal(ks[ki], (bs, c, h, w), jnp.float32)); ki += 1
    # deterministic init of the learnable per-scale mixing weight (torch.randn(scale))
    weight_param = jax.random.normal(ks[ki], (scale,), jnp.float32)

    fwd = jax.jit(functools.partial(qtattb_forward, nhead=nhead, topks=topks))
    out = fwd(queries, keys_p, values, weight_param)
    out = jax.block_until_ready(out)
    assert out.shape == (bs, sizes[0][0] * sizes[0][1], nhead, d), out.shape
    assert bool(jnp.all(jnp.isfinite(out)))
    print("KERNEL_OK")
</pallas_src>

<mosaic_0001>
module attributes {stable_mosaic.version = 11 : i64} {
  func.func @_coarse_kernel(%arg0: i32, %arg1: memref<4x16x8xf32, #tpu.memory_space<vmem>>, %arg2: memref<4x16x8xf32, #tpu.memory_space<vmem>>, %arg3: memref<4x16x8xf32, #tpu.memory_space<vmem>>, %arg4: memref<4x8x16xf32, #tpu.memory_space<vmem>>, %arg5: memref<4x4x16xi32, #tpu.memory_space<vmem>>) attributes {dimension_semantics = [#tpu.dimension_semantics<parallel>], iteration_bounds = array<i64: 1>, scalar_prefetch = 0 : i64, scratch_operands = 0 : i64, tpu.core_type = #tpu.core_type<tc>, window_params = [{transform_indices = @transform_0, window_bounds = array<i64: 4, 16, 8>}, {transform_indices = @transform_1, window_bounds = array<i64: 4, 16, 8>}, {transform_indices = @transform_2, window_bounds = array<i64: 4, 16, 8>}, {transform_indices = @transform_3, window_bounds = array<i64: 4, 8, 16>}, {transform_indices = @transform_4, window_bounds = array<i64: 4, 4, 16>}]} {
    %c0 = arith.constant 0 : index
    %c0_0 = arith.constant 0 : index
    %c0_1 = arith.constant 0 : index
    %0 = vector.load %arg1[%c0, %c0_0, %c0_1] : memref<4x16x8xf32, #tpu.memory_space<vmem>>, vector<4x16x8xf32>
    %cst = arith.constant 0.353553385 : f32
    %1 = vector.broadcast %cst : f32 to vector<4x16x8xf32>
    %2 = arith.mulf %0, %1 : vector<4x16x8xf32>
    %c0_2 = arith.constant 0 : index
    %c0_3 = arith.constant 0 : index
    %c0_4 = arith.constant 0 : index
    %3 = vector.load %arg2[%c0_2, %c0_3, %c0_4] : memref<4x16x8xf32, #tpu.memory_space<vmem>>, vector<4x16x8xf32>
    %c0_5 = arith.constant 0 : index
    %c0_6 = arith.constant 0 : index
    %c0_7 = arith.constant 0 : index
    %4 = vector.load %arg3[%c0_5, %c0_6, %c0_7] : memref<4x16x8xf32, #tpu.memory_space<vmem>>, vector<4x16x8xf32>
    "tpu.trace_start"() <{level = 10 : i32, message = "bld,bsd->bls"}> : () -> ()
    %cst_8 = arith.constant dense<0.000000e+00> : vector<4x16x16xf32>
    %5 = tpu.matmul %2, %3, %cst_8 {dimension_numbers = #tpu.dot_dimension_numbers<[2], [2], [1], [1], [0, 0, 0, 1, 1, 1], [0], [0]>} : vector<4x16x8xf32>, vector<4x16x8xf32>, vector<4x16x16xf32> -> vector<4x16x16xf32>
    "tpu.trace_stop"() : () -> ()
    %cst_9 = arith.constant dense<0xFF800000> : vector<4x16xf32>
    %6 = vector.multi_reduction <maximumf>, %5, %cst_9 [2] : vector<4x16x16xf32> to vector<4x16xf32>
    %7 = vector.shape_cast %6 : vector<4x16xf32> to vector<4x16x1xf32>
    %8 = vector.broadcast %7 : vector<4x16x1xf32> to vector<4x16x16xf32>
    %9 = arith.subf %5, %8 : vector<4x16x16xf32>
    %10 = math.exp %9 : vector<4x16x16xf32>
    %cst_10 = arith.constant dense<0.000000e+00> : vector<4x16xf32>
    %11 = vector.multi_reduction <add>, %10, %cst_10 [2] : vector<4x16x16xf32> to vector<4x16xf32>
    %12 = vector.shape_cast %11 : vector<4x16xf32> to vector<4x16x1xf32>
    %13 = tpu.reciprocal %12 {approx = true} : vector<4x16x1xf32> -> vector<4x16x1xf32>
    %14 = arith.mulf %12, %13 : vector<4x16x1xf32>
    %cst_11 = arith.constant 2.000000e+00 : f32
    %15 = vector.broadcast %cst_11 : f32 to vector<4x16x1xf32>
    %16 = arith.subf %15, %14 : vector<4x16x1xf32>
    %17 = arith.mulf %13, %16 : vector<4x16x1xf32>
    %18 = vector.broadcast %17 : vector<4x16x1xf32> to vector<4x16x16xf32>
    %19 = arith.mulf %10, %18 : vector<4x16x16xf32>
    "tpu.trace_start"() <{level = 10 : i32, message = "bsd,bls->bdl"}> : () -> ()
    %cst_12 = arith.constant dense<0.000000e+00> : vector<4x8x16xf32>
    %20 = tpu.matmul %4, %19, %cst_12 {dimension_numbers = #tpu.dot_dimension_numbers<[1], [2], [2], [1], [0, 0, 0, 2, 1, 1], [0], [0]>} : vector<4x16x8xf32>, vector<4x16x16xf32>, vector<4x8x16xf32> -> vector<4x8x16xf32>
    "tpu.trace_stop"() : () -> ()
    %c0_13 = arith.constant 0 : index
    %c0_14 = arith.constant 0 : index
    %c0_15 = arith.constant 0 : index
    %21 = vector.load %arg4[%c0_13, %c0_14, %c0_15] : memref<4x8x16xf32, #tpu.memory_space<vmem>>, vector<4x8x16xf32>
    tpu.vector_store %arg4[%c0_13, %c0_14, %c0_15], %20 {strides = array<i32>} : memref<4x8x16xf32, #tpu.memory_space<vmem>>, vector<4x8x16xf32>,
    %22 = tpu.iota {dimensions = array<i32: 2>} : vector<4x16x16xi32>
    %cst_16 = arith.constant dense<0xFF800000> : vector<4x16xf32>
    %23 = vector.multi_reduction <maximumf>, %19, %cst_16 [2] : vector<4x16x16xf32> to vector<4x16xf32>
    %24 = vector.shape_cast %23 : vector<4x16xf32> to vector<4x16x1xf32>
    %25 = vector.broadcast %24 : vector<4x16x1xf32> to vector<4x16x16xf32>
    %26 = arith.cmpf oeq, %19, %25 : vector<4x16x16xf32>
    %c16_i32 = arith.constant 16 : i32
    %27 = vector.broadcast %c16_i32 : i32 to vector<4x16x16xi32>
    %28 = arith.select %26, %22, %27 : vector<4x16x16xi1>, vector<4x16x16xi32>
    %cst_17 = arith.constant dense<2147483647> : vector<4x16xi32>
    %29 = vector.multi_reduction <minsi>, %28, %cst_17 [2] : vector<4x16x16xi32> to vector<4x16xi32>
    %30 = vector.shape_cast %29 : vector<4x16xi32> to vector<4x16x1xi32>
    %31 = vector.broadcast %30 : vector<4x16x1xi32> to vector<4x16x16xi32>
    %32 = arith.cmpi eq, %22, %31 : vector<4x16x16xi32>
    %cst_18 = arith.constant 0xFF800000 : f32
    %33 = vector.broadcast %cst_18 : f32 to vector<4x16x16xf32>
    %34 = arith.select %32, %33, %19 : vector<4x16x16xi1>, vector<4x16x16xf32>
    %cst_19 = arith.constant dense<0xFF800000> : vector<4x16xf32>
    %35 = vector.multi_reduction <maximumf>, %34, %cst_19 [2] : vector<4x16x16xf32> to vector<4x16xf32>
    %36 = vector.shape_cast %35 : vector<4x16xf32> to vector<4x16x1xf32>
    %37 = vector.broadcast %36 : vector<4x16x1xf32> to vector<4x16x16xf32>
    %38 = arith.cmpf oeq, %34, %37 : vector<4x16x16xf32>
    %c16_i32_20 = arith.constant 16 : i32
    %39 = vector.broadcast %c16_i32_20 : i32 to vector<4x16x16xi32>
    %40 = arith.select %38, %22, %39 : vector<4x16x16xi1>, vector<4x16x16xi32>
    %cst_21 = arith.constant dense<2147483647> : vector<4x16xi32>
    %41 = vector.multi_reduction <minsi>, %40, %cst_21 [2] : vector<4x16x16xi32> to vector<4x16xi32>
    %42 = vector.shape_cast %41 : vector<4x16xi32> to vector<4x16x1xi32>
    %43 = vector.broadcast %42 : vector<4x16x1xi32> to vector<4x16x16xi32>
    %44 = arith.cmpi eq, %22, %43 : vector<4x16x16xi32>
    %cst_22 = arith.constant 0xFF800000 : f32
    %45 = vector.broadcast %cst_22 : f32 to vector<4x16x16xf32>
    %46 = arith.select %44, %45, %34 : vector<4x16x16xi1>, vector<4x16x16xf32>
    %cst_23 = arith.constant dense<0xFF800000> : vector<4x16xf32>
    %47 = vector.multi_reduction <maximumf>, %46, %cst_23 [2] : vector<4x16x16xf32> to vector<4x16xf32>
    %48 = vector.shape_cast %47 : vector<4x16xf32> to vector<4x16x1xf32>
    %49 = vector.broadcast %48 : vector<4x16x1xf32> to vector<4x16x16xf32>
    %50 = arith.cmpf oeq, %46, %49 : vector<4x16x16xf32>
    %c16_i32_24 = arith.constant 16 : i32
    %51 = vector.broadcast %c16_i32_24 : i32 to vector<4x16x16xi32>
    %52 = arith.select %50, %22, %51 : vector<4x16x16xi1>, vector<4x16x16xi32>
    %cst_25 = arith.constant dense<2147483647> : vector<4x16xi32>
    %53 = vector.multi_reduction <minsi>, %52, %cst_25 [2] : vector<4x16x16xi32> to vector<4x16xi32>
    %54 = vector.shape_cast %53 : vector<4x16xi32> to vector<4x16x1xi32>
    %55 = vector.broadcast %54 : vector<4x16x1xi32> to vector<4x16x16xi32>
    %56 = arith.cmpi eq, %22, %55 : vector<4x16x16xi32>
    %cst_26 = arith.constant 0xFF800000 : f32
    %57 = vector.broadcast %cst_26 : f32 to vector<4x16x16xf32>
    %58 = arith.select %56, %57, %46 : vector<4x16x16xi1>, vector<4x16x16xf32>
    %cst_27 = arith.constant dense<0xFF800000> : vector<4x16xf32>
    %59 = vector.multi_reduction <maximumf>, %58, %cst_27 [2] : vector<4x16x16xf32> to vector<4x16xf32>
    %60 = vector.shape_cast %59 : vector<4x16xf32> to vector<4x16x1xf32>
    %61 = vector.broadcast %60 : vector<4x16x1xf32> to vector<4x16x16xf32>
    %62 = arith.cmpf oeq, %58, %61 : vector<4x16x16xf32>
    %c16_i32_28 = arith.constant 16 : i32
    %63 = vector.broadcast %c16_i32_28 : i32 to vector<4x16x16xi32>
    %64 = arith.select %62, %22, %63 : vector<4x16x16xi1>, vector<4x16x16xi32>
    %cst_29 = arith.constant dense<2147483647> : vector<4x16xi32>
    %65 = vector.multi_reduction <minsi>, %64, %cst_29 [2] : vector<4x16x16xi32> to vector<4x16xi32>
    %66 = vector.shape_cast %29 : vector<4x16xi32> to vector<4x1x16xi32>
    %67 = vector.shape_cast %41 : vector<4x16xi32> to vector<4x1x16xi32>
    %68 = vector.shape_cast %53 : vector<4x16xi32> to vector<4x1x16xi32>
    %69 = vector.shape_cast %65 : vector<4x16xi32> to vector<4x1x16xi32>
    %70 = tpu.concatenate %66, %67, %68, %69 in 1 : vector<4x1x16xi32>, vector<4x1x16xi32>, vector<4x1x16xi32>, vector<4x1x16xi32> -> vector<4x4x16xi32>
    %c0_30 = arith.constant 0 : index
    %c0_31 = arith.constant 0 : index
    %c0_32 = arith.constant 0 : index
    %71 = vector.load %arg5[%c0_30, %c0_31, %c0_32] : memref<4x4x16xi32, #tpu.memory_space<vmem>>, vector<4x4x16xi32>
    tpu.vector_store %arg5[%c0_30, %c0_31, %c0_32], %70 {strides = array<i32>} : memref<4x4x16xi32, #tpu.memory_space<vmem>>, vector<4x4x16xi32>,
    return
  }
  func.func @transform_0(%arg0: i32) -> (i32, i32, i32) {
    %c0_i32 = arith.constant 0 : i32
    %c0_i32_0 = arith.constant 0 : i32
    %c0_i32_1 = arith.constant 0 : i32
    return %arg0, %c0_i32, %c0_i32_0 : i32, i32, i32
  }
  func.func @transform_1(%arg0: i32) -> (i32, i32, i32) {
    %c0_i32 = arith.constant 0 : i32
    %c0_i32_0 = arith.constant 0 : i32
    %c0_i32_1 = arith.constant 0 : i32
    return %arg0, %c0_i32, %c0_i32_0 : i32, i32, i32
  }
  func.func @transform_2(%arg0: i32) -> (i32, i32, i32) {
    %c0_i32 = arith.constant 0 : i32
    %c0_i32_0 = arith.constant 0 : i32
    %c0_i32_1 = arith.constant 0 : i32
    return %arg0, %c0_i32, %c0_i32_0 : i32, i32, i32
  }
  func.func @transform_3(%arg0: i32) -> (i32, i32, i32) {
    %c0_i32 = arith.constant 0 : i32
    %c0_i32_0 = arith.constant 0 : i32
    %c0_i32_1 = arith.constant 0 : i32
    return %arg0, %c0_i32, %c0_i32_0 : i32, i32, i32
  }
  func.func @transform_4(%arg0: i32) -> (i32, i32, i32) {
    %c0_i32 = arith.constant 0 : i32
    %c0_i32_0 = arith.constant 0 : i32
    %c0_i32_1 = arith.constant 0 : i32
    return %arg0, %c0_i32, %c0_i32_0 : i32, i32, i32
  }
}

module attributes {stable_mosaic.version = 11 : i64} {
  func.func @_fine_kernel(%arg0: i32, %arg1: memref<8x4x64xf32, #tpu.memory_space<vmem>>, %arg2: memref<8x16x64xf32, #tpu.memory_space<vmem>>, %arg3: memref<16x8x64xf32, #tpu.memory_space<vmem>>, %arg4: memref<4x8x64xf32, #tpu.memory_space<vmem>>, %arg5: memref<4x4x64xi32, #tpu.memory_space<vmem>>) attributes {dimension_semantics = [#tpu.dimension_semantics<parallel>], iteration_bounds = array<i64: 1>, scalar_prefetch = 0 : i64, scratch_operands = 0 : i64, tpu.core_type = #tpu.core_type<tc>, window_params = [{transform_indices = @transform_0, window_bounds = array<i64: 8, 4, 64>}, {transform_indices = @transform_1, window_bounds = array<i64: 8, 16, 64>}, {transform_indices = @transform_2, window_bounds = array<i64: 16, 8, 64>}, {transform_indices = @transform_3, window_bounds = array<i64: 4, 8, 64>}, {transform_indices = @transform_4, window_bounds = array<i64: 4, 4, 64>}]} {
    %c0 = arith.constant 0 : index
    %c0_0 = arith.constant 0 : index
    %c0_1 = arith.constant 0 : index
    %0 = vector.load %arg1[%c0, %c0_0, %c0_1] : memref<8x4x64xf32, #tpu.memory_space<vmem>>, vector<8x4x64xf32>
    %cst = arith.constant 0.353553385 : f32
    %1 = vector.broadcast %cst : f32 to vector<8x4x64xf32>
    %2 = arith.mulf %0, %1 : vector<8x4x64xf32>
    %c0_2 = arith.constant 0 : index
    %c0_3 = arith.constant 0 : index
    %c0_4 = arith.constant 0 : index
    %3 = vector.load %arg2[%c0_2, %c0_3, %c0_4] : memref<8x16x64xf32, #tpu.memory_space<vmem>>, vector<8x16x64xf32>
    %c0_5 = arith.constant 0 : index
    %c0_6 = arith.constant 0 : index
    %c0_7 = arith.constant 0 : index
    %4 = vector.load %arg3[%c0_5, %c0_6, %c0_7] : memref<16x8x64xf32, #tpu.memory_space<vmem>>, vector<16x8x64xf32>
    %5 = vector.extract_strided_slice %2 {offsets = [0, 0, 0], sizes = [1, 4, 64], strides = [1, 1, 1]} : vector<8x4x64xf32> to vector<1x4x64xf32>
    %6 = vector.shape_cast %5 : vector<1x4x64xf32> to vector<4x64xf32>
    %7 = vector.shape_cast %6 : vector<4x64xf32> to vector<4x1x64xf32>
    %8 = vector.extract_strided_slice %3 {offsets = [0, 0, 0], sizes = [1, 16, 64], strides = [1, 1, 1]} : vector<8x16x64xf32> to vector<1x16x64xf32>
    %9 = vector.shape_cast %8 : vector<1x16x64xf32> to vector<16x64xf32>
    %10 = vector.shape_cast %9 : vector<16x64xf32> to vector<1x16x64xf32>
    %11 = vector.broadcast %7 : vector<4x1x64xf32> to vector<4x16x64xf32>
    %12 = vector.broadcast %10 : vector<1x16x64xf32> to vector<4x16x64xf32>
    %13 = arith.mulf %11, %12 : vector<4x16x64xf32>
    %14 = vector.extract_strided_slice %2 {offsets = [1, 0, 0], sizes = [1, 4, 64], strides = [1, 1, 1]} : vector<8x4x64xf32> to vector<1x4x64xf32>
    %15 = vector.shape_cast %14 : vector<1x4x64xf32> to vector<4x64xf32>
    %16 = vector.shape_cast %15 : vector<4x64xf32> to vector<4x1x64xf32>
    %17 = vector.extract_strided_slice %3 {offsets = [1, 0, 0], sizes = [1, 16, 64], strides = [1, 1, 1]} : vector<8x16x64xf32> to vector<1x16x64xf32>
    %18 = vector.shape_cast %17 : vector<1x16x64xf32> to vector<16x64xf32>
    %19 = vector.shape_cast %18 : vector<16x64xf32> to vector<1x16x64xf32>
    %20 = vector.broadcast %16 : vector<4x1x64xf32> to vector<4x16x64xf32>
    %21 = vector.broadcast %19 : vector<1x16x64xf32> to vector<4x16x64xf32>
    %22 = arith.mulf %20, %21 : vector<4x16x64xf32>
    %23 = arith.addf %13, %22 : vector<4x16x64xf32>
    %24 = vector.extract_strided_slice %2 {offsets = [2, 0, 0], sizes = [1, 4, 64], strides = [1, 1, 1]} : vector<8x4x64xf32> to vector<1x4x64xf32>
    %25 = vector.shape_cast %24 : vector<1x4x64xf32> to vector<4x64xf32>
    %26 = vector.shape_cast %25 : vector<4x64xf32> to vector<4x1x64xf32>
    %27 = vector.extract_strided_slice %3 {offsets = [2, 0, 0], sizes = [1, 16, 64], strides = [1, 1, 1]} : vector<8x16x64xf32> to vector<1x16x64xf32>
    %28 = vector.shape_cast %27 : vector<1x16x64xf32> to vector<16x64xf32>
    %29 = vector.shape_cast %28 : vector<16x64xf32> to vector<1x16x64xf32>
    %30 = vector.broadcast %26 : vector<4x1x64xf32> to vector<4x16x64xf32>
    %31 = vector.broadcast %29 : vector<1x16x64xf32> to vector<4x16x64xf32>
    %32 = arith.mulf %30, %31 : vector<4x16x64xf32>
    %33 = arith.addf %23, %32 : vector<4x16x64xf32>
    %34 = vector.extract_strided_slice %2 {offsets = [3, 0, 0], sizes = [1, 4, 64], strides = [1, 1, 1]} : vector<8x4x64xf32> to vector<1x4x64xf32>
    %35 = vector.shape_cast %34 : vector<1x4x64xf32> to vector<4x64xf32>
    %36 = vector.shape_cast %35 : vector<4x64xf32> to vector<4x1x64xf32>
    %37 = vector.extract_strided_slice %3 {offsets = [3, 0, 0], sizes = [1, 16, 64], strides = [1, 1, 1]} : vector<8x16x64xf32> to vector<1x16x64xf32>
    %38 = vector.shape_cast %37 : vector<1x16x64xf32> to vector<16x64xf32>
    %39 = vector.shape_cast %38 : vector<16x64xf32> to vector<1x16x64xf32>
    %40 = vector.broadcast %36 : vector<4x1x64xf32> to vector<4x16x64xf32>
    %41 = vector.broadcast %39 : vector<1x16x64xf32> to vector<4x16x64xf32>
    %42 = arith.mulf %40, %41 : vector<4x16x64xf32>
    %43 = arith.addf %33, %42 : vector<4x16x64xf32>
    %44 = vector.extract_strided_slice %2 {offsets = [4, 0, 0], sizes = [1, 4, 64], strides = [1, 1, 1]} : vector<8x4x64xf32> to vector<1x4x64xf32>
    %45 = vector.shape_cast %44 : vector<1x4x64xf32> to vector<4x64xf32>
    %46 = vector.shape_cast %45 : vector<4x64xf32> to vector<4x1x64xf32>
    %47 = vector.extract_strided_slice %3 {offsets = [4, 0, 0], sizes = [1, 16, 64], strides = [1, 1, 1]} : vector<8x16x64xf32> to vector<1x16x64xf32>
    %48 = vector.shape_cast %47 : vector<1x16x64xf32> to vector<16x64xf32>
    %49 = vector.shape_cast %48 : vector<16x64xf32> to vector<1x16x64xf32>
    %50 = vector.broadcast %46 : vector<4x1x64xf32> to vector<4x16x64xf32>
    %51 = vector.broadcast %49 : vector<1x16x64xf32> to vector<4x16x64xf32>
    %52 = arith.mulf %50, %51 : vector<4x16x64xf32>
    %53 = arith.addf %43, %52 : vector<4x16x64xf32>
    %54 = vector.extract_strided_slice %2 {offsets = [5, 0, 0], sizes = [1, 4, 64], strides = [1, 1, 1]} : vector<8x4x64xf32> to vector<1x4x64xf32>
    %55 = vector.shape_cast %54 : vector<1x4x64xf32> to vector<4x64xf32>
    %56 = vector.shape_cast %55 : vector<4x64xf32> to vector<4x1x64xf32>
    %57 = vector.extract_strided_slice %3 {offsets = [5, 0, 0], sizes = [1, 16, 64], strides = [1, 1, 1]} : vector<8x16x64xf32> to vector<1x16x64xf32>
    %58 = vector.shape_cast %57 : vector<1x16x64xf32> to vector<16x64xf32>
    %59 = vector.shape_cast %58 : vector<16x64xf32> to vector<1x16x64xf32>
    %60 = vector.broadcast %56 : vector<4x1x64xf32> to vector<4x16x64xf32>
    %61 = vector.broadcast %59 : vector<1x16x64xf32> to vector<4x16x64xf32>
    %62 = arith.mulf %60, %61 : vector<4x16x64xf32>
    %63 = arith.addf %53, %62 : vector<4x16x64xf32>
    %64 = vector.extract_strided_slice %2 {offsets = [6, 0, 0], sizes = [1, 4, 64], strides = [1, 1, 1]} : vector<8x4x64xf32> to vector<1x4x64xf32>
    %65 = vector.shape_cast %64 : vector<1x4x64xf32> to vector<4x64xf32>
    %66 = vector.shape_cast %65 : vector<4x64xf32> to vector<4x1x64xf32>
    %67 = vector.extract_strided_slice %3 {offsets = [6, 0, 0], sizes = [1, 16, 64], strides = [1, 1, 1]} : vector<8x16x64xf32> to vector<1x16x64xf32>
    %68 = vector.shape_cast %67 : vector<1x16x64xf32> to vector<16x64xf32>
    %69 = vector.shape_cast %68 : vector<16x64xf32> to vector<1x16x64xf32>
    %70 = vector.broadcast %66 : vector<4x1x64xf32> to vector<4x16x64xf32>
    %71 = vector.broadcast %69 : vector<1x16x64xf32> to vector<4x16x64xf32>
    %72 = arith.mulf %70, %71 : vector<4x16x64xf32>
    %73 = arith.addf %63, %72 : vector<4x16x64xf32>
    %74 = vector.extract_strided_slice %2 {offsets = [7, 0, 0], sizes = [1, 4, 64], strides = [1, 1, 1]} : vector<8x4x64xf32> to vector<1x4x64xf32>
    %75 = vector.shape_cast %74 : vector<1x4x64xf32> to vector<4x64xf32>
    %76 = vector.shape_cast %75 : vector<4x64xf32> to vector<4x1x64xf32>
    %77 = vector.extract_strided_slice %3 {offsets = [7, 0, 0], sizes = [1, 16, 64], strides = [1, 1, 1]} : vector<8x16x64xf32> to vector<1x16x64xf32>
    %78 = vector.shape_cast %77 : vector<1x16x64xf32> to vector<16x64xf32>
    %79 = vector.shape_cast %78 : vector<16x64xf32> to vector<1x16x64xf32>
    %80 = vector.broadcast %76 : vector<4x1x64xf32> to vector<4x16x64xf32>
    %81 = vector.broadcast %79 : vector<1x16x64xf32> to vector<4x16x64xf32>
    %82 = arith.mulf %80, %81 : vector<4x16x64xf32>
    %83 = arith.addf %73, %82 : vector<4x16x64xf32>
    %cst_8 = arith.constant dense<0xFF800000> : vector<4x64xf32>
    %84 = vector.multi_reduction <maximumf>, %83, %cst_8 [1] : vector<4x16x64xf32> to vector<4x64xf32>
    %85 = vector.shape_cast %84 : vector<4x64xf32> to vector<4x1x64xf32>
    %86 = vector.broadcast %85 : vector<4x1x64xf32> to vector<4x16x64xf32>
    %87 = arith.subf %83, %86 : vector<4x16x64xf32>
    %88 = math.exp %87 : vector<4x16x64xf32>
    %cst_9 = arith.constant dense<0.000000e+00> : vector<4x64xf32>
    %89 = vector.multi_reduction <add>, %88, %cst_9 [1] : vector<4x16x64xf32> to vector<4x64xf32>
    %90 = vector.shape_cast %89 : vector<4x64xf32> to vector<4x1x64xf32>
    %91 = tpu.reciprocal %90 {approx = true} : vector<4x1x64xf32> -> vector<4x1x64xf32>
    %92 = arith.mulf %90, %91 : vector<4x1x64xf32>
    %cst_10 = arith.constant 2.000000e+00 : f32
    %93 = vector.broadcast %cst_10 : f32 to vector<4x1x64xf32>
    %94 = arith.subf %93, %92 : vector<4x1x64xf32>
    %95 = arith.mulf %91, %94 : vector<4x1x64xf32>
    %96 = vector.broadcast %95 : vector<4x1x64xf32> to vector<4x16x64xf32>
    %97 = arith.mulf %88, %96 : vector<4x16x64xf32>
    %98 = vector.extract_strided_slice %97 {offsets = [0, 0, 0], sizes = [4, 1, 64], strides = [1, 1, 1]} : vector<4x16x64xf32> to vector<4x1x64xf32>
    %99 = vector.shape_cast %98 : vector<4x1x64xf32> to vector<4x64xf32>
    %100 = vector.shape_cast %99 : vector<4x64xf32> to vector<4x1x64xf32>
    %101 = vector.extract_strided_slice %4 {offsets = [0, 0, 0], sizes = [1, 8, 64], strides = [1, 1, 1]} : vector<16x8x64xf32> to vector<1x8x64xf32>
    %102 = vector.shape_cast %101 : vector<1x8x64xf32> to vector<8x64xf32>
    %103 = vector.shape_cast %102 : vector<8x64xf32> to vector<1x8x64xf32>
    %104 = vector.broadcast %100 : vector<4x1x64xf32> to vector<4x8x64xf32>
    %105 = vector.broadcast %103 : vector<1x8x64xf32> to vector<4x8x64xf32>
    %106 = arith.mulf %104, %105 : vector<4x8x64xf32>
    %107 = vector.extract_strided_slice %97 {offsets = [0, 1, 0], sizes = [4, 1, 64], strides = [1, 1, 1]} : vector<4x16x64xf32> to vector<4x1x64xf32>
    %108 = vector.shape_cast %107 : vector<4x1x64xf32> to vector<4x64xf32>
    %109 = vector.shape_cast %108 : vector<4x64xf32> to vector<4x1x64xf32>
    %110 = vector.extract_strided_slice %4 {offsets = [1, 0, 0], sizes = [1, 8, 64], strides = [1, 1, 1]} : vector<16x8x64xf32> to vector<1x8x64xf32>
    %111 = vector.shape_cast %110 : vector<1x8x64xf32> to vector<8x64xf32>
    %112 = vector.shape_cast %111 : vector<8x64xf32> to vector<1x8x64xf32>
    %113 = vector.broadcast %109 : vector<4x1x64xf32> to vector<4x8x64xf32>
    %114 = vector.broadcast %112 : vector<1x8x64xf32> to vector<4x8x64xf32>
    %115 = arith.mulf %113, %114 : vector<4x8x64xf32>
    %116 = arith.addf %106, %115 : vector<4x8x64xf32>
    %117 = vector.extract_strided_slice %97 {offsets = [0, 2, 0], sizes = [4, 1, 64], strides = [1, 1, 1]} : vector<4x16x64xf32> to vector<4x1x64xf32>
    %118 = vector.shape_cast %117 : vector<4x1x64xf32> to vector<4x64xf32>
    %119 = vector.shape_cast %118 : vector<4x64xf32> to vector<4x1x64xf32>
    %120 = vector.extract_strided_slice %4 {offsets = [2, 0, 0], sizes = [1, 8, 64], strides = [1, 1, 1]} : vector<16x8x64xf32> to vector<1x8x64xf32>
    %121 = vector.shape_cast %120 : vector<1x8x64xf32> to vector<8x64xf32>
    %122 = vector.shape_cast %121 : vector<8x64xf32> to vector<1x8x64xf32>
    %123 = vector.broadcast %119 : vector<4x1x64xf32> to vector<4x8x64xf32>
    %124 = vector.broadcast %122 : vector<1x8x64xf32> to vector<4x8x64xf32>
    %125 = arith.mulf %123, %124 : vector<4x8x64xf32>
    %126 = arith.addf %116, %125 : vector<4x8x64xf32>
    %127 = vector.extract_strided_slice %97 {offsets = [0, 3, 0], sizes = [4, 1, 64], strides = [1, 1, 1]} : vector<4x16x64xf32> to vector<4x1x64xf32>
    %128 = vector.shape_cast %127 : vector<4x1x64xf32> to vector<4x64xf32>
    %129 = vector.shape_cast %128 : vector<4x64xf32> to vector<4x1x64xf32>
    %130 = vector.extract_strided_slice %4 {offsets = [3, 0, 0], sizes = [1, 8, 64], strides = [1, 1, 1]} : vector<16x8x64xf32> to vector<1x8x64xf32>
    %131 = vector.shape_cast %130 : vector<1x8x64xf32> to vector<8x64xf32>
    %132 = vector.shape_cast %131 : vector<8x64xf32> to vector<1x8x64xf32>
    %133 = vector.broadcast %129 : vector<4x1x64xf32> to vector<4x8x64xf32>
    %134 = vector.broadcast %132 : vector<1x8x64xf32> to vector<4x8x64xf32>
    %135 = arith.mulf %133, %134 : vector<4x8x64xf32>
    %136 = arith.addf %126, %135 : vector<4x8x64xf32>
    %137 = vector.extract_strided_slice %97 {offsets = [0, 4, 0], sizes = [4, 1, 64], strides = [1, 1, 1]} : vector<4x16x64xf32> to vector<4x1x64xf32>
    %138 = vector.shape_cast %137 : vector<4x1x64xf32> to vector<4x64xf32>
    %139 = vector.shape_cast %138 : vector<4x64xf32> to vector<4x1x64xf32>
    %140 = vector.extract_strided_slice %4 {offsets = [4, 0, 0], sizes = [1, 8, 64], strides = [1, 1, 1]} : vector<16x8x64xf32> to vector<1x8x64xf32>
    %141 = vector.shape_cast %140 : vector<1x8x64xf32> to vector<8x64xf32>
    %142 = vector.shape_cast %141 : vector<8x64xf32> to vector<1x8x64xf32>
    %143 = vector.broadcast %139 : vector<4x1x64xf32> to vector<4x8x64xf32>
    %144 = vector.broadcast %142 : vector<1x8x64xf32> to vector<4x8x64xf32>
    %145 = arith.mulf %143, %144 : vector<4x8x64xf32>
    %146 = arith.addf %136, %145 : vector<4x8x64xf32>
    %147 = vector.extract_strided_slice %97 {offsets = [0, 5, 0], sizes = [4, 1, 64], strides = [1, 1, 1]} : vector<4x16x64xf32> to vector<4x1x64xf32>
    %148 = vector.shape_cast %147 : vector<4x1x64xf32> to vector<4x64xf32>
    %149 = vector.shape_cast %148 : vector<4x64xf32> to vector<4x1x64xf32>
    %150 = vector.extract_strided_slice %4 {offsets = [5, 0, 0], sizes = [1, 8, 64], strides = [1, 1, 1]} : vector<16x8x64xf32> to vector<1x8x64xf32>
    %151 = vector.shape_cast %150 : vector<1x8x64xf32> to vector<8x64xf32>
    %152 = vector.shape_cast %151 : vector<8x64xf32> to vector<1x8x64xf32>
    %153 = vector.broadcast %149 : vector<4x1x64xf32> to vector<4x8x64xf32>
    %154 = vector.broadcast %152 : vector<1x8x64xf32> to vector<4x8x64xf32>
    %155 = arith.mulf %153, %154 : vector<4x8x64xf32>
    %156 = arith.addf %146, %155 : vector<4x8x64xf32>
    %157 = vector.extract_strided_slice %97 {offsets = [0, 6, 0], sizes = [4, 1, 64], strides = [1, 1, 1]} : vector<4x16x64xf32> to vector<4x1x64xf32>
    %158 = vector.shape_cast %157 : vector<4x1x64xf32> to vector<4x64xf32>
    %159 = vector.shape_cast %158 : vector<4x64xf32> to vector<4x1x64xf32>
    %160 = vector.extract_strided_slice %4 {offsets = [6, 0, 0], sizes = [1, 8, 64], strides = [1, 1, 1]} : vector<16x8x64xf32> to vector<1x8x64xf32>
    %161 = vector.shape_cast %160 : vector<1x8x64xf32> to vector<8x64xf32>
    %162 = vector.shape_cast %161 : vector<8x64xf32> to vector<1x8x64xf32>
    %163 = vector.broadcast %159 : vector<4x1x64xf32> to vector<4x8x64xf32>
    %164 = vector.broadcast %162 : vector<1x8x64xf32> to vector<4x8x64xf32>
    %165 = arith.mulf %163, %164 : vector<4x8x64xf32>
    %166 = arith.addf %156, %165 : vector<4x8x64xf32>
    %167 = vector.extract_strided_slice %97 {offsets = [0, 7, 0], sizes = [4, 1, 64], strides = [1, 1, 1]} : vector<4x16x64xf32> to vector<4x1x64xf32>
    %168 = vector.shape_cast %167 : vector<4x1x64xf32> to vector<4x64xf32>
    %169 = vector.shape_cast %168 : vector<4x64xf32> to vector<4x1x64xf32>
    %170 = vector.extract_strided_slice %4 {offsets = [7, 0, 0], sizes = [1, 8, 64], strides = [1, 1, 1]} : vector<16x8x64xf32> to vector<1x8x64xf32>
    %171 = vector.shape_cast %170 : vector<1x8x64xf32> to vector<8x64xf32>
    %172 = vector.shape_cast %171 : vector<8x64xf32> to vector<1x8x64xf32>
    %173 = vector.broadcast %169 : vector<4x1x64xf32> to vector<4x8x64xf32>
    %174 = vector.broadcast %172 : vector<1x8x64xf32> to vector<4x8x64xf32>
    %175 = arith.mulf %173, %174 : vector<4x8x64xf32>
    %176 = arith.addf %166, %175 : vector<4x8x64xf32>
    %177 = vector.extract_strided_slice %97 {offsets = [0, 8, 0], sizes = [4, 1, 64], strides = [1, 1, 1]} : vector<4x16x64xf32> to vector<4x1x64xf32>
    %178 = vector.shape_cast %177 : vector<4x1x64xf32> to vector<4x64xf32>
    %179 = vector.shape_cast %178 : vector<4x64xf32> to vector<4x1x64xf32>
    %180 = vector.extract_strided_slice %4 {offsets = [8, 0, 0], sizes = [1, 8, 64], strides = [1, 1, 1]} : vector<16x8x64xf32> to vector<1x8x64xf32>
    %181 = vector.shape_cast %180 : vector<1x8x64xf32> to vector<8x64xf32>
    %182 = vector.shape_cast %181 : vector<8x64xf32> to vector<1x8x64xf32>
    %183 = vector.broadcast %179 : vector<4x1x64xf32> to vector<4x8x64xf32>
    %184 = vector.broadcast %182 : vector<1x8x64xf32> to vector<4x8x64xf32>
    %185 = arith.mulf %183, %184 : vector<4x8x64xf32>
    %186 = arith.addf %176, %185 : vector<4x8x64xf32>
    %187 = vector.extract_strided_slice %97 {offsets = [0, 9, 0], sizes = [4, 1, 64], strides = [1, 1, 1]} : vector<4x16x64xf32> to vector<4x1x64xf32>
    %188 = vector.shape_cast %187 : vector<4x1x64xf32> to vector<4x64xf32>
    %189 = vector.shape_cast %188 : vector<4x64xf32> to vector<4x1x64xf32>
    %190 = vector.extract_strided_slice %4 {offsets = [9, 0, 0], sizes = [1, 8, 64], strides = [1, 1, 1]} : vector<16x8x64xf32> to vector<1x8x64xf32>
    %191 = vector.shape_cast %190 : vector<1x8x64xf32> to vector<8x64xf32>
    %192 = vector.shape_cast %191 : vector<8x64xf32> to vector<1x8x64xf32>
    %193 = vector.broadcast %189 : vector<4x1x64xf32> to vector<4x8x64xf32>
    %194 = vector.broadcast %192 : vector<1x8x64xf32> to vector<4x8x64xf32>
    %195 = arith.mulf %193, %194 : vector<4x8x64xf32>
    %196 = arith.addf %186, %195 : vector<4x8x64xf32>
    %197 = vector.extract_strided_slice %97 {offsets = [0, 10, 0], sizes = [4, 1, 64], strides = [1, 1, 1]} : vector<4x16x64xf32> to vector<4x1x64xf32>
    %198 = vector.shape_cast %197 : vector<4x1x64xf32> to vector<4x64xf32>
    %199 = vector.shape_cast %198 : vector<4x64xf32> to vector<4x1x64xf32>
    %200 = vector.extract_strided_slice %4 {offsets = [10, 0, 0], sizes = [1, 8, 64], strides = [1, 1, 1]} : vector<16x8x64xf32> to vector<1x8x64xf32>
    %201 = vector.shape_cast %200 : vector<1x8x64xf32> to vector<8x64xf32>
    %202 = vector.shape_cast %201 : vector<8x64xf32> to vector<1x8x64xf32>
    %203 = vector.broadcast %199 : vector<4x1x64xf32> to vector<4x8x64xf32>
    %204 = vector.broadcast %202 : vector<1x8x64xf32> to vector<4x8x64xf32>
    %205 = arith.mulf %203, %204 : vector<4x8x64xf32>
    %206 = arith.addf %196, %205 : vector<4x8x64xf32>
    %207 = vector.extract_strided_slice %97 {offsets = [0, 11, 0], sizes = [4, 1, 64], strides = [1, 1, 1]} : vector<4x16x64xf32> to vector<4x1x64xf32>
    %208 = vector.shape_cast %207 : vector<4x1x64xf32> to vector<4x64xf32>
    %209 = vector.shape_cast %208 : vector<4x64xf32> to vector<4x1x64xf32>
    %210 = vector.extract_strided_slice %4 {offsets = [11, 0, 0], sizes = [1, 8, 64], strides = [1, 1, 1]} : vector<16x8x64xf32> to vector<1x8x64xf32>
    %211 = vector.shape_cast %210 : vector<1x8x64xf32> to vector<8x64xf32>
    %212 = vector.shape_cast %211 : vector<8x64xf32> to vector<1x8x64xf32>
    %213 = vector.broadcast %209 : vector<4x1x64xf32> to vector<4x8x64xf32>
    %214 = vector.broadcast %212 : vector<1x8x64xf32> to vector<4x8x64xf32>
    %215 = arith.mulf %213, %214 : vector<4x8x64xf32>
    %216 = arith.addf %206, %215 : vector<4x8x64xf32>
    %217 = vector.extract_strided_slice %97 {offsets = [0, 12, 0], sizes = [4, 1, 64], strides = [1, 1, 1]} : vector<4x16x64xf32> to vector<4x1x64xf32>
    %218 = vector.shape_cast %217 : vector<4x1x64xf32> to vector<4x64xf32>
    %219 = vector.shape_cast %218 : vector<4x64xf32> to vector<4x1x64xf32>
    %220 = vector.extract_strided_slice %4 {offsets = [12, 0, 0], sizes = [1, 8, 64], strides = [1, 1, 1]} : vector<16x8x64xf32> to vector<1x8x64xf32>
    %221 = vector.shape_cast %220 : vector<1x8x64xf32> to vector<8x64xf32>
    %222 = vector.shape_cast %221 : vector<8x64xf32> to vector<1x8x64xf32>
    %223 = vector.broadcast %219 : vector<4x1x64xf32> to vector<4x8x64xf32>
    %224 = vector.broadcast %222 : vector<1x8x64xf32> to vector<4x8x64xf32>
    %225 = arith.mulf %223, %224 : vector<4x8x64xf32>
    %226 = arith.addf %216, %225 : vector<4x8x64xf32>
    %227 = vector.extract_strided_slice %97 {offsets = [0, 13, 0], sizes = [4, 1, 64], strides = [1, 1, 1]} : vector<4x16x64xf32> to vector<4x1x64xf32>
    %228 = vector.shape_cast %227 : vector<4x1x64xf32> to vector<4x64xf32>
    %229 = vector.shape_cast %228 : vector<4x64xf32> to vector<4x1x64xf32>
    %230 = vector.extract_strided_slice %4 {offsets = [13, 0, 0], sizes = [1, 8, 64], strides = [1, 1, 1]} : vector<16x8x64xf32> to vector<1x8x64xf32>
    %231 = vector.shape_cast %230 : vector<1x8x64xf32> to vector<8x64xf32>
    %232 = vector.shape_cast %231 : vector<8x64xf32> to vector<1x8x64xf32>
    %233 = vector.broadcast %229 : vector<4x1x64xf32> to vector<4x8x64xf32>
    %234 = vector.broadcast %232 : vector<1x8x64xf32> to vector<4x8x64xf32>
    %235 = arith.mulf %233, %234 : vector<4x8x64xf32>
    %236 = arith.addf %226, %235 : vector<4x8x64xf32>
    %237 = vector.extract_strided_slice %97 {offsets = [0, 14, 0], sizes = [4, 1, 64], strides = [1, 1, 1]} : vector<4x16x64xf32> to vector<4x1x64xf32>
    %238 = vector.shape_cast %237 : vector<4x1x64xf32> to vector<4x64xf32>
    %239 = vector.shape_cast %238 : vector<4x64xf32> to vector<4x1x64xf32>
    %240 = vector.extract_strided_slice %4 {offsets = [14, 0, 0], sizes = [1, 8, 64], strides = [1, 1, 1]} : vector<16x8x64xf32> to vector<1x8x64xf32>
    %241 = vector.shape_cast %240 : vector<1x8x64xf32> to vector<8x64xf32>
    %242 = vector.shape_cast %241 : vector<8x64xf32> to vector<1x8x64xf32>
    %243 = vector.broadcast %239 : vector<4x1x64xf32> to vector<4x8x64xf32>
    %244 = vector.broadcast %242 : vector<1x8x64xf32> to vector<4x8x64xf32>
    %245 = arith.mulf %243, %244 : vector<4x8x64xf32>
    %246 = arith.addf %236, %245 : vector<4x8x64xf32>
    %247 = vector.extract_strided_slice %97 {offsets = [0, 15, 0], sizes = [4, 1, 64], strides = [1, 1, 1]} : vector<4x16x64xf32> to vector<4x1x64xf32>
    %248 = vector.shape_cast %247 : vector<4x1x64xf32> to vector<4x64xf32>
    %249 = vector.shape_cast %248 : vector<4x64xf32> to vector<4x1x64xf32>
    %250 = vector.extract_strided_slice %4 {offsets = [15, 0, 0], sizes = [1, 8, 64], strides = [1, 1, 1]} : vector<16x8x64xf32> to vector<1x8x64xf32>
    %251 = vector.shape_cast %250 : vector<1x8x64xf32> to vector<8x64xf32>
    %252 = vector.shape_cast %251 : vector<8x64xf32> to vector<1x8x64xf32>
    %253 = vector.broadcast %249 : vector<4x1x64xf32> to vector<4x8x64xf32>
    %254 = vector.broadcast %252 : vector<1x8x64xf32> to vector<4x8x64xf32>
    %255 = arith.mulf %253, %254 : vector<4x8x64xf32>
    %256 = arith.addf %246, %255 : vector<4x8x64xf32>
    %c0_11 = arith.constant 0 : index
    %c0_12 = arith.constant 0 : index
    %c0_13 = arith.constant 0 : index
    %257 = vector.load %arg4[%c0_11, %c0_12, %c0_13] : memref<4x8x64xf32, #tpu.memory_space<vmem>>, vector<4x8x64xf32>
    tpu.vector_store %arg4[%c0_11, %c0_12, %c0_13], %256 {strides = array<i32>} : memref<4x8x64xf32, #tpu.memory_space<vmem>>, vector<4x8x64xf32>,
    %258 = tpu.iota {dimensions = array<i32: 1>} : vector<4x16x64xi32>
    %cst_14 = arith.constant dense<0xFF800000> : vector<4x64xf32>
    %259 = vector.multi_reduction <maximumf>, %97, %cst_14 [1] : vector<4x16x64xf32> to vector<4x64xf32>
    %260 = vector.shape_cast %259 : vector<4x64xf32> to vector<4x1x64xf32>
    %261 = vector.broadcast %260 : vector<4x1x64xf32> to vector<4x16x64xf32>
    %262 = arith.cmpf oeq, %97, %261 : vector<4x16x64xf32>
    %c16_i32 = arith.constant 16 : i32
    %263 = vector.broadcast %c16_i32 : i32 to vector<4x16x64xi32>
    %264 = arith.select %262, %258, %263 : vector<4x16x64xi1>, vector<4x16x64xi32>
    %cst_15 = arith.constant dense<2147483647> : vector<4x64xi32>
    %265 = vector.multi_reduction <minsi>, %264, %cst_15 [1] : vector<4x16x64xi32> to vector<4x64xi32>
    %266 = vector.shape_cast %265 : vector<4x64xi32> to vector<4x1x64xi32>
    %267 = vector.broadcast %266 : vector<4x1x64xi32> to vector<4x16x64xi32>
    %268 = arith.cmpi eq, %258, %267 : vector<4x16x64xi32>
    %cst_16 = arith.constant 0xFF800000 : f32
    %269 = vector.broadcast %cst_16 : f32 to vector<4x16x64xf32>
    %270 = arith.select %268, %269, %97 : vector<4x16x64xi1>, vector<4x16x64xf32>
    %cst_17 = arith.constant dense<0xFF800000> : vector<4x64xf32>
    %271 = vector.multi_reduction <maximumf>, %270, %cst_17 [1] : vector<4x16x64xf32> to vector<4x64xf32>
    %272 = vector.shape_cast %271 : vector<4x64xf32> to vector<4x1x64xf32>
    %273 = vector.broadcast %272 : vector<4x1x64xf32> to vector<4x16x64xf32>
    %274 = arith.cmpf oeq, %270, %273 : vector<4x16x64xf32>
    %c16_i32_18 = arith.constant 16 : i32
    %275 = vector.broadcast %c16_i32_18 : i32 to vector<4x16x64xi32>
    %276 = arith.select %274, %258, %275 : vector<4x16x64xi1>, vector<4x16x64xi32>
    %cst_19 = arith.constant dense<2147483647> : vector<4x64xi32>
    %277 = vector.multi_reduction <minsi>, %276, %cst_19 [1] : vector<4x16x64xi32> to vector<4x64xi32>
    %278 = vector.shape_cast %277 : vector<4x64xi32> to vector<4x1x64xi32>
    %279 = vector.broadcast %278 : vector<4x1x64xi32> to vector<4x16x64xi32>
    %280 = arith.cmpi eq, %258, %279 : vector<4x16x64xi32>
    %cst_20 = arith.constant 0xFF800000 : f32
    %281 = vector.broadcast %cst_20 : f32 to vector<4x16x64xf32>
    %282 = arith.select %280, %281, %270 : vector<4x16x64xi1>, vector<4x16x64xf32>
    %cst_21 = arith.constant dense<0xFF800000> : vector<4x64xf32>
    %283 = vector.multi_reduction <maximumf>, %282, %cst_21 [1] : vector<4x16x64xf32> to vector<4x64xf32>
    %284 = vector.shape_cast %283 : vector<4x64xf32> to vector<4x1x64xf32>
    %285 = vector.broadcast %284 : vector<4x1x64xf32> to vector<4x16x64xf32>
    %286 = arith.cmpf oeq, %282, %285 : vector<4x16x64xf32>
    %c16_i32_22 = arith.constant 16 : i32
    %287 = vector.broadcast %c16_i32_22 : i32 to vector<4x16x64xi32>
    %288 = arith.select %286, %258, %287 : vector<4x16x64xi1>, vector<4x16x64xi32>
    %cst_23 = arith.constant dense<2147483647> : vector<4x64xi32>
    %289 = vector.multi_reduction <minsi>, %288, %cst_23 [1] : vector<4x16x64xi32> to vector<4x64xi32>
    %290 = vector.shape_cast %289 : vector<4x64xi32> to vector<4x1x64xi32>
    %291 = vector.broadcast %290 : vector<4x1x64xi32> to vector<4x16x64xi32>
    %292 = arith.cmpi eq, %258, %291 : vector<4x16x64xi32>
    %cst_24 = arith.constant 0xFF800000 : f32
    %293 = vector.broadcast %cst_24 : f32 to vector<4x16x64xf32>
    %294 = arith.select %292, %293, %282 : vector<4x16x64xi1>, vector<4x16x64xf32>
    %cst_25 = arith.constant dense<0xFF800000> : vector<4x64xf32>
    %295 = vector.multi_reduction <maximumf>, %294, %cst_25 [1] : vector<4x16x64xf32> to vector<4x64xf32>
    %296 = vector.shape_cast %295 : vector<4x64xf32> to vector<4x1x64xf32>
    %297 = vector.broadcast %296 : vector<4x1x64xf32> to vector<4x16x64xf32>
    %298 = arith.cmpf oeq, %294, %297 : vector<4x16x64xf32>
    %c16_i32_26 = arith.constant 16 : i32
    %299 = vector.broadcast %c16_i32_26 : i32 to vector<4x16x64xi32>
    %300 = arith.select %298, %258, %299 : vector<4x16x64xi1>, vector<4x16x64xi32>
    %cst_27 = arith.constant dense<2147483647> : vector<4x64xi32>
    %301 = vector.multi_reduction <minsi>, %300, %cst_27 [1] : vector<4x16x64xi32> to vector<4x64xi32>
    %302 = vector.shape_cast %265 : vector<4x64xi32> to vector<4x1x64xi32>
    %303 = vector.shape_cast %277 : vector<4x64xi32> to vector<4x1x64xi32>
    %304 = vector.shape_cast %289 : vector<4x64xi32> to vector<4x1x64xi32>
    %305 = vector.shape_cast %301 : vector<4x64xi32> to vector<4x1x64xi32>
    %306 = tpu.concatenate %302, %303, %304, %305 in 1 : vector<4x1x64xi32>, vector<4x1x64xi32>, vector<4x1x64xi32>, vector<4x1x64xi32> -> vector<4x4x64xi32>
    %c0_28 = arith.constant 0 : index
    %c0_29 = arith.constant 0 : index
    %c0_30 = arith.constant 0 : index
    %307 = vector.load %arg5[%c0_28, %c0_29, %c0_30] : memref<4x4x64xi32, #tpu.memory_space<vmem>>, vector<4x4x64xi32>
    tpu.vector_store %arg5[%c0_28, %c0_29, %c0_30], %306 {strides = array<i32>} : memref<4x4x64xi32, #tpu.memory_space<vmem>>, vector<4x4x64xi32>,
    return
  }
  func.func @transform_0(%arg0: i32) -> (i32, i32, i32) {
    %c0_i32 = arith.constant 0 : i32
    %c0_i32_0 = arith.constant 0 : i32
    %c0_i32_1 = arith.constant 0 : i32
    return %c0_i32, %c0_i32_0, %arg0 : i32, i32, i32
  }
  func.func @transform_1(%arg0: i32) -> (i32, i32, i32) {
    %c0_i32 = arith.constant 0 : i32
    %c0_i32_0 = arith.constant 0 : i32
    %c0_i32_1 = arith.constant 0 : i32
    return %c0_i32, %c0_i32_0, %arg0 : i32, i32, i32
  }
  func.func @transform_2(%arg0: i32) -> (i32, i32, i32) {
    %c0_i32 = arith.constant 0 : i32
    %c0_i32_0 = arith.constant 0 : i32
    %c0_i32_1 = arith.constant 0 : i32
    return %c0_i32, %c0_i32_0, %arg0 : i32, i32, i32
  }
  func.func @transform_3(%arg0: i32) -> (i32, i32, i32) {
    %c0_i32 = arith.constant 0 : i32
    %c0_i32_0 = arith.constant 0 : i32
    %c0_i32_1 = arith.constant 0 : i32
    return %c0_i32, %c0_i32_0, %arg0 : i32, i32, i32
  }
  func.func @transform_4(%arg0: i32) -> (i32, i32, i32) {
    %c0_i32 = arith.constant 0 : i32
    %c0_i32_0 = arith.constant 0 : i32
    %c0_i32_1 = arith.constant 0 : i32
    return %c0_i32, %c0_i32_0, %arg0 : i32, i32, i32
  }
}

module attributes {stable_mosaic.version = 11 : i64} {
  func.func @_fine_kernel(%arg0: i32, %arg1: memref<8x4x256xf32, #tpu.memory_space<vmem>>, %arg2: memref<8x16x256xf32, #tpu.memory_space<vmem>>, %arg3: memref<16x8x256xf32, #tpu.memory_space<vmem>>, %arg4: memref<4x8x256xf32, #tpu.memory_space<vmem>>, %arg5: memref<4x4x256xi32, #tpu.memory_space<vmem>>) attributes {dimension_semantics = [#tpu.dimension_semantics<parallel>], iteration_bounds = array<i64: 1>, scalar_prefetch = 0 : i64, scratch_operands = 0 : i64, tpu.core_type = #tpu.core_type<tc>, window_params = [{transform_indices = @transform_0, window_bounds = array<i64: 8, 4, 256>}, {transform_indices = @transform_1, window_bounds = array<i64: 8, 16, 256>}, {transform_indices = @transform_2, window_bounds = array<i64: 16, 8, 256>}, {transform_indices = @transform_3, window_bounds = array<i64: 4, 8, 256>}, {transform_indices = @transform_4, window_bounds = array<i64: 4, 4, 256>}]} {
    %c0 = arith.constant 0 : index
    %c0_0 = arith.constant 0 : index
    %c0_1 = arith.constant 0 : index
    %0 = vector.load %arg1[%c0, %c0_0, %c0_1] : memref<8x4x256xf32, #tpu.memory_space<vmem>>, vector<8x4x256xf32>
    %cst = arith.constant 0.353553385 : f32
    %1 = vector.broadcast %cst : f32 to vector<8x4x256xf32>
    %2 = arith.mulf %0, %1 : vector<8x4x256xf32>
    %c0_2 = arith.constant 0 : index
    %c0_3 = arith.constant 0 : index
    %c0_4 = arith.constant 0 : index
    %3 = vector.load %arg2[%c0_2, %c0_3, %c0_4] : memref<8x16x256xf32, #tpu.memory_space<vmem>>, vector<8x16x256xf32>
    %c0_5 = arith.constant 0 : index
    %c0_6 = arith.constant 0 : index
    %c0_7 = arith.constant 0 : index
    %4 = vector.load %arg3[%c0_5, %c0_6, %c0_7] : memref<16x8x256xf32, #tpu.memory_space<vmem>>, vector<16x8x256xf32>
    %5 = vector.extract_strided_slice %2 {offsets = [0, 0, 0], sizes = [1, 4, 256], strides = [1, 1, 1]} : vector<8x4x256xf32> to vector<1x4x256xf32>
    %6 = vector.shape_cast %5 : vector<1x4x256xf32> to vector<4x256xf32>
    %7 = vector.shape_cast %6 : vector<4x256xf32> to vector<4x1x256xf32>
    %8 = vector.extract_strided_slice %3 {offsets = [0, 0, 0], sizes = [1, 16, 256], strides = [1, 1, 1]} : vector<8x16x256xf32> to vector<1x16x256xf32>
    %9 = vector.shape_cast %8 : vector<1x16x256xf32> to vector<16x256xf32>
    %10 = vector.shape_cast %9 : vector<16x256xf32> to vector<1x16x256xf32>
    %11 = vector.broadcast %7 : vector<4x1x256xf32> to vector<4x16x256xf32>
    %12 = vector.broadcast %10 : vector<1x16x256xf32> to vector<4x16x256xf32>
    %13 = arith.mulf %11, %12 : vector<4x16x256xf32>
    %14 = vector.extract_strided_slice %2 {offsets = [1, 0, 0], sizes = [1, 4, 256], strides = [1, 1, 1]} : vector<8x4x256xf32> to vector<1x4x256xf32>
    %15 = vector.shape_cast %14 : vector<1x4x256xf32> to vector<4x256xf32>
    %16 = vector.shape_cast %15 : vector<4x256xf32> to vector<4x1x256xf32>
    %17 = vector.extract_strided_slice %3 {offsets = [1, 0, 0], sizes = [1, 16, 256], strides = [1, 1, 1]} : vector<8x16x256xf32> to vector<1x16x256xf32>
    %18 = vector.shape_cast %17 : vector<1x16x256xf32> to vector<16x256xf32>
    %19 = vector.shape_cast %18 : vector<16x256xf32> to vector<1x16x256xf32>
    %20 = vector.broadcast %16 : vector<4x1x256xf32> to vector<4x16x256xf32>
    %21 = vector.broadcast %19 : vector<1x16x256xf32> to vector<4x16x256xf32>
    %22 = arith.mulf %20, %21 : vector<4x16x256xf32>
    %23 = arith.addf %13, %22 : vector<4x16x256xf32>
    %24 = vector.extract_strided_slice %2 {offsets = [2, 0, 0], sizes = [1, 4, 256], strides = [1, 1, 1]} : vector<8x4x256xf32> to vector<1x4x256xf32>
    %25 = vector.shape_cast %24 : vector<1x4x256xf32> to vector<4x256xf32>
    %26 = vector.shape_cast %25 : vector<4x256xf32> to vector<4x1x256xf32>
    %27 = vector.extract_strided_slice %3 {offsets = [2, 0, 0], sizes = [1, 16, 256], strides = [1, 1, 1]} : vector<8x16x256xf32> to vector<1x16x256xf32>
    %28 = vector.shape_cast %27 : vector<1x16x256xf32> to vector<16x256xf32>
    %29 = vector.shape_cast %28 : vector<16x256xf32> to vector<1x16x256xf32>
    %30 = vector.broadcast %26 : vector<4x1x256xf32> to vector<4x16x256xf32>
    %31 = vector.broadcast %29 : vector<1x16x256xf32> to vector<4x16x256xf32>
    %32 = arith.mulf %30, %31 : vector<4x16x256xf32>
    %33 = arith.addf %23, %32 : vector<4x16x256xf32>
    %34 = vector.extract_strided_slice %2 {offsets = [3, 0, 0], sizes = [1, 4, 256], strides = [1, 1, 1]} : vector<8x4x256xf32> to vector<1x4x256xf32>
    %35 = vector.shape_cast %34 : vector<1x4x256xf32> to vector<4x256xf32>
    %36 = vector.shape_cast %35 : vector<4x256xf32> to vector<4x1x256xf32>
    %37 = vector.extract_strided_slice %3 {offsets = [3, 0, 0], sizes = [1, 16, 256], strides = [1, 1, 1]} : vector<8x16x256xf32> to vector<1x16x256xf32>
    %38 = vector.shape_cast %37 : vector<1x16x256xf32> to vector<16x256xf32>
    %39 = vector.shape_cast %38 : vector<16x256xf32> to vector<1x16x256xf32>
    %40 = vector.broadcast %36 : vector<4x1x256xf32> to vector<4x16x256xf32>
    %41 = vector.broadcast %39 : vector<1x16x256xf32> to vector<4x16x256xf32>
    %42 = arith.mulf %40, %41 : vector<4x16x256xf32>
    %43 = arith.addf %33, %42 : vector<4x16x256xf32>
    %44 = vector.extract_strided_slice %2 {offsets = [4, 0, 0], sizes = [1, 4, 256], strides = [1, 1, 1]} : vector<8x4x256xf32> to vector<1x4x256xf32>
    %45 = vector.shape_cast %44 : vector<1x4x256xf32> to vector<4x256xf32>
    %46 = vector.shape_cast %45 : vector<4x256xf32> to vector<4x1x256xf32>
    %47 = vector.extract_strided_slice %3 {offsets = [4, 0, 0], sizes = [1, 16, 256], strides = [1, 1, 1]} : vector<8x16x256xf32> to vector<1x16x256xf32>
    %48 = vector.shape_cast %47 : vector<1x16x256xf32> to vector<16x256xf32>
    %49 = vector.shape_cast %48 : vector<16x256xf32> to vector<1x16x256xf32>
    %50 = vector.broadcast %46 : vector<4x1x256xf32> to vector<4x16x256xf32>
    %51 = vector.broadcast %49 : vector<1x16x256xf32> to vector<4x16x256xf32>
    %52 = arith.mulf %50, %51 : vector<4x16x256xf32>
    %53 = arith.addf %43, %52 : vector<4x16x256xf32>
    %54 = vector.extract_strided_slice %2 {offsets = [5, 0, 0], sizes = [1, 4, 256], strides = [1, 1, 1]} : vector<8x4x256xf32> to vector<1x4x256xf32>
    %55 = vector.shape_cast %54 : vector<1x4x256xf32> to vector<4x256xf32>
    %56 = vector.shape_cast %55 : vector<4x256xf32> to vector<4x1x256xf32>
    %57 = vector.extract_strided_slice %3 {offsets = [5, 0, 0], sizes = [1, 16, 256], strides = [1, 1, 1]} : vector<8x16x256xf32> to vector<1x16x256xf32>
    %58 = vector.shape_cast %57 : vector<1x16x256xf32> to vector<16x256xf32>
    %59 = vector.shape_cast %58 : vector<16x256xf32> to vector<1x16x256xf32>
    %60 = vector.broadcast %56 : vector<4x1x256xf32> to vector<4x16x256xf32>
    %61 = vector.broadcast %59 : vector<1x16x256xf32> to vector<4x16x256xf32>
    %62 = arith.mulf %60, %61 : vector<4x16x256xf32>
    %63 = arith.addf %53, %62 : vector<4x16x256xf32>
    %64 = vector.extract_strided_slice %2 {offsets = [6, 0, 0], sizes = [1, 4, 256], strides = [1, 1, 1]} : vector<8x4x256xf32> to vector<1x4x256xf32>
    %65 = vector.shape_cast %64 : vector<1x4x256xf32> to vector<4x256xf32>
    %66 = vector.shape_cast %65 : vector<4x256xf32> to vector<4x1x256xf32>
    %67 = vector.extract_strided_slice %3 {offsets = [6, 0, 0], sizes = [1, 16, 256], strides = [1, 1, 1]} : vector<8x16x256xf32> to vector<1x16x256xf32>
    %68 = vector.shape_cast %67 : vector<1x16x256xf32> to vector<16x256xf32>
    %69 = vector.shape_cast %68 : vector<16x256xf32> to vector<1x16x256xf32>
    %70 = vector.broadcast %66 : vector<4x1x256xf32> to vector<4x16x256xf32>
    %71 = vector.broadcast %69 : vector<1x16x256xf32> to vector<4x16x256xf32>
    %72 = arith.mulf %70, %71 : vector<4x16x256xf32>
    %73 = arith.addf %63, %72 : vector<4x16x256xf32>
    %74 = vector.extract_strided_slice %2 {offsets = [7, 0, 0], sizes = [1, 4, 256], strides = [1, 1, 1]} : vector<8x4x256xf32> to vector<1x4x256xf32>
    %75 = vector.shape_cast %74 : vector<1x4x256xf32> to vector<4x256xf32>
    %76 = vector.shape_cast %75 : vector<4x256xf32> to vector<4x1x256xf32>
    %77 = vector.extract_strided_slice %3 {offsets = [7, 0, 0], sizes = [1, 16, 256], strides = [1, 1, 1]} : vector<8x16x256xf32> to vector<1x16x256xf32>
    %78 = vector.shape_cast %77 : vector<1x16x256xf32> to vector<16x256xf32>
    %79 = vector.shape_cast %78 : vector<16x256xf32> to vector<1x16x256xf32>
    %80 = vector.broadcast %76 : vector<4x1x256xf32> to vector<4x16x256xf32>
    %81 = vector.broadcast %79 : vector<1x16x256xf32> to vector<4x16x256xf32>
    %82 = arith.mulf %80, %81 : vector<4x16x256xf32>
    %83 = arith.addf %73, %82 : vector<4x16x256xf32>
    %cst_8 = arith.constant dense<0xFF800000> : vector<4x256xf32>
    %84 = vector.multi_reduction <maximumf>, %83, %cst_8 [1] : vector<4x16x256xf32> to vector<4x256xf32>
    %85 = vector.shape_cast %84 : vector<4x256xf32> to vector<4x1x256xf32>
    %86 = vector.broadcast %85 : vector<4x1x256xf32> to vector<4x16x256xf32>
    %87 = arith.subf %83, %86 : vector<4x16x256xf32>
    %88 = math.exp %87 : vector<4x16x256xf32>
    %cst_9 = arith.constant dense<0.000000e+00> : vector<4x256xf32>
    %89 = vector.multi_reduction <add>, %88, %cst_9 [1] : vector<4x16x256xf32> to vector<4x256xf32>
    %90 = vector.shape_cast %89 : vector<4x256xf32> to vector<4x1x256xf32>
    %91 = tpu.reciprocal %90 {approx = true} : vector<4x1x256xf32> -> vector<4x1x256xf32>
    %92 = arith.mulf %90, %91 : vector<4x1x256xf32>
    %cst_10 = arith.constant 2.000000e+00 : f32
    %93 = vector.broadcast %cst_10 : f32 to vector<4x1x256xf32>
    %94 = arith.subf %93, %92 : vector<4x1x256xf32>
    %95 = arith.mulf %91, %94 : vector<4x1x256xf32>
    %96 = vector.broadcast %95 : vector<4x1x256xf32> to vector<4x16x256xf32>
    %97 = arith.mulf %88, %96 : vector<4x16x256xf32>
    %98 = vector.extract_strided_slice %97 {offsets = [0, 0, 0], sizes = [4, 1, 256], strides = [1, 1, 1]} : vector<4x16x256xf32> to vector<4x1x256xf32>
    %99 = vector.shape_cast %98 : vector<4x1x256xf32> to vector<4x256xf32>
    %100 = vector.shape_cast %99 : vector<4x256xf32> to vector<4x1x256xf32>
    %101 = vector.extract_strided_slice %4 {offsets = [0, 0, 0], sizes = [1, 8, 256], strides = [1, 1, 1]} : vector<16x8x256xf32> to vector<1x8x256xf32>
    %102 = vector.shape_cast %101 : vector<1x8x256xf32> to vector<8x256xf32>
    %103 = vector.shape_cast %102 : vector<8x256xf32> to vector<1x8x256xf32>
    %104 = vector.broadcast %100 : vector<4x1x256xf32> to vector<4x8x256xf32>
    %105 = vector.broadcast %103 : vector<1x8x256xf32> to vector<4x8x256xf32>
    %106 = arith.mulf %104, %105 : vector<4x8x256xf32>
    %107 = vector.extract_strided_slice %97 {offsets = [0, 1, 0], sizes = [4, 1, 256], strides = [1, 1, 1]} : vector<4x16x256xf32> to vector<4x1x256xf32>
    %108 = vector.shape_cast %107 : vector<4x1x256xf32> to vector<4x256xf32>
    %109 = vector.shape_cast %108 : vector<4x256xf32> to vector<4x1x256xf32>
    %110 = vector.extract_strided_slice %4 {offsets = [1, 0, 0], sizes = [1, 8, 256], strides = [1, 1, 1]} : vector<16x8x256xf32> to vector<1x8x256xf32>
    %111 = vector.shape_cast %110 : vector<1x8x256xf32> to vector<8x256xf32>
    %112 = vector.shape_cast %111 : vector<8x256xf32> to vector<1x8x256xf32>
    %113 = vector.broadcast %109 : vector<4x1x256xf32> to vector<4x8x256xf32>
    %114 = vector.broadcast %112 : vector<1x8x256xf32> to vector<4x8x256xf32>
    %115 = arith.mulf %113, %114 : vector<4x8x256xf32>
    %116 = arith.addf %106, %115 : vector<4x8x256xf32>
    %117 = vector.extract_strided_slice %97 {offsets = [0, 2, 0], sizes = [4, 1, 256], strides = [1, 1, 1]} : vector<4x16x256xf32> to vector<4x1x256xf32>
    %118 = vector.shape_cast %117 : vector<4x1x256xf32> to vector<4x256xf32>
    %119 = vector.shape_cast %118 : vector<4x256xf32> to vector<4x1x256xf32>
    %120 = vector.extract_strided_slice %4 {offsets = [2, 0, 0], sizes = [1, 8, 256], strides = [1, 1, 1]} : vector<16x8x256xf32> to vector<1x8x256xf32>
    %121 = vector.shape_cast %120 : vector<1x8x256xf32> to vector<8x256xf32>
    %122 = vector.shape_cast %121 : vector<8x256xf32> to vector<1x8x256xf32>
    %123 = vector.broadcast %119 : vector<4x1x256xf32> to vector<4x8x256xf32>
    %124 = vector.broadcast %122 : vector<1x8x256xf32> to vector<4x8x256xf32>
    %125 = arith.mulf %123, %124 : vector<4x8x256xf32>
    %126 = arith.addf %116, %125 : vector<4x8x256xf32>
    %127 = vector.extract_strided_slice %97 {offsets = [0, 3, 0], sizes = [4, 1, 256], strides = [1, 1, 1]} : vector<4x16x256xf32> to vector<4x1x256xf32>
    %128 = vector.shape_cast %127 : vector<4x1x256xf32> to vector<4x256xf32>
    %129 = vector.shape_cast %128 : vector<4x256xf32> to vector<4x1x256xf32>
    %130 = vector.extract_strided_slice %4 {offsets = [3, 0, 0], sizes = [1, 8, 256], strides = [1, 1, 1]} : vector<16x8x256xf32> to vector<1x8x256xf32>
    %131 = vector.shape_cast %130 : vector<1x8x256xf32> to vector<8x256xf32>
    %132 = vector.shape_cast %131 : vector<8x256xf32> to vector<1x8x256xf32>
    %133 = vector.broadcast %129 : vector<4x1x256xf32> to vector<4x8x256xf32>
    %134 = vector.broadcast %132 : vector<1x8x256xf32> to vector<4x8x256xf32>
    %135 = arith.mulf %133, %134 : vector<4x8x256xf32>
    %136 = arith.addf %126, %135 : vector<4x8x256xf32>
    %137 = vector.extract_strided_slice %97 {offsets = [0, 4, 0], sizes = [4, 1, 256], strides = [1, 1, 1]} : vector<4x16x256xf32> to vector<4x1x256xf32>
    %138 = vector.shape_cast %137 : vector<4x1x256xf32> to vector<4x256xf32>
    %139 = vector.shape_cast %138 : vector<4x256xf32> to vector<4x1x256xf32>
    %140 = vector.extract_strided_slice %4 {offsets = [4, 0, 0], sizes = [1, 8, 256], strides = [1, 1, 1]} : vector<16x8x256xf32> to vector<1x8x256xf32>
    %141 = vector.shape_cast %140 : vector<1x8x256xf32> to vector<8x256xf32>
    %142 = vector.shape_cast %141 : vector<8x256xf32> to vector<1x8x256xf32>
    %143 = vector.broadcast %139 : vector<4x1x256xf32> to vector<4x8x256xf32>
    %144 = vector.broadcast %142 : vector<1x8x256xf32> to vector<4x8x256xf32>
    %145 = arith.mulf %143, %144 : vector<4x8x256xf32>
    %146 = arith.addf %136, %145 : vector<4x8x256xf32>
    %147 = vector.extract_strided_slice %97 {offsets = [0, 5, 0], sizes = [4, 1, 256], strides = [1, 1, 1]} : vector<4x16x256xf32> to vector<4x1x256xf32>
    %148 = vector.shape_cast %147 : vector<4x1x256xf32> to vector<4x256xf32>
    %149 = vector.shape_cast %148 : vector<4x256xf32> to vector<4x1x256xf32>
    %150 = vector.extract_strided_slice %4 {offsets = [5, 0, 0], sizes = [1, 8, 256], strides = [1, 1, 1]} : vector<16x8x256xf32> to vector<1x8x256xf32>
    %151 = vector.shape_cast %150 : vector<1x8x256xf32> to vector<8x256xf32>
    %152 = vector.shape_cast %151 : vector<8x256xf32> to vector<1x8x256xf32>
    %153 = vector.broadcast %149 : vector<4x1x256xf32> to vector<4x8x256xf32>
    %154 = vector.broadcast %152 : vector<1x8x256xf32> to vector<4x8x256xf32>
    %155 = arith.mulf %153, %154 : vector<4x8x256xf32>
    %156 = arith.addf %146, %155 : vector<4x8x256xf32>
    %157 = vector.extract_strided_slice %97 {offsets = [0, 6, 0], sizes = [4, 1, 256], strides = [1, 1, 1]} : vector<4x16x256xf32> to vector<4x1x256xf32>
    %158 = vector.shape_cast %157 : vector<4x1x256xf32> to vector<4x256xf32>
    %159 = vector.shape_cast %158 : vector<4x256xf32> to vector<4x1x256xf32>
    %160 = vector.extract_strided_slice %4 {offsets = [6, 0, 0], sizes = [1, 8, 256], strides = [1, 1, 1]} : vector<16x8x256xf32> to vector<1x8x256xf32>
    %161 = vector.shape_cast %160 : vector<1x8x256xf32> to vector<8x256xf32>
    %162 = vector.shape_cast %161 : vector<8x256xf32> to vector<1x8x256xf32>
    %163 = vector.broadcast %159 : vector<4x1x256xf32> to vector<4x8x256xf32>
    %164 = vector.broadcast %162 : vector<1x8x256xf32> to vector<4x8x256xf32>
    %165 = arith.mulf %163, %164 : vector<4x8x256xf32>
    %166 = arith.addf %156, %165 : vector<4x8x256xf32>
    %167 = vector.extract_strided_slice %97 {offsets = [0, 7, 0], sizes = [4, 1, 256], strides = [1, 1, 1]} : vector<4x16x256xf32> to vector<4x1x256xf32>
    %168 = vector.shape_cast %167 : vector<4x1x256xf32> to vector<4x256xf32>
    %169 = vector.shape_cast %168 : vector<4x256xf32> to vector<4x1x256xf32>
    %170 = vector.extract_strided_slice %4 {offsets = [7, 0, 0], sizes = [1, 8, 256], strides = [1, 1, 1]} : vector<16x8x256xf32> to vector<1x8x256xf32>
    %171 = vector.shape_cast %170 : vector<1x8x256xf32> to vector<8x256xf32>
    %172 = vector.shape_cast %171 : vector<8x256xf32> to vector<1x8x256xf32>
    %173 = vector.broadcast %169 : vector<4x1x256xf32> to vector<4x8x256xf32>
    %174 = vector.broadcast %172 : vector<1x8x256xf32> to vector<4x8x256xf32>
    %175 = arith.mulf %173, %174 : vector<4x8x256xf32>
    %176 = arith.addf %166, %175 : vector<4x8x256xf32>
    %177 = vector.extract_strided_slice %97 {offsets = [0, 8, 0], sizes = [4, 1, 256], strides = [1, 1, 1]} : vector<4x16x256xf32> to vector<4x1x256xf32>
    %178 = vector.shape_cast %177 : vector<4x1x256xf32> to vector<4x256xf32>
    %179 = vector.shape_cast %178 : vector<4x256xf32> to vector<4x1x256xf32>
    %180 = vector.extract_strided_slice %4 {offsets = [8, 0, 0], sizes = [1, 8, 256], strides = [1, 1, 1]} : vector<16x8x256xf32> to vector<1x8x256xf32>
    %181 = vector.shape_cast %180 : vector<1x8x256xf32> to vector<8x256xf32>
    %182 = vector.shape_cast %181 : vector<8x256xf32> to vector<1x8x256xf32>
    %183 = vector.broadcast %179 : vector<4x1x256xf32> to vector<4x8x256xf32>
    %184 = vector.broadcast %182 : vector<1x8x256xf32> to vector<4x8x256xf32>
    %185 = arith.mulf %183, %184 : vector<4x8x256xf32>
    %186 = arith.addf %176, %185 : vector<4x8x256xf32>
    %187 = vector.extract_strided_slice %97 {offsets = [0, 9, 0], sizes = [4, 1, 256], strides = [1, 1, 1]} : vector<4x16x256xf32> to vector<4x1x256xf32>
    %188 = vector.shape_cast %187 : vector<4x1x256xf32> to vector<4x256xf32>
    %189 = vector.shape_cast %188 : vector<4x256xf32> to vector<4x1x256xf32>
    %190 = vector.extract_strided_slice %4 {offsets = [9, 0, 0], sizes = [1, 8, 256], strides = [1, 1, 1]} : vector<16x8x256xf32> to vector<1x8x256xf32>
    %191 = vector.shape_cast %190 : vector<1x8x256xf32> to vector<8x256xf32>
    %192 = vector.shape_cast %191 : vector<8x256xf32> to vector<1x8x256xf32>
    %193 = vector.broadcast %189 : vector<4x1x256xf32> to vector<4x8x256xf32>
    %194 = vector.broadcast %192 : vector<1x8x256xf32> to vector<4x8x256xf32>
    %195 = arith.mulf %193, %194 : vector<4x8x256xf32>
    %196 = arith.addf %186, %195 : vector<4x8x256xf32>
    %197 = vector.extract_strided_slice %97 {offsets = [0, 10, 0], sizes = [4, 1, 256], strides = [1, 1, 1]} : vector<4x16x256xf32> to vector<4x1x256xf32>
    %198 = vector.shape_cast %197 : vector<4x1x256xf32> to vector<4x256xf32>
    %199 = vector.shape_cast %198 : vector<4x256xf32> to vector<4x1x256xf32>
    %200 = vector.extract_strided_slice %4 {offsets = [10, 0, 0], sizes = [1, 8, 256], strides = [1, 1, 1]} : vector<16x8x256xf32> to vector<1x8x256xf32>
    %201 = vector.shape_cast %200 : vector<1x8x256xf32> to vector<8x256xf32>
    %202 = vector.shape_cast %201 : vector<8x256xf32> to vector<1x8x256xf32>
    %203 = vector.broadcast %199 : vector<4x1x256xf32> to vector<4x8x256xf32>
    %204 = vector.broadcast %202 : vector<1x8x256xf32> to vector<4x8x256xf32>
    %205 = arith.mulf %203, %204 : vector<4x8x256xf32>
    %206 = arith.addf %196, %205 : vector<4x8x256xf32>
    %207 = vector.extract_strided_slice %97 {offsets = [0, 11, 0], sizes = [4, 1, 256], strides = [1, 1, 1]} : vector<4x16x256xf32> to vector<4x1x256xf32>
    %208 = vector.shape_cast %207 : vector<4x1x256xf32> to vector<4x256xf32>
    %209 = vector.shape_cast %208 : vector<4x256xf32> to vector<4x1x256xf32>
    %210 = vector.extract_strided_slice %4 {offsets = [11, 0, 0], sizes = [1, 8, 256], strides = [1, 1, 1]} : vector<16x8x256xf32> to vector<1x8x256xf32>
    %211 = vector.shape_cast %210 : vector<1x8x256xf32> to vector<8x256xf32>
    %212 = vector.shape_cast %211 : vector<8x256xf32> to vector<1x8x256xf32>
    %213 = vector.broadcast %209 : vector<4x1x256xf32> to vector<4x8x256xf32>
    %214 = vector.broadcast %212 : vector<1x8x256xf32> to vector<4x8x256xf32>
    %215 = arith.mulf %213, %214 : vector<4x8x256xf32>
    %216 = arith.addf %206, %215 : vector<4x8x256xf32>
    %217 = vector.extract_strided_slice %97 {offsets = [0, 12, 0], sizes = [4, 1, 256], strides = [1, 1, 1]} : vector<4x16x256xf32> to vector<4x1x256xf32>
    %218 = vector.shape_cast %217 : vector<4x1x256xf32> to vector<4x256xf32>
    %219 = vector.shape_cast %218 : vector<4x256xf32> to vector<4x1x256xf32>
    %220 = vector.extract_strided_slice %4 {offsets = [12, 0, 0], sizes = [1, 8, 256], strides = [1, 1, 1]} : vector<16x8x256xf32> to vector<1x8x256xf32>
    %221 = vector.shape_cast %220 : vector<1x8x256xf32> to vector<8x256xf32>
    %222 = vector.shape_cast %221 : vector<8x256xf32> to vector<1x8x256xf32>
    %223 = vector.broadcast %219 : vector<4x1x256xf32> to vector<4x8x256xf32>
    %224 = vector.broadcast %222 : vector<1x8x256xf32> to vector<4x8x256xf32>
    %225 = arith.mulf %223, %224 : vector<4x8x256xf32>
    %226 = arith.addf %216, %225 : vector<4x8x256xf32>
    %227 = vector.extract_strided_slice %97 {offsets = [0, 13, 0], sizes = [4, 1, 256], strides = [1, 1, 1]} : vector<4x16x256xf32> to vector<4x1x256xf32>
    %228 = vector.shape_cast %227 : vector<4x1x256xf32> to vector<4x256xf32>
    %229 = vector.shape_cast %228 : vector<4x256xf32> to vector<4x1x256xf32>
    %230 = vector.extract_strided_slice %4 {offsets = [13, 0, 0], sizes = [1, 8, 256], strides = [1, 1, 1]} : vector<16x8x256xf32> to vector<1x8x256xf32>
    %231 = vector.shape_cast %230 : vector<1x8x256xf32> to vector<8x256xf32>
    %232 = vector.shape_cast %231 : vector<8x256xf32> to vector<1x8x256xf32>
    %233 = vector.broadcast %229 : vector<4x1x256xf32> to vector<4x8x256xf32>
    %234 = vector.broadcast %232 : vector<1x8x256xf32> to vector<4x8x256xf32>
    %235 = arith.mulf %233, %234 : vector<4x8x256xf32>
    %236 = arith.addf %226, %235 : vector<4x8x256xf32>
    %237 = vector.extract_strided_slice %97 {offsets = [0, 14, 0], sizes = [4, 1, 256], strides = [1, 1, 1]} : vector<4x16x256xf32> to vector<4x1x256xf32>
    %238 = vector.shape_cast %237 : vector<4x1x256xf32> to vector<4x256xf32>
    %239 = vector.shape_cast %238 : vector<4x256xf32> to vector<4x1x256xf32>
    %240 = vector.extract_strided_slice %4 {offsets = [14, 0, 0], sizes = [1, 8, 256], strides = [1, 1, 1]} : vector<16x8x256xf32> to vector<1x8x256xf32>
    %241 = vector.shape_cast %240 : vector<1x8x256xf32> to vector<8x256xf32>
    %242 = vector.shape_cast %241 : vector<8x256xf32> to vector<1x8x256xf32>
    %243 = vector.broadcast %239 : vector<4x1x256xf32> to vector<4x8x256xf32>
    %244 = vector.broadcast %242 : vector<1x8x256xf32> to vector<4x8x256xf32>
    %245 = arith.mulf %243, %244 : vector<4x8x256xf32>
    %246 = arith.addf %236, %245 : vector<4x8x256xf32>
    %247 = vector.extract_strided_slice %97 {offsets = [0, 15, 0], sizes = [4, 1, 256], strides = [1, 1, 1]} : vector<4x16x256xf32> to vector<4x1x256xf32>
    %248 = vector.shape_cast %247 : vector<4x1x256xf32> to vector<4x256xf32>
    %249 = vector.shape_cast %248 : vector<4x256xf32> to vector<4x1x256xf32>
    %250 = vector.extract_strided_slice %4 {offsets = [15, 0, 0], sizes = [1, 8, 256], strides = [1, 1, 1]} : vector<16x8x256xf32> to vector<1x8x256xf32>
    %251 = vector.shape_cast %250 : vector<1x8x256xf32> to vector<8x256xf32>
    %252 = vector.shape_cast %251 : vector<8x256xf32> to vector<1x8x256xf32>
    %253 = vector.broadcast %249 : vector<4x1x256xf32> to vector<4x8x256xf32>
    %254 = vector.broadcast %252 : vector<1x8x256xf32> to vector<4x8x256xf32>
    %255 = arith.mulf %253, %254 : vector<4x8x256xf32>
    %256 = arith.addf %246, %255 : vector<4x8x256xf32>
    %c0_11 = arith.constant 0 : index
    %c0_12 = arith.constant 0 : index
    %c0_13 = arith.constant 0 : index
    %257 = vector.load %arg4[%c0_11, %c0_12, %c0_13] : memref<4x8x256xf32, #tpu.memory_space<vmem>>, vector<4x8x256xf32>
    tpu.vector_store %arg4[%c0_11, %c0_12, %c0_13], %256 {strides = array<i32>} : memref<4x8x256xf32, #tpu.memory_space<vmem>>, vector<4x8x256xf32>,
    %258 = tpu.iota {dimensions = array<i32: 1>} : vector<4x16x256xi32>
    %cst_14 = arith.constant dense<0xFF800000> : vector<4x256xf32>
    %259 = vector.multi_reduction <maximumf>, %97, %cst_14 [1] : vector<4x16x256xf32> to vector<4x256xf32>
    %260 = vector.shape_cast %259 : vector<4x256xf32> to vector<4x1x256xf32>
    %261 = vector.broadcast %260 : vector<4x1x256xf32> to vector<4x16x256xf32>
    %262 = arith.cmpf oeq, %97, %261 : vector<4x16x256xf32>
    %c16_i32 = arith.constant 16 : i32
    %263 = vector.broadcast %c16_i32 : i32 to vector<4x16x256xi32>
    %264 = arith.select %262, %258, %263 : vector<4x16x256xi1>, vector<4x16x256xi32>
    %cst_15 = arith.constant dense<2147483647> : vector<4x256xi32>
    %265 = vector.multi_reduction <minsi>, %264, %cst_15 [1] : vector<4x16x256xi32> to vector<4x256xi32>
    %266 = vector.shape_cast %265 : vector<4x256xi32> to vector<4x1x256xi32>
    %267 = vector.broadcast %266 : vector<4x1x256xi32> to vector<4x16x256xi32>
    %268 = arith.cmpi eq, %258, %267 : vector<4x16x256xi32>
    %cst_16 = arith.constant 0xFF800000 : f32
    %269 = vector.broadcast %cst_16 : f32 to vector<4x16x256xf32>
    %270 = arith.select %268, %269, %97 : vector<4x16x256xi1>, vector<4x16x256xf32>
    %cst_17 = arith.constant dense<0xFF800000> : vector<4x256xf32>
    %271 = vector.multi_reduction <maximumf>, %270, %cst_17 [1] : vector<4x16x256xf32> to vector<4x256xf32>
    %272 = vector.shape_cast %271 : vector<4x256xf32> to vector<4x1x256xf32>
    %273 = vector.broadcast %272 : vector<4x1x256xf32> to vector<4x16x256xf32>
    %274 = arith.cmpf oeq, %270, %273 : vector<4x16x256xf32>
    %c16_i32_18 = arith.constant 16 : i32
    %275 = vector.broadcast %c16_i32_18 : i32 to vector<4x16x256xi32>
    %276 = arith.select %274, %258, %275 : vector<4x16x256xi1>, vector<4x16x256xi32>
    %cst_19 = arith.constant dense<2147483647> : vector<4x256xi32>
    %277 = vector.multi_reduction <minsi>, %276, %cst_19 [1] : vector<4x16x256xi32> to vector<4x256xi32>
    %278 = vector.shape_cast %277 : vector<4x256xi32> to vector<4x1x256xi32>
    %279 = vector.broadcast %278 : vector<4x1x256xi32> to vector<4x16x256xi32>
    %280 = arith.cmpi eq, %258, %279 : vector<4x16x256xi32>
    %cst_20 = arith.constant 0xFF800000 : f32
    %281 = vector.broadcast %cst_20 : f32 to vector<4x16x256xf32>
    %282 = arith.select %280, %281, %270 : vector<4x16x256xi1>, vector<4x16x256xf32>
    %cst_21 = arith.constant dense<0xFF800000> : vector<4x256xf32>
    %283 = vector.multi_reduction <maximumf>, %282, %cst_21 [1] : vector<4x16x256xf32> to vector<4x256xf32>
    %284 = vector.shape_cast %283 : vector<4x256xf32> to vector<4x1x256xf32>
    %285 = vector.broadcast %284 : vector<4x1x256xf32> to vector<4x16x256xf32>
    %286 = arith.cmpf oeq, %282, %285 : vector<4x16x256xf32>
    %c16_i32_22 = arith.constant 16 : i32
    %287 = vector.broadcast %c16_i32_22 : i32 to vector<4x16x256xi32>
    %288 = arith.select %286, %258, %287 : vector<4x16x256xi1>, vector<4x16x256xi32>
    %cst_23 = arith.constant dense<2147483647> : vector<4x256xi32>
    %289 = vector.multi_reduction <minsi>, %288, %cst_23 [1] : vector<4x16x256xi32> to vector<4x256xi32>
    %290 = vector.shape_cast %289 : vector<4x256xi32> to vector<4x1x256xi32>
    %291 = vector.broadcast %290 : vector<4x1x256xi32> to vector<4x16x256xi32>
    %292 = arith.cmpi eq, %258, %291 : vector<4x16x256xi32>
    %cst_24 = arith.constant 0xFF800000 : f32
    %293 = vector.broadcast %cst_24 : f32 to vector<4x16x256xf32>
    %294 = arith.select %292, %293, %282 : vector<4x16x256xi1>, vector<4x16x256xf32>
    %cst_25 = arith.constant dense<0xFF800000> : vector<4x256xf32>
    %295 = vector.multi_reduction <maximumf>, %294, %cst_25 [1] : vector<4x16x256xf32> to vector<4x256xf32>
    %296 = vector.shape_cast %295 : vector<4x256xf32> to vector<4x1x256xf32>
    %297 = vector.broadcast %296 : vector<4x1x256xf32> to vector<4x16x256xf32>
    %298 = arith.cmpf oeq, %294, %297 : vector<4x16x256xf32>
    %c16_i32_26 = arith.constant 16 : i32
    %299 = vector.broadcast %c16_i32_26 : i32 to vector<4x16x256xi32>
    %300 = arith.select %298, %258, %299 : vector<4x16x256xi1>, vector<4x16x256xi32>
    %cst_27 = arith.constant dense<2147483647> : vector<4x256xi32>
    %301 = vector.multi_reduction <minsi>, %300, %cst_27 [1] : vector<4x16x256xi32> to vector<4x256xi32>
    %302 = vector.shape_cast %265 : vector<4x256xi32> to vector<4x1x256xi32>
    %303 = vector.shape_cast %277 : vector<4x256xi32> to vector<4x1x256xi32>
    %304 = vector.shape_cast %289 : vector<4x256xi32> to vector<4x1x256xi32>
    %305 = vector.shape_cast %301 : vector<4x256xi32> to vector<4x1x256xi32>
    %306 = tpu.concatenate %302, %303, %304, %305 in 1 : vector<4x1x256xi32>, vector<4x1x256xi32>, vector<4x1x256xi32>, vector<4x1x256xi32> -> vector<4x4x256xi32>
    %c0_28 = arith.constant 0 : index
    %c0_29 = arith.constant 0 : index
    %c0_30 = arith.constant 0 : index
    %307 = vector.load %arg5[%c0_28, %c0_29, %c0_30] : memref<4x4x256xi32, #tpu.memory_space<vmem>>, vector<4x4x256xi32>
    tpu.vector_store %arg5[%c0_28, %c0_29, %c0_30], %306 {strides = array<i32>} : memref<4x4x256xi32, #tpu.memory_space<vmem>>, vector<4x4x256xi32>,
    return
  }
  func.func @transform_0(%arg0: i32) -> (i32, i32, i32) {
    %c0_i32 = arith.constant 0 : i32
    %c0_i32_0 = arith.constant 0 : i32
    %c0_i32_1 = arith.constant 0 : i32
    return %c0_i32, %c0_i32_0, %arg0 : i32, i32, i32
  }
  func.func @transform_1(%arg0: i32) -> (i32, i32, i32) {
    %c0_i32 = arith.constant 0 : i32
    %c0_i32_0 = arith.constant 0 : i32
    %c0_i32_1 = arith.constant 0 : i32
    return %c0_i32, %c0_i32_0, %arg0 : i32, i32, i32
  }
  func.func @transform_2(%arg0: i32) -> (i32, i32, i32) {
    %c0_i32 = arith.constant 0 : i32
    %c0_i32_0 = arith.constant 0 : i32
    %c0_i32_1 = arith.constant 0 : i32
    return %c0_i32, %c0_i32_0, %arg0 : i32, i32, i32
  }
  func.func @transform_3(%arg0: i32) -> (i32, i32, i32) {
    %c0_i32 = arith.constant 0 : i32
    %c0_i32_0 = arith.constant 0 : i32
    %c0_i32_1 = arith.constant 0 : i32
    return %c0_i32, %c0_i32_0, %arg0 : i32, i32, i32
  }
  func.func @transform_4(%arg0: i32) -> (i32, i32, i32) {
    %c0_i32 = arith.constant 0 : i32
    %c0_i32_0 = arith.constant 0 : i32
    %c0_i32_1 = arith.constant 0 : i32
    return %c0_i32, %c0_i32_0, %arg0 : i32, i32, i32
  }
}

</mosaic_0001>

<bundles_post_ra>
// kernel: qtattb_forward.3
= control target key start
LH: loop header
LB: loop body
LE: loop exit
PB: predicated region body
PF: predicated region fallthrough
CT: control target
= control target key end

     0   :  { %vm48_vm0 = vcmask 64512   ;;  %vm397_vm2 = vcmask 130048   ;;  %s2707_s1 = inlined_call_operand.vmem [shape: f32[4,16,8], index: 1, kind: input, shape index: {}]   ;;  %s2708_s0 = inlined_call_operand.vmem [shape: f32[4,16,8], index: 0, kind: input, shape index: {}]   ;;  %s2709_s2 = inlined_call_operand.vmem [shape: f32[4,16,8], index: 2, kind: input, shape index: {}]   ;;  %s2710_s3 = inlined_call_operand.vmem [shape: f32[4,8,16], index: 3, kind: output, shape index: {0}]   ;;  %s2711_s4 = inlined_call_operand.vmem [shape: s32[4,4,16], index: 4, kind: output, shape index: {1}]  }
   0x1   :  { %v32_v0 = vld [vmem:[%s2707_s1] sm:$0xff]  ;;  %v33_v1 = vld [vmem:[%s2707_s1 + $0x8] sm:$0xff]  ;;  %vm2045_vm1 = vmpackc.low %vm48_vm0, %vm48_vm0 }
   0x2   :  { %v1934_v3 = vpack.c.bf16 %v33_v1, %v32_v0  ;;  %v34_v4 = vld [vmem:[%s2707_s1 + $0x10] sm:$0xff]  ;;  %v35_v5 = vld [vmem:[%s2707_s1 + $0x18] sm:$0xff]  ;;  %v16_v6 = vld [vmem:[%s2708_s0] sm:$0xff] }
   0x3   :  { %v1940_v7 = vpack.c.bf16 %v35_v5, %v34_v4  ;;  %v24_v8 = vmul.f32 0.35355338, %v16_v6  ;;  %v18_v9 = vld [vmem:[%s2708_s0 + $0x10] sm:$0xff]  ;;  %v17_v11 = vld [vmem:[%s2708_s0 + $0x8] sm:$0xff]  ;;  %v36_v12 = vld [vmem:[%s2707_s1 + $0x20] sm:$0xff] }
   0x4   :  { %1936 = vmatprep.subr.msk.bf16.mxu0 %vm2045_vm1, %v1934_v3  ;;  %v26_v10 = vmul.f32 0.35355338, %v18_v9  ;;  %v37_v13 = vld [vmem:[%s2707_s1 + $0x28] sm:$0xff]  ;;  %v38_v14 = vld [vmem:[%s2707_s1 + $0x30] sm:$0xff]  ;;  %v19_v15 = vld [vmem:[%s2708_s0 + $0x18] sm:$0xff] }
   0x5   :  { %1942 = vmatprep.subr.msk.bf16.mxu1 %vm2045_vm1, %v1940_v7  ;;  %1939 = vmatpush3.bf16.xpose.msk.msra.mxu0 %vm2045_vm1, %v1934_v3  ;;  %v1946_v16 = vpack.c.bf16 %v37_v13, %v36_v12  ;;  %v39_v17 = vld [vmem:[%s2707_s1 + $0x38] sm:$0xff]  ;;  %v20_v19 = vld [vmem:[%s2708_s0 + $0x20] sm:$0xff]  ;;  %v25_v20 = vmul.f32 0.35355338, %v17_v11  ;;  %v22_v21 = vld [vmem:[%s2708_s0 + $0x30] sm:$0xff] }
   0x6   :  { %1945 = vmatpush3.bf16.xpose.msk.msra.mxu1 %vm2045_vm1, %v1940_v7  ;;  %1882 = vmatprep.mubr.msk.f32.mxu0 %vm48_vm0, %v24_v8  ;;  %v1952_v18 = vpack.c.bf16 %v39_v17, %v38_v14  ;;  %v27_v22 = vmul.f32 0.35355338, %v19_v15  ;;  %v28_v23 = vmul.f32 0.35355338, %v20_v19  ;;  %v30_v24 = vmul.f32 0.35355338, %v22_v21  ;;  %vm2160_vm3 = vmpackc.low %vm397_vm2, %vm397_vm2 }
   0x7   :  { %1889 = vmatprep.mubr.msk.f32.mxu1 %vm48_vm0, %v26_v10  ;;  %1948 = vmatprep.subr.msk.bf16.mxu0 %vm2045_vm1, %v1946_v16  ;;  %v21_v25 = vld [vmem:[%s2708_s0 + $0x28] sm:$0xff]  ;;  %v23_v26 = vld [vmem:[%s2708_s0 + $0x38] sm:$0xff]  ;;  %v2009_v21 = vmov 0.0|0.0  }
   0x8   :  { %1954 = vmatprep.subr.msk.bf16.mxu1 %vm2045_vm1, %v1952_v18  ;;  %v29_v27 = vmul.f32 0.35355338, %v21_v25  ;;  %v31_v28 = vmul.f32 0.35355338, %v23_v26 }
   0xc   :  { %1883 = vmatmul.mubr.msk.f32.vlgmr.msra.gmra.mrb[0].mxu0 %vm48_vm0, %v25_v20 }
   0xd   :  { %1890 = vmatmul.mubr.msk.f32.vlgmr.msra.gmra.mrb[0].mxu1 %vm48_vm0, %v27_v22  ;;  %1951 = vmatpush3.bf16.xpose.msk.msra.mxu0 %vm2045_vm1, %v1946_v16 }
   0xe   :  { %1957 = vmatpush3.bf16.xpose.msk.msra.mxu1 %vm2045_vm1, %v1952_v18  ;;  %1896 = vmatprep.mubr.msk.f32.mxu0 %vm48_vm0, %v28_v23 }
   0xf   :  { %1903 = vmatprep.mubr.msk.f32.mxu1 %vm48_vm0, %v30_v24  ;;  %1958 = vmatprep.subr.bf16.mxu0 %v2009_v21 }
  0x10   :  { %1962 = vmatprep.subr.bf16.mxu1 %v2009_v21 }
  0x14   :  { %1897 = vmatmul.mubr.msk.f32.vlgmr.msra.gmra.mrb[2].mxu0 %vm48_vm0, %v29_v27 }
  0x15   :  { %1904 = vmatmul.mubr.msk.f32.vlgmr.msra.gmra.mrb[2].mxu1 %vm48_vm0, %v31_v28 }
  0xdf   :  { %v1884_v29 = vpop.f32.mrb[0].mxu0 }
  0xe0   :  { %v1891_v30 = vpop.f32.mrb[0].mxu1  ;;  %v127_v31 = vpop.f32.mrb[1].mxu0  ;;  %v401_v32 = vsel %vm397_vm2, %v1884_v29, -inf }
  0xe1   :  { %v407_v33 = vsel %vm397_vm2, %v1891_v30, -inf  ;;  %402 = vmax.xlane.f32.xlu0 %v401_v32  ;;  %v214_v34 = vpop.f32.mrb[1].mxu1  ;;  %v398_v36 = vsel %vm397_vm2, %v127_v31, -inf }
  0xe2   :  { %408 = vmax.xlane.f32.xlu1 %v407_v33  ;;  %v404_v35 = vsel %vm397_vm2, %v214_v34, -inf }
  0xe5   :  { %399 = vmax.xlane.f32.xlu0 %v398_v36 }
  0xe6   :  { %405 = vmax.xlane.f32.xlu1 %v404_v35 }
  0xe7   :  { %v1898_v37 = vpop.f32.mrb[2].mxu0 }
  0xe8   :  { %v301_v38 = vpop.f32.mrb[3].mxu0  ;;  %v413_v39 = vsel %vm397_vm2, %v1898_v37, -inf  ;;  %v1905_v40 = vpop.f32.mrb[2].mxu1 }
  0xe9   :  { %v410_v41 = vsel %vm397_vm2, %v301_v38, -inf  ;;  %v388_v42 = vpop.f32.mrb[3].mxu1  ;;  %v419_v43 = vsel %vm397_vm2, %v1905_v40, -inf }
  0xea   :  { %414 = vmax.xlane.f32.xlu1 %v413_v39  ;;  %411 = vmax.xlane.f32.xlu0 %v410_v41  ;;  %v416_v44 = vsel %vm397_vm2, %v388_v42, -inf }
  0xee   :  { %420 = vmax.xlane.f32.xlu1 %v419_v43  ;;  %417 = vmax.xlane.f32.xlu0 %v416_v44 }
 0x16e   :  { %v403_v45 = vpop.xlane.xlu0 %402 }
 0x16f   :  { %v409_v46 = vpop.xlane.xlu1 %408  ;;  %v423_v47 = vsub.f32 %v1884_v29, %v403_v45 }
 0x170   :  { %v425_v48 = vsub.f32 %v1891_v30, %v409_v46 }
 0x171   :  { %v432_v49 = vmul.f32 1.442695, %v423_v47 }
 0x172   :  { %v436_v50 = vmul.f32 1.442695, %v425_v48  ;;  %v400_v51 = vpop.xlane.xlu0 %399 }
 0x173   :  { %1977 = vpow2.f32 %v432_v49  ;;  %v406_v52 = vpop.xlane.xlu1 %405  ;;  %v422_v53 = vsub.f32 %v127_v31, %v400_v51 }
 0x174   :  { %v424_v54 = vsub.f32 %v214_v34, %v406_v52  ;;  %1979 = vpow2.f32 %v436_v50 }
 0x175   :  { %v430_v55 = vmul.f32 1.442695, %v422_v53 }
 0x176   :  { %v434_v56 = vmul.f32 1.442695, %v424_v54 }
 0x177   :  { %1981 = vpow2.f32 %v430_v55  ;;  %v415_v57 = vpop.xlane.xlu1 %414  ;;  %v412_v58 = vpop.xlane.xlu0 %411 }
 0x178   :  { %v427_v59 = vsub.f32 %v1898_v37, %v415_v57  ;;  %v426_v60 = vsub.f32 %v301_v38, %v412_v58  ;;  %1983 = vpow2.f32 %v434_v56  ;;  %v45_v57 = vld [vmem:[%s2709_s2 + $0x28] sm:$0xff] }
 0x17a   :  { %v440_v61 = vmul.f32 1.442695, %v427_v59  ;;  %v438_v62 = vmul.f32 1.442695, %v426_v60 }
 0x17b   :  { %v421_v63 = vpop.xlane.xlu1 %420  ;;  %v418_v0 = vpop.xlane.xlu0 %417 }
 0x17c   :  { %1985 = vpow2.f32 %v440_v61  ;;  %v429_v1 = vsub.f32 %v1905_v40, %v421_v63  ;;  %v428_v2 = vsub.f32 %v388_v42, %v418_v0 }
 0x17d   :  { %v1978_v3 = vpop.eup %1977  ;;  %1987 = vpow2.f32 %v438_v62 }
 0x17e   :  { %v444_v4 = vmul.f32 1.442695, %v429_v1  ;;  %v442_v5 = vmul.f32 1.442695, %v428_v2  ;;  %v449_v6 = vsel %vm397_vm2, %v1978_v3, 0.0  ;;  %v1980_v7 = vpop.eup %1979 }
 0x17f   :  { %450 = vadd.xlane.f32.xlu1 %v449_v6  ;;  %v455_v9 = vsel %vm397_vm2, %v1980_v7, 0.0 }
 0x180   :  { %1989 = vpow2.f32 %v444_v4 }
 0x181   :  { %v1982_v8 = vpop.eup %1981  ;;  %1991 = vpow2.f32 %v442_v5 }
 0x182   :  { %v446_v10 = vsel %vm397_vm2, %v1982_v8, 0.0  ;;  %v2126_v11 = vpop.eup %1983 }
 0x183   :  { %456 = vadd.xlane.f32.xlu1 %v455_v9  ;;  %447 = vadd.xlane.f32.xlu0 %v446_v10  ;;  %v452_v13 = vsel %vm397_vm2, %v2126_v11, 0.0 }
 0x186   :  { %v2128_v12 = vpop.eup %1985 }
 0x187   :  { %v2132_v14 = vpop.eup %1987  ;;  %v461_v15 = vsel %vm397_vm2, %v2128_v12, 0.0  ;;  %453 = vadd.xlane.f32.xlu0 %v452_v13 }
 0x188   :  { %462 = vadd.xlane.f32.xlu1 %v461_v15  ;;  %v458_v17 = vsel %vm397_vm2, %v2132_v14, 0.0 }
 0x18a   :  { %v2136_v16 = vpop.eup %1989 }
 0x18b   :  { %v2140_v18 = vpop.eup %1991  ;;  %v467_v19 = vsel %vm397_vm2, %v2136_v16, 0.0  ;;  %459 = vadd.xlane.f32.xlu0 %v458_v17  ;;  %v958_v17 = vlaneseq }
 0x18c   :  { %468 = vadd.xlane.f32.xlu1 %v467_v19  ;;  %v464_v20 = vsel %vm397_vm2, %v2140_v18, 0.0 }
 0x18d   :  { %v2202_v19 = vand.u32 127, %v958_v17 }
 0x18f   :  { %465 = vadd.xlane.f32.xlu0 %v464_v20 }
 0x20c   :  { %v451_v22 = vpop.xlane.xlu1 %450 }
 0x20d   :  { %1993 = vrcp.f32 %v451_v22 }
 0x210   :  { %v457_v23 = vpop.xlane.xlu1 %456  ;;  %v448_v24 = vpop.xlane.xlu0 %447 }
 0x211   :  { %1995 = vrcp.f32 %v457_v23 }
 0x212   :  { %1997 = vrcp.f32 %v448_v24 }
 0x214   :  { %v454_v25 = vpop.xlane.xlu0 %453 }
 0x215   :  { %v463_v26 = vpop.xlane.xlu1 %462  ;;  %1999 = vrcp.f32 %v454_v25 }
 0x216   :  { %2001 = vrcp.f32 %v463_v26 }
 0x217   :  { %v1994_v27 = vpop.eup %1993 }
 0x218   :  { %v479_v28 = vmul.f32 %v1994_v27, %v451_v22  ;;  %v460_v29 = vpop.xlane.xlu0 %459 }
 0x219   :  { %v469_v30 = vpop.xlane.xlu1 %468  ;;  %2003 = vrcp.f32 %v460_v29 }
 0x21a   :  { %v487_v31 = vsub.f32 2.0, %v479_v28  ;;  %2005 = vrcp.f32 %v469_v30 }
 0x21b   :  { %v1996_v32 = vpop.eup %1995 }
 0x21c   :  { %v1998_v33 = vpop.eup %1997  ;;  %v495_v34 = vmul.f32 %v1994_v27, %v487_v31  ;;  %v481_v35 = vmul.f32 %v1996_v32, %v457_v23  ;;  %v466_v36 = vpop.xlane.xlu0 %465 }
 0x21d   :  { %v478_v37 = vmul.f32 %v1998_v33, %v448_v24  ;;  %2007 = vrcp.f32 %v466_v36 }
 0x21e   :  { %v2148_v38 = vmul.f32 %v1978_v3, %v495_v34  ;;  %v489_v39 = vsub.f32 2.0, %v481_v35 }
 0x21f   :  { %v2000_v40 = vpop.eup %1999  ;;  %v486_v41 = vsub.f32 2.0, %v478_v37 }
 0x220   :  { %v2002_v42 = vpop.eup %2001  ;;  %v497_v43 = vmul.f32 %v1996_v32, %v489_v39  ;;  %v480_v44 = vmul.f32 %v2000_v40, %v454_v25  ;;  %v963_v45 = vsel %vm397_vm2, %v2148_v38, -inf }
 0x221   :  { %v494_v46 = vmul.f32 %v1998_v33, %v486_v41  ;;  %v483_v47 = vmul.f32 %v2002_v42, %v463_v26  ;;  %964 = vmax.xlane.f32.xlu1 %v963_v45 }
 0x222   :  { %v2152_v48 = vmul.f32 %v1980_v7, %v497_v43  ;;  %v488_v49 = vsub.f32 2.0, %v480_v44 }
 0x223   :  { %v2004_v50 = vpop.eup %2003  ;;  %v2154_v51 = vmul.f32 %v1982_v8, %v494_v46  ;;  %v491_v52 = vsub.f32 2.0, %v483_v47 }
 0x224   :  { %v2006_v53 = vpop.eup %2005  ;;  %v496_v54 = vmul.f32 %v2000_v40, %v488_v49  ;;  %v482_v55 = vmul.f32 %v2004_v50, %v460_v29  ;;  %v969_v56 = vsel %vm397_vm2, %v2152_v48, -inf }
 0x225   :  { %v499_v58 = vmul.f32 %v2002_v42, %v491_v52  ;;  %v485_v59 = vmul.f32 %v2006_v53, %v469_v30  ;;  %970 = vmax.xlane.f32.xlu1 %v969_v56  ;;  %v960_v60 = vsel %vm397_vm2, %v2154_v51, -inf  ;;  %v1959_v61 = vpack.c.bf16 %v2148_v38, %v2154_v51 }
 0x226   :  { %v2169_v62 = vmul.f32 %v2126_v11, %v496_v54  ;;  %v490_v63 = vsub.f32 2.0, %v482_v55  ;;  %961 = vmax.xlane.f32.xlu0 %v960_v60 }
 0x227   :  { %v2008_v0 = vpop.eup %2007  ;;  %v2172_v1 = vmul.f32 %v2128_v12, %v499_v58  ;;  %v493_v2 = vsub.f32 2.0, %v485_v59  ;;  %1961 = vmatpush3.bf16.xpose.msk.msra.mxu0 %vm2160_vm3, %v1959_v61 }
 0x228   :  { %v498_v3 = vmul.f32 %v2004_v50, %v490_v63  ;;  %v484_v4 = vmul.f32 %v2008_v0, %v466_v36  ;;  %v966_v5 = vsel %vm397_vm2, %v2169_v62, -inf  ;;  %v1963_v6 = vpack.c.bf16 %v2152_v48, %v2169_v62  ;;  %1966 = vmatprep.subr.bf16.mxu0 %v2009_v21 }
 0x229   :  { %v501_v7 = vmul.f32 %v2006_v53, %v493_v2  ;;  %v975_v8 = vsel %vm397_vm2, %v2172_v1, -inf }
 0x22a   :  { %v2184_v9 = vmul.f32 %v2132_v14, %v498_v3  ;;  %v492_v10 = vsub.f32 2.0, %v484_v4  ;;  %976 = vmax.xlane.f32.xlu1 %v975_v8  ;;  %967 = vmax.xlane.f32.xlu0 %v966_v5 }
 0x22b   :  { %v2187_v11 = vmul.f32 %v2136_v16, %v501_v7  ;;  %1965 = vmatpush3.bf16.xpose.msk.msra.mxu1 %vm2160_vm3, %v1963_v6 }
 0x22c   :  { %v500_v12 = vmul.f32 %v2008_v0, %v492_v10  ;;  %v972_v13 = vsel %vm397_vm2, %v2184_v9, -inf  ;;  %1970 = vmatprep.subr.bf16.mxu1 %v2009_v21 }
 0x22d   :  { %v981_v15 = vsel %vm397_vm2, %v2187_v11, -inf }
 0x22e   :  { %v2197_v14 = vmul.f32 %v2140_v18, %v500_v12  ;;  %982 = vmax.xlane.f32.xlu1 %v981_v15  ;;  %973 = vmax.xlane.f32.xlu0 %v972_v13 }
 0x230   :  { %v978_v16 = vsel %vm397_vm2, %v2197_v14, -inf }
 0x232   :  { %979 = vmax.xlane.f32.xlu0 %v978_v16 }
 0x2ae   :  { %v965_v20 = vpop.xlane.xlu1 %964 }
 0x2af   :  { %vm985_vm4 = vcmp.eq.f32.partialorder %v2148_v38, %v965_v20 }
 0x2b0   :  { %v993_v21 = vsel %vm985_vm4, %v2202_v19, 16 }
 0x2b1   :  { %v1015_v22 = vsel %vm397_vm2, %v993_v21, 2147483647 }
 0x2b2   :  { %v971_v23 = vpop.xlane.xlu1 %970  ;;  %v1017_v18 = vshra.s32 %v1015_v22, 16  ;;  %v1016_v0 = vand.u32 65535, %v1015_v22 }
 0x2b3   :  { %vm987_vm5 = vcmp.eq.f32.partialorder %v2152_v48, %v971_v23  ;;  %v962_v24 = vpop.xlane.xlu0 %961 }
 0x2b4   :  { %v995_v25 = vsel %vm987_vm5, %v2202_v19, 16  ;;  %vm984_vm6 = vcmp.eq.f32.partialorder %v2154_v51, %v962_v24  ;;  %v1019_v26 = vcvt.s32.f32 %v1017_v18  ;;  %v1018_v3 = vcvt.s32.f32 %v1016_v0 }
 0x2b5   :  { %v1045_v27 = vsel %vm397_vm2, %v995_v25, 2147483647  ;;  %v992_v28 = vsel %vm984_vm6, %v2202_v19, 16 }
 0x2b6   :  { %1020 = vmin.xlane.f32.xlu1 %v1019_v26  ;;  %v1047_v29 = vshra.s32 %v1045_v27, 16  ;;  %v1000_v30 = vsel %vm397_vm2, %v992_v28, 2147483647  ;;  %v1046_v4 = vand.u32 65535, %v1045_v27 }
 0x2b7   :  { %v977_v31 = vpop.xlane.xlu1 %976  ;;  %v968_v32 = vpop.xlane.xlu0 %967  ;;  %v1002_v33 = vshra.s32 %v1000_v30, 16  ;;  %v1001_v5 = vand.u32 65535, %v1000_v30 }
 0x2b8   :  { %vm989_vm7 = vcmp.eq.f32.partialorder %v2172_v1, %v977_v31  ;;  %vm986_vm8 = vcmp.eq.f32.partialorder %v2169_v62, %v968_v32  ;;  %v1049_v34 = vcvt.s32.f32 %v1047_v29  ;;  %v1048_v8 = vcvt.s32.f32 %v1046_v4 }
 0x2b9   :  { %v997_v35 = vsel %vm989_vm7, %v2202_v19, 16  ;;  %v994_v36 = vsel %vm986_vm8, %v2202_v19, 16  ;;  %v1004_v37 = vcvt.s32.f32 %v1002_v33  ;;  %v1003_v12 = vcvt.s32.f32 %v1001_v5 }
 0x2ba   :  { %v1075_v39 = vsel %vm397_vm2, %v997_v35, 2147483647  ;;  %v1030_v40 = vsel %vm397_vm2, %v994_v36, 2147483647  ;;  %1050 = vmin.xlane.f32.xlu1 %v1049_v34  ;;  %vm1657_vm7 = vcmask 130112  }
 0x2bb   :  { %v983_v41 = vpop.xlane.xlu1 %982  ;;  %1005 = vmin.xlane.f32.xlu0 %v1004_v37  ;;  %v974_v42 = vpop.xlane.xlu0 %973  ;;  %v1077_v43 = vshra.s32 %v1075_v39, 16  ;;  %v1032_v44 = vshra.s32 %v1030_v40, 16  ;;  %v1076_v13 = vand.u32 65535, %v1075_v39  ;;  %v1031_v15 = vand.u32 65535, %v1030_v40 }
 0x2bc   :  { %vm991_vm9 = vcmp.eq.f32.partialorder %v2187_v11, %v983_v41  ;;  %vm988_vm10 = vcmp.eq.f32.partialorder %v2184_v9, %v974_v42  ;;  %v1649_v40 = vshrl.u32 %v958_v17, 7 }
 0x2bd   :  { %v999_v45 = vsel %vm991_vm9, %v2202_v19, 16  ;;  %v996_v46 = vsel %vm988_vm10, %v2202_v19, 16  ;;  %v1079_v47 = vcvt.s32.f32 %v1077_v43  ;;  %v1034_v49 = vcvt.s32.f32 %v1032_v44 }
 0x2be   :  { %v1105_v50 = vsel %vm397_vm2, %v999_v45, 2147483647  ;;  %v1060_v52 = vsel %vm397_vm2, %v996_v46, 2147483647  ;;  %v1078_v23 = vcvt.s32.f32 %v1076_v13  ;;  %v1033_v18 = vcvt.s32.f32 %v1031_v15 }
 0x2bf   :  { %1080 = vmin.xlane.f32.xlu1 %v1079_v47  ;;  %1035 = vmin.xlane.f32.xlu0 %v1034_v49  ;;  %v980_v53 = vpop.xlane.xlu0 %979  ;;  %v1107_v54 = vshra.s32 %v1105_v50, 16  ;;  %v1062_v55 = vshra.s32 %v1060_v52, 16  ;;  %v1106_v24 = vand.u32 65535, %v1105_v50  ;;  %v1061_v25 = vand.u32 65535, %v1060_v52 }
 0x2c0   :  { %vm990_vm11 = vcmp.eq.f32.partialorder %v2197_v14, %v980_v53  ;;  %v1652_v44 = vadd.s32 4294967288, %v2202_v19  ;;  %v2237_v17 = vsub.s32 %v2202_v19, %v1649_v40 }
 0x2c1   :  { %v998_v56 = vsel %vm990_vm11, %v2202_v19, 16  ;;  %v1109_v58 = vcvt.s32.f32 %v1107_v54  ;;  %v1064_v59 = vcvt.s32.f32 %v1062_v55  ;;  %v1108_v30 = vcvt.s32.f32 %v1106_v24 }
 0x2c2   :  { %v1090_v60 = vsel %vm397_vm2, %v998_v56, 2147483647  ;;  %v1063_v31 = vcvt.s32.f32 %v1061_v25  ;;  %v2233_v54 = vsub.s32 %v1652_v44, %v1649_v40 }
 0x2c3   :  { %1110 = vmin.xlane.f32.xlu1 %v1109_v58  ;;  %1065 = vmin.xlane.f32.xlu0 %v1064_v59  ;;  %v1092_v61 = vshra.s32 %v1090_v60, 16  ;;  %v1091_v32 = vand.u32 65535, %v1090_v60 }
 0x2c5   :  { %v1094_v63 = vcvt.s32.f32 %v1092_v61  ;;  %v1093_v36 = vcvt.s32.f32 %v1091_v32 }
 0x2c7   :  { %1095 = vmin.xlane.f32.xlu0 %v1094_v63 }
 0x343   :  { %v1021_v2 = vpop.xlane.xlu1 %1020 }
 0x344   :  { %vm1022_vm12 = vcmp.eq.f32.partialorder %v1019_v26, %v1021_v2  ;;  %v1027_v39 = vcvt.f32.s32 %v1021_v2 }
 0x345   :  { %v1023_v6 = vsel %vm1022_vm12, %v1018_v3, inf }
 0x346   :  { %1024 = vmin.xlane.f32.xlu1 %v1023_v6  ;;  %v1028_v42 = vshll.u32 %v1027_v39, 16 }
 0x347   :  { %v1051_v7 = vpop.xlane.xlu1 %1050 }
 0x348   :  { %v1006_v10 = vpop.xlane.xlu0 %1005  ;;  %vm1052_vm13 = vcmp.eq.f32.partialorder %v1049_v34, %v1051_v7  ;;  %v1057_v43 = vcvt.f32.s32 %v1051_v7 }
 0x349   :  { %v1053_v16 = vsel %vm1052_vm13, %v1048_v8, inf  ;;  %vm1007_vm14 = vcmp.eq.f32.partialorder %v1004_v37, %v1006_v10  ;;  %v1012_v46 = vcvt.f32.s32 %v1006_v10 }
 0x34a   :  { %1054 = vmin.xlane.f32.xlu1 %v1053_v16  ;;  %v1008_v20 = vsel %vm1007_vm14, %v1003_v12, inf  ;;  %v1058_v53 = vshll.u32 %v1057_v43, 16 }
 0x34b   :  { %1009 = vmin.xlane.f32.xlu0 %v1008_v20 }
 0x34c   :  { %v1081_v21 = vpop.xlane.xlu1 %1080  ;;  %v1036_v22 = vpop.xlane.xlu0 %1035 }
 0x34d   :  { %vm1082_vm15 = vcmp.eq.f32.partialorder %v1079_v47, %v1081_v21  ;;  %vm1037_vm0 = vcmp.eq.f32.partialorder %v1034_v49, %v1036_v22  ;;  %v1087_v49 = vcvt.f32.s32 %v1081_v21  ;;  %v1042_v50 = vcvt.f32.s32 %v1036_v22 }
 0x34e   :  { %v1083_v26 = vsel %vm1082_vm15, %v1078_v23, inf  ;;  %v1038_v27 = vsel %vm1037_vm0, %v1033_v18, inf }
 0x34f   :  { %1084 = vmin.xlane.f32.xlu1 %v1083_v26  ;;  %1039 = vmin.xlane.f32.xlu0 %v1038_v27  ;;  %v1088_v0 = vshll.u32 %v1087_v49, 16  ;;  %v1043_v2 = vshll.u32 %v1042_v50, 16 }
 0x350   :  { %v1111_v28 = vpop.xlane.xlu1 %1110  ;;  %v1066_v29 = vpop.xlane.xlu0 %1065 }
 0x351   :  { %vm1112_vm1 = vcmp.eq.f32.partialorder %v1109_v58, %v1111_v28  ;;  %vm1067_vm4 = vcmp.eq.f32.partialorder %v1064_v59, %v1066_v29  ;;  %v1013_v58 = vshll.u32 %v1012_v46, 16  ;;  %v1117_v3 = vcvt.f32.s32 %v1111_v28 }
 0x352   :  { %v1113_v33 = vsel %vm1112_vm1, %v1108_v30, inf  ;;  %v1068_v34 = vsel %vm1067_vm4, %v1063_v31, inf  ;;  %v1072_v5 = vcvt.f32.s32 %v1066_v29 }
 0x353   :  { %1114 = vmin.xlane.f32.xlu1 %v1113_v33  ;;  %1069 = vmin.xlane.f32.xlu0 %v1068_v34  ;;  %v1118_v23 = vshll.u32 %v1117_v3, 16 }
 0x354   :  { %v2228_v35 = vpop.xlane.xlu0 %1095  ;;  %v1073_v18 = vshll.u32 %v1072_v5, 16 }
 0x355   :  { %vm1097_vm5 = vcmp.eq.f32.partialorder %v1094_v63, %v2228_v35  ;;  %v1102_v24 = vcvt.f32.s32 %v2228_v35 }
 0x356   :  { %v1098_v37 = vsel %vm1097_vm5, %v1093_v36, inf }
 0x357   :  { %1099 = vmin.xlane.f32.xlu0 %v1098_v37  ;;  %v1103_v34 = vshll.u32 %v1102_v24, 16 }
 0x3d3   :  { %v1025_v41 = vpop.xlane.xlu1 %1024 }
 0x3d4   :  { %v1026_v45 = vcvt.f32.s32 %v1025_v41 }
 0x3d6   :  { %v1029_v47 = vadd.s32 %v1028_v42, %v1026_v45 }
 0x3d7   :  { %v1055_v52 = vpop.xlane.xlu1 %1054 }
 0x3d8   :  { %v1056_v55 = vcvt.f32.s32 %v1055_v52  ;;  %v1010_v56 = vpop.xlane.xlu0 %1009  ;;  %vm1121_vm6 = vcmp.eq.s32.totalorder %v2202_v19, %v1029_v47  ;;  %v1656_v6 = vrot.slane %v1029_v47, %v2233_v54 }
 0x3d9   :  { %v1011_v59 = vcvt.f32.s32 %v1010_v56  ;;  %v2240_v60 = vsel %vm1121_vm6, -inf, %v2148_v38 }
 0x3da   :  { %v1059_v61 = vadd.s32 %v1058_v53, %v1056_v55  ;;  %v1139_v63 = vsel %vm397_vm2, %v2240_v60, -inf }
 0x3db   :  { %v1014_v4 = vadd.s32 %v1013_v58, %v1011_v59  ;;  %1140 = vmax.xlane.f32.xlu1 %v1139_v63 }
 0x3dc   :  { %v1085_v7 = vpop.xlane.xlu1 %1084  ;;  %v1040_v8 = vpop.xlane.xlu0 %1039  ;;  %vm1123_vm8 = vcmp.eq.s32.totalorder %v2202_v19, %v1059_v61  ;;  %v1666_v27 = vrot.slane %v1059_v61, %v2233_v54 }
 0x3dd   :  { %v1651_v38 = vrot.slane %v1014_v4, %v2237_v17  ;;  %v1086_v10 = vcvt.f32.s32 %v1085_v7  ;;  %v1041_v12 = vcvt.f32.s32 %v1040_v8  ;;  %v2248_v13 = vsel %vm1123_vm8, -inf, %v2152_v48 }
 0x3de   :  { %v1145_v15 = vsel %vm397_vm2, %v2248_v13, -inf  ;;  %vm1120_vm9 = vcmp.eq.s32.totalorder %v2202_v19, %v1014_v4 }
 0x3df   :  { %v2254_v16 = vsel %vm1657_vm7, %v1656_v6, %v1651_v38  ;;  %v1089_v20 = vadd.s32 %v1088_v0, %v1086_v10  ;;  %v1044_v21 = vadd.s32 %v1043_v2, %v1041_v12  ;;  %1146 = vmax.xlane.f32.xlu1 %v1145_v15  ;;  %v2257_v22 = vsel %vm1120_vm9, -inf, %v2154_v51 }
 0x3e0   :  { %v1115_v48 = vpop.xlane.xlu1 %1114  ;;  %v1136_v25 = vsel %vm397_vm2, %v2257_v22, -inf  ;;  %v1070_v26 = vpop.xlane.xlu0 %1069 }
 0x3e1   :  { %v1662_v28 = vrot.slane %v1044_v21, %v2237_v17  ;;  %v1116_v29 = vcvt.f32.s32 %v1115_v48  ;;  %1137 = vmax.xlane.f32.xlu0 %v1136_v25  ;;  %v1071_v30 = vcvt.f32.s32 %v1070_v26  ;;  %vm1125_vm10 = vcmp.eq.s32.totalorder %v2202_v19, %v1089_v20 }
 0x3e2   :  { %vm1122_vm11 = vcmp.eq.s32.totalorder %v2202_v19, %v1044_v21  ;;  %v2270_v33 = vsel %vm1125_vm10, -inf, %v2172_v1  ;;  %v1675_v39 = vrot.slane %v1089_v20, %v2233_v54 }
 0x3e3   :  { %v2267_v51 = vsel %vm1657_vm7, %v1666_v27, %v1662_v28  ;;  %v1119_v31 = vadd.s32 %v1118_v23, %v1116_v29  ;;  %v1074_v32 = vadd.s32 %v1073_v18, %v1071_v30  ;;  %v1151_v35 = vsel %vm397_vm2, %v2270_v33, -inf }
 0x3e4   :  { %v2275_v36 = vsel %vm1122_vm11, -inf, %v2169_v62  ;;  %v1100_v37 = vpop.xlane.xlu0 %1099  ;;  %1152 = vmax.xlane.f32.xlu1 %v1151_v35 }
 0x3e5   :  { %v1671_v40 = vrot.slane %v1074_v32, %v2237_v17  ;;  %v1142_v41 = vsel %vm397_vm2, %v2275_v36, -inf  ;;  %v1101_v42 = vcvt.f32.s32 %v1100_v37  ;;  %vm1127_vm12 = vcmp.eq.s32.totalorder %v2202_v19, %v1119_v31 }
 0x3e6   :  { %1143 = vmax.xlane.f32.xlu0 %v1142_v41  ;;  %vm1124_vm13 = vcmp.eq.s32.totalorder %v2202_v19, %v1074_v32  ;;  %v2287_v44 = vsel %vm1127_vm12, -inf, %v2187_v11  ;;  %v1684_v49 = vrot.slane %v1119_v31, %v2233_v54 }
 0x3e7   :  { %v2284_v43 = vsel %vm1657_vm7, %v1675_v39, %v1671_v40  ;;  %v1104_v62 = vadd.s32 %v1103_v34, %v1101_v42  ;;  %v2290_v45 = vsel %vm1124_vm13, -inf, %v2184_v9  ;;  %v1157_v46 = vsel %vm397_vm2, %v2287_v44, -inf }
 0x3e8   :  { %v1148_v47 = vsel %vm397_vm2, %v2290_v45, -inf  ;;  %1158 = vmax.xlane.f32.xlu1 %v1157_v46 }
 0x3e9   :  { %v1680_v50 = vrot.slane %v1104_v62, %v2237_v17  ;;  %vm1126_vm14 = vcmp.eq.s32.totalorder %v2202_v19, %v1104_v62 }
 0x3ea   :  { %1149 = vmax.xlane.f32.xlu0 %v1148_v47  ;;  %v2300_v52 = vsel %vm1126_vm14, -inf, %v2197_v14 }
 0x3eb   :  { %v2303_v53 = vsel %vm1657_vm7, %v1684_v49, %v1680_v50  ;;  %v1154_v55 = vsel %vm397_vm2, %v2300_v52, -inf }
 0x3ee   :  { %1155 = vmax.xlane.f32.xlu0 %v1154_v55 }
 0x468   :  { %v1141_v56 = vpop.xlane.xlu1 %1140 }
 0x469   :  { %vm1161_vm15 = vcmp.eq.f32.partialorder %v2240_v60, %v1141_v56 }
 0x46a   :  { %v1169_v58 = vsel %vm1161_vm15, %v2202_v19, 16 }
 0x46b   :  { %v1191_v59 = vsel %vm397_vm2, %v1169_v58, 2147483647 }
 0x46c   :  { %v1147_v61 = vpop.xlane.xlu1 %1146  ;;  %v1193_v63 = vshra.s32 %v1191_v59, 16  ;;  %v1192_v47 = vand.u32 65535, %v1191_v59 }
 0x46d   :  { %vm1163_vm0 = vcmp.eq.f32.partialorder %v2248_v13, %v1147_v61 }
 0x46e   :  { %v1171_v0 = vsel %vm1163_vm0, %v2202_v19, 16  ;;  %v1138_v2 = vpop.xlane.xlu0 %1137  ;;  %v1195_v3 = vcvt.s32.f32 %v1193_v63  ;;  %v1194_v50 = vcvt.s32.f32 %v1192_v47 }
 0x46f   :  { %v1221_v4 = vsel %vm397_vm2, %v1171_v0, 2147483647  ;;  %vm1160_vm1 = vcmp.eq.f32.partialorder %v2257_v22, %v1138_v2 }
 0x470   :  { %v1168_v5 = vsel %vm1160_vm1, %v2202_v19, 16  ;;  %1196 = vmin.xlane.f32.xlu1 %v1195_v3  ;;  %v1223_v6 = vshra.s32 %v1221_v4, 16  ;;  %v1222_v55 = vand.u32 65535, %v1221_v4 }
 0x471   :  { %v1176_v7 = vsel %vm397_vm2, %v1168_v5, 2147483647  ;;  %v1153_v8 = vpop.xlane.xlu1 %1152 }
 0x472   :  { %v1225_v38 = vcvt.s32.f32 %v1223_v6  ;;  %v1178_v10 = vshra.s32 %v1176_v7, 16  ;;  %vm1165_vm4 = vcmp.eq.f32.partialorder %v2270_v33, %v1153_v8  ;;  %v1177_v58 = vand.u32 65535, %v1176_v7 }
 0x473   :  { %v1144_v12 = vpop.xlane.xlu0 %1143  ;;  %v1173_v15 = vsel %vm1165_vm4, %v2202_v19, 16  ;;  %v1224_v63 = vcvt.s32.f32 %v1222_v55 }
 0x474   :  { %vm1162_vm5 = vcmp.eq.f32.partialorder %v2275_v36, %v1144_v12  ;;  %1226 = vmin.xlane.f32.xlu1 %v1225_v38  ;;  %v1180_v20 = vcvt.s32.f32 %v1178_v10  ;;  %v1251_v21 = vsel %vm397_vm2, %v1173_v15, 2147483647  ;;  %v1179_v5 = vcvt.s32.f32 %v1177_v58 }
 0x475   :  { %v1170_v23 = vsel %vm1162_vm5, %v2202_v19, 16  ;;  %v1159_v24 = vpop.xlane.xlu1 %1158  ;;  %v1253_v48 = vshra.s32 %v1251_v21, 16  ;;  %v1252_v6 = vand.u32 65535, %v1251_v21 }
 0x476   :  { %v1206_v18 = vsel %vm397_vm2, %v1170_v23, 2147483647  ;;  %1181 = vmin.xlane.f32.xlu0 %v1180_v20  ;;  %vm1167_vm6 = vcmp.eq.f32.partialorder %v2287_v44, %v1159_v24 }
 0x477   :  { %v1150_v25 = vpop.xlane.xlu0 %1149  ;;  %v1208_v26 = vshra.s32 %v1206_v18, 16  ;;  %v1175_v27 = vsel %vm1167_vm6, %v2202_v19, 16  ;;  %v1255_v28 = vcvt.s32.f32 %v1253_v48  ;;  %v1207_v8 = vand.u32 65535, %v1206_v18 }
 0x478   :  { %vm1164_vm8 = vcmp.eq.f32.partialorder %v2290_v45, %v1150_v25  ;;  %v1281_v29 = vsel %vm397_vm2, %v1175_v27, 2147483647  ;;  %v1254_v12 = vcvt.s32.f32 %v1252_v6  ;;  %vm1794_vm6 = vcmask 1040384  }
 0x479   :  { %v1172_v30 = vsel %vm1164_vm8, %v2202_v19, 16  ;;  %v1210_v31 = vcvt.s32.f32 %v1208_v26  ;;  %1256 = vmin.xlane.f32.xlu1 %v1255_v28  ;;  %v1283_v34 = vshra.s32 %v1281_v29, 16  ;;  %v1282_v15 = vand.u32 65535, %v1281_v29 }
 0x47a   :  { %v1236_v32 = vsel %vm397_vm2, %v1172_v30, 2147483647 }
 0x47b   :  { %1211 = vmin.xlane.f32.xlu0 %v1210_v31  ;;  %v1156_v35 = vpop.xlane.xlu0 %1155  ;;  %v1238_v37 = vshra.s32 %v1236_v32, 16  ;;  %v1285_v39 = vcvt.s32.f32 %v1283_v34  ;;  %v1237_v7 = vand.u32 65535, %v1236_v32  ;;  %v1284_v48 = vcvt.s32.f32 %v1282_v15 }
 0x47c   :  { %vm1166_vm9 = vcmp.eq.f32.partialorder %v2300_v52, %v1156_v35 }
 0x47d   :  { %v1174_v40 = vsel %vm1166_vm9, %v2202_v19, 16  ;;  %v1240_v41 = vcvt.s32.f32 %v1238_v37  ;;  %1286 = vmin.xlane.f32.xlu1 %v1285_v39 }
 0x47e   :  { %v1266_v42 = vsel %vm397_vm2, %v1174_v40, 2147483647 }
 0x47f   :  { %1241 = vmin.xlane.f32.xlu0 %v1240_v41  ;;  %v1268_v62 = vshra.s32 %v1266_v42, 16  ;;  %v1267_v18 = vand.u32 65535, %v1266_v42 }
 0x481   :  { %v1270_v46 = vcvt.s32.f32 %v1268_v62 }
 0x483   :  { %1271 = vmin.xlane.f32.xlu0 %v1270_v46 }
 0x4fd   :  { %v1197_v49 = vpop.xlane.xlu1 %1196 }
 0x4fe   :  { %vm1198_vm10 = vcmp.eq.f32.partialorder %v1195_v3, %v1197_v49  ;;  %v1209_v3 = vcvt.s32.f32 %v1207_v8  ;;  %v1203_v30 = vcvt.f32.s32 %v1197_v49 }
 0x4ff   :  { %v1199_v56 = vsel %vm1198_vm10, %v1194_v50, inf }
 0x500   :  { %1200 = vmin.xlane.f32.xlu1 %v1199_v56  ;;  %v1204_v32 = vshll.u32 %v1203_v30, 16 }
 0x501   :  { %v1227_v61 = vpop.xlane.xlu1 %1226 }
 0x502   :  { %vm1228_vm11 = vcmp.eq.f32.partialorder %v1225_v38, %v1227_v61  ;;  %v1233_v34 = vcvt.f32.s32 %v1227_v61 }
 0x503   :  { %v1182_v0 = vpop.xlane.xlu0 %1181  ;;  %v1229_v2 = vsel %vm1228_vm11, %v1224_v63, inf }
 0x504   :  { %1230 = vmin.xlane.f32.xlu1 %v1229_v2  ;;  %vm1183_vm12 = vcmp.eq.f32.partialorder %v1180_v20, %v1182_v0  ;;  %v1239_v20 = vcvt.s32.f32 %v1237_v7  ;;  %v1188_v37 = vcvt.f32.s32 %v1182_v0  ;;  %v1234_v42 = vshll.u32 %v1233_v34, 16 }
 0x505   :  { %v1184_v10 = vsel %vm1183_vm12, %v1179_v5, inf }
 0x506   :  { %1185 = vmin.xlane.f32.xlu0 %v1184_v10  ;;  %v1257_v59 = vpop.xlane.xlu1 %1256 }
 0x507   :  { %vm1258_vm13 = vcmp.eq.f32.partialorder %v1255_v28, %v1257_v59  ;;  %v1269_v28 = vcvt.s32.f32 %v1267_v18 }
 0x508   :  { %v1212_v4 = vpop.xlane.xlu0 %1211  ;;  %v1259_v23 = vsel %vm1258_vm13, %v1254_v12, inf }
 0x509   :  { %vm1213_vm14 = vcmp.eq.f32.partialorder %v1210_v31, %v1212_v4  ;;  %1260 = vmin.xlane.f32.xlu1 %v1259_v23  ;;  %v1218_v58 = vcvt.f32.s32 %v1212_v4 }
 0x50a   :  { %v1214_v38 = vsel %vm1213_vm14, %v1209_v3, inf  ;;  %v1287_v24 = vpop.xlane.xlu1 %1286 }
 0x50b   :  { %1215 = vmin.xlane.f32.xlu0 %v1214_v38  ;;  %vm1288_vm15 = vcmp.eq.f32.partialorder %v1285_v39, %v1287_v24  ;;  %v1293_v63 = vcvt.f32.s32 %v1287_v24  ;;  %v1219_v15 = vshll.u32 %v1218_v58, 16 }
 0x50c   :  { %v1242_v21 = vpop.xlane.xlu0 %1241  ;;  %v1289_v25 = vsel %vm1288_vm15, %v1284_v48, inf }
 0x50d   :  { %vm1243_vm0 = vcmp.eq.f32.partialorder %v1240_v41, %v1242_v21  ;;  %1290 = vmin.xlane.f32.xlu1 %v1289_v25  ;;  %v1263_v41 = vcvt.f32.s32 %v1257_v59  ;;  %v1248_v2 = vcvt.f32.s32 %v1242_v21  ;;  %v1294_v38 = vshll.u32 %v1293_v63, 16 }
 0x50e   :  { %v1244_v26 = vsel %vm1243_vm0, %v1239_v20, inf }
 0x50f   :  { %1245 = vmin.xlane.f32.xlu0 %v1244_v26  ;;  %v1264_v61 = vshll.u32 %v1263_v41, 16  ;;  %v1249_v24 = vshll.u32 %v1248_v2, 16 }
 0x510   :  { %v2331_v27 = vpop.xlane.xlu0 %1271 }
 0x511   :  { %vm1273_vm1 = vcmp.eq.f32.partialorder %v1270_v46, %v2331_v27  ;;  %v1189_v46 = vshll.u32 %v1188_v37, 16  ;;  %v1278_v18 = vcvt.f32.s32 %v2331_v27 }
 0x512   :  { %v1274_v29 = vsel %vm1273_vm1, %v1269_v28, inf }
 0x513   :  { %1275 = vmin.xlane.f32.xlu0 %v1274_v29  ;;  %v1279_v37 = vshll.u32 %v1278_v18, 16 }
 0x58d   :  { %v1201_v31 = vpop.xlane.xlu1 %1200 }
 0x58e   :  { %v1202_v35 = vcvt.f32.s32 %v1201_v31 }
 0x590   :  { %v1205_v39 = vadd.s32 %v1204_v32, %v1202_v35 }
 0x591   :  { %v1231_v40 = vpop.xlane.xlu1 %1230 }
 0x592   :  { %v1232_v62 = vcvt.f32.s32 %v1231_v40  ;;  %vm1297_vm4 = vcmp.eq.s32.totalorder %v2202_v19, %v1205_v39  ;;  %v1693_v5 = vrot.slane %v1205_v39, %v2233_v54 }
 0x593   :  { %v1186_v47 = vpop.xlane.xlu0 %1185  ;;  %v2336_v50 = vsel %vm1297_vm4, -inf, %v2240_v60 }
 0x594   :  { %v1235_v55 = vadd.s32 %v1234_v42, %v1232_v62  ;;  %v1187_v56 = vcvt.f32.s32 %v1186_v47  ;;  %v1315_v49 = vsel %vm397_vm2, %v2336_v50, -inf }
 0x595   :  { %1316 = vmax.xlane.f32.xlu1 %v1315_v49 }
 0x596   :  { %v1190_v0 = vadd.s32 %v1189_v46, %v1187_v56  ;;  %vm1299_vm5 = vcmp.eq.s32.totalorder %v2202_v19, %v1235_v55  ;;  %v1261_v6 = vpop.xlane.xlu1 %1260 }
 0x597   :  { %v2343_v60 = vsel %vm1299_vm5, -inf, %v2248_v13  ;;  %v1262_v10 = vcvt.f32.s32 %v1261_v6 }
 0x598   :  { %v1689_v8 = vrot.slane %v1190_v0, %v2237_v17  ;;  %v1216_v59 = vpop.xlane.xlu0 %1215  ;;  %v1321_v12 = vsel %vm397_vm2, %v2343_v60, -inf  ;;  %vm1296_vm8 = vcmp.eq.s32.totalorder %v2202_v19, %v1190_v0 }
 0x599   :  { %v1217_v4 = vcvt.f32.s32 %v1216_v59  ;;  %1322 = vmax.xlane.f32.xlu1 %v1321_v12  ;;  %v2350_v3 = vsel %vm1296_vm8, -inf, %v2257_v22  ;;  %v1265_v23 = vadd.s32 %v1264_v61, %v1262_v10  ;;  %v1702_v22 = vrot.slane %v1235_v55, %v2233_v54 }
 0x59a   :  { %v1694_v7 = vsel %vm1657_vm7, %v1693_v5, %v1689_v8  ;;  %v1312_v13 = vsel %vm397_vm2, %v2350_v3, -inf  ;;  %v1291_v20 = vpop.xlane.xlu1 %1290 }
 0x59b   :  { %v2357_v48 = vsel %vm1794_vm6, %v2254_v16, %v1694_v7  ;;  %v1220_v21 = vadd.s32 %v1219_v15, %v1217_v4  ;;  %1313 = vmax.xlane.f32.xlu0 %v1312_v13  ;;  %v1292_v25 = vcvt.f32.s32 %v1291_v20  ;;  %vm1301_vm9 = vcmp.eq.s32.totalorder %v2202_v19, %v1265_v23 }
 0x59c   :  { %v1246_v26 = vpop.xlane.xlu0 %1245  ;;  %v2364_v30 = vsel %vm1301_vm9, -inf, %v2270_v33  ;;  %v1711_v33 = vrot.slane %v1265_v23, %v2233_v54  ;;  %vm2010_vm9 = vmmov 0  }
 0x59d   :  { %v1698_v28 = vrot.slane %v1220_v21, %v2237_v17  ;;  %v1247_v29 = vcvt.f32.s32 %v1246_v26  ;;  %vm1298_vm10 = vcmp.eq.s32.totalorder %v2202_v19, %v1220_v21  ;;  %v1295_v16 = vadd.s32 %v1294_v38, %v1292_v25 }
 0x59e   :  { %v1327_v31 = vsel %vm397_vm2, %v2364_v30, -inf  ;;  %v2370_v27 = vsel %vm1298_vm10, -inf, %v2275_v36 }
 0x59f   :  { %v1703_v32 = vsel %vm1657_vm7, %v1702_v22, %v1698_v28  ;;  %v1250_v34 = vadd.s32 %v1249_v24, %v1247_v29  ;;  %1328 = vmax.xlane.f32.xlu1 %v1327_v31  ;;  %v1318_v35 = vsel %vm397_vm2, %v2370_v27, -inf  ;;  %vm1303_vm11 = vcmp.eq.s32.totalorder %v2202_v19, %v1295_v16 }
 0x5a0   :  { %v2378_v39 = vsel %vm1794_vm6, %v2267_v51, %v1703_v32  ;;  %1319 = vmax.xlane.f32.xlu0 %v1318_v35  ;;  %v1276_v40 = vpop.xlane.xlu0 %1275  ;;  %v2383_v41 = vsel %vm1303_vm11, -inf, %v2287_v44  ;;  %v1720_v44 = vrot.slane %v1295_v16, %v2233_v54 }
 0x5a1   :  { %v1707_v36 = vrot.slane %v1250_v34, %v2237_v17  ;;  %v1277_v42 = vcvt.f32.s32 %v1276_v40  ;;  %vm1300_vm12 = vcmp.eq.s32.totalorder %v2202_v19, %v1250_v34  ;;  %v1333_v62 = vsel %vm397_vm2, %v2383_v41, -inf }
 0x5a2   :  { %v2389_v47 = vsel %vm1300_vm12, -inf, %v2290_v45 }
 0x5a3   :  { %v1712_v51 = vsel %vm1657_vm7, %v1711_v33, %v1707_v36  ;;  %v1280_v46 = vadd.s32 %v1279_v37, %v1277_v42  ;;  %1334 = vmax.xlane.f32.xlu1 %v1333_v62  ;;  %v1324_v55 = vsel %vm397_vm2, %v2389_v47, -inf }
 0x5a4   :  { %v2396_v56 = vsel %vm1794_vm6, %v2284_v43, %v1712_v51  ;;  %1325 = vmax.xlane.f32.xlu0 %v1324_v55 }
 0x5a5   :  { %v1716_v49 = vrot.slane %v1280_v46, %v2237_v17  ;;  %vm1302_vm13 = vcmp.eq.s32.totalorder %v2202_v19, %v1280_v46 }
 0x5a6   :  { %v2402_v45 = vsel %vm1302_vm13, -inf, %v2300_v52 }
 0x5a7   :  { %v1721_v58 = vsel %vm1657_vm7, %v1720_v44, %v1716_v49  ;;  %v1330_v61 = vsel %vm397_vm2, %v2402_v45, -inf  ;;  %v2011_v44 = vmov 0.0   ;;  %v40_v49 = vld [vmem:[%s2709_s2] sm:$0xff] }
 0x5a8   :  { %v2409_v63 = vsel %vm1794_vm6, %v2303_v53, %v1721_v58  ;;  %1331 = vmax.xlane.f32.xlu0 %v1330_v61  ;;  %1910 = vmatprep.mubr.msk.f32.mxu0 %vm2010_vm9, %v2011_v44  ;;  %v42_v58 = vld [vmem:[%s2709_s2 + $0x10] sm:$0xff]  ;;  %v41_v61 = vld [vmem:[%s2709_s2 + $0x8] sm:$0xff] }
 0x5a9   :  { %1917 = vmatprep.mubr.msk.f32.mxu1 %vm2010_vm9, %v2011_v44 }
 0x622   :  { %v1317_v43 = vpop.xlane.xlu1 %1316 }
 0x623   :  { %vm1337_vm14 = vcmp.eq.f32.partialorder %v2336_v50, %v1317_v43  ;;  %v43_v43 = vld [vmem:[%s2709_s2 + $0x18] sm:$0xff] }
 0x624   :  { %v1345_v0 = vsel %vm1337_vm14, %v2202_v19, 16 }
 0x625   :  { %v2414_v2 = vsel %vm397_vm2, %v1345_v0, 2147483647 }
 0x626   :  { %v1323_v52 = vpop.xlane.xlu1 %1322  ;;  %v1369_v5 = vshra.s32 %v2414_v2, 16  ;;  %v1368_v0 = vand.u32 65535, %v2414_v2 }
 0x627   :  { %vm1339_vm15 = vcmp.eq.f32.partialorder %v2343_v60, %v1323_v52 }
 0x628   :  { %v1347_v6 = vsel %vm1339_vm15, %v2202_v19, 16  ;;  %v1314_v8 = vpop.xlane.xlu0 %1313  ;;  %v2419_v10 = vcvt.s32.f32 %v1369_v5  ;;  %v1370_v5 = vcvt.s32.f32 %v1368_v0 }
 0x629   :  { %v2422_v53 = vsel %vm397_vm2, %v1347_v6, 2147483647  ;;  %vm1336_vm0 = vcmp.eq.f32.partialorder %v2350_v3, %v1314_v8 }
 0x62a   :  { %v1344_v59 = vsel %vm1336_vm0, %v2202_v19, 16  ;;  %1372 = vmin.xlane.f32.xlu1 %v2419_v10  ;;  %v1399_v12 = vshra.s32 %v2422_v53, 16  ;;  %v1398_v6 = vand.u32 65535, %v2422_v53 }
 0x62b   :  { %v2429_v15 = vsel %vm397_vm2, %v1344_v59, 2147483647 }
 0x62c   :  { %v1329_v4 = vpop.xlane.xlu1 %1328  ;;  %v2431_v7 = vcvt.s32.f32 %v1399_v12  ;;  %v1354_v23 = vshra.s32 %v2429_v15, 16  ;;  %v1353_v59 = vand.u32 65535, %v2429_v15 }
 0x62d   :  { %vm1341_vm1 = vcmp.eq.f32.partialorder %v2364_v30, %v1329_v4  ;;  %v1320_v13 = vpop.xlane.xlu0 %1319  ;;  %v1400_v4 = vcvt.s32.f32 %v1398_v6 }
 0x62e   :  { %v1349_v38 = vsel %vm1341_vm1, %v2202_v19, 16  ;;  %vm1338_vm4 = vcmp.eq.f32.partialorder %v2370_v27, %v1320_v13  ;;  %1402 = vmin.xlane.f32.xlu1 %v2431_v7  ;;  %v2438_v24 = vcvt.s32.f32 %v1354_v23  ;;  %v1355_v13 = vcvt.s32.f32 %v1353_v59 }
 0x62f   :  { %v2441_v21 = vsel %vm397_vm2, %v1349_v38, 2147483647  ;;  %v1346_v20 = vsel %vm1338_vm4, %v2202_v19, 16 }
 0x630   :  { %v2445_v18 = vsel %vm397_vm2, %v1346_v20, 2147483647  ;;  %v1335_v22 = vpop.xlane.xlu1 %1334  ;;  %1357 = vmin.xlane.f32.xlu0 %v2438_v24  ;;  %v1429_v25 = vshra.s32 %v2441_v21, 16  ;;  %v1428_v38 = vand.u32 65535, %v2441_v21 }
 0x631   :  { %vm1343_vm5 = vcmp.eq.f32.partialorder %v2383_v41, %v1335_v22  ;;  %v1326_v26 = vpop.xlane.xlu0 %1325  ;;  %v1384_v28 = vshra.s32 %v2445_v18, 16 }
 0x632   :  { %v1351_v29 = vsel %vm1343_vm5, %v2202_v19, 16  ;;  %vm1340_vm6 = vcmp.eq.f32.partialorder %v2389_v47, %v1326_v26  ;;  %v1431_v16 = vcvt.s32.f32 %v1429_v25  ;;  %v1430_v20 = vcvt.s32.f32 %v1428_v38 }
 0x633   :  { %v2454_v31 = vsel %vm397_vm2, %v1351_v29, 2147483647  ;;  %v1348_v32 = vsel %vm1340_vm6, %v2202_v19, 16  ;;  %v1386_v34 = vcvt.s32.f32 %v1384_v28  ;;  %vm1799_vm5 = vcmask 1041408  }
 0x634   :  { %v2458_v35 = vsel %vm397_vm2, %v1348_v32, 2147483647  ;;  %1432 = vmin.xlane.f32.xlu1 %v1431_v16  ;;  %v1459_v37 = vshra.s32 %v2454_v31, 16  ;;  %v1458_v22 = vand.u32 65535, %v2454_v31 }
 0x635   :  { %1387 = vmin.xlane.f32.xlu0 %v1386_v34  ;;  %v1332_v33 = vpop.xlane.xlu0 %1331  ;;  %v1414_v40 = vshra.s32 %v2458_v35, 16  ;;  %v1413_v21 = vand.u32 65535, %v2458_v35 }
 0x636   :  { %vm1342_vm8 = vcmp.eq.f32.partialorder %v2402_v45, %v1332_v33  ;;  %v1461_v36 = vcvt.s32.f32 %v1459_v37  ;;  %v1460_v28 = vcvt.s32.f32 %v1458_v22 }
 0x637   :  { %v1350_v42 = vsel %vm1342_vm8, %v2202_v19, 16  ;;  %v1416_v62 = vcvt.s32.f32 %v1414_v40  ;;  %v1415_v31 = vcvt.s32.f32 %v1413_v21 }
 0x638   :  { %v2465_v51 = vsel %vm397_vm2, %v1350_v42, 2147483647  ;;  %1462 = vmin.xlane.f32.xlu1 %v1461_v36 }
 0x639   :  { %1417 = vmin.xlane.f32.xlu0 %v1416_v62  ;;  %v1444_v46 = vshra.s32 %v2465_v51, 16  ;;  %v1443_v32 = vand.u32 65535, %v2465_v51 }
 0x63b   :  { %v1446_v55 = vcvt.s32.f32 %v1444_v46  ;;  %v1445_v37 = vcvt.s32.f32 %v1443_v32 }
 0x63d   :  { %1447 = vmin.xlane.f32.xlu0 %v1446_v55 }
 0x66a   :  { %510 = vxpose.xlu0.b32.start [1/2] (short) (narrow) %v40_v49, 8 }
 0x66b   :  { %621 = vxpose.xlu1.b32.start [1/2] (short) (narrow) %v42_v58, 8 }
 0x66e   :  { %511 = vxpose.xlu0.b32.end [2/2] (short) (narrow) %v41_v61, 8 }
 0x66f   :  { %622 = vxpose.xlu1.b32.end [2/2] (short) (narrow) %v43_v43, 8 }
 0x6b7   :  { %v2485_v52 = vpop.xlane.xlu1 %1372 }
 0x6b8   :  { %vm1374_vm10 = vcmp.eq.f32.partialorder %v2419_v10, %v2485_v52  ;;  %v1383_v10 = vand.u32 65535, %v2445_v18 }
 0x6b9   :  { %v1375_v8 = vsel %vm1374_vm10, %v1370_v5, inf }
 0x6ba   :  { %1376 = vmin.xlane.f32.xlu1 %v1375_v8  ;;  %v1385_v25 = vcvt.s32.f32 %v1383_v10 }
 0x6bb   :  { %v2491_v12 = vpop.xlane.xlu1 %1402 }
 0x6bc   :  { %vm1404_vm11 = vcmp.eq.f32.partialorder %v2431_v7, %v2491_v12 }
 0x6bd   :  { %v2495_v23 = vpop.xlane.xlu0 %1357  ;;  %v1405_v2 = vsel %vm1404_vm11, %v1400_v4, inf }
 0x6be   :  { %1406 = vmin.xlane.f32.xlu1 %v1405_v2  ;;  %vm1359_vm12 = vcmp.eq.f32.partialorder %v2438_v24, %v2495_v23  ;;  %v1364_v49 = vcvt.f32.s32 %v2495_v23 }
 0x6bf   :  { %v1360_v53 = vsel %vm1359_vm12, %v1355_v13, inf }
 0x6c0   :  { %1361 = vmin.xlane.f32.xlu0 %v1360_v53 }
 0x6c1   :  { %v2501_v15 = vpop.xlane.xlu1 %1432 }
 0x6c2   :  { %v2504_v7 = vpop.xlane.xlu0 %1387  ;;  %vm1434_vm13 = vcmp.eq.f32.partialorder %v1431_v16, %v2501_v15  ;;  %v1439_v0 = vcvt.f32.s32 %v2501_v15 }
 0x6c3   :  { %v1435_v26 = vsel %vm1434_vm13, %v1430_v20, inf  ;;  %vm1389_vm14 = vcmp.eq.f32.partialorder %v1386_v34, %v2504_v7  ;;  %v1394_v23 = vcvt.f32.s32 %v2504_v7 }
 0x6c4   :  { %1436 = vmin.xlane.f32.xlu1 %v1435_v26  ;;  %v1390_v24 = vsel %vm1389_vm14, %v1385_v25, inf  ;;  %v1440_v2 = vshll.u32 %v1439_v0, 16 }
 0x6c5   :  { %1391 = vmin.xlane.f32.xlu0 %v1390_v24  ;;  %v2509_v18 = vpop.xlane.xlu1 %1462  ;;  %v1395_v21 = vshll.u32 %v1394_v23, 16 }
 0x6c6   :  { %v2511_v29 = vpop.xlane.xlu0 %1417  ;;  %vm1464_vm15 = vcmp.eq.f32.partialorder %v1461_v36, %v2509_v18  ;;  %v1967_v36 = vpack.c.bf16 %v2172_v1, %v2184_v9  ;;  %v44_v1 = vld [vmem:[%s2709_s2 + $0x20] sm:$0xff]  ;;  %v46_v9 = vld [vmem:[%s2709_s2 + $0x30] sm:$0xff]  ;;  %v1469_v13 = vcvt.f32.s32 %v2509_v18 }
 0x6c7   :  { %v1465_v16 = vsel %vm1464_vm15, %v1460_v28, inf  ;;  %vm1419_vm0 = vcmp.eq.f32.partialorder %v1416_v62, %v2511_v29  ;;  %v1971_v62 = vpack.c.bf16 %v2187_v11, %v2197_v14  ;;  %v47_v11 = vld [vmem:[%s2709_s2 + $0x38] sm:$0xff]  ;;  %v1379_v14 = vcvt.f32.s32 %v2485_v52 }
 0x6c8   :  { %1466 = vmin.xlane.f32.xlu1 %v1465_v16  ;;  %v1420_v35 = vsel %vm1419_vm0, %v1415_v31, inf  ;;  %v1365_v52 = vshll.u32 %v1364_v49, 16  ;;  %v1424_v10 = vcvt.f32.s32 %v2511_v29  ;;  %v1470_v29 = vshll.u32 %v1469_v13, 16 }
 0x6c9   :  { %1421 = vmin.xlane.f32.xlu0 %v1420_v35  ;;  %v1380_v46 = vshll.u32 %v1379_v14, 16 }
 0x6ca   :  { %v2516_v34 = vpop.xlane.xlu0 %1447  ;;  %v1425_v31 = vshll.u32 %v1424_v10, 16 }
 0x6cb   :  { %vm1449_vm1 = vcmp.eq.f32.partialorder %v1446_v55, %v2516_v34  ;;  %v1409_v55 = vcvt.f32.s32 %v2491_v12 }
 0x6cc   :  { %v1450_v33 = vsel %vm1449_vm1, %v1445_v37, inf  ;;  %v1454_v37 = vcvt.f32.s32 %v2516_v34 }
 0x6cd   :  { %1451 = vmin.xlane.f32.xlu0 %v1450_v33  ;;  %v1410_v43 = vshll.u32 %v1409_v55, 16 }
 0x6ce   :  { %v1455_v14 = vshll.u32 %v1454_v37, 16 }
 0x6ea   :  { %v526_v40 = vpop.trf.xlu0 }
 0x6eb   :  { %1911 = vmatmul.mubr.msk.f32.vlgmr.msra.gmra.mrb[4].mxu0 %vm397_vm2, %v526_v40  ;;  %v637_v42 = vpop.trf.xlu1 }
 0x6ec   :  { %1969 = vmatpush3.bf16.xpose.msk.msra.mxu0 %vm2160_vm3, %v1967_v36  ;;  %1918 = vmatmul.mubr.msk.f32.vlgmr.msra.gmra.mrb[4].mxu1 %vm397_vm2, %v637_v42 }
 0x6ed   :  { %1973 = vmatpush3.bf16.xpose.msk.msra.mxu1 %vm2160_vm3, %v1971_v62  ;;  %1924 = vmatprep.mubr.msk.f32.mxu0 %vm2010_vm9, %v2011_v44 }
 0x6ee   :  { %1931 = vmatprep.mubr.msk.f32.mxu1 %vm2010_vm9, %v2011_v44 }
 0x6fa   :  { %732 = vxpose.xlu0.b32.start [1/2] (short) (narrow) %v44_v1, 8 }
 0x6fb   :  { %843 = vxpose.xlu1.b32.start [1/2] (short) (narrow) %v46_v9, 8 }
 0x6fe   :  { %733 = vxpose.xlu0.b32.end [2/2] (short) (narrow) %v45_v57, 8 }
 0x6ff   :  { %844 = vxpose.xlu1.b32.end [2/2] (short) (narrow) %v47_v11, 8 }
 0x747   :  { %v1377_v51 = vpop.xlane.xlu1 %1376 }
 0x748   :  { %v1378_v44 = vcvt.f32.s32 %v1377_v51 }
 0x74a   :  { %v1381_v58 = vadd.s32 %v1380_v46, %v1378_v44 }
 0x74b   :  { %v1407_v61 = vpop.xlane.xlu1 %1406 }
 0x74c   :  { %v1408_v5 = vcvt.f32.s32 %v1407_v61  ;;  %vm1473_vm3 = vcmp.eq.s32.totalorder %v2202_v19, %v1381_v58 }
 0x74d   :  { %v1362_v6 = vpop.xlane.xlu0 %1361  ;;  %v2551_v8 = vsel %vm1473_vm3, -inf, %v2336_v50  ;;  %v1729_v50 = vrot.slane %v1381_v58, %v2233_v54 }
 0x74e   :  { %v1411_v59 = vadd.s32 %v1410_v43, %v1408_v5  ;;  %v1363_v4 = vcvt.f32.s32 %v1362_v6  ;;  %v1491_v12 = vsel %vm397_vm2, %v2551_v8, -inf }
 0x74f   :  { %1492 = vmax.xlane.f32.xlu1 %v1491_v12 }
 0x750   :  { %v1366_v38 = vadd.s32 %v1365_v52, %v1363_v4  ;;  %vm1475_vm4 = vcmp.eq.s32.totalorder %v2202_v19, %v1411_v59 }
 0x751   :  { %v1437_v53 = vpop.xlane.xlu1 %1436  ;;  %v2561_v15 = vsel %vm1475_vm4, -inf, %v2343_v60 }
 0x752   :  { %v1725_v20 = vrot.slane %v1366_v38, %v2237_v17  ;;  %v1438_v22 = vcvt.f32.s32 %v1437_v53  ;;  %v1392_v7 = vpop.xlane.xlu0 %1391  ;;  %v1497_v25 = vsel %vm397_vm2, %v2561_v15, -inf  ;;  %vm1472_vm6 = vcmp.eq.s32.totalorder %v2202_v19, %v1366_v38 }
 0x753   :  { %v1393_v26 = vcvt.f32.s32 %v1392_v7  ;;  %1498 = vmax.xlane.f32.xlu1 %v1497_v25  ;;  %v2568_v24 = vsel %vm1472_vm6, -inf, %v2350_v3  ;;  %v1738_v3 = vrot.slane %v1411_v59, %v2233_v54 }
 0x754   :  { %v1730_v18 = vsel %vm1657_vm7, %v1729_v50, %v1725_v20  ;;  %v1441_v28 = vadd.s32 %v1440_v2, %v1438_v22  ;;  %v1488_v60 = vsel %vm397_vm2, %v2568_v24, -inf }
 0x755   :  { %v2575_v32 = vsel %vm1799_vm5, %v2357_v48, %v1730_v18  ;;  %v1396_v16 = vadd.s32 %v1395_v21, %v1393_v26  ;;  %v1467_v35 = vpop.xlane.xlu1 %1466  ;;  %1489 = vmax.xlane.f32.xlu0 %v1488_v60 }
 0x756   :  { %v1468_v33 = vcvt.f32.s32 %v1467_v35  ;;  %v1422_v40 = vpop.xlane.xlu0 %1421  ;;  %vm1477_vm8 = vcmp.eq.s32.totalorder %v2202_v19, %v1441_v28 }
 0x757   :  { %v1734_v36 = vrot.slane %v1396_v16, %v2237_v17  ;;  %v1423_v42 = vcvt.f32.s32 %v1422_v40  ;;  %v2582_v62 = vsel %vm1477_vm8, -inf, %v2364_v30  ;;  %vm1474_vm9 = vcmp.eq.s32.totalorder %v2202_v19, %v1396_v16 }
 0x758   :  { %v1471_v48 = vadd.s32 %v1470_v29, %v1468_v33  ;;  %v1503_v1 = vsel %vm397_vm2, %v2582_v62, -inf  ;;  %v2588_v34 = vsel %vm1474_vm9, -inf, %v2370_v27  ;;  %v1747_v30 = vrot.slane %v1441_v28, %v2233_v54 }
 0x759   :  { %v1739_v9 = vsel %vm1657_vm7, %v1738_v3, %v1734_v36  ;;  %v1426_v57 = vadd.s32 %v1425_v31, %v1423_v42  ;;  %1504 = vmax.xlane.f32.xlu1 %v1503_v1  ;;  %v1494_v11 = vsel %vm397_vm2, %v2588_v34, -inf }
 0x75a   :  { %v2596_v51 = vsel %vm1799_vm5, %v2378_v39, %v1739_v9  ;;  %1495 = vmax.xlane.f32.xlu0 %v1494_v11  ;;  %v1452_v46 = vpop.xlane.xlu0 %1451  ;;  %vm1479_vm10 = vcmp.eq.s32.totalorder %v2202_v19, %v1471_v48 }
 0x75b   :  { %v1743_v27 = vrot.slane %v1426_v57, %v2237_v17  ;;  %v1453_v55 = vcvt.f32.s32 %v1452_v46  ;;  %v2601_v44 = vsel %vm1479_vm10, -inf, %v2383_v41  ;;  %vm1476_vm11 = vcmp.eq.s32.totalorder %v2202_v19, %v1426_v57 }
 0x75c   :  { %v1509_v49 = vsel %vm397_vm2, %v2601_v44, -inf  ;;  %v2607_v58 = vsel %vm1476_vm11, -inf, %v2389_v47  ;;  %v1756_v41 = vrot.slane %v1471_v48, %v2233_v54 }
 0x75d   :  { %v1748_v39 = vsel %vm1657_vm7, %v1747_v30, %v1743_v27  ;;  %v1456_v61 = vadd.s32 %v1455_v14, %v1453_v55  ;;  %1510 = vmax.xlane.f32.xlu1 %v1509_v49  ;;  %v1500_v43 = vsel %vm397_vm2, %v2607_v58, -inf }
 0x75e   :  { %v2614_v0 = vsel %vm1799_vm5, %v2396_v56, %v1748_v39  ;;  %1501 = vmax.xlane.f32.xlu0 %v1500_v43 }
 0x75f   :  { %v1752_v5 = vrot.slane %v1456_v61, %v2237_v17  ;;  %vm1478_vm12 = vcmp.eq.s32.totalorder %v2202_v19, %v1456_v61 }
 0x760   :  { %v2620_v47 = vsel %vm1478_vm12, -inf, %v2402_v45 }
 0x761   :  { %v1757_v6 = vsel %vm1657_vm7, %v1756_v41, %v1752_v5  ;;  %v1506_v52 = vsel %vm397_vm2, %v2620_v47, -inf }
 0x762   :  { %v2627_v59 = vsel %vm1799_vm5, %v2409_v63, %v1757_v6  ;;  %1507 = vmax.xlane.f32.xlu0 %v1506_v52 }
 0x77a   :  { %v748_v56 = vpop.trf.xlu0 }
 0x77b   :  { %v859_v4 = vpop.trf.xlu1  ;;  %1925 = vmatmul.mubr.msk.f32.vlgmr.msra.gmra.mrb[6].mxu0 %vm397_vm2, %v748_v56 }
 0x77c   :  { %1932 = vmatmul.mubr.msk.f32.vlgmr.msra.gmra.mrb[6].mxu1 %vm397_vm2, %v859_v4 }
 0x7be   :  { %v617_v12 = vpop.f32.mrb[4].mxu0 }
 0x7bf   :  { %954 = vst.msk [vmem:[%s2710_s3] sm:$0xff] %vm397_vm2, %v617_v12  ;;  %v728_v45 = vpop.f32.mrb[4].mxu1  ;;  %v1912_v23 = vpop.f32.mrb[5].mxu0 }
 0x7c0   :  { %955 = vst.msk [vmem:[%s2710_s3 + $0x8] sm:$0xff] %vm397_vm2, %v728_v45  ;;  %v1919_v63 = vpop.f32.mrb[5].mxu1 }
 0x7dc   :  { %v1493_v2 = vpop.xlane.xlu1 %1492 }
 0x7dd   :  { %vm1513_vm13 = vcmp.eq.f32.partialorder %v2551_v8, %v1493_v2 }
 0x7de   :  { %v1521_v13 = vsel %vm1513_vm13, %v2202_v19, 16 }
 0x7df   :  { %v1543_v38 = vsel %vm397_vm2, %v1521_v13, 2147483647 }
 0x7e0   :  { %v1545_v10 = vshra.s32 %v1543_v38, 16  ;;  %v1499_v50 = vpop.xlane.xlu1 %1498  ;;  %v1544_v39 = vand.u32 65535, %v1543_v38 }
 0x7e1   :  { %vm1515_vm14 = vcmp.eq.f32.partialorder %v2561_v15, %v1499_v50 }
 0x7e2   :  { %v1523_v53 = vsel %vm1515_vm14, %v2202_v19, 16  ;;  %v1490_v20 = vpop.xlane.xlu0 %1489  ;;  %v1547_v22 = vcvt.s32.f32 %v1545_v10  ;;  %v1546_v41 = vcvt.s32.f32 %v1544_v39  ;;  %vm1804_vm14 = vcmask 1042432  }
 0x7e3   :  { %v1573_v7 = vsel %vm397_vm2, %v1523_v53, 2147483647  ;;  %vm1512_vm15 = vcmp.eq.f32.partialorder %v2568_v24, %v1490_v20 }
 0x7e4   :  { %v1575_v25 = vshra.s32 %v1573_v7, 16  ;;  %v1520_v21 = vsel %vm1512_vm15, %v2202_v19, 16  ;;  %1548 = vmin.xlane.f32.xlu1 %v1547_v22  ;;  %v1574_v61 = vand.u32 65535, %v1573_v7  ;;  %vm1809_vm15 = vcmask 125952  }
 0x7e5   :  { %v1528_v8 = vsel %vm397_vm2, %v1520_v21, 2147483647 }
 0x7e6   :  { %v1530_v26 = vshra.s32 %v1528_v8, 16  ;;  %v1505_v18 = vpop.xlane.xlu1 %1504  ;;  %v1577_v28 = vcvt.s32.f32 %v1575_v25  ;;  %v1529_v5 = vand.u32 65535, %v1528_v8  ;;  %v1576_v52 = vcvt.s32.f32 %v1574_v61 }
 0x7e7   :  { %vm1517_vm0 = vcmp.eq.f32.partialorder %v2582_v62, %v1505_v18  ;;  %v1496_v15 = vpop.xlane.xlu0 %1495 }
 0x7e8   :  { %v1525_v60 = vsel %vm1517_vm0, %v2202_v19, 16  ;;  %vm1514_vm1 = vcmp.eq.f32.partialorder %v2588_v34, %v1496_v15  ;;  %1578 = vmin.xlane.f32.xlu1 %v1577_v28  ;;  %v1532_v29 = vcvt.s32.f32 %v1530_v26  ;;  %v1531_v45 = vcvt.s32.f32 %v1529_v5 }
 0x7e9   :  { %v1603_v24 = vsel %vm397_vm2, %v1525_v60, 2147483647  ;;  %v1522_v31 = vsel %vm1514_vm1, %v2202_v19, 16 }
 0x7ea   :  { %v1605_v16 = vshra.s32 %v1603_v24, 16  ;;  %v1558_v35 = vsel %vm397_vm2, %v1522_v31, 2147483647  ;;  %v1511_v37 = vpop.xlane.xlu1 %1510  ;;  %1533 = vmin.xlane.f32.xlu0 %v1532_v29  ;;  %v1604_v56 = vand.u32 65535, %v1603_v24 }
 0x7eb   :  { %v1560_v3 = vshra.s32 %v1558_v35, 16  ;;  %vm1519_vm3 = vcmp.eq.f32.partialorder %v2601_v44, %v1511_v37  ;;  %v1502_v33 = vpop.xlane.xlu0 %1501  ;;  %v1559_v23 = vand.u32 65535, %v1558_v35 }
 0x7ec   :  { %v1527_v40 = vsel %vm1519_vm3, %v2202_v19, 16  ;;  %vm1516_vm4 = vcmp.eq.f32.partialorder %v2607_v58, %v1502_v33  ;;  %v1607_v36 = vcvt.s32.f32 %v1605_v16  ;;  %v1606_v38 = vcvt.s32.f32 %v1604_v56 }
 0x7ed   :  { %v1633_v42 = vsel %vm397_vm2, %v1527_v40, 2147483647  ;;  %v1524_v62 = vsel %vm1516_vm4, %v2202_v19, 16  ;;  %v1562_v48 = vcvt.s32.f32 %v1560_v3  ;;  %v1561_v53 = vcvt.s32.f32 %v1559_v23 }
 0x7ee   :  { %v1635_v1 = vshra.s32 %v1633_v42, 16  ;;  %v1588_v34 = vsel %vm397_vm2, %v1524_v62, 2147483647  ;;  %1608 = vmin.xlane.f32.xlu1 %v1607_v36  ;;  %v1634_v2 = vand.u32 65535, %v1633_v42 }
 0x7ef   :  { %v1590_v9 = vshra.s32 %v1588_v34, 16  ;;  %1563 = vmin.xlane.f32.xlu0 %v1562_v48  ;;  %v1508_v57 = vpop.xlane.xlu0 %1507  ;;  %v1589_v10 = vand.u32 65535, %v1588_v34 }
 0x7f0   :  { %vm1518_vm5 = vcmp.eq.f32.partialorder %v2620_v47, %v1508_v57  ;;  %v1637_v11 = vcvt.s32.f32 %v1635_v1  ;;  %v1636_v25 = vcvt.s32.f32 %v1634_v2 }
 0x7f1   :  { %v1526_v14 = vsel %vm1518_vm5, %v2202_v19, 16  ;;  %v1592_v30 = vcvt.s32.f32 %v1590_v9  ;;  %v1591_v26 = vcvt.s32.f32 %v1589_v10 }
 0x7f2   :  { %v1618_v46 = vsel %vm397_vm2, %v1526_v14, 2147483647  ;;  %1638 = vmin.xlane.f32.xlu1 %v1637_v11 }
 0x7f3   :  { %v1620_v27 = vshra.s32 %v1618_v46, 16  ;;  %1593 = vmin.xlane.f32.xlu0 %v1592_v30  ;;  %v1619_v21 = vand.u32 65535, %v1618_v46 }
 0x7f5   :  { %v1622_v55 = vcvt.s32.f32 %v1620_v27  ;;  %v1621_v60 = vcvt.s32.f32 %v1619_v21 }
 0x7f7   :  { %1623 = vmin.xlane.f32.xlu0 %v1622_v55 }
 0x84e   :  { %v839_v44 = vpop.f32.mrb[6].mxu0 }
 0x84f   :  { %956 = vst.msk [vmem:[%s2710_s3 + $0x10] sm:$0xff] %vm397_vm2, %v839_v44  ;;  %v950_v49 = vpop.f32.mrb[6].mxu1  ;;  %v1926_v58 = vpop.f32.mrb[7].mxu0 }
 0x850   :  { %957 = vst.msk [vmem:[%s2710_s3 + $0x18] sm:$0xff] %vm397_vm2, %v950_v49  ;;  %v1933_v19 = vpop.f32.mrb[7].mxu1 }
 0x871   :  { %v1549_v43 = vpop.xlane.xlu1 %1548 }
 0x872   :  { %vm1550_vm6 = vcmp.eq.f32.partialorder %v1547_v22, %v1549_v43  ;;  %v1555_v31 = vcvt.f32.s32 %v1549_v43 }
 0x873   :  { %v1551_v47 = vsel %vm1550_vm6, %v1546_v41, inf }
 0x874   :  { %1552 = vmin.xlane.f32.xlu1 %v1551_v47  ;;  %v1556_v3 = vshll.u32 %v1555_v31, 16 }
 0x875   :  { %v1579_v6 = vpop.xlane.xlu1 %1578 }
 0x876   :  { %vm1580_vm8 = vcmp.eq.f32.partialorder %v1577_v28, %v1579_v6  ;;  %v1585_v33 = vcvt.f32.s32 %v1579_v6 }
 0x877   :  { %v1534_v4 = vpop.xlane.xlu0 %1533  ;;  %v1581_v12 = vsel %vm1580_vm8, %v1576_v52, inf }
 0x878   :  { %vm1535_vm9 = vcmp.eq.f32.partialorder %v1532_v29, %v1534_v4  ;;  %1582 = vmin.xlane.f32.xlu1 %v1581_v12  ;;  %v1540_v16 = vcvt.f32.s32 %v1534_v4  ;;  %v1586_v34 = vshll.u32 %v1585_v33, 16 }
 0x879   :  { %v1536_v63 = vsel %vm1535_vm9, %v1531_v45, inf }
 0x87a   :  { %1537 = vmin.xlane.f32.xlu0 %v1536_v63 }
 0x87b   :  { %v1609_v13 = vpop.xlane.xlu1 %1608 }
 0x87c   :  { %vm1610_vm2 = vcmp.eq.f32.partialorder %v1607_v36, %v1609_v13  ;;  %v1564_v50 = vpop.xlane.xlu0 %1563  ;;  %v1541_v36 = vshll.u32 %v1540_v16, 16  ;;  %v1615_v57 = vcvt.f32.s32 %v1609_v13 }
 0x87d   :  { %vm1565_vm10 = vcmp.eq.f32.partialorder %v1562_v48, %v1564_v50  ;;  %v1611_v20 = vsel %vm1610_vm2, %v1606_v38, inf  ;;  %v1570_v1 = vcvt.f32.s32 %v1564_v50 }
 0x87e   :  { %1612 = vmin.xlane.f32.xlu1 %v1611_v20  ;;  %v1566_v22 = vsel %vm1565_vm10, %v1561_v53, inf  ;;  %v1616_v39 = vshll.u32 %v1615_v57, 16 }
 0x87f   :  { %1567 = vmin.xlane.f32.xlu0 %v1566_v22  ;;  %v1639_v7 = vpop.xlane.xlu1 %1638  ;;  %v1571_v44 = vshll.u32 %v1570_v1, 16 }
 0x880   :  { %vm1640_vm11 = vcmp.eq.f32.partialorder %v1637_v11, %v1639_v7  ;;  %v1594_v8 = vpop.xlane.xlu0 %1593  ;;  %v1645_v61 = vcvt.f32.s32 %v1639_v7 }
 0x881   :  { %vm1595_vm12 = vcmp.eq.f32.partialorder %v1592_v30, %v1594_v8  ;;  %v1641_v18 = vsel %vm1640_vm11, %v1636_v25, inf  ;;  %v1600_v11 = vcvt.f32.s32 %v1594_v8 }
 0x882   :  { %1642 = vmin.xlane.f32.xlu1 %v1641_v18  ;;  %v1596_v28 = vsel %vm1595_vm12, %v1591_v26, inf  ;;  %v1646_v63 = vshll.u32 %v1645_v61, 16 }
 0x883   :  { %1597 = vmin.xlane.f32.xlu0 %v1596_v28  ;;  %v1601_v47 = vshll.u32 %v1600_v11, 16 }
 0x884   :  { %v1624_v15 = vpop.xlane.xlu0 %1623 }
 0x885   :  { %vm1625_vm13 = vcmp.eq.f32.partialorder %v1622_v55, %v1624_v15  ;;  %v1630_v6 = vcvt.f32.s32 %v1624_v15 }
 0x886   :  { %v1626_v29 = vsel %vm1625_vm13, %v1621_v60, inf }
 0x887   :  { %1627 = vmin.xlane.f32.xlu0 %v1626_v29  ;;  %v1631_v13 = vshll.u32 %v1630_v6, 16 }
 0x901   :  { %v1553_v24 = vpop.xlane.xlu1 %1552 }
 0x902   :  { %v1554_v35 = vcvt.f32.s32 %v1553_v24 }
 0x904   :  { %v1557_v42 = vadd.s32 %v1556_v3, %v1554_v35 }
 0x905   :  { %v1583_v37 = vpop.xlane.xlu1 %1582 }
 0x906   :  { %v1584_v62 = vcvt.f32.s32 %v1583_v37  ;;  %v1765_v30 = vrot.slane %v1557_v42, %v2233_v54 }
 0x907   :  { %v1538_v40 = vpop.xlane.xlu0 %1537 }
 0x908   :  { %v1539_v48 = vcvt.f32.s32 %v1538_v40  ;;  %v1587_v46 = vadd.s32 %v1586_v34, %v1584_v62 }
 0x90a   :  { %v1542_v9 = vadd.s32 %v1541_v36, %v1539_v48  ;;  %v1774_v52 = vrot.slane %v1587_v46, %v2233_v54 }
 0x90b   :  { %v1613_v14 = vpop.xlane.xlu1 %1612 }
 0x90c   :  { %v1761_v27 = vrot.slane %v1542_v9, %v2237_v17  ;;  %v1568_v55 = vpop.xlane.xlu0 %1567  ;;  %v1614_v49 = vcvt.f32.s32 %v1613_v14 }
 0x90d   :  { %v1569_v58 = vcvt.f32.s32 %v1568_v55 }
 0x90e   :  { %v1766_v19 = vsel %vm1657_vm7, %v1765_v30, %v1761_v27  ;;  %v1617_v4 = vadd.s32 %v1616_v39, %v1614_v49 }
 0x90f   :  { %v1805_v43 = vsel %vm1804_vm14, %v2575_v32, %v1766_v19  ;;  %v1572_v41 = vadd.s32 %v1571_v44, %v1569_v58  ;;  %v1643_v5 = vpop.xlane.xlu1 %1642 }
 0x910   :  { %1810 = vst.msk [vmem:[%s2711_s4] sm:$0xf] %vm1809_vm15, %v1805_v43  ;;  %v1598_v56 = vpop.xlane.xlu0 %1597  ;;  %v1644_v45 = vcvt.f32.s32 %v1643_v5  ;;  %v1783_v50 = vrot.slane %v1617_v4, %v2233_v54 }
 0x911   :  { %v1770_v12 = vrot.slane %v1572_v41, %v2237_v17  ;;  %v1599_v23 = vcvt.f32.s32 %v1598_v56 }
 0x912   :  { %v1647_v53 = vadd.s32 %v1646_v63, %v1644_v45 }
 0x913   :  { %v1775_v32 = vsel %vm1657_vm7, %v1774_v52, %v1770_v12  ;;  %v1602_v2 = vadd.s32 %v1601_v47, %v1599_v23 }
 0x914   :  { %v1806_v38 = vsel %vm1804_vm14, %v2596_v51, %v1775_v32  ;;  %v1628_v10 = vpop.xlane.xlu0 %1627  ;;  %v1792_v51 = vrot.slane %v1647_v53, %v2233_v54 }
 0x915   :  { %1811 = vst.msk [vmem:[%s2711_s4 + $0x4] sm:$0xf] %vm1809_vm15, %v1806_v38  ;;  %v1779_v20 = vrot.slane %v1602_v2, %v2237_v17  ;;  %v1629_v22 = vcvt.f32.s32 %v1628_v10 }
 0x917   :  { %v1784_v7 = vsel %vm1657_vm7, %v1783_v50, %v1779_v20  ;;  %v1632_v25 = vadd.s32 %v1631_v13, %v1629_v22 }
 0x918   :  { %v1807_v21 = vsel %vm1804_vm14, %v2614_v0, %v1784_v7 }
 0x919   :  { %1812 = vst.msk [vmem:[%s2711_s4 + $0x8] sm:$0xf] %vm1809_vm15, %v1807_v21  ;;  %v1788_v8 = vrot.slane %v1632_v25, %v2237_v17 }
 0x91b   :  { %v1793_v26 = vsel %vm1657_vm7, %v1792_v51, %v1788_v8 }
 0x91c   :  { %v1808_v18 = vsel %vm1804_vm14, %v2627_v59, %v1793_v26 }
 0x91d   :  { %1813 = vst.msk [vmem:[%s2711_s4 + $0xc] sm:$0xf] %vm1809_vm15, %v1808_v18 }

// kernel: qtattb_forward.4
= control target key start
LH: loop header
LB: loop body
LE: loop exit
PB: predicated region body
PF: predicated region fallthrough
CT: control target
= control target key end

     0   :  { %v1569_v0 = vmov 1966171168   ;;  %v68_v5 = vlaneseq  ;;  %vm544_vm0 = vcmask 523264   ;;  %s2337_s0 = inlined_call_operand.vmem [shape: f32[8,4,64], index: 0, kind: input, shape index: {}]   ;;  %s2338_s1 = inlined_call_operand.vmem [shape: f32[8,16,64], index: 1, kind: input, shape index: {}]   ;;  %s2339_s2 = inlined_call_operand.vmem [shape: f32[16,8,64], index: 2, kind: input, shape index: {}]   ;;  %s2340_s3 = inlined_call_operand.vmem [shape: f32[4,8,64], index: 3, kind: output, shape index: {0}]   ;;  %s2341_s4 = inlined_call_operand.vmem [shape: s32[4,4,64], index: 4, kind: output, shape index: {1}]  }
   0x1   :  { %v66_v1 = vunpack.c.l.s4 %v1569_v0  ;;  %v16_v2 = vld [vmem:[%s2337_s0] sm:$0xf]  ;;  %v17_v3 = vld [vmem:[%s2337_s0 + $0x4] sm:$0xf]  ;;  %v18_v4 = vld [vmem:[%s2337_s0 + $0x8] sm:$0xf] }
   0x2   :  { %v19_v6 = vld [vmem:[%s2337_s0 + $0xc] sm:$0xf]  ;;  %v20_v7 = vld [vmem:[%s2337_s0 + $0x10] sm:$0xf]  ;;  %v21_v8 = vld [vmem:[%s2337_s0 + $0x14] sm:$0xf] }
   0x3   :  { %v22_v9 = vld [vmem:[%s2337_s0 + $0x18] sm:$0xf]  ;;  %v23_v10 = vld [vmem:[%s2337_s0 + $0x1c] sm:$0xf]  ;;  %v67_v11 = vunpack.c.0.s8 %v66_v1  ;;  %v24_v12 = vmul.f32 0.35355338, %v16_v2 }
   0x4   :  { %v25_v13 = vmul.f32 0.35355338, %v17_v3  ;;  %v26_v14 = vmul.f32 0.35355338, %v18_v4  ;;  %v27_v15 = vmul.f32 0.35355338, %v19_v6 }
   0x5   :  { %v28_v16 = vmul.f32 0.35355338, %v20_v7  ;;  %v1619_v17 = vshrl.u32 %v68_v5, 7  ;;  %v29_v18 = vmul.f32 0.35355338, %v21_v8  ;;  %v32_v35 = vld [vmem:[%s2338_s1] sm:$0xff] }
   0x6   :  { %v30_v19 = vmul.f32 0.35355338, %v22_v9  ;;  %v31_v20 = vmul.f32 0.35355338, %v23_v10  ;;  %v33_v40 = vld [vmem:[%s2338_s1 + $0x8] sm:$0xff]  ;;  %v34_v49 = vld [vmem:[%s2338_s1 + $0x10] sm:$0xff] }
   0x7   :  { %v1622_v21 = vsub.s32 %v67_v11, %v1619_v17  ;;  %v1625_v22 = vsub.s32 0, %v1619_v17  ;;  %v35_v50 = vld [vmem:[%s2338_s1 + $0x18] sm:$0xff] }
   0x9   :  { %v71_v23 = vrot.slane %v24_v12, %v1622_v21  ;;  %v124_v24 = vrot.slane %v25_v13, %v1622_v21  ;;  %v185_v25 = vrot.slane %v26_v14, %v1622_v21  ;;  %v1631_v26 = vrot.slane %v27_v15, %v1622_v21  ;;  %v36_v15 = vld [vmem:[%s2338_s1 + $0x20] sm:$0xff] }
   0xa   :  { %v1634_v27 = vrot.slane %v28_v16, %v1622_v21  ;;  %v1637_v28 = vrot.slane %v29_v18, %v1622_v21  ;;  %v1640_v29 = vrot.slane %v30_v19, %v1622_v21  ;;  %v1643_v30 = vrot.slane %v31_v20, %v1622_v21  ;;  %v37_v16 = vld [vmem:[%s2338_s1 + $0x28] sm:$0xff] }
   0xb   :  { %v72_v31 = vcombine.high %v71_v23, %v71_v23  ;;  %v79_v32 = vrot.slane %v71_v23, %v1622_v21  ;;  %v125_v33 = vcombine.high %v124_v24, %v124_v24  ;;  %v132_v34 = vrot.slane %v124_v24, %v1622_v21 }
   0xc   :  { %v186_v36 = vcombine.high %v185_v25, %v185_v25  ;;  %v193_v37 = vrot.slane %v185_v25, %v1622_v21  ;;  %v247_v38 = vcombine.high %v1631_v26, %v1631_v26  ;;  %v1655_v39 = vrot.slane %v1631_v26, %v1622_v21 }
   0xd   :  { %v86_v41 = vrot.slane %v72_v31, %v1622_v21  ;;  %v87_v42 = vcombine.high %v79_v32, %v79_v32  ;;  %v92_v43 = vrot.slane %v79_v32, %v1625_v22  ;;  %v139_v44 = vrot.slane %v125_v33, %v1622_v21 }
   0xe   :  { %v140_v45 = vcombine.high %v132_v34, %v132_v34  ;;  %v145_v46 = vrot.slane %v132_v34, %v1625_v22  ;;  %v200_v47 = vrot.slane %v186_v36, %v1622_v21  ;;  %v201_v48 = vcombine.high %v193_v37, %v193_v37 }
   0xf   :  { %v88_v51 = vcombine.high %v86_v41, %v86_v41  ;;  %v96_v52 = vrot.slane %v86_v41, %v1625_v22  ;;  %v100_v53 = vrot.slane %v87_v42, %v1625_v22  ;;  %v109_v54 = vmul.f32 %v92_v43, %v32_v35 }
  0x10   :  { %v110_v55 = vmul.f32 %v92_v43, %v33_v40  ;;  %v141_v56 = vcombine.high %v139_v44, %v139_v44  ;;  %v149_v57 = vrot.slane %v139_v44, %v1625_v22  ;;  %v153_v58 = vrot.slane %v140_v45, %v1625_v22 }
  0x11   :  { %v104_v59 = vrot.slane %v88_v51, %v1625_v22  ;;  %v111_v60 = vmul.f32 %v96_v52, %v32_v35  ;;  %v112_v61 = vmul.f32 %v96_v52, %v33_v40  ;;  %v113_v62 = vmul.f32 %v100_v53, %v32_v35 }
  0x12   :  { %v114_v63 = vmul.f32 %v100_v53, %v33_v40  ;;  %v157_v0 = vrot.slane %v141_v56, %v1625_v22  ;;  %v162_v1 = vmul.f32 %v145_v46, %v34_v49  ;;  %v163_v2 = vmul.f32 %v145_v46, %v35_v50 }
  0x13   :  { %v115_v3 = vmul.f32 %v104_v59, %v32_v35  ;;  %v116_v4 = vmul.f32 %v104_v59, %v33_v40  ;;  %v164_v5 = vmul.f32 %v149_v57, %v34_v49  ;;  %v165_v6 = vmul.f32 %v149_v57, %v35_v50 }
  0x14   :  { %v166_v7 = vmul.f32 %v153_v58, %v34_v49  ;;  %v167_v8 = vmul.f32 %v153_v58, %v35_v50  ;;  %v168_v9 = vmul.f32 %v157_v0, %v34_v49  ;;  %v169_v10 = vmul.f32 %v157_v0, %v35_v50 }
  0x15   :  { %v170_v11 = vadd.f32 %v162_v1, %v109_v54  ;;  %v171_v12 = vadd.f32 %v163_v2, %v110_v55  ;;  %v172_v13 = vadd.f32 %v164_v5, %v111_v60  ;;  %v173_v14 = vadd.f32 %v165_v6, %v112_v61 }
  0x16   :  { %v174_v18 = vadd.f32 %v166_v7, %v113_v62  ;;  %v175_v19 = vadd.f32 %v167_v8, %v114_v63  ;;  %v176_v20 = vadd.f32 %v168_v9, %v115_v3  ;;  %v177_v23 = vadd.f32 %v169_v10, %v116_v4  ;;  %v40_v10 = vld [vmem:[%s2338_s1 + $0x40] sm:$0xff] }
  0x17   :  { %v202_v24 = vcombine.high %v200_v47, %v200_v47  ;;  %v206_v25 = vrot.slane %v193_v37, %v1625_v22  ;;  %v210_v26 = vrot.slane %v200_v47, %v1625_v22  ;;  %v214_v31 = vrot.slane %v201_v48, %v1625_v22 }
  0x18   :  { %v261_v32 = vrot.slane %v247_v38, %v1622_v21  ;;  %v262_v33 = vcombine.high %v1655_v39, %v1655_v39  ;;  %v267_v34 = vrot.slane %v1655_v39, %v1625_v22  ;;  %v308_v35 = vcombine.high %v1634_v27, %v1634_v27  ;;  %v38_v38 = vld [vmem:[%s2338_s1 + $0x30] sm:$0xff]  ;;  %v39_v39 = vld [vmem:[%s2338_s1 + $0x38] sm:$0xff] }
  0x19   :  { %v218_v36 = vrot.slane %v202_v24, %v1625_v22  ;;  %v223_v40 = vmul.f32 %v206_v25, %v36_v15  ;;  %v224_v41 = vmul.f32 %v206_v25, %v37_v16  ;;  %v225_v37 = vmul.f32 %v210_v26, %v36_v15 }
  0x1a   :  { %v226_v42 = vmul.f32 %v210_v26, %v37_v16  ;;  %v227_v43 = vmul.f32 %v214_v31, %v36_v15  ;;  %v228_v44 = vmul.f32 %v214_v31, %v37_v16  ;;  %v263_v45 = vcombine.high %v261_v32, %v261_v32 }
  0x1b   :  { %v229_v46 = vmul.f32 %v218_v36, %v36_v15  ;;  %v230_v47 = vmul.f32 %v218_v36, %v37_v16  ;;  %v231_v48 = vadd.f32 %v223_v40, %v170_v11  ;;  %v232_v49 = vadd.f32 %v224_v41, %v171_v12 }
  0x1c   :  { %v233_v50 = vadd.f32 %v225_v37, %v172_v13  ;;  %v234_v51 = vadd.f32 %v226_v42, %v173_v14  ;;  %v235_v52 = vadd.f32 %v227_v43, %v174_v18  ;;  %v236_v53 = vadd.f32 %v228_v44, %v175_v19  ;;  %v42_v43 = vld [vmem:[%s2338_s1 + $0x50] sm:$0xff] }
  0x1d   :  { %v237_v54 = vadd.f32 %v229_v46, %v176_v20  ;;  %v238_v55 = vadd.f32 %v230_v47, %v177_v23  ;;  %v271_v56 = vrot.slane %v261_v32, %v1625_v22  ;;  %v275_v57 = vrot.slane %v262_v33, %v1625_v22 }
  0x1e   :  { %v279_v58 = vrot.slane %v263_v45, %v1625_v22  ;;  %v284_v59 = vmul.f32 %v267_v34, %v38_v38  ;;  %v285_v60 = vmul.f32 %v267_v34, %v39_v39  ;;  %v315_v61 = vrot.slane %v1634_v27, %v1622_v21  ;;  %v41_v27 = vld [vmem:[%s2338_s1 + $0x48] sm:$0xff] }
  0x1f   :  { %v286_v62 = vmul.f32 %v271_v56, %v38_v38  ;;  %v287_v63 = vmul.f32 %v271_v56, %v39_v39  ;;  %v288_v0 = vmul.f32 %v275_v57, %v38_v38  ;;  %v289_v1 = vmul.f32 %v275_v57, %v39_v39 }
  0x20   :  { %v290_v2 = vmul.f32 %v279_v58, %v38_v38  ;;  %v291_v3 = vmul.f32 %v279_v58, %v39_v39  ;;  %v292_v4 = vadd.f32 %v284_v59, %v231_v48  ;;  %v293_v5 = vadd.f32 %v285_v60, %v232_v49 }
  0x21   :  { %v294_v6 = vadd.f32 %v286_v62, %v233_v50  ;;  %v295_v7 = vadd.f32 %v287_v63, %v234_v51  ;;  %v296_v8 = vadd.f32 %v288_v0, %v235_v52  ;;  %v297_v9 = vadd.f32 %v289_v1, %v236_v53  ;;  %v44_v63 = vld [vmem:[%s2338_s1 + $0x60] sm:$0xff] }
  0x22   :  { %v298_v11 = vadd.f32 %v290_v2, %v237_v54  ;;  %v299_v12 = vadd.f32 %v291_v3, %v238_v55  ;;  %v322_v13 = vrot.slane %v308_v35, %v1622_v21  ;;  %v323_v14 = vcombine.high %v315_v61, %v315_v61 }
  0x23   :  { %v328_v15 = vrot.slane %v315_v61, %v1625_v22  ;;  %v369_v16 = vcombine.high %v1637_v28, %v1637_v28  ;;  %v376_v18 = vrot.slane %v1637_v28, %v1622_v21  ;;  %v430_v19 = vcombine.high %v1640_v29, %v1640_v29 }
  0x24   :  { %v324_v20 = vcombine.high %v322_v13, %v322_v13  ;;  %v332_v23 = vrot.slane %v322_v13, %v1625_v22  ;;  %v336_v24 = vrot.slane %v323_v14, %v1625_v22  ;;  %v437_v25 = vrot.slane %v1640_v29, %v1622_v21  ;;  %v43_v29 = vld [vmem:[%s2338_s1 + $0x58] sm:$0xff] }
  0x25   :  { %v345_v26 = vmul.f32 %v328_v15, %v40_v10  ;;  %v346_v31 = vmul.f32 %v328_v15, %v41_v27  ;;  %v383_v32 = vrot.slane %v369_v16, %v1622_v21  ;;  %v384_v33 = vcombine.high %v376_v18, %v376_v18 }
  0x26   :  { %v340_v34 = vrot.slane %v324_v20, %v1625_v22  ;;  %v347_v35 = vmul.f32 %v332_v23, %v40_v10  ;;  %v348_v28 = vmul.f32 %v332_v23, %v41_v27  ;;  %v349_v36 = vmul.f32 %v336_v24, %v40_v10 }
  0x27   :  { %v350_v40 = vmul.f32 %v336_v24, %v41_v27  ;;  %v353_v41 = vadd.f32 %v345_v26, %v292_v4  ;;  %v354_v37 = vadd.f32 %v346_v31, %v293_v5  ;;  %v385_v42 = vcombine.high %v383_v32, %v383_v32  ;;  %v45_v4 = vld [vmem:[%s2338_s1 + $0x68] sm:$0xff] }
  0x28   :  { %v351_v44 = vmul.f32 %v340_v34, %v40_v10  ;;  %v352_v45 = vmul.f32 %v340_v34, %v41_v27  ;;  %v355_v38 = vadd.f32 %v347_v35, %v294_v6  ;;  %v356_v39 = vadd.f32 %v348_v28, %v295_v7 }
  0x29   :  { %v357_v46 = vadd.f32 %v349_v36, %v296_v8  ;;  %v358_v47 = vadd.f32 %v350_v40, %v297_v9  ;;  %v389_v48 = vrot.slane %v376_v18, %v1625_v22  ;;  %v393_v49 = vrot.slane %v383_v32, %v1625_v22 }
  0x2a   :  { %v359_v50 = vadd.f32 %v351_v44, %v298_v11  ;;  %v360_v51 = vadd.f32 %v352_v45, %v299_v12  ;;  %v397_v52 = vrot.slane %v384_v33, %v1625_v22  ;;  %v401_v53 = vrot.slane %v385_v42, %v1625_v22 }
  0x2b   :  { %v406_v54 = vmul.f32 %v389_v48, %v42_v43  ;;  %v407_v55 = vmul.f32 %v389_v48, %v43_v29  ;;  %v408_v56 = vmul.f32 %v393_v49, %v42_v43  ;;  %v409_v57 = vmul.f32 %v393_v49, %v43_v29 }
  0x2c   :  { %v410_v58 = vmul.f32 %v397_v52, %v42_v43  ;;  %v411_v59 = vmul.f32 %v397_v52, %v43_v29  ;;  %v412_v60 = vmul.f32 %v401_v53, %v42_v43  ;;  %v413_v61 = vmul.f32 %v401_v53, %v43_v29 }
  0x2d   :  { %v414_v62 = vadd.f32 %v406_v54, %v353_v41  ;;  %v415_v0 = vadd.f32 %v407_v55, %v354_v37  ;;  %v416_v1 = vadd.f32 %v408_v56, %v355_v38  ;;  %v417_v2 = vadd.f32 %v409_v57, %v356_v39 }
  0x2e   :  { %v418_v3 = vadd.f32 %v410_v58, %v357_v46  ;;  %v444_v5 = vrot.slane %v430_v19, %v1622_v21  ;;  %v445_v6 = vcombine.high %v437_v25, %v437_v25  ;;  %v450_v7 = vrot.slane %v437_v25, %v1625_v22 }
  0x2f   :  { %v491_v8 = vcombine.high %v1643_v30, %v1643_v30  ;;  %v419_v9 = vadd.f32 %v411_v59, %v358_v47  ;;  %v420_v10 = vadd.f32 %v412_v60, %v359_v50  ;;  %v421_v27 = vadd.f32 %v413_v61, %v360_v51 }
  0x30   :  { %v498_v11 = vrot.slane %v1643_v30, %v1622_v21  ;;  %v446_v12 = vcombine.high %v444_v5, %v444_v5  ;;  %v454_v13 = vrot.slane %v444_v5, %v1625_v22  ;;  %v458_v14 = vrot.slane %v445_v6, %v1625_v22  ;;  %v46_v30 = vld [vmem:[%s2338_s1 + $0x70] sm:$0xff] }
  0x31   :  { %v467_v15 = vmul.f32 %v450_v7, %v44_v63  ;;  %v468_v16 = vmul.f32 %v450_v7, %v45_v4  ;;  %v505_v18 = vrot.slane %v491_v8, %v1622_v21  ;;  %v47_v21 = vld [vmem:[%s2338_s1 + $0x78] sm:$0xff] }
  0x32   :  { %v506_v19 = vcombine.high %v498_v11, %v498_v11  ;;  %v511_v20 = vrot.slane %v498_v11, %v1625_v22  ;;  %v462_v23 = vrot.slane %v446_v12, %v1625_v22  ;;  %v469_v24 = vmul.f32 %v454_v13, %v44_v63 }
  0x33   :  { %v470_v25 = vmul.f32 %v454_v13, %v45_v4  ;;  %v471_v26 = vmul.f32 %v458_v14, %v44_v63  ;;  %v472_v31 = vmul.f32 %v458_v14, %v45_v4  ;;  %v475_v32 = vadd.f32 %v467_v15, %v414_v62 }
  0x34   :  { %v476_v33 = vadd.f32 %v468_v16, %v415_v0  ;;  %v507_v34 = vcombine.high %v505_v18, %v505_v18  ;;  %v473_v35 = vmul.f32 %v462_v23, %v44_v63  ;;  %v474_v28 = vmul.f32 %v462_v23, %v45_v4 }
  0x35   :  { %v477_v36 = vadd.f32 %v469_v24, %v416_v1  ;;  %v478_v40 = vadd.f32 %v470_v25, %v417_v2  ;;  %v479_v41 = vadd.f32 %v471_v26, %v418_v3  ;;  %v480_v37 = vadd.f32 %v472_v31, %v419_v9 }
  0x36   :  { %v515_v42 = vrot.slane %v505_v18, %v1625_v22  ;;  %v519_v43 = vrot.slane %v506_v19, %v1625_v22  ;;  %v481_v29 = vadd.f32 %v473_v35, %v420_v10  ;;  %v482_v44 = vadd.f32 %v474_v28, %v421_v27 }
  0x37   :  { %v523_v45 = vrot.slane %v507_v34, %v1625_v22  ;;  %v528_v38 = vmul.f32 %v511_v20, %v46_v30  ;;  %v529_v39 = vmul.f32 %v511_v20, %v47_v21 }
  0x38   :  { %v530_v46 = vmul.f32 %v515_v42, %v46_v30  ;;  %v531_v47 = vmul.f32 %v515_v42, %v47_v21  ;;  %v532_v48 = vmul.f32 %v519_v43, %v46_v30  ;;  %v533_v49 = vmul.f32 %v519_v43, %v47_v21 }
  0x39   :  { %v534_v50 = vmul.f32 %v523_v45, %v46_v30  ;;  %v535_v51 = vmul.f32 %v523_v45, %v47_v21  ;;  %v536_v52 = vadd.f32 %v528_v38, %v475_v32  ;;  %v537_v53 = vadd.f32 %v529_v39, %v476_v33 }
  0x3a   :  { %v538_v54 = vadd.f32 %v530_v46, %v477_v36  ;;  %v539_v55 = vadd.f32 %v531_v47, %v478_v40  ;;  %v540_v56 = vadd.f32 %v532_v48, %v479_v41  ;;  %v541_v57 = vadd.f32 %v533_v49, %v480_v37 }
  0x3b   :  { %v542_v58 = vadd.f32 %v534_v50, %v481_v29  ;;  %v543_v59 = vadd.f32 %v535_v51, %v482_v44  ;;  %v545_v60 = vsel %vm544_vm0, %v536_v52, -inf  ;;  %v546_v61 = vsel %vm544_vm0, %v537_v53, -inf }
  0x3c   :  { %v554_v62 = vsel %vm544_vm0, %v538_v54, -inf  ;;  %v555_v63 = vsel %vm544_vm0, %v539_v55, -inf  ;;  %v563_v0 = vsel %vm544_vm0, %v540_v56, -inf  ;;  %v547_v1 = vmax.f32 %v545_v60, %v546_v61 }
  0x3d   :  { %v556_v2 = vmax.f32 %v554_v62, %v555_v63  ;;  %v564_v3 = vsel %vm544_vm0, %v541_v57, -inf  ;;  %v572_v4 = vsel %vm544_vm0, %v542_v58, -inf  ;;  %v573_v6 = vsel %vm544_vm0, %v543_v59, -inf }
  0x3e   :  { %v565_v5 = vmax.f32 %v563_v0, %v564_v3  ;;  %v548_v7 = vrot.slane %v547_v1, 4  ;;  %v574_v9 = vmax.f32 %v572_v4, %v573_v6 }
  0x3f   :  { %v557_v8 = vrot.slane %v556_v2, 4 }
  0x40   :  { %v566_v10 = vrot.slane %v565_v5, 4  ;;  %v549_v27 = vmax.f32 %v547_v1, %v548_v7  ;;  %v575_v12 = vrot.slane %v574_v9, 4 }
  0x41   :  { %v558_v11 = vmax.f32 %v556_v2, %v557_v8 }
  0x42   :  { %v567_v13 = vmax.f32 %v565_v5, %v566_v10  ;;  %v550_v14 = vrot.slane %v549_v27, 2  ;;  %v576_v16 = vmax.f32 %v574_v9, %v575_v12 }
  0x43   :  { %v559_v15 = vrot.slane %v558_v11, 2 }
  0x44   :  { %v568_v18 = vrot.slane %v567_v13, 2  ;;  %v551_v19 = vmax.f32 %v549_v27, %v550_v14  ;;  %v577_v23 = vrot.slane %v576_v16, 2 }
  0x45   :  { %v560_v20 = vmax.f32 %v558_v11, %v559_v15 }
  0x46   :  { %v569_v24 = vmax.f32 %v567_v13, %v568_v18  ;;  %v552_v25 = vrot.slane %v551_v19, 1  ;;  %v578_v30 = vmax.f32 %v576_v16, %v577_v23 }
  0x47   :  { %v561_v26 = vrot.slane %v560_v20, 1 }
  0x48   :  { %v570_v31 = vrot.slane %v569_v24, 1  ;;  %v553_v32 = vmax.f32 %v551_v19, %v552_v25  ;;  %v579_v34 = vrot.slane %v578_v30, 1 }
  0x49   :  { %v562_v33 = vmax.f32 %v560_v20, %v561_v26 }
  0x4a   :  { %v571_v21 = vmax.f32 %v569_v24, %v570_v31  ;;  %v580_v35 = vmax.f32 %v578_v30, %v579_v34  ;;  %v581_v28 = vsub.f32 %v536_v52, %v553_v32  ;;  %v582_v36 = vsub.f32 %v537_v53, %v553_v32 }
  0x4b   :  { %v583_v40 = vsub.f32 %v538_v54, %v562_v33  ;;  %v584_v41 = vsub.f32 %v539_v55, %v562_v33 }
  0x4c   :  { %v585_v37 = vsub.f32 %v540_v56, %v571_v21  ;;  %v586_v42 = vsub.f32 %v541_v57, %v571_v21  ;;  %v587_v43 = vsub.f32 %v542_v58, %v580_v35  ;;  %v589_v29 = vmul.f32 1.442695, %v581_v28 }
  0x4d   :  { %v591_v44 = vmul.f32 1.442695, %v582_v36  ;;  %v588_v45 = vsub.f32 %v543_v59, %v580_v35  ;;  %v593_v38 = vmul.f32 1.442695, %v583_v40  ;;  %v595_v39 = vmul.f32 1.442695, %v584_v41 }
  0x4e   :  { %1545 = vpow2.f32 %v589_v29  ;;  %v597_v46 = vmul.f32 1.442695, %v585_v37  ;;  %v599_v47 = vmul.f32 1.442695, %v586_v42  ;;  %v601_v48 = vmul.f32 1.442695, %v587_v43 }
  0x4f   :  { %1547 = vpow2.f32 %v591_v44  ;;  %v603_v49 = vmul.f32 1.442695, %v588_v45  ;;  %v1802_v44 = vsub.s32 1, %v1619_v17  ;;  %v1805_v45 = vsub.s32 2, %v1619_v17 }
  0x50   :  { %1549 = vpow2.f32 %v593_v38  ;;  %v1808_v38 = vsub.s32 3, %v1619_v17 }
  0x51   :  { %1551 = vpow2.f32 %v595_v39  ;;  %v1811_v39 = vsub.s32 4, %v1619_v17 }
  0x52   :  { %1553 = vpow2.f32 %v597_v46 }
  0x53   :  { %1555 = vpow2.f32 %v599_v47 }
  0x54   :  { %1557 = vpow2.f32 %v601_v48 }
  0x55   :  { %1559 = vpow2.f32 %v603_v49  ;;  %v1814_v49 = vsub.s32 5, %v1619_v17 }
  0x58   :  { %v1769_v50 = vpop.eup %1545 }
  0x59   :  { %v1771_v51 = vpop.eup %1547  ;;  %v605_v52 = vsel %vm544_vm0, %v1769_v50, 0.0 }
  0x5a   :  { %v1775_v53 = vpop.eup %1549  ;;  %v606_v54 = vsel %vm544_vm0, %v1771_v51, 0.0 }
  0x5b   :  { %v1779_v55 = vpop.eup %1551  ;;  %v607_v56 = vadd.f32 %v606_v54, %v605_v52  ;;  %v614_v57 = vsel %vm544_vm0, %v1775_v53, 0.0 }
  0x5c   :  { %v1783_v58 = vpop.eup %1553  ;;  %v615_v59 = vsel %vm544_vm0, %v1779_v55, 0.0 }
  0x5d   :  { %v1787_v60 = vpop.eup %1555  ;;  %v608_v61 = vrot.slane %v607_v56, 4  ;;  %v616_v62 = vadd.f32 %v615_v59, %v614_v57  ;;  %v623_v63 = vsel %vm544_vm0, %v1783_v58, 0.0  ;;  %v1826_v57 = vsub.s32 7, %v1619_v17  ;;  %v48_v59 = vld [vmem:[%s2339_s2] sm:$0xff] }
  0x5e   :  { %v1791_v0 = vpop.eup %1557  ;;  %v624_v1 = vsel %vm544_vm0, %v1787_v60, 0.0 }
  0x5f   :  { %v1795_v2 = vpop.eup %1559  ;;  %v609_v3 = vadd.f32 %v608_v61, %v607_v56  ;;  %v617_v4 = vrot.slane %v616_v62, 4  ;;  %v625_v5 = vadd.f32 %v624_v1, %v623_v63  ;;  %v632_v6 = vsel %vm544_vm0, %v1791_v0, 0.0  ;;  %v49_v61 = vld [vmem:[%s2339_s2 + $0x8] sm:$0xff] }
  0x60   :  { %v633_v7 = vsel %vm544_vm0, %v1795_v2, 0.0  ;;  %v1823_v56 = vsub.s32 6, %v1619_v17 }
  0x61   :  { %v610_v8 = vrot.slane %v609_v3, 2  ;;  %v618_v9 = vadd.f32 %v617_v4, %v616_v62  ;;  %v626_v10 = vrot.slane %v625_v5, 4  ;;  %v634_v27 = vadd.f32 %v633_v7, %v632_v6 }
  0x63   :  { %v611_v11 = vadd.f32 %v610_v8, %v609_v3  ;;  %v619_v12 = vrot.slane %v618_v9, 2  ;;  %v627_v13 = vadd.f32 %v626_v10, %v625_v5  ;;  %v635_v14 = vrot.slane %v634_v27, 4 }
  0x65   :  { %v612_v15 = vrot.slane %v611_v11, 1  ;;  %v620_v16 = vadd.f32 %v619_v12, %v618_v9  ;;  %v628_v18 = vrot.slane %v627_v13, 2  ;;  %v636_v19 = vadd.f32 %v635_v14, %v634_v27 }
  0x67   :  { %v613_v20 = vadd.f32 %v612_v15, %v611_v11  ;;  %v621_v23 = vrot.slane %v620_v16, 1  ;;  %v629_v24 = vadd.f32 %v628_v18, %v627_v13  ;;  %v637_v25 = vrot.slane %v636_v19, 2  ;;  %v50_v11 = vld [vmem:[%s2339_s2 + $0x10] sm:$0xff] }
  0x69   :  { %v622_v26 = vadd.f32 %v621_v23, %v620_v16  ;;  %v630_v30 = vrot.slane %v629_v24, 1  ;;  %v638_v31 = vadd.f32 %v637_v25, %v636_v19  ;;  %1561 = vrcp.f32 %v613_v20  ;;  %v51_v23 = vld [vmem:[%s2339_s2 + $0x18] sm:$0xff] }
  0x6b   :  { %v631_v32 = vadd.f32 %v630_v30, %v629_v24  ;;  %v639_v33 = vrot.slane %v638_v31, 1  ;;  %1563 = vrcp.f32 %v622_v26 }
  0x6d   :  { %v640_v34 = vadd.f32 %v639_v33, %v638_v31  ;;  %1565 = vrcp.f32 %v631_v32 }
  0x6f   :  { %1567 = vrcp.f32 %v640_v34 }
  0x73   :  { %v1562_v21 = vpop.eup %1561 }
  0x74   :  { %v645_v35 = vmul.f32 %v1562_v21, %v613_v20 }
  0x75   :  { %v1564_v28 = vpop.eup %1563 }
  0x76   :  { %v646_v36 = vmul.f32 %v1564_v28, %v622_v26  ;;  %v649_v40 = vsub.f32 2.0, %v645_v35 }
  0x77   :  { %v1566_v41 = vpop.eup %1565 }
  0x78   :  { %v647_v37 = vmul.f32 %v1566_v41, %v631_v32  ;;  %v650_v42 = vsub.f32 2.0, %v646_v36  ;;  %v653_v43 = vmul.f32 %v1562_v21, %v649_v40  ;;  %v52_v40 = vld [vmem:[%s2339_s2 + $0x20] sm:$0xff] }
  0x79   :  { %v1568_v29 = vpop.eup %1567 }
  0x7a   :  { %v648_v46 = vmul.f32 %v1568_v29, %v640_v34  ;;  %v651_v47 = vsub.f32 2.0, %v647_v37  ;;  %v654_v48 = vmul.f32 %v1564_v28, %v650_v42  ;;  %v1817_v52 = vmul.f32 %v1769_v50, %v653_v43 }
  0x7b   :  { %v1820_v54 = vmul.f32 %v1771_v51, %v653_v43 }
  0x7c   :  { %v652_v62 = vsub.f32 2.0, %v648_v46  ;;  %v655_v50 = vmul.f32 %v1566_v41, %v651_v47  ;;  %v1835_v63 = vmul.f32 %v1775_v53, %v654_v48  ;;  %v1838_v51 = vmul.f32 %v1779_v55, %v654_v48 }
  0x7d   :  { %v668_v1 = vrot.slane %v1817_v52, %v1625_v22  ;;  %v688_v3 = vrot.slane %v1817_v52, %v1802_v44  ;;  %v712_v4 = vrot.slane %v1817_v52, %v1805_v45  ;;  %v736_v5 = vrot.slane %v1817_v52, %v1808_v38 }
  0x7e   :  { %v656_v6 = vmul.f32 %v1568_v29, %v652_v62  ;;  %v1849_v7 = vmul.f32 %v1783_v58, %v655_v50  ;;  %v1852_v53 = vmul.f32 %v1787_v60, %v655_v50  ;;  %v672_v55 = vrot.slane %v1835_v63, %v1625_v22 }
  0x7f   :  { %v681_v8 = vmul.f32 %v668_v1, %v48_v59  ;;  %v692_v9 = vrot.slane %v1835_v63, %v1802_v44  ;;  %v701_v10 = vmul.f32 %v688_v3, %v49_v61  ;;  %v716_v27 = vrot.slane %v1835_v63, %v1805_v45  ;;  %v53_v1 = vld [vmem:[%s2339_s2 + $0x28] sm:$0xff] }
  0x80   :  { %v1864_v58 = vmul.f32 %v1791_v0, %v656_v6  ;;  %v1867_v60 = vmul.f32 %v1795_v2, %v656_v6  ;;  %v676_v12 = vrot.slane %v1849_v7, %v1625_v22  ;;  %v682_v13 = vmul.f32 %v672_v55, %v48_v59 }
  0x81   :  { %v696_v14 = vrot.slane %v1849_v7, %v1802_v44  ;;  %v702_v15 = vmul.f32 %v692_v9, %v49_v61  ;;  %v705_v16 = vadd.f32 %v701_v10, %v681_v8  ;;  %v720_v18 = vrot.slane %v1849_v7, %v1805_v45 }
  0x82   :  { %v680_v19 = vrot.slane %v1864_v58, %v1625_v22  ;;  %v683_v0 = vmul.f32 %v676_v12, %v48_v59  ;;  %v700_v2 = vrot.slane %v1864_v58, %v1802_v44  ;;  %v724_v20 = vrot.slane %v1864_v58, %v1805_v45 }
  0x83   :  { %v703_v24 = vmul.f32 %v696_v14, %v49_v61  ;;  %v706_v25 = vadd.f32 %v702_v15, %v682_v13  ;;  %v725_v26 = vmul.f32 %v712_v4, %v50_v11  ;;  %v726_v30 = vmul.f32 %v716_v27, %v50_v11  ;;  %v54_v14 = vld [vmem:[%s2339_s2 + $0x30] sm:$0xff] }
  0x84   :  { %v684_v31 = vmul.f32 %v680_v19, %v48_v59  ;;  %v704_v32 = vmul.f32 %v700_v2, %v49_v61  ;;  %v727_v33 = vmul.f32 %v720_v18, %v50_v11  ;;  %v728_v34 = vmul.f32 %v724_v20, %v50_v11 }
  0x85   :  { %v707_v21 = vadd.f32 %v703_v24, %v683_v0  ;;  %v729_v35 = vadd.f32 %v725_v26, %v705_v16  ;;  %v730_v28 = vadd.f32 %v726_v30, %v706_v25  ;;  %v740_v36 = vrot.slane %v1835_v63, %v1808_v38 }
  0x86   :  { %v708_v41 = vadd.f32 %v704_v32, %v684_v31  ;;  %v744_v37 = vrot.slane %v1849_v7, %v1808_v38  ;;  %v748_v42 = vrot.slane %v1864_v58, %v1808_v38  ;;  %v749_v43 = vmul.f32 %v736_v5, %v51_v23  ;;  %v55_v31 = vld [vmem:[%s2339_s2 + $0x38] sm:$0xff] }
  0x87   :  { %v731_v29 = vadd.f32 %v727_v33, %v707_v21  ;;  %v750_v46 = vmul.f32 %v740_v36, %v51_v23  ;;  %v760_v47 = vrot.slane %v1817_v52, %v1811_v39  ;;  %v764_v48 = vrot.slane %v1835_v63, %v1811_v39 }
  0x88   :  { %v732_v59 = vadd.f32 %v728_v34, %v708_v41  ;;  %v751_v61 = vmul.f32 %v744_v37, %v51_v23  ;;  %v752_v62 = vmul.f32 %v748_v42, %v51_v23  ;;  %v753_v50 = vadd.f32 %v749_v43, %v729_v35 }
  0x89   :  { %v754_v3 = vadd.f32 %v750_v46, %v730_v28  ;;  %v768_v4 = vrot.slane %v1849_v7, %v1811_v39  ;;  %v772_v5 = vrot.slane %v1864_v58, %v1811_v39  ;;  %v773_v6 = vmul.f32 %v760_v47, %v52_v40 }
  0x8a   :  { %v755_v55 = vadd.f32 %v751_v61, %v731_v29  ;;  %v756_v8 = vadd.f32 %v752_v62, %v732_v59  ;;  %v774_v9 = vmul.f32 %v764_v48, %v52_v40  ;;  %v784_v10 = vrot.slane %v1817_v52, %v1814_v49  ;;  %v56_v29 = vld [vmem:[%s2339_s2 + $0x40] sm:$0xff] }
  0x8b   :  { %v775_v27 = vmul.f32 %v768_v4, %v52_v40  ;;  %v776_v11 = vmul.f32 %v772_v5, %v52_v40  ;;  %v777_v12 = vadd.f32 %v773_v6, %v753_v50  ;;  %v788_v13 = vrot.slane %v1835_v63, %v1814_v49 }
  0x8c   :  { %v778_v15 = vadd.f32 %v774_v9, %v754_v3  ;;  %v792_v16 = vrot.slane %v1849_v7, %v1814_v49  ;;  %v796_v18 = vrot.slane %v1864_v58, %v1814_v49  ;;  %v797_v19 = vmul.f32 %v784_v10, %v53_v1 }
  0x8d   :  { %v779_v0 = vadd.f32 %v775_v27, %v755_v55  ;;  %v780_v2 = vadd.f32 %v776_v11, %v756_v8  ;;  %v798_v20 = vmul.f32 %v788_v13, %v53_v1  ;;  %v808_v23 = vrot.slane %v1817_v52, %v1823_v56  ;;  %v57_v55 = vld [vmem:[%s2339_s2 + $0x48] sm:$0xff] }
  0x8e   :  { %v799_v24 = vmul.f32 %v792_v16, %v53_v1  ;;  %v800_v25 = vmul.f32 %v796_v18, %v53_v1  ;;  %v801_v26 = vadd.f32 %v797_v19, %v777_v12  ;;  %v812_v30 = vrot.slane %v1835_v63, %v1823_v56 }
  0x8f   :  { %v802_v32 = vadd.f32 %v798_v20, %v778_v15  ;;  %v816_v33 = vrot.slane %v1849_v7, %v1823_v56  ;;  %v820_v34 = vrot.slane %v1864_v58, %v1823_v56  ;;  %v821_v21 = vmul.f32 %v808_v23, %v54_v14 }
  0x90   :  { %v803_v35 = vadd.f32 %v799_v24, %v779_v0  ;;  %v804_v28 = vadd.f32 %v800_v25, %v780_v2  ;;  %v822_v36 = vmul.f32 %v812_v30, %v54_v14  ;;  %v832_v40 = vrot.slane %v1817_v52, %v1826_v57  ;;  %v58_v0 = vld [vmem:[%s2339_s2 + $0x50] sm:$0xff] }
  0x91   :  { %v823_v41 = vmul.f32 %v816_v33, %v54_v14  ;;  %v824_v37 = vmul.f32 %v820_v34, %v54_v14  ;;  %v825_v42 = vadd.f32 %v821_v21, %v801_v26  ;;  %v836_v43 = vrot.slane %v1835_v63, %v1826_v57  ;;  %v59_v21 = vld [vmem:[%s2339_s2 + $0x58] sm:$0xff] }
  0x92   :  { %v826_v46 = vadd.f32 %v822_v36, %v802_v32  ;;  %v840_v47 = vrot.slane %v1849_v7, %v1826_v57  ;;  %v844_v48 = vrot.slane %v1864_v58, %v1826_v57  ;;  %v845_v59 = vmul.f32 %v832_v40, %v55_v31 }
  0x93   :  { %v827_v61 = vadd.f32 %v823_v41, %v803_v35  ;;  %v828_v62 = vadd.f32 %v824_v37, %v804_v28  ;;  %v846_v50 = vmul.f32 %v836_v43, %v55_v31  ;;  %v856_v1 = vrot.slane %v1820_v54, %v1625_v22 }
  0x94   :  { %v847_v3 = vmul.f32 %v840_v47, %v55_v31  ;;  %v848_v4 = vmul.f32 %v844_v48, %v55_v31  ;;  %v849_v5 = vadd.f32 %v845_v59, %v825_v42  ;;  %v860_v6 = vrot.slane %v1838_v51, %v1625_v22  ;;  %v60_v48 = vld [vmem:[%s2339_s2 + $0x60] sm:$0xff] }
  0x95   :  { %v850_v8 = vadd.f32 %v846_v50, %v826_v46  ;;  %v864_v9 = vrot.slane %v1852_v53, %v1625_v22  ;;  %v868_v10 = vrot.slane %v1867_v60, %v1625_v22  ;;  %v869_v27 = vmul.f32 %v856_v1, %v56_v29 }
  0x96   :  { %v851_v11 = vadd.f32 %v847_v3, %v827_v61  ;;  %v852_v12 = vadd.f32 %v848_v4, %v828_v62  ;;  %v870_v13 = vmul.f32 %v860_v6, %v56_v29  ;;  %v880_v14 = vrot.slane %v1820_v54, %v1802_v44 }
  0x97   :  { %v871_v15 = vmul.f32 %v864_v9, %v56_v29  ;;  %v872_v16 = vmul.f32 %v868_v10, %v56_v29  ;;  %v873_v18 = vadd.f32 %v869_v27, %v849_v5  ;;  %v884_v19 = vrot.slane %v1838_v51, %v1802_v44  ;;  %v61_v9 = vld [vmem:[%s2339_s2 + $0x68] sm:$0xff] }
  0x98   :  { %v874_v2 = vadd.f32 %v870_v13, %v850_v8  ;;  %v888_v22 = vrot.slane %v1852_v53, %v1802_v44  ;;  %v892_v20 = vrot.slane %v1867_v60, %v1802_v44  ;;  %v893_v23 = vmul.f32 %v880_v14, %v57_v55 }
  0x99   :  { %v875_v24 = vadd.f32 %v871_v15, %v851_v11  ;;  %v876_v25 = vadd.f32 %v872_v16, %v852_v12  ;;  %v894_v26 = vmul.f32 %v884_v19, %v57_v55  ;;  %v904_v30 = vrot.slane %v1820_v54, %v1805_v45 }
  0x9a   :  { %v895_v31 = vmul.f32 %v888_v22, %v57_v55  ;;  %v896_v32 = vmul.f32 %v892_v20, %v57_v55  ;;  %v897_v33 = vadd.f32 %v893_v23, %v873_v18  ;;  %v908_v34 = vrot.slane %v1838_v51, %v1805_v45 }
  0x9b   :  { %v898_v35 = vadd.f32 %v894_v26, %v874_v2  ;;  %v912_v44 = vrot.slane %v1852_v53, %v1805_v45  ;;  %v916_v28 = vrot.slane %v1867_v60, %v1805_v45  ;;  %v917_v36 = vmul.f32 %v904_v30, %v58_v0  ;;  %v62_v2 = vld [vmem:[%s2339_s2 + $0x70] sm:$0xff] }
  0x9c   :  { %v899_v40 = vadd.f32 %v895_v31, %v875_v24  ;;  %v900_v41 = vadd.f32 %v896_v32, %v876_v25  ;;  %v918_v37 = vmul.f32 %v908_v34, %v58_v0  ;;  %v928_v42 = vrot.slane %v1820_v54, %v1808_v38 }
  0x9d   :  { %v919_v43 = vmul.f32 %v912_v44, %v58_v0  ;;  %v920_v29 = vmul.f32 %v916_v28, %v58_v0  ;;  %v921_v46 = vadd.f32 %v917_v36, %v897_v33  ;;  %v932_v47 = vrot.slane %v1838_v51, %v1808_v38 }
  0x9e   :  { %v922_v59 = vadd.f32 %v918_v37, %v898_v35  ;;  %v936_v45 = vrot.slane %v1852_v53, %v1808_v38  ;;  %v940_v61 = vrot.slane %v1867_v60, %v1808_v38  ;;  %v941_v62 = vmul.f32 %v928_v42, %v59_v21 }
  0x9f   :  { %v923_v50 = vadd.f32 %v919_v43, %v899_v40  ;;  %v924_v1 = vadd.f32 %v920_v29, %v900_v41  ;;  %v942_v3 = vmul.f32 %v932_v47, %v59_v21  ;;  %v952_v4 = vrot.slane %v1820_v54, %v1811_v39 }
  0xa0   :  { %v943_v5 = vmul.f32 %v936_v45, %v59_v21  ;;  %v944_v6 = vmul.f32 %v940_v61, %v59_v21  ;;  %v945_v55 = vadd.f32 %v941_v62, %v921_v46  ;;  %v956_v8 = vrot.slane %v1838_v51, %v1811_v39  ;;  %v63_v21 = vld [vmem:[%s2339_s2 + $0x78] sm:$0xff] }
  0xa1   :  { %v946_v10 = vadd.f32 %v942_v3, %v922_v59  ;;  %v960_v38 = vrot.slane %v1852_v53, %v1811_v39  ;;  %v964_v27 = vrot.slane %v1867_v60, %v1811_v39  ;;  %v965_v11 = vmul.f32 %v952_v4, %v60_v48 }
  0xa2   :  { %v947_v12 = vadd.f32 %v943_v5, %v923_v50  ;;  %v948_v13 = vadd.f32 %v944_v6, %v924_v1  ;;  %v966_v14 = vmul.f32 %v956_v8, %v60_v48  ;;  %v976_v15 = vrot.slane %v1820_v54, %v1814_v49 }
  0xa3   :  { %v967_v16 = vmul.f32 %v960_v38, %v60_v48  ;;  %v968_v18 = vmul.f32 %v964_v27, %v60_v48  ;;  %v969_v19 = vadd.f32 %v965_v11, %v945_v55  ;;  %v980_v0 = vrot.slane %v1838_v51, %v1814_v49 }
  0xa4   :  { %v970_v22 = vadd.f32 %v966_v14, %v946_v10  ;;  %v984_v39 = vrot.slane %v1852_v53, %v1814_v49  ;;  %v988_v20 = vrot.slane %v1867_v60, %v1814_v49  ;;  %v989_v23 = vmul.f32 %v976_v15, %v61_v9 }
  0xa5   :  { %v971_v24 = vadd.f32 %v967_v16, %v947_v12  ;;  %v972_v25 = vadd.f32 %v968_v18, %v948_v13  ;;  %v990_v26 = vmul.f32 %v980_v0, %v61_v9  ;;  %v1000_v30 = vrot.slane %v1820_v54, %v1823_v56 }
  0xa6   :  { %v991_v31 = vmul.f32 %v984_v39, %v61_v9  ;;  %v992_v32 = vmul.f32 %v988_v20, %v61_v9  ;;  %v993_v33 = vadd.f32 %v989_v23, %v969_v19  ;;  %v1004_v34 = vrot.slane %v1838_v51, %v1823_v56 }
  0xa7   :  { %v994_v35 = vadd.f32 %v990_v26, %v970_v22  ;;  %v1008_v49 = vrot.slane %v1852_v53, %v1823_v56  ;;  %v1012_v44 = vrot.slane %v1867_v60, %v1823_v56  ;;  %v1013_v28 = vmul.f32 %v1000_v30, %v62_v2 }
  0xa8   :  { %v995_v36 = vadd.f32 %v991_v31, %v971_v24  ;;  %v996_v40 = vadd.f32 %v992_v32, %v972_v25  ;;  %v1014_v41 = vmul.f32 %v1004_v34, %v62_v2  ;;  %v1024_v37 = vrot.slane %v1820_v54, %v1826_v57 }
  0xa9   :  { %v1015_v42 = vmul.f32 %v1008_v49, %v62_v2  ;;  %v1016_v43 = vmul.f32 %v1012_v44, %v62_v2  ;;  %v1017_v29 = vadd.f32 %v1013_v28, %v993_v33  ;;  %v1028_v46 = vrot.slane %v1838_v51, %v1826_v57 }
  0xaa   :  { %v1018_v47 = vadd.f32 %v1014_v41, %v994_v35  ;;  %v1032_v48 = vrot.slane %v1852_v53, %v1826_v57  ;;  %v1036_v56 = vrot.slane %v1867_v60, %v1826_v57  ;;  %v1037_v59 = vmul.f32 %v1024_v37, %v63_v21 }
  0xab   :  { %v1019_v45 = vadd.f32 %v1015_v42, %v995_v36  ;;  %v1020_v61 = vadd.f32 %v1016_v43, %v996_v40  ;;  %v1038_v62 = vmul.f32 %v1028_v46, %v63_v21  ;;  %v1052_v50 = vsel %vm544_vm0, %v1817_v52, -inf }
  0xac   :  { %v1039_v1 = vmul.f32 %v1032_v48, %v63_v21  ;;  %v1040_v3 = vmul.f32 %v1036_v56, %v63_v21  ;;  %v1041_v4 = vadd.f32 %v1037_v59, %v1017_v29  ;;  %v1053_v5 = vsel %vm544_vm0, %v1820_v54, -inf }
  0xad   :  { %v1042_v6 = vadd.f32 %v1038_v62, %v1018_v47  ;;  %v1054_v55 = vmax.f32 %v1052_v50, %v1053_v5  ;;  %v1061_v8 = vsel %vm544_vm0, %v1835_v63, -inf  ;;  %v1062_v57 = vsel %vm544_vm0, %v1838_v51, -inf }
  0xae   :  { %v1043_v9 = vadd.f32 %v1039_v1, %v1019_v45  ;;  %v1044_v10 = vadd.f32 %v1040_v3, %v1020_v61  ;;  %1045 = vst.msk [vmem:[%s2340_s3] sm:$0xff] %vm544_vm0, %v1041_v4  ;;  %v1063_v38 = vmax.f32 %v1061_v8, %v1062_v57  ;;  %v1070_v27 = vsel %vm544_vm0, %v1849_v7, -inf }
  0xaf   :  { %1046 = vst.msk [vmem:[%s2340_s3 + $0x8] sm:$0xff] %vm544_vm0, %v1042_v6  ;;  %v1055_v11 = vrot.slane %v1054_v55, 4  ;;  %v1071_v12 = vsel %vm544_vm0, %v1852_v53, -inf  ;;  %v1079_v13 = vsel %vm544_vm0, %v1864_v58, -inf  ;;  %v1080_v14 = vsel %vm544_vm0, %v1867_v60, -inf }
  0xb0   :  { %1047 = vst.msk [vmem:[%s2340_s3 + $0x10] sm:$0xff] %vm544_vm0, %v1043_v9  ;;  %1048 = vst.msk [vmem:[%s2340_s3 + $0x18] sm:$0xff] %vm544_vm0, %v1044_v10  ;;  %v1064_v15 = vrot.slane %v1063_v38, 4  ;;  %v1072_v16 = vmax.f32 %v1070_v27, %v1071_v12  ;;  %v1081_v18 = vmax.f32 %v1079_v13, %v1080_v14  ;;  %v2055_v35 = vadd.s32 8, %v1619_v17 }
  0xb1   :  { %v1056_v19 = vmax.f32 %v1054_v55, %v1055_v11 }
  0xb2   :  { %v1065_v0 = vmax.f32 %v1063_v38, %v1064_v15  ;;  %v1073_v2 = vrot.slane %v1072_v16, 4  ;;  %v1082_v22 = vrot.slane %v1081_v18, 4 }
  0xb3   :  { %v1057_v39 = vrot.slane %v1056_v19, 2 }
  0xb4   :  { %v1066_v20 = vrot.slane %v1065_v0, 2  ;;  %v1074_v23 = vmax.f32 %v1072_v16, %v1073_v2  ;;  %v1083_v24 = vmax.f32 %v1081_v18, %v1082_v22 }
  0xb5   :  { %v1058_v25 = vmax.f32 %v1056_v19, %v1057_v39 }
  0xb6   :  { %v1067_v26 = vmax.f32 %v1065_v0, %v1066_v20  ;;  %v1075_v30 = vrot.slane %v1074_v23, 2  ;;  %v1084_v31 = vrot.slane %v1083_v24, 2 }
  0xb7   :  { %v1059_v32 = vrot.slane %v1058_v25, 1 }
  0xb8   :  { %v1068_v33 = vrot.slane %v1067_v26, 1  ;;  %v1076_v34 = vmax.f32 %v1074_v23, %v1075_v30  ;;  %v1085_v21 = vmax.f32 %v1083_v24, %v1084_v31 }
  0xb9   :  { %v1060_v49 = vmax.f32 %v1058_v25, %v1059_v32 }
  0xba   :  { %v1069_v44 = vmax.f32 %v1067_v26, %v1068_v33  ;;  %v1077_v28 = vrot.slane %v1076_v34, 1  ;;  %v1086_v36 = vrot.slane %v1085_v21, 1 }
  0xbb   :  { %vm1088_vm1 = vcmp.eq.f32.partialorder %v1817_v52, %v1060_v49  ;;  %vm1089_vm2 = vcmp.eq.f32.partialorder %v1820_v54, %v1060_v49 }
  0xbc   :  { %v1078_v40 = vmax.f32 %v1076_v34, %v1077_v28  ;;  %v1087_v41 = vmax.f32 %v1085_v21, %v1086_v36  ;;  %vm1090_vm3 = vcmp.eq.f32.partialorder %v1835_v63, %v1069_v44  ;;  %vm1091_vm4 = vcmp.eq.f32.partialorder %v1838_v51, %v1069_v44 }
  0xbd   :  { %v1096_v37 = vsel %vm1088_vm1, %v1619_v17, 16  ;;  %v1097_v42 = vsel %vm1089_vm2, %v2055_v35, 16  ;;  %v1098_v43 = vsel %vm1090_vm3, %v1619_v17, 16  ;;  %v1099_v29 = vsel %vm1091_vm4, %v2055_v35, 16 }
  0xbe   :  { %vm1092_vm5 = vcmp.eq.f32.partialorder %v1849_v7, %v1078_v40  ;;  %vm1093_vm6 = vcmp.eq.f32.partialorder %v1852_v53, %v1078_v40  ;;  %vm1094_vm7 = vcmp.eq.f32.partialorder %v1864_v58, %v1087_v41  ;;  %vm1095_vm8 = vcmp.eq.f32.partialorder %v1867_v60, %v1087_v41 }
  0xbf   :  { %v1100_v46 = vsel %vm1092_vm5, %v1619_v17, 16  ;;  %v1101_v47 = vsel %vm1093_vm6, %v2055_v35, 16  ;;  %v1102_v48 = vsel %vm1094_vm7, %v1619_v17, 16  ;;  %v1103_v56 = vsel %vm1095_vm8, %v2055_v35, 16 }
  0xc0   :  { %v1104_v59 = vsel %vm544_vm0, %v1096_v37, 2147483647  ;;  %v1105_v45 = vsel %vm544_vm0, %v1097_v42, 2147483647  ;;  %v1117_v61 = vsel %vm544_vm0, %v1098_v43, 2147483647 }
  0xc1   :  { %vm1106_vm9 = vcmp.lt.s32.totalorder %v1104_v59, %v1105_v45  ;;  %v1118_v62 = vsel %vm544_vm0, %v1099_v29, 2147483647  ;;  %v1130_v50 = vsel %vm544_vm0, %v1100_v46, 2147483647  ;;  %v1131_v1 = vsel %vm544_vm0, %v1101_v47, 2147483647 }
  0xc2   :  { %v1107_v3 = vsel %vm1106_vm9, %v1104_v59, %v1105_v45  ;;  %vm1119_vm10 = vcmp.lt.s32.totalorder %v1117_v61, %v1118_v62  ;;  %vm1132_vm11 = vcmp.lt.s32.totalorder %v1130_v50, %v1131_v1  ;;  %v1143_v4 = vsel %vm544_vm0, %v1102_v48, 2147483647 }
  0xc3   :  { %v1108_v5 = vrot.slane %v1107_v3, 4  ;;  %v1120_v6 = vsel %vm1119_vm10, %v1117_v61, %v1118_v62  ;;  %v1133_v55 = vsel %vm1132_vm11, %v1130_v50, %v1131_v1  ;;  %v1144_v8 = vsel %vm544_vm0, %v1103_v56, 2147483647 }
  0xc4   :  { %v1121_v57 = vrot.slane %v1120_v6, 4  ;;  %v1134_v9 = vrot.slane %v1133_v55, 4  ;;  %vm1145_vm12 = vcmp.lt.s32.totalorder %v1143_v4, %v1144_v8 }
  0xc5   :  { %vm1109_vm13 = vcmp.lt.s32.totalorder %v1107_v3, %v1108_v5  ;;  %v1146_v10 = vsel %vm1145_vm12, %v1143_v4, %v1144_v8 }
  0xc6   :  { %v1110_v38 = vsel %vm1109_vm13, %v1107_v3, %v1108_v5  ;;  %vm1122_vm14 = vcmp.lt.s32.totalorder %v1120_v6, %v1121_v57  ;;  %vm1135_vm15 = vcmp.lt.s32.totalorder %v1133_v55, %v1134_v9  ;;  %v1147_v27 = vrot.slane %v1146_v10, 4 }
  0xc7   :  { %v1111_v11 = vrot.slane %v1110_v38, 2  ;;  %v1123_v12 = vsel %vm1122_vm14, %v1120_v6, %v1121_v57  ;;  %v1136_v13 = vsel %vm1135_vm15, %v1133_v55, %v1134_v9 }
  0xc8   :  { %v1124_v14 = vrot.slane %v1123_v12, 2  ;;  %v1137_v15 = vrot.slane %v1136_v13, 2  ;;  %vm1148_vm1 = vcmp.lt.s32.totalorder %v1146_v10, %v1147_v27 }
  0xc9   :  { %vm1112_vm2 = vcmp.lt.s32.totalorder %v1110_v38, %v1111_v11  ;;  %v1149_v16 = vsel %vm1148_vm1, %v1146_v10, %v1147_v27 }
  0xca   :  { %v1113_v18 = vsel %vm1112_vm2, %v1110_v38, %v1111_v11  ;;  %vm1125_vm3 = vcmp.lt.s32.totalorder %v1123_v12, %v1124_v14  ;;  %vm1138_vm4 = vcmp.lt.s32.totalorder %v1136_v13, %v1137_v15  ;;  %v1150_v19 = vrot.slane %v1149_v16, 2 }
  0xcb   :  { %v1114_v0 = vrot.slane %v1113_v18, 1  ;;  %v1126_v2 = vsel %vm1125_vm3, %v1123_v12, %v1124_v14  ;;  %v1139_v22 = vsel %vm1138_vm4, %v1136_v13, %v1137_v15 }
  0xcc   :  { %v1127_v39 = vrot.slane %v1126_v2, 1  ;;  %v1140_v20 = vrot.slane %v1139_v22, 1  ;;  %vm1151_vm5 = vcmp.lt.s32.totalorder %v1149_v16, %v1150_v19 }
  0xcd   :  { %vm1115_vm6 = vcmp.lt.s32.totalorder %v1113_v18, %v1114_v0  ;;  %v1152_v23 = vsel %vm1151_vm5, %v1149_v16, %v1150_v19 }
  0xce   :  { %v2081_v24 = vsel %vm1115_vm6, %v1113_v18, %v1114_v0  ;;  %vm1128_vm7 = vcmp.lt.s32.totalorder %v1126_v2, %v1127_v39  ;;  %vm1141_vm8 = vcmp.lt.s32.totalorder %v1139_v22, %v1140_v20  ;;  %v1153_v25 = vrot.slane %v1152_v23, 1 }
  0xcf   :  { %v2083_v26 = vsel %vm1128_vm7, %v1126_v2, %v1127_v39  ;;  %v2085_v30 = vsel %vm1141_vm8, %v1139_v22, %v1140_v20  ;;  %vm1156_vm9 = vcmp.eq.s32.totalorder %v1619_v17, %v2081_v24  ;;  %vm1157_vm10 = vcmp.eq.s32.totalorder %v2055_v35, %v2081_v24 }
  0xd0   :  { %vm1154_vm11 = vcmp.lt.s32.totalorder %v1152_v23, %v1153_v25  ;;  %vm1158_vm12 = vcmp.eq.s32.totalorder %v1619_v17, %v2083_v26  ;;  %vm1159_vm13 = vcmp.eq.s32.totalorder %v2055_v35, %v2083_v26  ;;  %vm1160_vm14 = vcmp.eq.s32.totalorder %v1619_v17, %v2085_v30 }
  0xd1   :  { %v2097_v31 = vsel %vm1154_vm11, %v1152_v23, %v1153_v25  ;;  %vm1161_vm15 = vcmp.eq.s32.totalorder %v2055_v35, %v2085_v30  ;;  %v2102_v32 = vsel %vm1156_vm9, -inf, %v1817_v52  ;;  %v2105_v33 = vsel %vm1157_vm10, -inf, %v1820_v54 }
  0xd2   :  { %vm1162_vm1 = vcmp.eq.s32.totalorder %v1619_v17, %v2097_v31  ;;  %vm1163_vm2 = vcmp.eq.s32.totalorder %v2055_v35, %v2097_v31  ;;  %v2112_v34 = vsel %vm1158_vm12, -inf, %v1835_v63  ;;  %v2115_v21 = vsel %vm1159_vm13, -inf, %v1838_v51 }
  0xd3   :  { %v2118_v49 = vsel %vm1160_vm14, -inf, %v1849_v7  ;;  %v2121_v52 = vsel %vm1161_vm15, -inf, %v1852_v53  ;;  %v2124_v54 = vsel %vm1162_vm1, -inf, %v1864_v58  ;;  %v2127_v44 = vsel %vm1163_vm2, -inf, %v1867_v60 }
  0xd4   :  { %v1172_v28 = vsel %vm544_vm0, %v2102_v32, -inf  ;;  %v1173_v63 = vsel %vm544_vm0, %v2105_v33, -inf  ;;  %v1181_v51 = vsel %vm544_vm0, %v2112_v34, -inf  ;;  %v1182_v7 = vsel %vm544_vm0, %v2115_v21, -inf }
  0xd5   :  { %v1174_v53 = vmax.f32 %v1172_v28, %v1173_v63  ;;  %v1183_v36 = vmax.f32 %v1181_v51, %v1182_v7  ;;  %v1190_v58 = vsel %vm544_vm0, %v2118_v49, -inf  ;;  %v1191_v60 = vsel %vm544_vm0, %v2121_v52, -inf }
  0xd6   :  { %v1192_v40 = vmax.f32 %v1190_v58, %v1191_v60  ;;  %v1199_v41 = vsel %vm544_vm0, %v2124_v54, -inf  ;;  %v1200_v37 = vsel %vm544_vm0, %v2127_v44, -inf }
  0xd7   :  { %v1175_v42 = vrot.slane %v1174_v53, 4  ;;  %v1184_v43 = vrot.slane %v1183_v36, 4  ;;  %v1201_v29 = vmax.f32 %v1199_v41, %v1200_v37 }
  0xd8   :  { %v1193_v46 = vrot.slane %v1192_v40, 4 }
  0xd9   :  { %v1176_v47 = vmax.f32 %v1174_v53, %v1175_v42  ;;  %v1185_v48 = vmax.f32 %v1183_v36, %v1184_v43  ;;  %v1202_v56 = vrot.slane %v1201_v29, 4 }
  0xda   :  { %v1194_v59 = vmax.f32 %v1192_v40, %v1193_v46 }
  0xdb   :  { %v1177_v45 = vrot.slane %v1176_v47, 2  ;;  %v1186_v61 = vrot.slane %v1185_v48, 2  ;;  %v1203_v62 = vmax.f32 %v1201_v29, %v1202_v56 }
  0xdc   :  { %v1195_v50 = vrot.slane %v1194_v59, 2 }
  0xdd   :  { %v1178_v1 = vmax.f32 %v1176_v47, %v1177_v45  ;;  %v1187_v3 = vmax.f32 %v1185_v48, %v1186_v61  ;;  %v1204_v4 = vrot.slane %v1203_v62, 2 }
  0xde   :  { %v1196_v5 = vmax.f32 %v1194_v59, %v1195_v50 }
  0xdf   :  { %v1179_v6 = vrot.slane %v1178_v1, 1  ;;  %v1188_v55 = vrot.slane %v1187_v3, 1  ;;  %v1205_v8 = vmax.f32 %v1203_v62, %v1204_v4 }
  0xe0   :  { %v1197_v57 = vrot.slane %v1196_v5, 1 }
  0xe1   :  { %v1180_v9 = vmax.f32 %v1178_v1, %v1179_v6  ;;  %v1189_v10 = vmax.f32 %v1187_v3, %v1188_v55  ;;  %v1206_v38 = vrot.slane %v1205_v8, 1 }
  0xe2   :  { %v1198_v27 = vmax.f32 %v1196_v5, %v1197_v57 }
  0xe3   :  { %v1207_v11 = vmax.f32 %v1205_v8, %v1206_v38  ;;  %vm1208_vm3 = vcmp.eq.f32.partialorder %v2102_v32, %v1180_v9  ;;  %vm1209_vm4 = vcmp.eq.f32.partialorder %v2105_v33, %v1180_v9  ;;  %vm1210_vm5 = vcmp.eq.f32.partialorder %v2112_v34, %v1189_v10 }
  0xe4   :  { %vm1211_vm6 = vcmp.eq.f32.partialorder %v2115_v21, %v1189_v10  ;;  %vm1212_vm7 = vcmp.eq.f32.partialorder %v2118_v49, %v1198_v27  ;;  %vm1213_vm8 = vcmp.eq.f32.partialorder %v2121_v52, %v1198_v27  ;;  %v1216_v12 = vsel %vm1208_vm3, %v1619_v17, 16 }
  0xe5   :  { %vm1214_vm9 = vcmp.eq.f32.partialorder %v2124_v54, %v1207_v11  ;;  %vm1215_vm10 = vcmp.eq.f32.partialorder %v2127_v44, %v1207_v11  ;;  %v1217_v13 = vsel %vm1209_vm4, %v2055_v35, 16  ;;  %v1218_v14 = vsel %vm1210_vm5, %v1619_v17, 16 }
  0xe6   :  { %v1219_v15 = vsel %vm1211_vm6, %v2055_v35, 16  ;;  %v1220_v16 = vsel %vm1212_vm7, %v1619_v17, 16  ;;  %v1221_v18 = vsel %vm1213_vm8, %v2055_v35, 16  ;;  %v1222_v19 = vsel %vm1214_vm9, %v1619_v17, 16 }
  0xe7   :  { %v1223_v0 = vsel %vm1215_vm10, %v2055_v35, 16  ;;  %v1224_v2 = vsel %vm544_vm0, %v1216_v12, 2147483647  ;;  %v1225_v22 = vsel %vm544_vm0, %v1217_v13, 2147483647  ;;  %vm1516_vm10 = vcmask 1040384  }
  0xe8   :  { %vm1226_vm11 = vcmp.lt.s32.totalorder %v1224_v2, %v1225_v22  ;;  %v1237_v39 = vsel %vm544_vm0, %v1218_v14, 2147483647  ;;  %v1238_v20 = vsel %vm544_vm0, %v1219_v15, 2147483647  ;;  %v1250_v23 = vsel %vm544_vm0, %v1220_v16, 2147483647 }
  0xe9   :  { %v1227_v25 = vsel %vm1226_vm11, %v1224_v2, %v1225_v22  ;;  %vm1239_vm12 = vcmp.lt.s32.totalorder %v1237_v39, %v1238_v20  ;;  %v1251_v28 = vsel %vm544_vm0, %v1221_v18, 2147483647  ;;  %v1263_v63 = vsel %vm544_vm0, %v1222_v19, 2147483647 }
  0xea   :  { %v1228_v51 = vrot.slane %v1227_v25, 4  ;;  %v1240_v7 = vsel %vm1239_vm12, %v1237_v39, %v1238_v20  ;;  %vm1252_vm13 = vcmp.lt.s32.totalorder %v1250_v23, %v1251_v28  ;;  %v1264_v53 = vsel %vm544_vm0, %v1223_v0, 2147483647 }
  0xeb   :  { %v1241_v36 = vrot.slane %v1240_v7, 4  ;;  %v1253_v58 = vsel %vm1252_vm13, %v1250_v23, %v1251_v28  ;;  %vm1265_vm14 = vcmp.lt.s32.totalorder %v1263_v63, %v1264_v53 }
  0xec   :  { %vm1229_vm15 = vcmp.lt.s32.totalorder %v1227_v25, %v1228_v51  ;;  %v1254_v60 = vrot.slane %v1253_v58, 4  ;;  %v1266_v40 = vsel %vm1265_vm14, %v1263_v63, %v1264_v53 }
  0xed   :  { %v1230_v41 = vsel %vm1229_vm15, %v1227_v25, %v1228_v51  ;;  %vm1242_vm1 = vcmp.lt.s32.totalorder %v1240_v7, %v1241_v36  ;;  %v1267_v37 = vrot.slane %v1266_v40, 4 }
  0xee   :  { %v1231_v42 = vrot.slane %v1230_v41, 2  ;;  %v1243_v43 = vsel %vm1242_vm1, %v1240_v7, %v1241_v36  ;;  %vm1255_vm2 = vcmp.lt.s32.totalorder %v1253_v58, %v1254_v60 }
  0xef   :  { %v1244_v29 = vrot.slane %v1243_v43, 2  ;;  %v1256_v46 = vsel %vm1255_vm2, %v1253_v58, %v1254_v60  ;;  %vm1268_vm3 = vcmp.lt.s32.totalorder %v1266_v40, %v1267_v37 }
  0xf0   :  { %vm1232_vm4 = vcmp.lt.s32.totalorder %v1230_v41, %v1231_v42  ;;  %v1257_v47 = vrot.slane %v1256_v46, 2  ;;  %v1269_v48 = vsel %vm1268_vm3, %v1266_v40, %v1267_v37 }
  0xf1   :  { %v1233_v56 = vsel %vm1232_vm4, %v1230_v41, %v1231_v42  ;;  %vm1245_vm5 = vcmp.lt.s32.totalorder %v1243_v43, %v1244_v29  ;;  %v1270_v59 = vrot.slane %v1269_v48, 2 }
  0xf2   :  { %v1234_v45 = vrot.slane %v1233_v56, 1  ;;  %v1246_v61 = vsel %vm1245_vm5, %v1243_v43, %v1244_v29  ;;  %vm1258_vm6 = vcmp.lt.s32.totalorder %v1256_v46, %v1257_v47 }
  0xf3   :  { %v1247_v62 = vrot.slane %v1246_v61, 1  ;;  %v1259_v50 = vsel %vm1258_vm6, %v1256_v46, %v1257_v47  ;;  %vm1271_vm7 = vcmp.lt.s32.totalorder %v1269_v48, %v1270_v59 }
  0xf4   :  { %vm1235_vm8 = vcmp.lt.s32.totalorder %v1233_v56, %v1234_v45  ;;  %v1260_v1 = vrot.slane %v1259_v50, 1  ;;  %v1272_v3 = vsel %vm1271_vm7, %v1269_v48, %v1270_v59 }
  0xf5   :  { %v1236_v4 = vsel %vm1235_vm8, %v1233_v56, %v1234_v45  ;;  %vm1248_vm9 = vcmp.lt.s32.totalorder %v1246_v61, %v1247_v62  ;;  %v1273_v5 = vrot.slane %v1272_v3, 1 }
  0xf6   :  { %v1249_v6 = vsel %vm1248_vm9, %v1246_v61, %v1247_v62  ;;  %vm1261_vm11 = vcmp.lt.s32.totalorder %v1259_v50, %v1260_v1  ;;  %vm1276_vm12 = vcmp.eq.s32.totalorder %v1619_v17, %v1236_v4  ;;  %vm1277_vm13 = vcmp.eq.s32.totalorder %v2055_v35, %v1236_v4 }
  0xf7   :  { %v1262_v55 = vsel %vm1261_vm11, %v1259_v50, %v1260_v1  ;;  %vm1274_vm14 = vcmp.lt.s32.totalorder %v1272_v3, %v1273_v5  ;;  %vm1278_vm15 = vcmp.eq.s32.totalorder %v1619_v17, %v1249_v6  ;;  %vm1279_vm1 = vcmp.eq.s32.totalorder %v2055_v35, %v1249_v6 }
  0xf8   :  { %v1275_v8 = vsel %vm1274_vm14, %v1272_v3, %v1273_v5  ;;  %vm1280_vm2 = vcmp.eq.s32.totalorder %v1619_v17, %v1262_v55  ;;  %vm1281_vm3 = vcmp.eq.s32.totalorder %v2055_v35, %v1262_v55  ;;  %v2176_v57 = vsel %vm1276_vm12, -inf, %v2102_v32 }
  0xf9   :  { %vm1282_vm4 = vcmp.eq.s32.totalorder %v1619_v17, %v1275_v8  ;;  %vm1283_vm5 = vcmp.eq.s32.totalorder %v2055_v35, %v1275_v8  ;;  %v2181_v9 = vsel %vm1277_vm13, -inf, %v2105_v33  ;;  %v2184_v10 = vsel %vm1278_vm15, -inf, %v2112_v34 }
  0xfa   :  { %v2187_v38 = vsel %vm1279_vm1, -inf, %v2115_v21  ;;  %v2190_v27 = vsel %vm1280_vm2, -inf, %v2118_v49  ;;  %v2193_v11 = vsel %vm1281_vm3, -inf, %v2121_v52  ;;  %v2196_v32 = vsel %vm1282_vm4, -inf, %v2124_v54 }
  0xfb   :  { %v2199_v12 = vsel %vm1283_vm5, -inf, %v2127_v44  ;;  %v1292_v33 = vsel %vm544_vm0, %v2176_v57, -inf  ;;  %v1293_v34 = vsel %vm544_vm0, %v2181_v9, -inf  ;;  %v1301_v21 = vsel %vm544_vm0, %v2184_v10, -inf }
  0xfc   :  { %v1294_v49 = vmax.f32 %v1292_v33, %v1293_v34  ;;  %v1302_v52 = vsel %vm544_vm0, %v2187_v38, -inf  ;;  %v1310_v54 = vsel %vm544_vm0, %v2190_v27, -inf  ;;  %v1311_v44 = vsel %vm544_vm0, %v2193_v11, -inf }
  0xfd   :  { %v1303_v13 = vmax.f32 %v1301_v21, %v1302_v52  ;;  %v1312_v14 = vmax.f32 %v1310_v54, %v1311_v44  ;;  %v1319_v15 = vsel %vm544_vm0, %v2196_v32, -inf  ;;  %v1320_v16 = vsel %vm544_vm0, %v2199_v12, -inf }
  0xfe   :  { %v1295_v18 = vrot.slane %v1294_v49, 4  ;;  %v1321_v19 = vmax.f32 %v1319_v15, %v1320_v16  ;;  %v2219_v0 = vsel %vm1516_vm10, %v2081_v24, %v1236_v4  ;;  %v2223_v2 = vsel %vm1516_vm10, %v2083_v26, %v1249_v6 }
  0xff   :  { %v1304_v22 = vrot.slane %v1303_v13, 4  ;;  %v1313_v39 = vrot.slane %v1312_v14, 4  ;;  %v2227_v20 = vsel %vm1516_vm10, %v2085_v30, %v1262_v55  ;;  %v2231_v23 = vsel %vm1516_vm10, %v2097_v31, %v1275_v8 }
 0x100   :  { %v1296_v25 = vmax.f32 %v1294_v49, %v1295_v18  ;;  %v1322_v28 = vrot.slane %v1321_v19, 4 }
 0x101   :  { %v1305_v63 = vmax.f32 %v1303_v13, %v1304_v22  ;;  %v1314_v51 = vmax.f32 %v1312_v14, %v1313_v39 }
 0x102   :  { %v1297_v24 = vrot.slane %v1296_v25, 2  ;;  %v1323_v7 = vmax.f32 %v1321_v19, %v1322_v28 }
 0x103   :  { %v1306_v53 = vrot.slane %v1305_v63, 2  ;;  %v1315_v36 = vrot.slane %v1314_v51, 2 }
 0x104   :  { %v1298_v26 = vmax.f32 %v1296_v25, %v1297_v24  ;;  %v1324_v58 = vrot.slane %v1323_v7, 2 }
 0x105   :  { %v1307_v60 = vmax.f32 %v1305_v63, %v1306_v53  ;;  %v1316_v40 = vmax.f32 %v1314_v51, %v1315_v36 }
 0x106   :  { %v1299_v41 = vrot.slane %v1298_v26, 1  ;;  %v1325_v37 = vmax.f32 %v1323_v7, %v1324_v58 }
 0x107   :  { %v1308_v30 = vrot.slane %v1307_v60, 1  ;;  %v1317_v42 = vrot.slane %v1316_v40, 1 }
 0x108   :  { %v1300_v43 = vmax.f32 %v1298_v26, %v1299_v41  ;;  %v1326_v29 = vrot.slane %v1325_v37, 1 }
 0x109   :  { %v1309_v31 = vmax.f32 %v1307_v60, %v1308_v30  ;;  %v1318_v46 = vmax.f32 %v1316_v40, %v1317_v42 }
 0x10a   :  { %v1327_v47 = vmax.f32 %v1325_v37, %v1326_v29  ;;  %vm1328_vm6 = vcmp.eq.f32.partialorder %v2176_v57, %v1300_v43  ;;  %vm1329_vm7 = vcmp.eq.f32.partialorder %v2181_v9, %v1300_v43 }
 0x10b   :  { %vm1330_vm8 = vcmp.eq.f32.partialorder %v2184_v10, %v1309_v31  ;;  %vm1331_vm9 = vcmp.eq.f32.partialorder %v2187_v38, %v1309_v31  ;;  %vm1332_vm10 = vcmp.eq.f32.partialorder %v2190_v27, %v1318_v46  ;;  %vm1333_vm11 = vcmp.eq.f32.partialorder %v2193_v11, %v1318_v46 }
 0x10c   :  { %vm1334_vm12 = vcmp.eq.f32.partialorder %v2196_v32, %v1327_v47  ;;  %vm1335_vm13 = vcmp.eq.f32.partialorder %v2199_v12, %v1327_v47  ;;  %v1336_v48 = vsel %vm1328_vm6, %v1619_v17, 16  ;;  %v1337_v56 = vsel %vm1329_vm7, %v2055_v35, 16 }
 0x10d   :  { %v1338_v59 = vsel %vm1330_vm8, %v1619_v17, 16  ;;  %v1339_v45 = vsel %vm1331_vm9, %v2055_v35, 16  ;;  %v1340_v61 = vsel %vm1332_vm10, %v1619_v17, 16  ;;  %v1341_v62 = vsel %vm1333_vm11, %v2055_v35, 16 }
 0x10e   :  { %v1342_v50 = vsel %vm1334_vm12, %v1619_v17, 16  ;;  %v1343_v1 = vsel %vm1335_vm13, %v2055_v35, 16  ;;  %v1344_v3 = vsel %vm544_vm0, %v1336_v48, 2147483647  ;;  %v1345_v4 = vsel %vm544_vm0, %v1337_v56, 2147483647 }
 0x10f   :  { %vm1346_vm14 = vcmp.lt.s32.totalorder %v1344_v3, %v1345_v4  ;;  %v1357_v5 = vsel %vm544_vm0, %v1338_v59, 2147483647  ;;  %v1358_v6 = vsel %vm544_vm0, %v1339_v45, 2147483647  ;;  %v1370_v55 = vsel %vm544_vm0, %v1340_v61, 2147483647 }
 0x110   :  { %v1347_v8 = vsel %vm1346_vm14, %v1344_v3, %v1345_v4  ;;  %vm1359_vm15 = vcmp.lt.s32.totalorder %v1357_v5, %v1358_v6  ;;  %v1371_v33 = vsel %vm544_vm0, %v1341_v62, 2147483647  ;;  %v1383_v34 = vsel %vm544_vm0, %v1342_v50, 2147483647 }
 0x111   :  { %v1348_v21 = vrot.slane %v1347_v8, 4  ;;  %v1360_v49 = vsel %vm1359_vm15, %v1357_v5, %v1358_v6  ;;  %vm1372_vm1 = vcmp.lt.s32.totalorder %v1370_v55, %v1371_v33  ;;  %v1384_v52 = vsel %vm544_vm0, %v1343_v1, 2147483647 }
 0x112   :  { %v1361_v54 = vrot.slane %v1360_v49, 4  ;;  %v1373_v44 = vsel %vm1372_vm1, %v1370_v55, %v1371_v33  ;;  %vm1385_vm2 = vcmp.lt.s32.totalorder %v1383_v34, %v1384_v52  ;;  %vm1521_vm13 = vcmask 1041408  }
 0x113   :  { %vm1349_vm3 = vcmp.lt.s32.totalorder %v1347_v8, %v1348_v21  ;;  %v1374_v13 = vrot.slane %v1373_v44, 4  ;;  %v1386_v14 = vsel %vm1385_vm2, %v1383_v34, %v1384_v52 }
 0x114   :  { %v1350_v15 = vsel %vm1349_vm3, %v1347_v8, %v1348_v21  ;;  %vm1362_vm4 = vcmp.lt.s32.totalorder %v1360_v49, %v1361_v54  ;;  %v1387_v16 = vrot.slane %v1386_v14, 4 }
 0x115   :  { %v1351_v18 = vrot.slane %v1350_v15, 2  ;;  %v1363_v19 = vsel %vm1362_vm4, %v1360_v49, %v1361_v54  ;;  %vm1375_vm5 = vcmp.lt.s32.totalorder %v1373_v44, %v1374_v13 }
 0x116   :  { %v1364_v22 = vrot.slane %v1363_v19, 2  ;;  %v1376_v39 = vsel %vm1375_vm5, %v1373_v44, %v1374_v13  ;;  %vm1388_vm6 = vcmp.lt.s32.totalorder %v1386_v14, %v1387_v16 }
 0x117   :  { %vm1352_vm7 = vcmp.lt.s32.totalorder %v1350_v15, %v1351_v18  ;;  %v1377_v25 = vrot.slane %v1376_v39, 2  ;;  %v1389_v28 = vsel %vm1388_vm6, %v1386_v14, %v1387_v16 }
 0x118   :  { %v1353_v63 = vsel %vm1352_vm7, %v1350_v15, %v1351_v18  ;;  %vm1365_vm8 = vcmp.lt.s32.totalorder %v1363_v19, %v1364_v22  ;;  %v1390_v51 = vrot.slane %v1389_v28, 2 }
 0x119   :  { %v1354_v24 = vrot.slane %v1353_v63, 1  ;;  %v1366_v7 = vsel %vm1365_vm8, %v1363_v19, %v1364_v22  ;;  %vm1378_vm9 = vcmp.lt.s32.totalorder %v1376_v39, %v1377_v25 }
 0x11a   :  { %v1367_v53 = vrot.slane %v1366_v7, 1  ;;  %v1379_v36 = vsel %vm1378_vm9, %v1376_v39, %v1377_v25  ;;  %vm1391_vm10 = vcmp.lt.s32.totalorder %v1389_v28, %v1390_v51 }
 0x11b   :  { %vm1355_vm11 = vcmp.lt.s32.totalorder %v1353_v63, %v1354_v24  ;;  %v1380_v26 = vrot.slane %v1379_v36, 1  ;;  %v1392_v58 = vsel %vm1391_vm10, %v1389_v28, %v1390_v51 }
 0x11c   :  { %v1356_v60 = vsel %vm1355_vm11, %v1353_v63, %v1354_v24  ;;  %vm1368_vm12 = vcmp.lt.s32.totalorder %v1366_v7, %v1367_v53  ;;  %v1393_v40 = vrot.slane %v1392_v58, 1 }
 0x11d   :  { %v1369_v41 = vsel %vm1368_vm12, %v1366_v7, %v1367_v53  ;;  %vm1381_vm14 = vcmp.lt.s32.totalorder %v1379_v36, %v1380_v26  ;;  %vm1396_vm15 = vcmp.eq.s32.totalorder %v1619_v17, %v1356_v60  ;;  %vm1397_vm1 = vcmp.eq.s32.totalorder %v2055_v35, %v1356_v60 }
 0x11e   :  { %v1382_v37 = vsel %vm1381_vm14, %v1379_v36, %v1380_v26  ;;  %vm1394_vm2 = vcmp.lt.s32.totalorder %v1392_v58, %v1393_v40  ;;  %vm1398_vm3 = vcmp.eq.s32.totalorder %v1619_v17, %v1369_v41  ;;  %vm1399_vm4 = vcmp.eq.s32.totalorder %v2055_v35, %v1369_v41 }
 0x11f   :  { %v1395_v30 = vsel %vm1394_vm2, %v1392_v58, %v1393_v40  ;;  %vm1400_vm5 = vcmp.eq.s32.totalorder %v1619_v17, %v1382_v37  ;;  %vm1401_vm6 = vcmp.eq.s32.totalorder %v2055_v35, %v1382_v37  ;;  %v1404_v42 = vsel %vm1396_vm15, -inf, %v2176_v57 }
 0x120   :  { %vm1402_vm7 = vcmp.eq.s32.totalorder %v1619_v17, %v1395_v30  ;;  %vm1403_vm8 = vcmp.eq.s32.totalorder %v2055_v35, %v1395_v30  ;;  %v1405_v43 = vsel %vm1397_vm1, -inf, %v2181_v9  ;;  %v1406_v29 = vsel %vm1398_vm3, -inf, %v2184_v10 }
 0x121   :  { %v1407_v31 = vsel %vm1399_vm4, -inf, %v2187_v38  ;;  %v1408_v46 = vsel %vm1400_vm5, -inf, %v2190_v27  ;;  %v1409_v47 = vsel %vm1401_vm6, -inf, %v2193_v11  ;;  %v1410_v48 = vsel %vm1402_vm7, -inf, %v2196_v32 }
 0x122   :  { %v1411_v56 = vsel %vm1403_vm8, -inf, %v2199_v12  ;;  %v1412_v57 = vsel %vm544_vm0, %v1404_v42, -inf  ;;  %v1413_v59 = vsel %vm544_vm0, %v1405_v43, -inf  ;;  %v1421_v45 = vsel %vm544_vm0, %v1406_v29, -inf }
 0x123   :  { %v1414_v61 = vmax.f32 %v1412_v57, %v1413_v59  ;;  %v1422_v9 = vsel %vm544_vm0, %v1407_v31, -inf  ;;  %v1430_v10 = vsel %vm544_vm0, %v1408_v46, -inf  ;;  %v1431_v38 = vsel %vm544_vm0, %v1409_v47, -inf }
 0x124   :  { %v1423_v27 = vmax.f32 %v1421_v45, %v1422_v9  ;;  %v1432_v62 = vmax.f32 %v1430_v10, %v1431_v38  ;;  %v1439_v11 = vsel %vm544_vm0, %v1410_v48, -inf  ;;  %v1440_v32 = vsel %vm544_vm0, %v1411_v56, -inf }
 0x125   :  { %v1415_v12 = vrot.slane %v1414_v61, 4  ;;  %v1441_v50 = vmax.f32 %v1439_v11, %v1440_v32  ;;  %v2283_v1 = vsel %vm1521_vm13, %v2219_v0, %v1356_v60  ;;  %v2287_v3 = vsel %vm1521_vm13, %v2223_v2, %v1369_v41 }
 0x126   :  { %v1424_v4 = vrot.slane %v1423_v27, 4  ;;  %v1433_v5 = vrot.slane %v1432_v62, 4  ;;  %v2291_v6 = vsel %vm1521_vm13, %v2227_v20, %v1382_v37  ;;  %v2295_v55 = vsel %vm1521_vm13, %v2231_v23, %v1395_v30 }
 0x127   :  { %v1416_v8 = vmax.f32 %v1414_v61, %v1415_v12  ;;  %v1442_v33 = vrot.slane %v1441_v50, 4 }
 0x128   :  { %v1425_v34 = vmax.f32 %v1423_v27, %v1424_v4  ;;  %v1434_v21 = vmax.f32 %v1432_v62, %v1433_v5 }
 0x129   :  { %v1417_v0 = vrot.slane %v1416_v8, 2  ;;  %v1443_v49 = vmax.f32 %v1441_v50, %v1442_v33 }
 0x12a   :  { %v1426_v52 = vrot.slane %v1425_v34, 2  ;;  %v1435_v54 = vrot.slane %v1434_v21, 2 }
 0x12b   :  { %v1418_v2 = vmax.f32 %v1416_v8, %v1417_v0  ;;  %v1444_v44 = vrot.slane %v1443_v49, 2 }
 0x12c   :  { %v1427_v13 = vmax.f32 %v1425_v34, %v1426_v52  ;;  %v1436_v14 = vmax.f32 %v1434_v21, %v1435_v54 }
 0x12d   :  { %v1419_v15 = vrot.slane %v1418_v2, 1  ;;  %v1445_v16 = vmax.f32 %v1443_v49, %v1444_v44 }
 0x12e   :  { %v1428_v20 = vrot.slane %v1427_v13, 1  ;;  %v1437_v18 = vrot.slane %v1436_v14, 1 }
 0x12f   :  { %v1420_v19 = vmax.f32 %v1418_v2, %v1419_v15  ;;  %v1446_v22 = vrot.slane %v1445_v16, 1 }
 0x130   :  { %v1429_v23 = vmax.f32 %v1427_v13, %v1428_v20  ;;  %v1438_v39 = vmax.f32 %v1436_v14, %v1437_v18 }
 0x131   :  { %v1447_v25 = vmax.f32 %v1445_v16, %v1446_v22  ;;  %vm1448_vm9 = vcmp.eq.f32.partialorder %v1404_v42, %v1420_v19  ;;  %vm1449_vm10 = vcmp.eq.f32.partialorder %v1405_v43, %v1420_v19 }
 0x132   :  { %vm1450_vm11 = vcmp.eq.f32.partialorder %v1406_v29, %v1429_v23  ;;  %vm1451_vm12 = vcmp.eq.f32.partialorder %v1407_v31, %v1429_v23  ;;  %vm1452_vm13 = vcmp.eq.f32.partialorder %v1408_v46, %v1438_v39  ;;  %vm1453_vm14 = vcmp.eq.f32.partialorder %v1409_v47, %v1438_v39 }
 0x133   :  { %vm1454_vm15 = vcmp.eq.f32.partialorder %v1410_v48, %v1447_v25  ;;  %vm1455_vm1 = vcmp.eq.f32.partialorder %v1411_v56, %v1447_v25  ;;  %v1456_v28 = vsel %vm1448_vm9, %v1619_v17, 16  ;;  %v1457_v63 = vsel %vm1449_vm10, %v2055_v35, 16 }
 0x134   :  { %v1458_v51 = vsel %vm1450_vm11, %v1619_v17, 16  ;;  %v1459_v24 = vsel %vm1451_vm12, %v2055_v35, 16  ;;  %v1460_v7 = vsel %vm1452_vm13, %v1619_v17, 16  ;;  %v1461_v53 = vsel %vm1453_vm14, %v2055_v35, 16 }
 0x135   :  { %v1462_v36 = vsel %vm1454_vm15, %v1619_v17, 16  ;;  %v1463_v26 = vsel %vm1455_vm1, %v2055_v35, 16  ;;  %v1464_v58 = vsel %vm544_vm0, %v1456_v28, 2147483647  ;;  %v1465_v60 = vsel %vm544_vm0, %v1457_v63, 2147483647 }
 0x136   :  { %vm1466_vm2 = vcmp.lt.s32.totalorder %v1464_v58, %v1465_v60  ;;  %v1477_v40 = vsel %vm544_vm0, %v1458_v51, 2147483647  ;;  %v1478_v41 = vsel %vm544_vm0, %v1459_v24, 2147483647  ;;  %v1490_v37 = vsel %vm544_vm0, %v1460_v7, 2147483647 }
 0x137   :  { %v1467_v30 = vsel %vm1466_vm2, %v1464_v58, %v1465_v60  ;;  %vm1479_vm3 = vcmp.lt.s32.totalorder %v1477_v40, %v1478_v41  ;;  %v1491_v42 = vsel %vm544_vm0, %v1461_v53, 2147483647  ;;  %v1503_v43 = vsel %vm544_vm0, %v1462_v36, 2147483647 }
 0x138   :  { %v1468_v17 = vrot.slane %v1467_v30, 4  ;;  %v1480_v29 = vsel %vm1479_vm3, %v1477_v40, %v1478_v41  ;;  %vm1492_vm4 = vcmp.lt.s32.totalorder %v1490_v37, %v1491_v42  ;;  %v1504_v35 = vsel %vm544_vm0, %v1463_v26, 2147483647 }
 0x139   :  { %v1481_v31 = vrot.slane %v1480_v29, 4  ;;  %v1493_v46 = vsel %vm1492_vm4, %v1490_v37, %v1491_v42  ;;  %vm1505_vm5 = vcmp.lt.s32.totalorder %v1503_v43, %v1504_v35  ;;  %vm1526_vm13 = vcmask 1042432  }
 0x13a   :  { %vm1469_vm6 = vcmp.lt.s32.totalorder %v1467_v30, %v1468_v17  ;;  %v1494_v47 = vrot.slane %v1493_v46, 4  ;;  %v1506_v48 = vsel %vm1505_vm5, %v1503_v43, %v1504_v35  ;;  %vm1531_vm15 = vcmask 519168  }
 0x13b   :  { %v1470_v56 = vsel %vm1469_vm6, %v1467_v30, %v1468_v17  ;;  %vm1482_vm7 = vcmp.lt.s32.totalorder %v1480_v29, %v1481_v31  ;;  %v1507_v57 = vrot.slane %v1506_v48, 4 }
 0x13c   :  { %v1471_v59 = vrot.slane %v1470_v56, 2  ;;  %v1483_v45 = vsel %vm1482_vm7, %v1480_v29, %v1481_v31  ;;  %vm1495_vm8 = vcmp.lt.s32.totalorder %v1493_v46, %v1494_v47 }
 0x13d   :  { %v1484_v61 = vrot.slane %v1483_v45, 2  ;;  %v1496_v9 = vsel %vm1495_vm8, %v1493_v46, %v1494_v47  ;;  %vm1508_vm9 = vcmp.lt.s32.totalorder %v1506_v48, %v1507_v57 }
 0x13e   :  { %vm1472_vm10 = vcmp.lt.s32.totalorder %v1470_v56, %v1471_v59  ;;  %v1497_v10 = vrot.slane %v1496_v9, 2  ;;  %v1509_v38 = vsel %vm1508_vm9, %v1506_v48, %v1507_v57 }
 0x13f   :  { %v1473_v27 = vsel %vm1472_vm10, %v1470_v56, %v1471_v59  ;;  %vm1485_vm0 = vcmp.lt.s32.totalorder %v1483_v45, %v1484_v61  ;;  %v1510_v62 = vrot.slane %v1509_v38, 2 }
 0x140   :  { %v1474_v11 = vrot.slane %v1473_v27, 1  ;;  %v1486_v32 = vsel %vm1485_vm0, %v1483_v45, %v1484_v61  ;;  %vm1498_vm11 = vcmp.lt.s32.totalorder %v1496_v9, %v1497_v10 }
 0x141   :  { %v1487_v12 = vrot.slane %v1486_v32, 1  ;;  %v1499_v50 = vsel %vm1498_vm11, %v1496_v9, %v1497_v10  ;;  %vm1511_vm12 = vcmp.lt.s32.totalorder %v1509_v38, %v1510_v62 }
 0x142   :  { %vm1475_vm14 = vcmp.lt.s32.totalorder %v1473_v27, %v1474_v11  ;;  %v1500_v4 = vrot.slane %v1499_v50, 1  ;;  %v1512_v5 = vsel %vm1511_vm12, %v1509_v38, %v1510_v62 }
 0x143   :  { %v1476_v8 = vsel %vm1475_vm14, %v1473_v27, %v1474_v11  ;;  %vm1488_vm1 = vcmp.lt.s32.totalorder %v1486_v32, %v1487_v12  ;;  %v1513_v33 = vrot.slane %v1512_v5, 1 }
 0x144   :  { %v1489_v34 = vsel %vm1488_vm1, %v1486_v32, %v1487_v12  ;;  %vm1501_vm2 = vcmp.lt.s32.totalorder %v1499_v50, %v1500_v4  ;;  %v1527_v21 = vsel %vm1526_vm13, %v2283_v1, %v1476_v8 }
 0x145   :  { %v1502_v0 = vsel %vm1501_vm2, %v1499_v50, %v1500_v4  ;;  %vm1514_vm3 = vcmp.lt.s32.totalorder %v1512_v5, %v1513_v33  ;;  %v1528_v49 = vsel %vm1526_vm13, %v2287_v3, %v1489_v34  ;;  %1532 = vst.msk [vmem:[%s2341_s4] sm:$0xf] %vm1531_vm15, %v1527_v21 }
 0x146   :  { %v1515_v52 = vsel %vm1514_vm3, %v1512_v5, %v1513_v33  ;;  %v1529_v54 = vsel %vm1526_vm13, %v2291_v6, %v1502_v0  ;;  %1533 = vst.msk [vmem:[%s2341_s4 + $0x4] sm:$0xf] %vm1531_vm15, %v1528_v49 }
 0x147   :  { %v1530_v1 = vsel %vm1526_vm13, %v2295_v55, %v1515_v52  ;;  %1534 = vst.msk [vmem:[%s2341_s4 + $0x8] sm:$0xf] %vm1531_vm15, %v1529_v54 }
 0x148   :  { %1535 = vst.msk [vmem:[%s2341_s4 + $0xc] sm:$0xf] %vm1531_vm15, %v1530_v1 }

// kernel: qtattb_forward.5
= control target key start
LH: loop header
LB: loop body
LE: loop exit
PB: predicated region body
PF: predicated region fallthrough
CT: control target
= control target key end

     0   :  { %v2787_v3 = vmov 1966171168   ;;  %v101_v5 = vlaneseq  ;;  %s4636_s0 = inlined_call_operand.vmem [shape: f32[8,4,256], index: 0, kind: input, shape index: {}]   ;;  %s4637_s1 = inlined_call_operand.vmem [shape: f32[8,16,256], index: 1, kind: input, shape index: {}]   ;;  %s4638_s2 = inlined_call_operand.vmem [shape: f32[16,8,256], index: 2, kind: input, shape index: {}]   ;;  %s4639_s3 = inlined_call_operand.vmem [shape: f32[4,8,256], index: 3, kind: output, shape index: {0}]   ;;  %s4640_s4 = inlined_call_operand.hbm [shape: s32[4,4,256], index: 4, kind: output, shape index: {1}]  }
   0x1   :  { %v17_v0 = vld [vmem:[%s4636_s0] sm:$0xff]  ;;  %v18_v1 = vld [vmem:[%s4636_s0 + $0x8] sm:$0xff]  ;;  %v19_v2 = vld [vmem:[%s4636_s0 + $0x10] sm:$0xff]  ;;  %v99_v4 = vunpack.c.l.s4 %v2787_v3 }
   0x2   :  { %v20_v6 = vld [vmem:[%s4636_s0 + $0x18] sm:$0xff]  ;;  %v21_v7 = vld [vmem:[%s4636_s0 + $0x20] sm:$0xff]  ;;  %v22_v8 = vld [vmem:[%s4636_s0 + $0x28] sm:$0xff]  ;;  %v25_v12 = vmul.f32 0.35355338, %v17_v0  ;;  %v2840_v17 = vshrl.u32 %v101_v5, 7 }
   0x3   :  { %v23_v9 = vld [vmem:[%s4636_s0 + $0x30] sm:$0xff]  ;;  %v24_v10 = vld [vmem:[%s4636_s0 + $0x38] sm:$0xff]  ;;  %v100_v11 = vunpack.c.0.s8 %v99_v4  ;;  %v26_v13 = vmul.f32 0.35355338, %v18_v1  ;;  %v27_v14 = vmul.f32 0.35355338, %v19_v2 }
   0x4   :  { %v28_v15 = vmul.f32 0.35355338, %v20_v6  ;;  %v29_v16 = vmul.f32 0.35355338, %v21_v7  ;;  %4699 = vst [vmem:[#allocation5_spill] sm:$0xff] %v2840_v17  ;;  %v2846_v22 = vsub.s32 0, %v2840_v17 }
   0x5   :  { %v30_v18 = vmul.f32 0.35355338, %v22_v8  ;;  %v31_v19 = vmul.f32 0.35355338, %v23_v9  ;;  %v32_v20 = vmul.f32 0.35355338, %v24_v10  ;;  %v2843_v21 = vsub.s32 %v100_v11, %v2840_v17 }
   0x6   :  { %v2849_v23 = vsub.s32 1, %v2840_v17  ;;  %v2878_v32 = vld [vmem:[%s4637_s1] sm:$0xff]  ;;  %v2883_v33 = vld [vmem:[%s4637_s1 + $0x8] sm:$0xff]  ;;  %v2888_v34 = vld [vmem:[%s4637_s1 + $0x10] sm:$0xff] }
   0x7   :  { %v2852_v24 = vrot.slane %v25_v12, %v2843_v21  ;;  %v2855_v25 = vrot.slane %v26_v13, %v2843_v21  ;;  %v2858_v26 = vrot.slane %v27_v14, %v2843_v21  ;;  %v2861_v27 = vrot.slane %v28_v15, %v2843_v21  ;;  %4702 = vst [vmem:[#allocation8_spill] sm:$0xff] %v2878_v32  ;;  %v2909_v39 = vld [vmem:[%s4637_s1 + $0x18] sm:$0xff]  ;;  %v2914_v40 = vld [vmem:[%s4637_s1 + $0x20] sm:$0xff]  ;;  %v2919_v41 = vld [vmem:[%s4637_s1 + $0x28] sm:$0xff] }
   0x8   :  { %4700 = vst [vmem:[#allocation6_spill] sm:$0xff] %v2849_v23  ;;  %v2864_v28 = vrot.slane %v29_v16, %v2843_v21  ;;  %v2867_v29 = vrot.slane %v30_v18, %v2843_v21  ;;  %v2870_v30 = vrot.slane %v31_v19, %v2843_v21  ;;  %v2873_v31 = vrot.slane %v32_v20, %v2843_v21  ;;  %v2940_v46 = vld [vmem:[%s4637_s1 + $0x30] sm:$0xff]  ;;  %v2945_v47 = vld [vmem:[%s4637_s1 + $0x38] sm:$0xff]  ;;  %v2950_v48 = vld [vmem:[%s4637_s1 + $0x40] sm:$0xff] }
   0x9   :  { %4703 = vst [vmem:[#allocation9_spill] sm:$0xff] %v2883_v33  ;;  %4704 = vst [vmem:[#allocation10_spill] sm:$0xff] %v2888_v34  ;;  %v2892_v35 = vrot.slane %v2852_v24, %v2843_v21  ;;  %v2896_v36 = vrot.slane %v2855_v25, %v2843_v21  ;;  %v2900_v37 = vrot.slane %v2858_v26, %v2843_v21  ;;  %v2963_v53 = vld [vmem:[%s4637_s1 + $0x48] sm:$0xff]  ;;  %v2968_v54 = vld [vmem:[%s4637_s1 + $0x50] sm:$0xff] }
   0xa   :  { %4701 = vst [vmem:[#allocation7_spill] sm:$0xff] %v2873_v31  ;;  %v2904_v38 = vrot.slane %v2861_v27, %v2843_v21  ;;  %4709 = vst [vmem:[#allocation15_spill] sm:$0xff] %v2909_v39  ;;  %v2923_v42 = vrot.slane %v2864_v28, %v2843_v21  ;;  %v2927_v43 = vrot.slane %v2867_v29, %v2843_v21  ;;  %v2973_v55 = vld [vmem:[%s4637_s1 + $0x58] sm:$0xff]  ;;  %v2986_v60 = vld [vmem:[%s4637_s1 + $0x60] sm:$0xff] }
   0xb   :  { %4705 = vst [vmem:[#allocation11_spill] sm:$0xff] %v2892_v35  ;;  %4706 = vst [vmem:[#allocation12_spill] sm:$0xff] %v2896_v36  ;;  %v2931_v44 = vrot.slane %v2870_v30, %v2843_v21  ;;  %v2935_v45 = vrot.slane %v2873_v31, %v2843_v21  ;;  %v125_v49 = vrot.slane %v2892_v35, %v2846_v22 }
   0xc   :  { %4707 = vst [vmem:[#allocation13_spill] sm:$0xff] %v2900_v37  ;;  %4708 = vst [vmem:[#allocation14_spill] sm:$0xff] %v2904_v38  ;;  %v129_v50 = vrot.slane %v2892_v35, %v2849_v23  ;;  %v206_v51 = vrot.slane %v2896_v36, %v2846_v22  ;;  %v210_v52 = vrot.slane %v2896_v36, %v2849_v23 }
   0xd   :  { %4710 = vst [vmem:[#allocation16_spill] sm:$0xff] %v2914_v40  ;;  %4711 = vst [vmem:[#allocation17_spill] sm:$0xff] %v2919_v41  ;;  %v303_v56 = vrot.slane %v2900_v37, %v2846_v22  ;;  %v307_v57 = vrot.slane %v2900_v37, %v2849_v23  ;;  %v400_v58 = vrot.slane %v2904_v38, %v2846_v22 }
   0xe   :  { %4712 = vst [vmem:[#allocation18_spill] sm:$0xff] %v2923_v42  ;;  %4713 = vst [vmem:[#allocation19_spill] sm:$0xff] %v2927_v43  ;;  %v404_v59 = vrot.slane %v2904_v38, %v2849_v23  ;;  %v162_v61 = vmul.f32 %v125_v49, %v2878_v32  ;;  %v163_v62 = vmul.f32 %v129_v50, %v2883_v33 }
   0xf   :  { %4714 = vst [vmem:[#allocation20_spill] sm:$0xff] %v2931_v44  ;;  %4715 = vst [vmem:[#allocation21_spill] sm:$0xff] %v2935_v45  ;;  %v164_v63 = vmul.f32 %v125_v49, %v2888_v34  ;;  %v165_v0 = vmul.f32 %v129_v50, %v2909_v39 }
  0x10   :  { %4716 = vst [vmem:[#allocation22_spill] sm:$0xff] %v2940_v46  ;;  %4717 = vst [vmem:[#allocation23_spill] sm:$0xff] %v2945_v47 }
  0x11   :  { %4718 = vst [vmem:[#allocation24_spill] sm:$0xff] %v2950_v48  ;;  %4719 = vst [vmem:[#allocation25_spill] sm:$0xff] %v2963_v53 }
  0x12   :  { %4720 = vst [vmem:[#allocation26_spill] sm:$0xff] %v2968_v54  ;;  %4721 = vst [vmem:[#allocation27_spill] sm:$0xff] %v2973_v55 }
  0x13   :  { %10 = vsyncpa [#allocation3], 0  ;;  %v2995_v1 = vld [vmem:[%s4637_s1 + $0x68] sm:$0xff]  ;;  %v3000_v2 = vld [vmem:[%s4637_s1 + $0x70] sm:$0xff]  ;;  %v243_v4 = vmul.f32 %v206_v51, %v2914_v40  ;;  %v244_v5 = vmul.f32 %v210_v52, %v2919_v41  ;;  %v245_v6 = vmul.f32 %v206_v51, %v2940_v46  ;;  %v246_v7 = vmul.f32 %v210_v52, %v2945_v47  ;;  %s2788_s30 = smov [#allocation2]  }
  0x14   :  { %v3005_v3 = vld [vmem:[%s4637_s1 + $0x78] sm:$0xff]  ;;  %v340_v8 = vmul.f32 %v303_v56, %v2950_v48  ;;  %v341_v9 = vmul.f32 %v307_v57, %v2963_v53  ;;  %v342_v10 = vmul.f32 %v303_v56, %v2968_v54  ;;  %v343_v11 = vmul.f32 %v307_v57, %v2973_v55  ;;  %v3018_v16 = vld [vmem:[%s4637_s1 + $0x80] sm:$0xff]  ;;  %v3023_v18 = vld [vmem:[%s4637_s1 + $0x88] sm:$0xff]  ;;  %s2678_s0 = sshll.u32 %s2788_s30, 4  ;;  %s4571_s0 = int_to_ptr.vmem [resolvable:$true] %s2678_s0 }
  0x15   :  { %v259_v12 = vadd.f32 %v243_v4, %v162_v61  ;;  %v260_v13 = vadd.f32 %v244_v5, %v163_v62  ;;  %v261_v14 = vadd.f32 %v245_v6, %v164_v63  ;;  %v262_v15 = vadd.f32 %v246_v7, %v165_v0  ;;  %v3032_v51 = vld [vmem:[%s4637_s1 + $0x90] sm:$0xff]  ;;  %v3037_v52 = vld [vmem:[%s4637_s1 + $0x98] sm:$0xff]  ;;  %v3042_v56 = vld [vmem:[%s4637_s1 + $0xa0] sm:$0xff]  ;;  %s2763_s9 = scalar_lea.vmem %s4571_s0, 512  ;;  %p2768_p1 = scmp.lt.s32.totalorder %s4571_s0, %s4571_s0 }
  0x16   :  { %v437_v19 = vmul.f32 %v400_v58, %v2986_v60  ;;  %v438_v20 = vmul.f32 %v404_v59, %v2995_v1  ;;  %v439_v49 = vmul.f32 %v400_v58, %v3000_v2  ;;  %v440_v50 = vmul.f32 %v404_v59, %v3005_v3  ;;  %v3047_v59 = vld [vmem:[%s4637_s1 + $0xa8] sm:$0xff]  ;;  %v3052_v63 = vld [vmem:[%s4637_s1 + $0xb0] sm:$0xff]  ;;  %v3057_v0 = vld [vmem:[%s4637_s1 + $0xb8] sm:$0xff]  ;;  %p2764_p0 = scmp.ne.s32.totalorder %s4571_s0, %s2763_s9  ;;  %p2769_p2 = scmp.lt.s32.totalorder %s2763_s9, %s2763_s9 }
  0x17   :  { %v356_v57 = vadd.f32 %v340_v8, %v259_v12  ;;  %v357_v61 = vadd.f32 %v341_v9, %v260_v13  ;;  %v358_v58 = vadd.f32 %v342_v10, %v261_v14  ;;  %v359_v62 = vadd.f32 %v343_v11, %v262_v15  ;;  %4722 = vst [vmem:[#allocation28_spill] sm:$0xff] %v3047_v59  ;;  %v3074_v17 = vld [vmem:[%s4637_s1 + $0xc0] sm:$0xff]  ;;  %v3113_v38 = vld [vmem:[%s4637_s1 + $0xf8] sm:$0xff] }
  0x18   :  { %4723 = vst [vmem:[#allocation29_spill] sm:$0xff] %v3057_v0  ;;  %v497_v4 = vrot.slane %v2923_v42, %v2846_v22  ;;  %v501_v5 = vrot.slane %v2923_v42, %v2849_v23  ;;  %v594_v6 = vrot.slane %v2927_v43, %v2846_v22  ;;  %v598_v7 = vrot.slane %v2927_v43, %v2849_v23  ;;  %v3108_v42 = vld [vmem:[%s4637_s1 + $0xf0] sm:$0xff]  ;;  %p2770_p3 = por %p2769_p2, %p2768_p1 }
  0x19   :  { %v453_v8 = vadd.f32 %v437_v19, %v356_v57  ;;  %v454_v9 = vadd.f32 %v438_v20, %v357_v61  ;;  %v455_v10 = vadd.f32 %v439_v49, %v358_v58  ;;  %v456_v11 = vadd.f32 %v440_v50, %v359_v62  ;;  %v3079_v19 = vld [vmem:[%s4637_s1 + $0xc8] sm:$0xff]  ;;  %v3088_v61 = vld [vmem:[%s4637_s1 + $0xd0] sm:$0xff]  ;;  %v3093_v58 = vld [vmem:[%s4637_s1 + $0xd8] sm:$0xff] }
  0x1a   :  { %v534_v12 = vmul.f32 %v497_v4, %v3018_v16  ;;  %v535_v13 = vmul.f32 %v501_v5, %v3023_v18  ;;  %v536_v14 = vmul.f32 %v497_v4, %v3032_v51  ;;  %v537_v15 = vmul.f32 %v501_v5, %v3037_v52  ;;  %v3098_v62 = vld [vmem:[%s4637_s1 + $0xe0] sm:$0xff]  ;;  %p2771_p4 = pnand %p2770_p3, %p2764_p0 }
  0x1b   :  { %v631_v20 = vmul.f32 %v594_v6, %v3042_v56  ;;  %v632_v49 = vmul.f32 %v598_v7, %v3047_v59  ;;  %v633_v50 = vmul.f32 %v594_v6, %v3052_v63  ;;  %v634_v57 = vmul.f32 %v598_v7, %v3057_v0  ;;  %v3103_v7 = vld [vmem:[%s4637_s1 + $0xe8] sm:$0xff] }
  0x1c   :  { %v550_v4 = vadd.f32 %v534_v12, %v453_v8  ;;  %v551_v5 = vadd.f32 %v535_v13, %v454_v9  ;;  %v552_v6 = vadd.f32 %v536_v14, %v455_v10  ;;  %v553_v43 = vadd.f32 %v537_v15, %v456_v11 }
  0x1d   :  { %v691_v8 = vrot.slane %v2931_v44, %v2846_v22  ;;  %v695_v9 = vrot.slane %v2931_v44, %v2849_v23  ;;  %v788_v10 = vrot.slane %v2935_v45, %v2846_v22  ;;  %v792_v11 = vrot.slane %v2935_v45, %v2849_v23 }
  0x1e   :  { %v647_v12 = vadd.f32 %v631_v20, %v550_v4  ;;  %v648_v13 = vadd.f32 %v632_v49, %v551_v5  ;;  %v649_v14 = vadd.f32 %v633_v50, %v552_v6  ;;  %v650_v15 = vadd.f32 %v634_v57, %v553_v43 }
  0x1f   :  { %v728_v37 = vmul.f32 %v691_v8, %v3074_v17  ;;  %v729_v36 = vmul.f32 %v695_v9, %v3079_v19  ;;  %v730_v35 = vmul.f32 %v691_v8, %v3088_v61  ;;  %v731_v0 = vmul.f32 %v695_v9, %v3093_v58 }
  0x20   :  { %v825_v44 = vmul.f32 %v788_v10, %v3098_v62  ;;  %v826_v59 = vmul.f32 %v792_v11, %v3103_v7  ;;  %v827_v31 = vmul.f32 %v788_v10, %v3108_v42  ;;  %v828_v45 = vmul.f32 %v792_v11, %v3113_v38 }
  0x21   :  { %v744_v20 = vadd.f32 %v728_v37, %v647_v12  ;;  %v745_v49 = vadd.f32 %v729_v36, %v648_v13  ;;  %v746_v50 = vadd.f32 %v730_v35, %v649_v14  ;;  %v747_v43 = vadd.f32 %v731_v0, %v650_v15 }
  0x22   :  { %v105_v57 = vcombine.high %v2852_v24, %v2852_v24  ;;  %v186_v4 = vcombine.high %v2855_v25, %v2855_v25  ;;  %v283_v5 = vcombine.high %v2858_v26, %v2858_v26  ;;  %v380_v6 = vcombine.high %v2861_v27, %v2861_v27 }
  0x23   :  { %v3139_v8 = vadd.f32 %v825_v44, %v744_v20  ;;  %v3141_v9 = vadd.f32 %v826_v59, %v745_v49  ;;  %v3143_v37 = vadd.f32 %v827_v31, %v746_v50  ;;  %v3145_v35 = vadd.f32 %v828_v45, %v747_v43 }
  0x24   :  { %v3148_v36 = vrot.slane %v105_v57, %v2843_v21  ;;  %v3151_v24 = vrot.slane %v186_v4, %v2843_v21  ;;  %v3154_v25 = vrot.slane %v283_v5, %v2843_v21  ;;  %v3157_v26 = vrot.slane %v380_v6, %v2843_v21 }
  0x25   :  { %v857_v27 = vmax.f32 %v3139_v8, %v3143_v37  ;;  %v864_v31 = vmax.f32 %v3141_v9, %v3145_v35  ;;  %v477_v44 = vcombine.high %v2864_v28, %v2864_v28  ;;  %v574_v45 = vcombine.high %v2867_v29, %v2867_v29 }
  0x26   :  { %4724 = vst [vmem:[#allocation30_spill] sm:$0xff] %v3148_v36  ;;  %4725 = vst [vmem:[#allocation31_spill] sm:$0xff] %v3151_v24  ;;  %v133_v59 = vrot.slane %v3148_v36, %v2846_v22  ;;  %v137_v0 = vrot.slane %v3148_v36, %v2849_v23  ;;  %v214_v10 = vrot.slane %v3151_v24, %v2846_v22 }
  0x27   :  { %4726 = vst [vmem:[#allocation32_spill] sm:$0xff] %v3154_v25  ;;  %4727 = vst [vmem:[#allocation33_spill] sm:$0xff] %v3157_v26  ;;  %v218_v11 = vrot.slane %v3151_v24, %v2849_v23  ;;  %v858_v12 = vrot.slane %v857_v27, 4  ;;  %v865_v13 = vrot.slane %v864_v31, 4  ;;  %v311_v28 = vrot.slane %v3154_v25, %v2846_v22 }
  0x28   :  { %v315_v29 = vrot.slane %v3154_v25, %v2849_v23  ;;  %v166_v14 = vmul.f32 %v133_v59, %v2878_v32  ;;  %v167_v15 = vmul.f32 %v137_v0, %v2883_v33  ;;  %v168_v20 = vmul.f32 %v133_v59, %v2888_v34 }
  0x29   :  { %v169_v49 = vmul.f32 %v137_v0, %v2909_v39  ;;  %v859_v50 = vmax.f32 %v857_v27, %v858_v12  ;;  %v866_v43 = vmax.f32 %v864_v31, %v865_v13  ;;  %v247_v57 = vmul.f32 %v214_v10, %v2914_v40 }
  0x2a   :  { %v248_v4 = vmul.f32 %v218_v11, %v2919_v41  ;;  %v249_v5 = vmul.f32 %v214_v10, %v2940_v46  ;;  %v250_v6 = vmul.f32 %v218_v11, %v2945_v47  ;;  %v344_v25 = vmul.f32 %v311_v28, %v2950_v48 }
  0x2b   :  { %v345_v24 = vmul.f32 %v315_v29, %v2963_v53  ;;  %v860_v36 = vrot.slane %v859_v50, 2  ;;  %v867_v33 = vrot.slane %v866_v43, 2  ;;  %v263_v32 = vadd.f32 %v247_v57, %v166_v14 }
  0x2c   :  { %v264_v59 = vadd.f32 %v248_v4, %v167_v15  ;;  %v265_v34 = vadd.f32 %v249_v5, %v168_v20  ;;  %v266_v0 = vadd.f32 %v250_v6, %v169_v49  ;;  %v346_v27 = vmul.f32 %v311_v28, %v2968_v54 }
  0x2d   :  { %v347_v31 = vmul.f32 %v315_v29, %v2973_v55  ;;  %v861_v12 = vmax.f32 %v859_v50, %v860_v36  ;;  %v868_v13 = vmax.f32 %v866_v43, %v867_v33  ;;  %v360_v41 = vadd.f32 %v344_v25, %v263_v32 }
  0x2e   :  { %v361_v10 = vadd.f32 %v345_v24, %v264_v59  ;;  %v362_v46 = vadd.f32 %v346_v27, %v265_v34  ;;  %v408_v48 = vrot.slane %v3157_v26, %v2846_v22  ;;  %v412_v53 = vrot.slane %v3157_v26, %v2849_v23 }
  0x2f   :  { %v363_v11 = vadd.f32 %v347_v31, %v266_v0  ;;  %v862_v14 = vrot.slane %v861_v12, 1  ;;  %v869_v15 = vrot.slane %v868_v13, 1  ;;  %v3196_v20 = vrot.slane %v477_v44, %v2843_v21 }
  0x30   :  { %v3199_v28 = vrot.slane %v574_v45, %v2843_v21  ;;  %v441_v33 = vmul.f32 %v408_v48, %v2986_v60  ;;  %v442_v32 = vmul.f32 %v412_v53, %v2995_v1  ;;  %v443_v34 = vmul.f32 %v408_v48, %v3000_v2 }
  0x31   :  { %4728 = vst [vmem:[#allocation34_spill] sm:$0xff] %v3196_v20  ;;  %v444_v36 = vmul.f32 %v412_v53, %v3005_v3  ;;  %v863_v24 = vmax.f32 %v861_v12, %v862_v14  ;;  %v870_v25 = vmax.f32 %v868_v13, %v869_v15  ;;  %v505_v29 = vrot.slane %v3196_v20, %v2846_v22  ;;  %v4730_v15 = vld [vmem:[#allocation7_spill] sm:$0xff] }
  0x32   :  { %4729 = vst [vmem:[#allocation35_spill] sm:$0xff] %v3199_v28  ;;  %v509_v44 = vrot.slane %v3196_v20, %v2849_v23  ;;  %v457_v49 = vadd.f32 %v441_v33, %v360_v41  ;;  %v458_v50 = vadd.f32 %v442_v32, %v361_v10  ;;  %v459_v45 = vadd.f32 %v443_v34, %v362_v46  ;;  %v4731_v32 = vld [vmem:[#allocation28_spill] sm:$0xff] }
  0x33   :  { %v460_v43 = vadd.f32 %v444_v36, %v363_v11  ;;  %v913_v57 = vsub.f32 %v3139_v8, %v863_v24  ;;  %v914_v4 = vsub.f32 %v3141_v9, %v870_v25  ;;  %v915_v48 = vsub.f32 %v3143_v37, %v863_v24  ;;  %v4732_v36 = vld [vmem:[#allocation29_spill] sm:$0xff] }
  0x34   :  { %v916_v53 = vsub.f32 %v3145_v35, %v870_v25  ;;  %v538_v5 = vmul.f32 %v505_v29, %v3018_v16  ;;  %v539_v6 = vmul.f32 %v509_v44, %v3023_v18  ;;  %v540_v59 = vmul.f32 %v505_v29, %v3032_v51 }
  0x35   :  { %v541_v0 = vmul.f32 %v509_v44, %v3037_v52  ;;  %v929_v41 = vmul.f32 1.442695, %v913_v57  ;;  %v931_v27 = vmul.f32 1.442695, %v914_v4  ;;  %v933_v46 = vmul.f32 1.442695, %v915_v48 }
  0x36   :  { %v602_v8 = vrot.slane %v3199_v28, %v2846_v22  ;;  %v935_v31 = vmul.f32 1.442695, %v916_v53  ;;  %v554_v9 = vadd.f32 %v538_v5, %v457_v49  ;;  %v555_v12 = vadd.f32 %v539_v6, %v458_v50  ;;  %v4736_v57 = vld [vmem:[#allocation12_spill] sm:$0xff] }
  0x37   :  { %v556_v37 = vadd.f32 %v540_v59, %v459_v45  ;;  %2695 = vpow2.f32 %v929_v41  ;;  %v557_v35 = vadd.f32 %v541_v0, %v460_v43  ;;  %v606_v13 = vrot.slane %v3199_v28, %v2849_v23 }
  0x38   :  { %v635_v10 = vmul.f32 %v602_v8, %v3042_v56  ;;  %2697 = vpow2.f32 %v931_v27  ;;  %v637_v11 = vmul.f32 %v602_v8, %v3052_v63  ;;  %v671_v14 = vcombine.high %v2870_v30, %v2870_v30  ;;  %v4735_v30 = vld [vmem:[#allocation11_spill] sm:$0xff] }
  0x39   :  { %v768_v33 = vcombine.high %v4730_v15, %v4730_v15  ;;  %2699 = vpow2.f32 %v933_v46  ;;  %v636_v34 = vmul.f32 %v606_v13, %v4731_v32  ;;  %v638_v24 = vmul.f32 %v606_v13, %v4732_v36 }
  0x3a   :  { %v651_v25 = vadd.f32 %v635_v10, %v554_v9  ;;  %2701 = vpow2.f32 %v935_v31  ;;  %v653_v29 = vadd.f32 %v637_v11, %v556_v37  ;;  %v3230_v44 = vrot.slane %v671_v14, %v2843_v21 }
  0x3b   :  { %v3233_v49 = vrot.slane %v768_v33, %v2843_v21  ;;  %v652_v50 = vadd.f32 %v636_v34, %v555_v12  ;;  %v654_v45 = vadd.f32 %v638_v24, %v557_v35  ;;  %v120_v43 = vcombine.high %v4735_v30, %v4735_v30  ;;  %v4737_v33 = vld [vmem:[#allocation8_spill] sm:$0xff]  ;;  %v4738_v24 = vld [vmem:[#allocation9_spill] sm:$0xff] }
  0x3c   :  { %4733 = vst [vmem:[#allocation7_spill] sm:$0xff] %v3230_v44  ;;  %v201_v4 = vcombine.high %v4736_v57, %v4736_v57  ;;  %v699_v48 = vrot.slane %v3230_v44, %v2846_v22  ;;  %v703_v53 = vrot.slane %v3230_v44, %v2849_v23 }
  0x3d   :  { %4734 = vst [vmem:[#allocation28_spill] sm:$0xff] %v3233_v49  ;;  %v796_v5 = vrot.slane %v3233_v49, %v2846_v22  ;;  %v800_v21 = vrot.slane %v3233_v49, %v2849_v23  ;;  %v141_v6 = vrot.slane %v120_v43, %v2846_v22  ;;  %v145_v59 = vrot.slane %v120_v43, %v2849_v23  ;;  %v4739_v43 = vld [vmem:[#allocation10_spill] sm:$0xff] }
  0x3e   :  { %v222_v0 = vrot.slane %v201_v4, %v2846_v22  ;;  %v226_v41 = vrot.slane %v201_v4, %v2849_v23  ;;  %v732_v27 = vmul.f32 %v699_v48, %v3074_v17  ;;  %v733_v46 = vmul.f32 %v703_v53, %v3079_v19 }
  0x3f   :  { %v734_v8 = vmul.f32 %v699_v48, %v3088_v61  ;;  %v735_v31 = vmul.f32 %v703_v53, %v3093_v58  ;;  %v829_v9 = vmul.f32 %v796_v5, %v3098_v62  ;;  %v830_v12 = vmul.f32 %v800_v21, %v3103_v7 }
  0x40   :  { %v831_v37 = vmul.f32 %v796_v5, %v3108_v42  ;;  %v832_v35 = vmul.f32 %v800_v21, %v3113_v38  ;;  %v748_v13 = vadd.f32 %v732_v27, %v651_v25  ;;  %v749_v10 = vadd.f32 %v733_v46, %v652_v50  ;;  %v4740_v21 = vld [vmem:[#allocation17_spill] sm:$0xff]  ;;  %v4741_v46 = vld [vmem:[#allocation22_spill] sm:$0xff] }
  0x41   :  { %v750_v11 = vadd.f32 %v734_v8, %v653_v29  ;;  %v751_v14 = vadd.f32 %v735_v31, %v654_v45  ;;  %v3259_v15 = vpop.eup %2695  ;;  %v170_v34 = vmul.f32 %v141_v6, %v4737_v33  ;;  %v171_v30 = vmul.f32 %v145_v59, %v4738_v24 }
  0x42   :  { %v172_v57 = vmul.f32 %v141_v6, %v4739_v43  ;;  %v173_v4 = vmul.f32 %v145_v59, %v2909_v39  ;;  %v3265_v48 = vpop.eup %2697  ;;  %v3267_v53 = vadd.f32 %v829_v9, %v748_v13  ;;  %v3269_v5 = vadd.f32 %v830_v12, %v749_v10 }
  0x43   :  { %v3271_v25 = vadd.f32 %v831_v37, %v750_v11  ;;  %v3273_v29 = vadd.f32 %v832_v35, %v751_v14  ;;  %v3275_v50 = vpop.eup %2699  ;;  %v251_v45 = vmul.f32 %v222_v0, %v2914_v40  ;;  %v252_v27 = vmul.f32 %v226_v41, %v4740_v21  ;;  %v4742_v37 = vld [vmem:[#allocation13_spill] sm:$0xff]  ;;  %v4744_v40 = vld [vmem:[#allocation18_spill] sm:$0xff] }
  0x44   :  { %v253_v6 = vmul.f32 %v222_v0, %v4741_v46  ;;  %v254_v59 = vmul.f32 %v226_v41, %v2945_v47  ;;  %v3281_v8 = vpop.eup %2701  ;;  %v961_v31 = vadd.f32 %v3275_v50, %v3259_v15  ;;  %v298_v35 = vcombine.high %v4742_v37, %v4742_v37  ;;  %v4743_v47 = vld [vmem:[#allocation14_spill] sm:$0xff] }
  0x45   :  { %v871_v9 = vmax.f32 %v3267_v53, %v3271_v25  ;;  %v878_v12 = vmax.f32 %v3269_v5, %v3273_v29  ;;  %v968_v13 = vadd.f32 %v3281_v8, %v3265_v48  ;;  %v267_v0 = vadd.f32 %v251_v45, %v170_v34 }
  0x46   :  { %v268_v10 = vadd.f32 %v252_v27, %v171_v30  ;;  %v269_v41 = vadd.f32 %v253_v6, %v172_v57  ;;  %v962_v11 = vrot.slane %v961_v31, 4  ;;  %v270_v44 = vadd.f32 %v254_v59, %v173_v4  ;;  %v4745_v57 = vld [vmem:[#allocation24_spill] sm:$0xff]  ;;  %v4746_v27 = vld [vmem:[#allocation25_spill] sm:$0xff] }
  0x47   :  { %v872_v14 = vrot.slane %v871_v9, 4  ;;  %v879_v49 = vrot.slane %v878_v12, 4  ;;  %v969_v28 = vrot.slane %v968_v13, 4  ;;  %v319_v20 = vrot.slane %v298_v35, %v2846_v22 }
  0x48   :  { %v323_v26 = vrot.slane %v298_v35, %v2849_v23  ;;  %v395_v46 = vcombine.high %v4743_v47, %v4743_v47  ;;  %v963_v39 = vadd.f32 %v962_v11, %v961_v31  ;;  %v492_v34 = vcombine.high %v4744_v40, %v4744_v40 }
  0x49   :  { %v873_v37 = vmax.f32 %v871_v9, %v872_v14  ;;  %v880_v21 = vmax.f32 %v878_v12, %v879_v49  ;;  %v970_v30 = vadd.f32 %v969_v28, %v968_v13  ;;  %v348_v45 = vmul.f32 %v319_v20, %v4745_v57 }
  0x4a   :  { %v349_v6 = vmul.f32 %v323_v26, %v4746_v27  ;;  %v350_v4 = vmul.f32 %v319_v20, %v2968_v54  ;;  %v964_v59 = vrot.slane %v963_v39, 2  ;;  %v351_v35 = vmul.f32 %v323_v26, %v2973_v55 }
  0x4b   :  { %v874_v43 = vrot.slane %v873_v37, 2  ;;  %v881_v24 = vrot.slane %v880_v21, 2  ;;  %v971_v33 = vrot.slane %v970_v30, 2  ;;  %v364_v47 = vadd.f32 %v348_v45, %v267_v0 }
  0x4c   :  { %v365_v31 = vadd.f32 %v349_v6, %v268_v10  ;;  %v366_v9 = vadd.f32 %v350_v4, %v269_v41  ;;  %v965_v49 = vadd.f32 %v964_v59, %v963_v39  ;;  %v367_v40 = vadd.f32 %v351_v35, %v270_v44 }
  0x4d   :  { %v875_v12 = vmax.f32 %v873_v37, %v874_v43  ;;  %v882_v11 = vmax.f32 %v880_v21, %v881_v24  ;;  %v972_v28 = vadd.f32 %v971_v33, %v970_v30  ;;  %v416_v13 = vrot.slane %v395_v46, %v2846_v22 }
  0x4e   :  { %v420_v14 = vrot.slane %v395_v46, %v2849_v23  ;;  %v513_v20 = vrot.slane %v492_v34, %v2846_v22  ;;  %v966_v27 = vrot.slane %v965_v49, 1  ;;  %v517_v26 = vrot.slane %v492_v34, %v2849_v23 }
  0x4f   :  { %v876_v54 = vrot.slane %v875_v12, 1  ;;  %v883_v57 = vrot.slane %v882_v11, 1  ;;  %v973_v55 = vrot.slane %v972_v28, 1  ;;  %v445_v0 = vmul.f32 %v416_v13, %v2986_v60 }
  0x50   :  { %v446_v39 = vmul.f32 %v420_v14, %v2995_v1  ;;  %v447_v24 = vmul.f32 %v416_v13, %v3000_v2  ;;  %v967_v44 = vadd.f32 %v966_v27, %v965_v49  ;;  %v448_v21 = vmul.f32 %v420_v14, %v3005_v3 }
  0x51   :  { %v877_v33 = vmax.f32 %v875_v12, %v876_v54  ;;  %v884_v43 = vmax.f32 %v882_v11, %v883_v57  ;;  %v974_v46 = vadd.f32 %v973_v55, %v972_v28  ;;  %v461_v10 = vadd.f32 %v445_v0, %v364_v47 }
  0x52   :  { %v462_v41 = vadd.f32 %v446_v39, %v365_v31  ;;  %v463_v37 = vadd.f32 %v447_v24, %v366_v9  ;;  %2703 = vrcp.f32 %v967_v44  ;;  %v464_v2 = vadd.f32 %v448_v21, %v367_v40  ;;  %v4749_v31 = vld [vmem:[#allocation21_spill] sm:$0xff] }
  0x53   :  { %v917_v30 = vsub.f32 %v3267_v53, %v877_v33  ;;  %v918_v34 = vsub.f32 %v3269_v5, %v884_v43  ;;  %v919_v60 = vsub.f32 %v3271_v25, %v877_v33  ;;  %2705 = vrcp.f32 %v974_v46  ;;  %v4747_v25 = vld [vmem:[#allocation19_spill] sm:$0xff] }
  0x54   :  { %v920_v1 = vsub.f32 %v3273_v29, %v884_v43  ;;  %v542_v54 = vmul.f32 %v513_v20, %v3018_v16  ;;  %v543_v55 = vmul.f32 %v517_v26, %v3023_v18  ;;  %v544_v6 = vmul.f32 %v513_v20, %v3032_v51  ;;  %v4748_v29 = vld [vmem:[#allocation20_spill] sm:$0xff] }
  0x55   :  { %v937_v57 = vmul.f32 1.442695, %v917_v30  ;;  %v939_v45 = vmul.f32 1.442695, %v918_v34  ;;  %v941_v3 = vmul.f32 1.442695, %v919_v60  ;;  %v545_v53 = vmul.f32 %v517_v26, %v3037_v52 }
  0x56   :  { %v943_v27 = vmul.f32 1.442695, %v920_v1  ;;  %v558_v4 = vadd.f32 %v542_v54, %v461_v10  ;;  %v559_v5 = vadd.f32 %v543_v55, %v462_v41  ;;  %v589_v59 = vcombine.high %v4747_v25, %v4747_v25 }
  0x57   :  { %2707 = vpow2.f32 %v937_v57  ;;  %v686_v35 = vcombine.high %v4748_v29, %v4748_v29  ;;  %v560_v16 = vadd.f32 %v544_v6, %v463_v37  ;;  %v561_v47 = vadd.f32 %v545_v53, %v464_v2 }
  0x58   :  { %2709 = vpow2.f32 %v939_v45  ;;  %v783_v18 = vcombine.high %v4749_v31, %v4749_v31  ;;  %v610_v51 = vrot.slane %v589_v59, %v2846_v22  ;;  %v614_v52 = vrot.slane %v589_v59, %v2849_v23  ;;  %v4750_v45 = vld [vmem:[#allocation30_spill] sm:$0xff] }
  0x59   :  { %2711 = vpow2.f32 %v941_v3  ;;  %v707_v9 = vrot.slane %v686_v35, %v2846_v22  ;;  %v711_v49 = vrot.slane %v686_v35, %v2849_v23  ;;  %v121_v3 = vcombine.high %v4750_v45, %v4750_v45 }
  0x5a   :  { %2713 = vpow2.f32 %v943_v27  ;;  %v804_v12 = vrot.slane %v783_v18, %v2846_v22  ;;  %v808_v11 = vrot.slane %v783_v18, %v2849_v23  ;;  %v639_v40 = vmul.f32 %v610_v51, %v3042_v56 }
  0x5b   :  { %v640_v28 = vmul.f32 %v614_v52, %v4731_v32  ;;  %v641_v13 = vmul.f32 %v610_v51, %v3052_v63  ;;  %v642_v14 = vmul.f32 %v614_v52, %v4732_v36  ;;  %v736_v20 = vmul.f32 %v707_v9, %v3074_v17  ;;  %v4751_v52 = vld [vmem:[#allocation5_spill] sm:$0xff] }
  0x5c   :  { %v737_v26 = vmul.f32 %v711_v49, %v3079_v19  ;;  %v738_v0 = vmul.f32 %v707_v9, %v3088_v61  ;;  %v739_v39 = vmul.f32 %v711_v49, %v3093_v58  ;;  %v2704_v24 = vpop.eup %2703  ;;  %v655_v33 = vadd.f32 %v639_v40, %v558_v4 }
  0x5d   :  { %v656_v43 = vadd.f32 %v640_v28, %v559_v5  ;;  %v657_v21 = vadd.f32 %v641_v13, %v560_v16  ;;  %v658_v10 = vadd.f32 %v642_v14, %v561_v47  ;;  %v2706_v56 = vpop.eup %2705  ;;  %v1025_v41 = vmul.f32 %v2704_v24, %v967_v44  ;;  %v4752_v14 = vld [vmem:[#allocation31_spill] sm:$0xff] }
  0x5e   :  { %v833_v32 = vmul.f32 %v804_v12, %v3098_v62  ;;  %v834_v63 = vmul.f32 %v808_v11, %v3103_v7  ;;  %v835_v36 = vmul.f32 %v804_v12, %v3108_v42  ;;  %v1026_v17 = vmul.f32 %v2706_v56, %v974_v46 }
  0x5f   :  { %v752_v37 = vadd.f32 %v736_v20, %v655_v33  ;;  %v753_v19 = vadd.f32 %v737_v26, %v656_v43  ;;  %v754_v30 = vadd.f32 %v738_v0, %v657_v21  ;;  %v1033_v61 = vsub.f32 2.0, %v1025_v41 }
  0x60   :  { %v755_v34 = vadd.f32 %v739_v39, %v658_v10  ;;  %v836_v58 = vmul.f32 %v808_v11, %v3113_v38  ;;  %v1034_v1 = vsub.f32 2.0, %v1026_v17  ;;  %v149_v47 = vrot.slane %v121_v3, %v2846_v22  ;;  %v4755_v17 = vld [vmem:[#allocation10_spill] sm:$0xff] }
  0x61   :  { %v3343_v60 = vpop.eup %2707  ;;  %v3345_v2 = vadd.f32 %v833_v32, %v752_v37  ;;  %v3347_v44 = vadd.f32 %v834_v63, %v753_v19  ;;  %v3349_v62 = vadd.f32 %v835_v36, %v754_v30  ;;  %v1041_v42 = vmul.f32 %v2704_v24, %v1033_v61  ;;  %v4753_v24 = vld [vmem:[#allocation8_spill] sm:$0xff] }
  0x62   :  { %v3351_v7 = vpop.eup %2709  ;;  %v3353_v46 = vadd.f32 %v836_v58, %v755_v34  ;;  %v1042_v57 = vmul.f32 %v2706_v56, %v1034_v1  ;;  %v3387_v51 = vrot.slane %v121_v3, %v2849_v23  ;;  %v3390_v9 = vadd.s32 8, %v4751_v52  ;;  %v4754_v56 = vld [vmem:[#allocation9_spill] sm:$0xff] }
  0x63   :  { %v3355_v54 = vpop.eup %2711  ;;  %v885_v38 = vmax.f32 %v3345_v2, %v3349_v62  ;;  %v3364_v27 = vmul.f32 %v3259_v15, %v1041_v42  ;;  %v3367_v6 = vmul.f32 %v3275_v50, %v1041_v42  ;;  %v202_v20 = vcombine.high %v4752_v14, %v4752_v14 }
  0x64   :  { %v3361_v55 = vpop.eup %2713  ;;  %v975_v53 = vadd.f32 %v3355_v54, %v3343_v60  ;;  %v3372_v4 = vmul.f32 %v3265_v48, %v1042_v57  ;;  %v3375_v5 = vmul.f32 %v3281_v8, %v1042_v57  ;;  %v892_v50 = vmax.f32 %v3347_v44, %v3353_v46  ;;  %v4756_v57 = vld [vmem:[#allocation32_spill] sm:$0xff] }
  0x65   :  { %v982_v25 = vadd.f32 %v3361_v55, %v3351_v7  ;;  %v886_v59 = vrot.slane %v885_v38, 4  ;;  %v1836_v15 = vmax.f32 %v3364_v27, %v3367_v6  ;;  %v3395_v33 = vmul.f32 %v149_v47, %v4753_v24 }
  0x66   :  { %v976_v29 = vrot.slane %v975_v53, 4  ;;  %v1843_v35 = vmax.f32 %v3372_v4, %v3375_v5  ;;  %v893_v18 = vrot.slane %v892_v50, 4  ;;  %v3399_v41 = vmul.f32 %v3387_v51, %v4754_v56 }
  0x67   :  { %v983_v16 = vrot.slane %v982_v25, 4  ;;  %v887_v48 = vmax.f32 %v885_v38, %v886_v59  ;;  %v1837_v8 = vrot.slane %v1836_v15, 4  ;;  %v3402_v37 = vmul.f32 %v149_v47, %v4755_v17 }
  0x68   :  { %v977_v31 = vadd.f32 %v976_v29, %v975_v53  ;;  %v1844_v49 = vrot.slane %v1843_v35, 4  ;;  %v894_v13 = vmax.f32 %v892_v50, %v893_v18  ;;  %v230_v34 = vrot.slane %v202_v20, %v2846_v22 }
  0x69   :  { %v984_v12 = vadd.f32 %v983_v16, %v982_v25  ;;  %v888_v11 = vrot.slane %v887_v48, 2  ;;  %v1838_v40 = vmax.f32 %v1836_v15, %v1837_v8  ;;  %v299_v38 = vcombine.high %v4756_v57, %v4756_v57 }
  0x6a   :  { %v978_v28 = vrot.slane %v977_v31, 2  ;;  %v1845_v26 = vmax.f32 %v1843_v35, %v1844_v49  ;;  %v895_v10 = vrot.slane %v894_v13, 2  ;;  %v234_v25 = vrot.slane %v202_v20, %v2849_v23  ;;  %v4758_v20 = vld [vmem:[#allocation17_spill] sm:$0xff] }
  0x6b   :  { %v985_v0 = vrot.slane %v984_v12, 2  ;;  %v889_v39 = vmax.f32 %v887_v48, %v888_v11  ;;  %v1839_v43 = vrot.slane %v1838_v40, 2  ;;  %v4757_v48 = vld [vmem:[#allocation16_spill] sm:$0xff] }
  0x6c   :  { %v979_v21 = vadd.f32 %v978_v28, %v977_v31  ;;  %v1846_v32 = vrot.slane %v1845_v26, 2  ;;  %v896_v61 = vmax.f32 %v894_v13, %v895_v10  ;;  %v255_v47 = vmul.f32 %v230_v34, %v4757_v48  ;;  %v4761_v10 = vld [vmem:[#allocation23_spill] sm:$0xff]  ;;  %v4764_v48 = vld [vmem:[#allocation26_spill] sm:$0xff] }
  0x6d   :  { %v986_v63 = vadd.f32 %v985_v0, %v984_v12  ;;  %v890_v36 = vrot.slane %v889_v39, 1  ;;  %v1840_v19 = vmax.f32 %v1838_v40, %v1839_v43  ;;  %v4760_v43 = vld [vmem:[#allocation22_spill] sm:$0xff]  ;;  %v258_v56 = vmul.f32 %v234_v25, %v4761_v10 }
  0x6e   :  { %v980_v30 = vrot.slane %v979_v21, 1  ;;  %v1847_v58 = vmax.f32 %v1845_v26, %v1846_v32  ;;  %v897_v53 = vrot.slane %v896_v61, 1  ;;  %v256_v26 = vmul.f32 %v234_v25, %v4758_v20 }
  0x6f   :  { %v987_v1 = vrot.slane %v986_v63, 1  ;;  %v891_v42 = vmax.f32 %v889_v39, %v890_v36  ;;  %v1841_v45 = vrot.slane %v1840_v19, 1  ;;  %v4759_v39 = vld [vmem:[#allocation15_spill] sm:$0xff]  ;;  %v327_v32 = vrot.slane %v299_v38, %v2846_v22 }
  0x70   :  { %v981_v3 = vadd.f32 %v980_v30, %v979_v21  ;;  %v1848_v59 = vrot.slane %v1847_v58, 1  ;;  %v898_v16 = vmax.f32 %v896_v61, %v897_v53  ;;  %v177_v24 = vmul.f32 %v3387_v51, %v4759_v39  ;;  %v4762_v53 = vld [vmem:[#allocation24_spill] sm:$0xff] }
  0x71   :  { %v988_v15 = vadd.f32 %v987_v1, %v986_v63  ;;  %v921_v29 = vsub.f32 %v3345_v2, %v891_v42  ;;  %v923_v50 = vsub.f32 %v3349_v62, %v891_v42  ;;  %v1842_v35 = vmax.f32 %v1840_v19, %v1841_v45 }
  0x72   :  { %2715 = vrcp.f32 %v981_v3  ;;  %v1849_v8 = vmax.f32 %v1847_v58, %v1848_v59  ;;  %v922_v49 = vsub.f32 %v3347_v44, %v898_v16  ;;  %v924_v12 = vsub.f32 %v3353_v46, %v898_v16 }
  0x73   :  { %2717 = vrcp.f32 %v988_v15  ;;  %v945_v31 = vmul.f32 1.442695, %v921_v29  ;;  %v949_v18 = vmul.f32 1.442695, %v923_v50  ;;  %vm1892_vm0 = vcmp.eq.f32.partialorder %v3364_v27, %v1842_v35  ;;  %v4763_v50 = vld [vmem:[#allocation33_spill] sm:$0xff] }
  0x74   :  { %vm1894_vm1 = vcmp.eq.f32.partialorder %v3367_v6, %v1842_v35  ;;  %vm1893_vm2 = vcmp.eq.f32.partialorder %v3372_v4, %v1849_v8  ;;  %vm1895_vm3 = vcmp.eq.f32.partialorder %v3375_v5, %v1849_v8  ;;  %v1908_v2 = vsel %vm1892_vm0, %v4751_v52, 16  ;;  %v4765_v8 = vld [vmem:[#allocation25_spill] sm:$0xff] }
  0x75   :  { %v1910_v62 = vsel %vm1894_vm1, %v3390_v9, 16  ;;  %v1909_v11 = vsel %vm1893_vm2, %v4751_v52, 16  ;;  %v1911_v40 = vsel %vm1895_vm3, %v3390_v9, 16  ;;  %2719 = vpow2.f32 %v945_v31 }
  0x76   :  { %vm1924_vm4 = vcmp.lt.s32.totalorder %v1908_v2, %v1910_v62  ;;  %vm1935_vm5 = vcmp.lt.s32.totalorder %v1909_v11, %v1911_v40  ;;  %v947_v13 = vmul.f32 1.442695, %v922_v49  ;;  %2721 = vpow2.f32 %v949_v18  ;;  %v4766_v18 = vld [vmem:[#allocation27_spill] sm:$0xff] }
  0x77   :  { %v1925_v28 = vsel %vm1924_vm4, %v1908_v2, %v1910_v62  ;;  %v1936_v46 = vsel %vm1935_vm5, %v1909_v11, %v1911_v40  ;;  %v951_v14 = vmul.f32 1.442695, %v924_v12  ;;  %v257_v21 = vmul.f32 %v230_v34, %v4760_v43 }
  0x78   :  { %v1926_v44 = vrot.slane %v1925_v28, 4  ;;  %v1937_v0 = vrot.slane %v1936_v46, 4  ;;  %2723 = vpow2.f32 %v947_v13  ;;  %v271_v30 = vadd.f32 %v255_v47, %v3395_v33 }
  0x79   :  { %2725 = vpow2.f32 %v951_v14  ;;  %v272_v61 = vadd.f32 %v256_v26, %v3399_v41  ;;  %v273_v34 = vadd.f32 %v257_v21, %v3402_v37  ;;  %v331_v42 = vrot.slane %v299_v38, %v2849_v23 }
  0x7a   :  { %vm1927_vm6 = vcmp.lt.s32.totalorder %v1925_v28, %v1926_v44  ;;  %vm1938_vm7 = vcmp.lt.s32.totalorder %v1936_v46, %v1937_v0  ;;  %v274_v45 = vadd.f32 %v258_v56, %v177_v24  ;;  %v352_v25 = vmul.f32 %v327_v32, %v4762_v53 }
  0x7b   :  { %v1928_v63 = vsel %vm1927_vm6, %v1925_v28, %v1926_v44  ;;  %v1939_v19 = vsel %vm1938_vm7, %v1936_v46, %v1937_v0  ;;  %v396_v33 = vcombine.high %v4763_v50, %v4763_v50  ;;  %v354_v37 = vmul.f32 %v327_v32, %v4764_v48 }
  0x7c   :  { %v2716_v36 = vpop.eup %2715  ;;  %v1929_v17 = vrot.slane %v1928_v63, 2  ;;  %v1940_v1 = vrot.slane %v1939_v19, 2  ;;  %v353_v31 = vmul.f32 %v331_v42, %v4765_v8  ;;  %v355_v49 = vmul.f32 %v331_v42, %v4766_v18 }
  0x7d   :  { %v2718_v58 = vpop.eup %2717  ;;  %v1027_v51 = vmul.f32 %v2716_v36, %v981_v3  ;;  %v3443_v62 = vadd.f32 %v352_v25, %v271_v30  ;;  %v370_v32 = vadd.f32 %v354_v37, %v273_v34  ;;  %v2743_v34 = vld [vmem:[%s4637_s1 + $0x60] sm:$0xff] }
  0x7e   :  { %vm1930_vm8 = vcmp.lt.s32.totalorder %v1928_v63, %v1929_v17  ;;  %v1028_v57 = vmul.f32 %v2718_v58, %v988_v15  ;;  %vm1941_vm9 = vcmp.lt.s32.totalorder %v1939_v19, %v1940_v1  ;;  %v3497_v50 = vadd.f32 %v355_v49, %v274_v45  ;;  %v2745_v45 = vld [vmem:[%s4637_s1 + $0x70] sm:$0xff] }
  0x7f   :  { %v1931_v59 = vsel %vm1930_vm8, %v1928_v63, %v1929_v17  ;;  %v1035_v29 = vsub.f32 2.0, %v1027_v51  ;;  %v3434_v35 = vpop.eup %2719  ;;  %v1942_v16 = vsel %vm1941_vm9, %v1939_v19, %v1940_v1  ;;  %v424_v63 = vrot.slane %v396_v33, %v2846_v22 }
  0x80   :  { %v1932_v41 = vrot.slane %v1931_v59, 1  ;;  %v1036_v3 = vsub.f32 2.0, %v1028_v57  ;;  %v3437_v47 = vpop.eup %2721  ;;  %v1943_v38 = vrot.slane %v1942_v16, 1  ;;  %v369_v1 = vadd.f32 %v353_v31, %v272_v61 }
  0x81   :  { %v1043_v15 = vmul.f32 %v2716_v36, %v1035_v29  ;;  %v989_v2 = vadd.f32 %v3437_v47, %v3434_v35  ;;  %v428_v51 = vrot.slane %v396_v33, %v2849_v23  ;;  %v2744_v33 = vld [vmem:[%s4637_s1 + $0x68] sm:$0xff]  ;;  %v451_v8 = vmul.f32 %v2745_v45, %v424_v63 }
  0x82   :  { %vm1933_vm10 = vcmp.lt.s32.totalorder %v1931_v59, %v1932_v41  ;;  %v1044_v12 = vmul.f32 %v2718_v58, %v1036_v3  ;;  %v3445_v11 = vpop.eup %2723  ;;  %vm1944_vm11 = vcmp.lt.s32.totalorder %v1942_v16, %v1943_v38 }
  0x83   :  { %v3447_v40 = vsel %vm1933_vm10, %v1931_v59, %v1932_v41  ;;  %v3450_v28 = vmul.f32 %v3343_v60, %v1043_v15  ;;  %v3453_v13 = vmul.f32 %v3355_v54, %v1043_v15  ;;  %v3455_v44 = vpop.eup %2725  ;;  %v3457_v46 = vsel %vm1944_vm11, %v1942_v16, %v1943_v38 }
  0x84   :  { %vm2012_vm12 = vcmp.eq.s32.totalorder %v4751_v52, %v3447_v40  ;;  %vm2014_vm13 = vcmp.eq.s32.totalorder %v3390_v9, %v3447_v40  ;;  %v3464_v14 = vmul.f32 %v3351_v7, %v1044_v12  ;;  %vm2013_vm14 = vcmp.eq.s32.totalorder %v4751_v52, %v3457_v46 }
  0x85   :  { %vm2015_vm15 = vcmp.eq.s32.totalorder %v3390_v9, %v3457_v46  ;;  %v3471_v60 = vsel %vm2012_vm12, -inf, %v3364_v27  ;;  %v3474_v54 = vsel %vm2014_vm13, -inf, %v3367_v6  ;;  %v3477_v20 = vsel %vm2013_vm14, -inf, %v3372_v4 }
  0x86   :  { %v3480_v26 = vsel %vm2015_vm15, -inf, %v3375_v5  ;;  %v2044_v7 = vmax.f32 %v3471_v60, %v3474_v54  ;;  %v3485_v0 = vmul.f32 %v3361_v55, %v1044_v12  ;;  %v1850_v24 = vmax.f32 %v3450_v28, %v3453_v13 }
  0x87   :  { %v2051_v39 = vmax.f32 %v3477_v20, %v3480_v26  ;;  %v990_v43 = vrot.slane %v989_v2, 4  ;;  %v996_v21 = vadd.f32 %v3455_v44, %v3445_v11  ;;  %v449_v41 = vmul.f32 %v2743_v34, %v424_v63 }
  0x88   :  { %v2045_v10 = vrot.slane %v2044_v7, 4  ;;  %v1857_v56 = vmax.f32 %v3464_v14, %v3485_v0  ;;  %v1851_v55 = vrot.slane %v1850_v24, 4  ;;  %v450_v15 = vmul.f32 %v2744_v33, %v428_v51 }
  0x89   :  { %v2052_v36 = vrot.slane %v2051_v39, 4  ;;  %v991_v17 = vadd.f32 %v990_v43, %v989_v2  ;;  %v997_v19 = vrot.slane %v996_v21, 4  ;;  %v4767_v43 = vld [vmem:[#allocation34_spill] sm:$0xff] }
  0x8a   :  { %v2046_v30 = vmax.f32 %v2044_v7, %v2045_v10  ;;  %v1858_v58 = vrot.slane %v1857_v56, 4  ;;  %v1852_v57 = vmax.f32 %v1850_v24, %v1851_v55 }
  0x8b   :  { %v2053_v42 = vmax.f32 %v2051_v39, %v2052_v36  ;;  %v992_v53 = vrot.slane %v991_v17, 2  ;;  %v998_v25 = vadd.f32 %v997_v19, %v996_v21  ;;  %v2746_v39 = vld [vmem:[%s4637_s1 + $0x78] sm:$0xff]  ;;  %v493_v21 = vcombine.high %v4767_v43, %v4767_v43 }
  0x8c   :  { %v2047_v59 = vrot.slane %v2046_v30, 2  ;;  %v1859_v29 = vmax.f32 %v1857_v56, %v1858_v58  ;;  %v1853_v3 = vrot.slane %v1852_v57, 2  ;;  %v452_v24 = vmul.f32 %v2746_v39, %v428_v51 }
  0x8d   :  { %v2054_v16 = vrot.slane %v2053_v42, 2  ;;  %v993_v48 = vadd.f32 %v992_v53, %v991_v17  ;;  %v999_v37 = vrot.slane %v998_v25, 2  ;;  %v3514_v19 = vadd.f32 %v449_v41, %v3443_v62 }
  0x8e   :  { %v2048_v61 = vmax.f32 %v2046_v30, %v2047_v59  ;;  %v1860_v38 = vrot.slane %v1859_v29, 2  ;;  %v1854_v18 = vmax.f32 %v1852_v57, %v1853_v3  ;;  %v3516_v30 = vadd.f32 %v450_v15, %v369_v1 }
  0x8f   :  { %v2055_v31 = vmax.f32 %v2053_v42, %v2054_v16  ;;  %v994_v49 = vrot.slane %v993_v48, 1  ;;  %v1000_v12 = vadd.f32 %v999_v37, %v998_v25  ;;  %v3518_v57 = vadd.f32 %v451_v8, %v370_v32 }
  0x90   :  { %v2049_v2 = vrot.slane %v2048_v61, 1  ;;  %v1861_v7 = vmax.f32 %v1859_v29, %v1860_v38  ;;  %v1855_v56 = vrot.slane %v1854_v18, 1 }
  0x91   :  { %v2056_v10 = vrot.slane %v2055_v31, 1  ;;  %v995_v36 = vadd.f32 %v994_v49, %v993_v48  ;;  %v1001_v55 = vrot.slane %v1000_v12, 1 }
  0x92   :  { %v2050_v17 = vmax.f32 %v2048_v61, %v2049_v2  ;;  %v1862_v63 = vrot.slane %v1861_v7, 1  ;;  %v1856_v42 = vmax.f32 %v1854_v18, %v1855_v56  ;;  %v521_v2 = vrot.slane %v493_v21, %v2846_v22 }
  0x93   :  { %v2057_v58 = vmax.f32 %v2055_v31, %v2056_v10  ;;  %2727 = vrcp.f32 %v995_v36  ;;  %v3522_v53 = vadd.f32 %v1001_v55, %v1000_v12  ;;  %v3540_v12 = vadd.f32 %v452_v24, %v3497_v50  ;;  %v2747_v50 = vld [vmem:[%s4637_s1 + $0x80] sm:$0xff] }
  0x94   :  { %vm2100_vm0 = vcmp.eq.f32.partialorder %v3471_v60, %v2050_v17  ;;  %vm2102_vm1 = vcmp.eq.f32.partialorder %v3474_v54, %v2050_v17  ;;  %v1863_v51 = vmax.f32 %v1861_v7, %v1862_v63  ;;  %vm1896_vm5 = vcmp.eq.f32.partialorder %v3450_v28, %v1856_v42 }
  0x95   :  { %vm2101_vm2 = vcmp.eq.f32.partialorder %v3477_v20, %v2057_v58  ;;  %vm2103_vm3 = vcmp.eq.f32.partialorder %v3480_v26, %v2057_v58  ;;  %v2116_v62 = vsel %vm2100_vm0, %v4751_v52, 16  ;;  %v2118_v1 = vsel %vm2102_vm1, %v3390_v9, 16 }
  0x96   :  { %v2117_v25 = vsel %vm2101_vm2, %v4751_v52, 16  ;;  %v2119_v32 = vsel %vm2103_vm3, %v3390_v9, 16  ;;  %vm2132_vm4 = vcmp.lt.s32.totalorder %v2116_v62, %v2118_v1  ;;  %vm1897_vm7 = vcmp.eq.f32.partialorder %v3464_v14, %v1863_v51 }
  0x97   :  { %v2133_v59 = vsel %vm2132_vm4, %v2116_v62, %v2118_v1  ;;  %vm2143_vm6 = vcmp.lt.s32.totalorder %v2117_v25, %v2119_v32  ;;  %vm1898_vm8 = vcmp.eq.f32.partialorder %v3453_v13, %v1856_v42  ;;  %vm1899_vm9 = vcmp.eq.f32.partialorder %v3485_v0, %v1863_v51  ;;  %v2750_v1 = vld [vmem:[%s4637_s1 + $0x98] sm:$0xff] }
  0x98   :  { %v2134_v29 = vrot.slane %v2133_v59, 4  ;;  %v2144_v34 = vsel %vm2143_vm6, %v2117_v25, %v2119_v32  ;;  %v1912_v41 = vsel %vm1896_vm5, %v4751_v52, 16  ;;  %v1913_v3 = vsel %vm1897_vm7, %v4751_v52, 16 }
  0x99   :  { %v2145_v16 = vrot.slane %v2144_v34, 4  ;;  %v1914_v48 = vsel %vm1898_vm8, %v3390_v9, 16  ;;  %v1915_v37 = vsel %vm1899_vm9, %v3390_v9, 16  ;;  %2729 = vrcp.f32 %v3522_v53 }
  0x9a   :  { %vm2135_vm10 = vcmp.lt.s32.totalorder %v2133_v59, %v2134_v29  ;;  %vm1946_vm11 = vcmp.lt.s32.totalorder %v1912_v41, %v1914_v48  ;;  %vm1957_vm12 = vcmp.lt.s32.totalorder %v1913_v3, %v1915_v37  ;;  %v525_v7 = vrot.slane %v493_v21, %v2849_v23  ;;  %v2748_v21 = vld [vmem:[%s4637_s1 + $0x88] sm:$0xff] }
  0x9b   :  { %v2136_v61 = vsel %vm2135_vm10, %v2133_v59, %v2134_v29  ;;  %vm2146_vm13 = vcmp.lt.s32.totalorder %v2144_v34, %v2145_v16  ;;  %v1947_v38 = vsel %vm1946_vm11, %v1912_v41, %v1914_v48  ;;  %v1958_v33 = vsel %vm1957_vm12, %v1913_v3, %v1915_v37 }
  0x9c   :  { %v2137_v15 = vrot.slane %v2136_v61, 2  ;;  %v2147_v45 = vsel %vm2146_vm13, %v2144_v34, %v2145_v16  ;;  %v1948_v8 = vrot.slane %v1947_v38, 4  ;;  %v1959_v31 = vrot.slane %v1958_v33, 4 }
  0x9d   :  { %v2728_v18 = vpop.eup %2727  ;;  %v2148_v49 = vrot.slane %v2147_v45, 2  ;;  %v546_v24 = vmul.f32 %v2747_v50, %v521_v2  ;;  %v547_v51 = vmul.f32 %v2748_v21, %v525_v7  ;;  %v549_v25 = vmul.f32 %v2750_v1, %v525_v7 }
  0x9e   :  { %vm2138_vm14 = vcmp.lt.s32.totalorder %v2136_v61, %v2137_v15  ;;  %vm1949_vm15 = vcmp.lt.s32.totalorder %v1947_v38, %v1948_v8  ;;  %vm1960_vm0 = vcmp.lt.s32.totalorder %v1958_v33, %v1959_v31  ;;  %v1029_v39 = vmul.f32 %v2728_v18, %v995_v36  ;;  %v2749_v36 = vld [vmem:[%s4637_s1 + $0x90] sm:$0xff] }
  0x9f   :  { %v2139_v43 = vsel %vm2138_vm14, %v2136_v61, %v2137_v15  ;;  %vm2149_vm1 = vcmp.lt.s32.totalorder %v2147_v45, %v2148_v49  ;;  %v1950_v10 = vsel %vm1949_vm15, %v1947_v38, %v1948_v8  ;;  %v1961_v56 = vsel %vm1960_vm0, %v1958_v33, %v1959_v31 }
  0xa0   :  { %v2140_v55 = vrot.slane %v2139_v43, 1  ;;  %v2150_v17 = vsel %vm2149_vm1, %v2147_v45, %v2148_v49  ;;  %v1951_v63 = vrot.slane %v1950_v10, 2  ;;  %v1962_v58 = vrot.slane %v1961_v56, 2 }
  0xa1   :  { %v2151_v42 = vrot.slane %v2150_v17, 1  ;;  %v548_v62 = vmul.f32 %v2749_v36, %v521_v2  ;;  %v1037_v29 = vsub.f32 2.0, %v1029_v39  ;;  %vm2636_vm10 = vcmask 1040384  }
  0xa2   :  { %vm2141_vm2 = vcmp.lt.s32.totalorder %v2139_v43, %v2140_v55  ;;  %vm1952_vm3 = vcmp.lt.s32.totalorder %v1950_v10, %v1951_v63  ;;  %vm1963_vm4 = vcmp.lt.s32.totalorder %v1961_v56, %v1962_v58  ;;  %v3575_v33 = vadd.f32 %v546_v24, %v3514_v19 }
  0xa3   :  { %v2142_v32 = vsel %vm2141_vm2, %v2139_v43, %v2140_v55  ;;  %vm2152_vm5 = vcmp.lt.s32.totalorder %v2150_v17, %v2151_v42  ;;  %v1953_v59 = vsel %vm1952_vm3, %v1950_v10, %v1951_v63  ;;  %v2730_v34 = vpop.eup %2729  ;;  %v1964_v16 = vsel %vm1963_vm4, %v1961_v56, %v1962_v58 }
  0xa4   :  { %v2153_v41 = vsel %vm2152_vm5, %v2150_v17, %v2151_v42  ;;  %vm2220_vm6 = vcmp.eq.s32.totalorder %v4751_v52, %v2142_v32  ;;  %vm2222_vm7 = vcmp.eq.s32.totalorder %v3390_v9, %v2142_v32  ;;  %v1954_v15 = vrot.slane %v1953_v59, 1 }
  0xa5   :  { %vm2221_vm8 = vcmp.eq.s32.totalorder %v4751_v52, %v2153_v41  ;;  %vm2223_vm9 = vcmp.eq.s32.totalorder %v3390_v9, %v2153_v41  ;;  %v3561_v3 = vsel %vm2220_vm6, -inf, %v3471_v60  ;;  %v3564_v48 = vsel %vm2222_vm7, -inf, %v3474_v54 }
  0xa6   :  { %v3567_v37 = vsel %vm2221_vm8, -inf, %v3477_v20  ;;  %v3570_v61 = vsel %vm2223_vm9, -inf, %v3480_v26  ;;  %v2252_v38 = vmax.f32 %v3561_v3, %v3564_v48  ;;  %v1965_v45 = vrot.slane %v1964_v16, 1 }
  0xa7   :  { %v2259_v60 = vmax.f32 %v3567_v37, %v3570_v61  ;;  %v1030_v54 = vmul.f32 %v2730_v34, %v3522_v53  ;;  %v1045_v20 = vmul.f32 %v2728_v18, %v1037_v29  ;;  %v3581_v31 = vadd.f32 %v547_v51, %v3516_v30  ;;  %v4769_v51 = vld [vmem:[#allocation35_spill] sm:$0xff] }
  0xa8   :  { %v2253_v8 = vrot.slane %v2252_v38, 4  ;;  %v3584_v26 = vadd.f32 %v548_v62, %v3518_v57  ;;  %vm1955_vm11 = vcmp.lt.s32.totalorder %v1953_v59, %v1954_v15  ;;  %vm1966_vm12 = vcmp.lt.s32.totalorder %v1964_v16, %v1965_v45 }
  0xa9   :  { %v2260_v49 = vrot.slane %v2259_v60, 4  ;;  %v1038_v19 = vsub.f32 2.0, %v1030_v54  ;;  %v3586_v7 = vsel %vm1955_vm11, %v1953_v59, %v1954_v15  ;;  %v3588_v39 = vsel %vm1966_vm12, %v1964_v16, %v1965_v45 }
  0xaa   :  { %v2254_v2 = vmax.f32 %v2252_v38, %v2253_v8  ;;  %v3591_v43 = vmul.f32 %v3434_v35, %v1045_v20  ;;  %vm2016_vm13 = vcmp.eq.s32.totalorder %v4751_v52, %v3586_v7  ;;  %vm2017_vm14 = vcmp.eq.s32.totalorder %v4751_v52, %v3588_v39 }
  0xab   :  { %v2261_v53 = vmax.f32 %v2259_v60, %v2260_v49  ;;  %vm2018_vm15 = vcmp.eq.s32.totalorder %v3390_v9, %v3586_v7  ;;  %vm2019_vm0 = vcmp.eq.s32.totalorder %v3390_v9, %v3588_v39  ;;  %v3602_v57 = vsel %vm2016_vm13, -inf, %v3450_v28 }
  0xac   :  { %v2255_v30 = vrot.slane %v2254_v2, 2  ;;  %v3605_v35 = vsel %vm2017_vm14, -inf, %v3464_v14  ;;  %v3608_v10 = vsel %vm2018_vm15, -inf, %v3453_v13  ;;  %v3611_v56 = vsel %vm2019_vm0, -inf, %v3485_v0 }
  0xad   :  { %v2262_v18 = vrot.slane %v2261_v53, 2  ;;  %v1046_v55 = vmul.f32 %v2730_v34, %v1038_v19  ;;  %v2058_v63 = vmax.f32 %v3602_v57, %v3608_v10  ;;  %v2065_v58 = vmax.f32 %v3605_v35, %v3611_v56 }
  0xae   :  { %v2256_v17 = vmax.f32 %v2254_v2, %v2255_v30  ;;  %v3618_v42 = vmul.f32 %v3437_v47, %v1045_v20  ;;  %v590_v36 = vcombine.high %v4769_v51, %v4769_v51  ;;  %v3632_v47 = vsel %vm2636_vm10, %v3447_v40, %v2142_v32 }
  0xaf   :  { %v2263_v50 = vmax.f32 %v2261_v53, %v2262_v18  ;;  %v3621_v24 = vmul.f32 %v3445_v11, %v1046_v55  ;;  %v3624_v21 = vmul.f32 %v3455_v44, %v1046_v55  ;;  %v2059_v1 = vrot.slane %v2058_v63, 4 }
  0xb0   :  { %v2257_v62 = vrot.slane %v2256_v17, 1  ;;  %v2066_v59 = vrot.slane %v2065_v58, 4  ;;  %v1864_v29 = vmax.f32 %v3591_v43, %v3618_v42  ;;  %v3637_v44 = vadd.f32 %v549_v25, %v3540_v12 }
  0xb1   :  { %4768 = vst [vmem:[#allocation29_spill] sm:$0xff] %v3624_v21  ;;  %v2264_v34 = vrot.slane %v2263_v50, 1  ;;  %v1871_v11 = vmax.f32 %v3621_v24, %v3624_v21  ;;  %v3641_v38 = vsel %vm2636_vm10, %v3457_v46, %v2153_v41  ;;  %v2060_v60 = vmax.f32 %v2058_v63, %v2059_v1 }
  0xb2   :  { %v2258_v16 = vmax.f32 %v2256_v17, %v2257_v62  ;;  %v2067_v15 = vmax.f32 %v2065_v58, %v2066_v59  ;;  %v1865_v54 = vrot.slane %v1864_v29, 4  ;;  %v618_v20 = vrot.slane %v590_v36, %v2846_v22  ;;  %v2751_v59 = vld [vmem:[%s4637_s1 + $0xa0] sm:$0xff] }
  0xb3   :  { %v2265_v45 = vmax.f32 %v2263_v50, %v2264_v34  ;;  %v1872_v8 = vrot.slane %v1871_v11, 4  ;;  %v2061_v40 = vrot.slane %v2060_v60, 2  ;;  %v622_v51 = vrot.slane %v590_v36, %v2849_v23 }
  0xb4   :  { %vm2308_vm1 = vcmp.eq.f32.partialorder %v3561_v3, %v2258_v16  ;;  %vm2310_vm2 = vcmp.eq.f32.partialorder %v3564_v48, %v2258_v16  ;;  %v2068_v32 = vrot.slane %v2067_v15, 2  ;;  %v1866_v53 = vmax.f32 %v1864_v29, %v1865_v54 }
  0xb5   :  { %vm2309_vm3 = vcmp.eq.f32.partialorder %v3567_v37, %v2265_v45  ;;  %vm2311_vm4 = vcmp.eq.f32.partialorder %v3570_v61, %v2265_v45  ;;  %v2324_v46 = vsel %vm2308_vm1, %v4751_v52, 16  ;;  %v2326_v12 = vsel %vm2310_vm2, %v3390_v9, 16 }
  0xb6   :  { %v2325_v25 = vsel %vm2309_vm3, %v4751_v52, 16  ;;  %v2327_v41 = vsel %vm2311_vm4, %v3390_v9, 16  ;;  %vm2340_vm5 = vcmp.lt.s32.totalorder %v2324_v46, %v2326_v12  ;;  %v2062_v49 = vmax.f32 %v2060_v60, %v2061_v40 }
  0xb7   :  { %v2341_v19 = vsel %vm2340_vm5, %v2324_v46, %v2326_v12  ;;  %vm2351_vm6 = vcmp.lt.s32.totalorder %v2325_v25, %v2327_v41  ;;  %v2069_v2 = vmax.f32 %v2067_v15, %v2068_v32  ;;  %v1873_v17 = vmax.f32 %v1871_v11, %v1872_v8 }
  0xb8   :  { %v2342_v30 = vrot.slane %v2341_v19, 4  ;;  %v2352_v18 = vsel %vm2351_vm6, %v2325_v25, %v2327_v41  ;;  %v2063_v55 = vrot.slane %v2062_v49, 1  ;;  %v1867_v50 = vrot.slane %v1866_v53, 2 }
  0xb9   :  { %v2353_v63 = vrot.slane %v2352_v18, 4  ;;  %v2070_v58 = vrot.slane %v2069_v2, 1  ;;  %v1874_v1 = vrot.slane %v1873_v17, 2  ;;  %v643_v34 = vmul.f32 %v2751_v59, %v618_v20 }
  0xba   :  { %vm2343_vm7 = vcmp.lt.s32.totalorder %v2341_v19, %v2342_v30  ;;  %v2064_v62 = vmax.f32 %v2062_v49, %v2063_v55  ;;  %v1868_v60 = vmax.f32 %v1866_v53, %v1867_v50  ;;  %v2752_v53 = vld [vmem:[%s4637_s1 + $0xa8] sm:$0xff]  ;;  %v2753_v55 = vld [vmem:[%s4637_s1 + $0xb0] sm:$0xff] }
  0xbb   :  { %v2344_v16 = vsel %vm2343_vm7, %v2341_v19, %v2342_v30  ;;  %vm2354_vm8 = vcmp.lt.s32.totalorder %v2352_v18, %v2353_v63  ;;  %v2071_v29 = vmax.f32 %v2069_v2, %v2070_v58  ;;  %v3667_v30 = vmul.f32 %v2752_v53, %v622_v51  ;;  %v2754_v58 = vld [vmem:[%s4637_s1 + $0xb8] sm:$0xff] }
  0xbc   :  { %v2345_v15 = vrot.slane %v2344_v16, 2  ;;  %v2355_v45 = vsel %vm2354_vm8, %v2352_v18, %v2353_v63  ;;  %vm2104_vm9 = vcmp.eq.f32.partialorder %v3602_v57, %v2064_v62  ;;  %vm2106_vm11 = vcmp.eq.f32.partialorder %v3608_v10, %v2064_v62 }
  0xbd   :  { %v2356_v11 = vrot.slane %v2355_v45, 2  ;;  %vm2105_vm12 = vcmp.eq.f32.partialorder %v3605_v35, %v2071_v29  ;;  %vm2107_vm13 = vcmp.eq.f32.partialorder %v3611_v56, %v2071_v29  ;;  %v2120_v36 = vsel %vm2104_vm9, %v4751_v52, 16 }
  0xbe   :  { %vm2346_vm14 = vcmp.lt.s32.totalorder %v2344_v16, %v2345_v15  ;;  %v2121_v54 = vsel %vm2105_vm12, %v4751_v52, 16  ;;  %v2122_v8 = vsel %vm2106_vm11, %v3390_v9, 16  ;;  %v2123_v40 = vsel %vm2107_vm13, %v3390_v9, 16 }
  0xbf   :  { %v2347_v32 = vsel %vm2346_vm14, %v2344_v16, %v2345_v15  ;;  %vm2357_vm15 = vcmp.lt.s32.totalorder %v2355_v45, %v2356_v11  ;;  %vm2154_vm0 = vcmp.lt.s32.totalorder %v2120_v36, %v2122_v8  ;;  %vm2165_vm1 = vcmp.lt.s32.totalorder %v2121_v54, %v2123_v40 }
  0xc0   :  { %v2348_v46 = vrot.slane %v2347_v32, 1  ;;  %v2358_v12 = vsel %vm2357_vm15, %v2355_v45, %v2356_v11  ;;  %v2155_v25 = vsel %vm2154_vm0, %v2120_v36, %v2122_v8  ;;  %v2166_v41 = vsel %vm2165_vm1, %v2121_v54, %v2123_v40 }
  0xc1   :  { %v2359_v49 = vrot.slane %v2358_v12, 1  ;;  %v2156_v19 = vrot.slane %v2155_v25, 4  ;;  %v2167_v2 = vrot.slane %v2166_v41, 4  ;;  %v1869_v18 = vrot.slane %v1868_v60, 1 }
  0xc2   :  { %vm2349_vm2 = vcmp.lt.s32.totalorder %v2347_v32, %v2348_v46  ;;  %v3672_v63 = vmul.f32 %v2753_v55, %v618_v20  ;;  %v3677_v50 = vmul.f32 %v2754_v58, %v622_v51  ;;  %v1875_v16 = vmax.f32 %v1873_v17, %v1874_v1 }
  0xc3   :  { %v3679_v62 = vsel %vm2349_vm2, %v2347_v32, %v2348_v46  ;;  %vm2360_vm3 = vcmp.lt.s32.totalorder %v2358_v12, %v2359_v49  ;;  %vm3681_vm4 = vcmp.lt.s32.totalorder %v2155_v25, %v2156_v19  ;;  %vm2168_vm7 = vcmp.lt.s32.totalorder %v2166_v41, %v2167_v2 }
  0xc4   :  { %v3685_v29 = vsel %vm2360_vm3, %v2358_v12, %v2359_v49  ;;  %vm2428_vm5 = vcmp.eq.s32.totalorder %v4751_v52, %v3679_v62  ;;  %vm2430_vm6 = vcmp.eq.s32.totalorder %v3390_v9, %v3679_v62  ;;  %v3710_v45 = vadd.f32 %v643_v34, %v3575_v33  ;;  %v4772_v33 = vld [vmem:[#allocation7_spill] sm:$0xff] }
  0xc5   :  { %vm2429_vm8 = vcmp.eq.s32.totalorder %v4751_v52, %v3685_v29  ;;  %vm2431_vm9 = vcmp.eq.s32.totalorder %v3390_v9, %v3685_v29  ;;  %v3696_v20 = vsel %vm2428_vm5, -inf, %v3561_v3  ;;  %v3699_v17 = vsel %vm2430_vm6, -inf, %v3564_v48 }
  0xc6   :  { %v3702_v51 = vsel %vm2429_vm8, -inf, %v3567_v37  ;;  %v3705_v1 = vsel %vm2431_vm9, -inf, %v3570_v61  ;;  %v2460_v15 = vmax.f32 %v3696_v20, %v3699_v17  ;;  %vm2645_vm11 = vcmask 1041408  }
  0xc7   :  { %v2467_v11 = vmax.f32 %v3702_v51, %v3705_v1  ;;  %v2158_v3 = vsel %vm3681_vm4, %v2155_v25, %v2156_v19  ;;  %v2169_v48 = vsel %vm2168_vm7, %v2166_v41, %v2167_v2  ;;  %v1870_v36 = vmax.f32 %v1868_v60, %v1869_v18 }
  0xc8   :  { %v2461_v37 = vrot.slane %v2460_v15, 4  ;;  %v2159_v54 = vrot.slane %v2158_v3, 2  ;;  %v2170_v8 = vrot.slane %v2169_v48, 2  ;;  %v1876_v61 = vrot.slane %v1875_v16, 1 }
  0xc9   :  { %v2468_v40 = vrot.slane %v2467_v11, 4  ;;  %vm1900_vm12 = vcmp.eq.f32.partialorder %v3591_v43, %v1870_v36  ;;  %vm1902_vm13 = vcmp.eq.f32.partialorder %v3618_v42, %v1870_v36  ;;  %v3720_v34 = vcombine.high %v4772_v33, %v4772_v33 }
  0xca   :  { %v2462_v32 = vmax.f32 %v2460_v15, %v2461_v37  ;;  %vm2160_vm14 = vcmp.lt.s32.totalorder %v2158_v3, %v2159_v54  ;;  %vm2171_vm15 = vcmp.lt.s32.totalorder %v2169_v48, %v2170_v8  ;;  %v1877_v46 = vmax.f32 %v1875_v16, %v1876_v61 }
  0xcb   :  { %v2469_v12 = vmax.f32 %v2467_v11, %v2468_v40  ;;  %v2161_v25 = vsel %vm2160_vm14, %v2158_v3, %v2159_v54  ;;  %v2172_v60 = vsel %vm2171_vm15, %v2169_v48, %v2170_v8  ;;  %v1916_v41 = vsel %vm1900_vm12, %v4751_v52, 16 }
  0xcc   :  { %v2463_v49 = vrot.slane %v2462_v32, 2  ;;  %v2162_v19 = vrot.slane %v2161_v25, 1  ;;  %v2173_v2 = vrot.slane %v2172_v60, 1  ;;  %vm1901_vm0 = vcmp.eq.f32.partialorder %v3621_v24, %v1877_v46 }
  0xcd   :  { %v2470_v53 = vrot.slane %v2469_v12, 2  ;;  %vm1903_vm1 = vcmp.eq.f32.partialorder %v3624_v21, %v1877_v46  ;;  %v1917_v18 = vsel %vm1901_vm0, %v4751_v52, 16  ;;  %v1918_v55 = vsel %vm1902_vm13, %v3390_v9, 16 }
  0xce   :  { %v2464_v58 = vmax.f32 %v2462_v32, %v2463_v49  ;;  %vm2163_vm2 = vcmp.lt.s32.totalorder %v2161_v25, %v2162_v19  ;;  %vm2174_vm3 = vcmp.lt.s32.totalorder %v2172_v60, %v2173_v2  ;;  %v1919_v59 = vsel %vm1903_vm1, %v3390_v9, 16 }
  0xcf   :  { %v2471_v16 = vmax.f32 %v2469_v12, %v2470_v53  ;;  %v3730_v15 = vsel %vm2163_vm2, %v2161_v25, %v2162_v19  ;;  %v3732_v11 = vsel %vm2174_vm3, %v2172_v60, %v2173_v2  ;;  %vm1968_vm4 = vcmp.lt.s32.totalorder %v1916_v41, %v1918_v55 }
  0xd0   :  { %v2465_v3 = vrot.slane %v2464_v58, 1  ;;  %vm2224_vm5 = vcmp.eq.s32.totalorder %v4751_v52, %v3730_v15  ;;  %vm2225_vm6 = vcmp.eq.s32.totalorder %v4751_v52, %v3732_v11  ;;  %vm2226_vm7 = vcmp.eq.s32.totalorder %v3390_v9, %v3730_v15 }
  0xd1   :  { %v2472_v48 = vrot.slane %v2471_v16, 1  ;;  %vm2227_vm8 = vcmp.eq.s32.totalorder %v3390_v9, %v3732_v11  ;;  %v3743_v36 = vsel %vm2224_vm5, -inf, %v3602_v57  ;;  %v3746_v37 = vsel %vm2225_vm6, -inf, %v3605_v35 }
  0xd2   :  { %v2466_v54 = vmax.f32 %v2464_v58, %v2465_v3  ;;  %v3751_v8 = vsel %vm2645_vm11, %v3632_v47, %v3679_v62  ;;  %v3754_v61 = vsel %vm2226_vm7, -inf, %v3608_v10  ;;  %v3757_v40 = vsel %vm2227_vm8, -inf, %v3611_v56 }
  0xd3   :  { %v2473_v33 = vmax.f32 %v2471_v16, %v2472_v48  ;;  %v3762_v57 = vsel %vm2645_vm11, %v3641_v38, %v3685_v29  ;;  %v2266_v35 = vmax.f32 %v3743_v36, %v3754_v61  ;;  %v2273_v32 = vmax.f32 %v3746_v37, %v3757_v40 }
  0xd4   :  { %vm2516_vm9 = vcmp.eq.f32.partialorder %v3696_v20, %v2466_v54  ;;  %vm2518_vm12 = vcmp.eq.f32.partialorder %v3699_v17, %v2466_v54  ;;  %v1969_v10 = vsel %vm1968_vm4, %v1916_v41, %v1918_v55  ;;  %vm1979_vm13 = vcmp.lt.s32.totalorder %v1917_v18, %v1919_v59 }
  0xd5   :  { %vm2517_vm14 = vcmp.eq.f32.partialorder %v3702_v51, %v2473_v33  ;;  %vm2519_vm15 = vcmp.eq.f32.partialorder %v3705_v1, %v2473_v33  ;;  %v2532_v56 = vsel %vm2516_vm9, %v4751_v52, 16  ;;  %v2534_v47 = vsel %vm2518_vm12, %v3390_v9, 16 }
  0xd6   :  { %v2533_v38 = vsel %vm2517_vm14, %v4751_v52, 16  ;;  %v2535_v62 = vsel %vm2519_vm15, %v3390_v9, 16  ;;  %vm2548_vm0 = vcmp.lt.s32.totalorder %v2532_v56, %v2534_v47  ;;  %v2267_v29 = vrot.slane %v2266_v35, 4 }
  0xd7   :  { %v2549_v20 = vsel %vm2548_vm0, %v2532_v56, %v2534_v47  ;;  %vm2559_vm1 = vcmp.lt.s32.totalorder %v2533_v38, %v2535_v62  ;;  %v2274_v17 = vrot.slane %v2273_v32, 4  ;;  %v1970_v46 = vrot.slane %v1969_v10, 4 }
  0xd8   :  { %v2550_v12 = vrot.slane %v2549_v20, 4  ;;  %v2560_v25 = vsel %vm2559_vm1, %v2533_v38, %v2535_v62  ;;  %v2268_v60 = vmax.f32 %v2266_v35, %v2267_v29  ;;  %v1980_v51 = vsel %vm1979_vm13, %v1917_v18, %v1919_v59 }
  0xd9   :  { %v2561_v1 = vrot.slane %v2560_v25, 4  ;;  %vm2654_vm2 = vcmask 1042432   ;;  %v2275_v41 = vmax.f32 %v2273_v32, %v2274_v17  ;;  %vm1971_vm3 = vcmp.lt.s32.totalorder %v1969_v10, %v1970_v46 }
  0xda   :  { %v1981_v49 = vrot.slane %v1980_v51, 4  ;;  %vm2551_vm4 = vcmp.lt.s32.totalorder %v2549_v20, %v2550_v12  ;;  %v2269_v19 = vrot.slane %v2268_v60, 2  ;;  %v1972_v2 = vsel %vm1971_vm3, %v1969_v10, %v1970_v46 }
  0xdb   :  { %v3780_v53 = vrot.slane %v3720_v34, %v2846_v22  ;;  %v2552_v55 = vsel %vm2551_vm4, %v2549_v20, %v2550_v12  ;;  %vm2562_vm5 = vcmp.lt.s32.totalorder %v2560_v25, %v2561_v1  ;;  %v2276_v58 = vrot.slane %v2275_v41, 2 }
  0xdc   :  { %v1973_v16 = vrot.slane %v1972_v2, 2  ;;  %v2553_v3 = vrot.slane %v2552_v55, 2  ;;  %v2563_v48 = vsel %vm2562_vm5, %v2560_v25, %v2561_v1  ;;  %v2270_v54 = vmax.f32 %v2268_v60, %v2269_v19 }
  0xdd   :  { %vm1982_vm6 = vcmp.lt.s32.totalorder %v1980_v51, %v1981_v49  ;;  %v2564_v18 = vrot.slane %v2563_v48, 2  ;;  %v2277_v59 = vmax.f32 %v2275_v41, %v2276_v58 }
  0xde   :  { %vm1974_vm7 = vcmp.lt.s32.totalorder %v1972_v2, %v1973_v16  ;;  %v1983_v33 = vsel %vm1982_vm6, %v1980_v51, %v1981_v49  ;;  %vm2554_vm8 = vcmp.lt.s32.totalorder %v2552_v55, %v2553_v3  ;;  %v2271_v35 = vrot.slane %v2270_v54, 1 }
  0xdf   :  { %v1975_v32 = vsel %vm1974_vm7, %v1972_v2, %v1973_v16  ;;  %v1984_v10 = vrot.slane %v1983_v33, 2  ;;  %v2555_v56 = vsel %vm2554_vm8, %v2552_v55, %v2553_v3  ;;  %vm2565_vm9 = vcmp.lt.s32.totalorder %v2563_v48, %v2564_v18 }
  0xe0   :  { %v2278_v47 = vrot.slane %v2277_v59, 1  ;;  %v1976_v38 = vrot.slane %v1975_v32, 1  ;;  %v2556_v62 = vrot.slane %v2555_v56, 1  ;;  %v2566_v29 = vsel %vm2565_vm9, %v2563_v48, %v2564_v18 }
  0xe1   :  { %v2272_v20 = vmax.f32 %v2270_v54, %v2271_v35  ;;  %vm1985_vm12 = vcmp.lt.s32.totalorder %v1983_v33, %v1984_v10  ;;  %v2567_v17 = vrot.slane %v2566_v29, 1 }
  0xe2   :  { %v2279_v46 = vmax.f32 %v2277_v59, %v2278_v47  ;;  %vm1977_vm13 = vcmp.lt.s32.totalorder %v1975_v32, %v1976_v38  ;;  %v1986_v12 = vsel %vm1985_vm12, %v1983_v33, %v1984_v10  ;;  %vm2557_vm14 = vcmp.lt.s32.totalorder %v2555_v56, %v2556_v62 }
  0xe3   :  { %vm2312_vm15 = vcmp.eq.f32.partialorder %v3743_v36, %v2272_v20  ;;  %vm2314_vm0 = vcmp.eq.f32.partialorder %v3754_v61, %v2272_v20  ;;  %v3784_v25 = vsel %vm1977_vm13, %v1975_v32, %v1976_v38  ;;  %v2558_v60 = vsel %vm2557_vm14, %v2555_v56, %v2556_v62 }
  0xe4   :  { %vm2568_vm1 = vcmp.lt.s32.totalorder %v2566_v29, %v2567_v17  ;;  %vm2313_vm3 = vcmp.eq.f32.partialorder %v3746_v37, %v2279_v46  ;;  %vm2315_vm4 = vcmp.eq.f32.partialorder %v3757_v40, %v2279_v46  ;;  %v2655_v1 = vsel %vm2654_vm2, %v3751_v8, %v2558_v60 }
  0xe5   :  { %v2569_v51 = vsel %vm2568_vm1, %v2566_v29, %v2567_v17  ;;  %v2328_v41 = vsel %vm2312_vm15, %v4751_v52, 16  ;;  %v2329_v49 = vsel %vm2313_vm3, %v4751_v52, 16  ;;  %v2330_v2 = vsel %vm2314_vm0, %v3390_v9, 16 }
  0xe6   :  { %v2656_v19 = vsel %vm2654_vm2, %v3762_v57, %v2569_v51  ;;  %v2331_v55 = vsel %vm2315_vm4, %v3390_v9, 16  ;;  %v1987_v58 = vrot.slane %v1986_v12, 1  ;;  %vm2362_vm5 = vcmp.lt.s32.totalorder %v2328_v41, %v2330_v2  ;;  %v2756_v51 = vld [vmem:[%s4637_s1 + $0xc8] sm:$0xff] }
  0xe7   :  { %v2663_v16 = vcombine.low %v2655_v1, %v2656_v19  ;;  %vm2373_vm6 = vcmp.lt.s32.totalorder %v2329_v49, %v2331_v55  ;;  %vm2020_vm7 = vcmp.eq.s32.totalorder %v4751_v52, %v3784_v25  ;;  %v2363_v3 = vsel %vm2362_vm5, %v2328_v41, %v2330_v2 }
  0xe8   :  { %v2374_v8 = vsel %vm2373_vm6, %v2329_v49, %v2331_v55  ;;  %vm1988_vm8 = vcmp.lt.s32.totalorder %v1986_v12, %v1987_v58  ;;  %vm2022_vm9 = vcmp.eq.s32.totalorder %v3390_v9, %v3784_v25  ;;  %v2364_v48 = vrot.slane %v2363_v3, 4 }
  0xe9   :  { %2667 = vst [vmem:[#allocation2] sm:$0xff] %v2663_v16  ;;  %v2375_v57 = vrot.slane %v2374_v8, 4  ;;  %v3800_v54 = vsel %vm1988_vm8, %v1986_v12, %v1987_v58  ;;  %v3803_v18 = vsel %vm2020_vm7, -inf, %v3591_v43  ;;  %v3810_v59 = vsel %vm2022_vm9, -inf, %v3618_v42  ;;  %v2755_v12 = vld [vmem:[%s4637_s1 + $0xc0] sm:$0xff]  ;;  %v2758_v58 = vld [vmem:[%s4637_s1 + $0xd8] sm:$0xff] }
  0xea   :  { %vm2021_vm12 = vcmp.eq.s32.totalorder %v4751_v52, %v3800_v54  ;;  %vm2023_vm13 = vcmp.eq.s32.totalorder %v3390_v9, %v3800_v54  ;;  %v719_v33 = vrot.slane %v3720_v34, %v2849_v23  ;;  %vm2365_vm14 = vcmp.lt.s32.totalorder %v2363_v3, %v2364_v48 }
  0xeb   :  { %vm2376_vm15 = vcmp.lt.s32.totalorder %v2374_v8, %v2375_v57  ;;  %v3815_v35 = vsel %vm2021_vm12, -inf, %v3621_v24  ;;  %v3818_v32 = vsel %vm2023_vm13, -inf, %v3624_v21  ;;  %v2366_v10 = vsel %vm2365_vm14, %v2363_v3, %v2364_v48  ;;  %v4773_v3 = vld [vmem:[#allocation28_spill] sm:$0xff] }
  0xec   :  { %v2377_v56 = vsel %vm2376_vm15, %v2374_v8, %v2375_v57  ;;  %v2072_v47 = vmax.f32 %v3803_v18, %v3810_v59  ;;  %v2079_v38 = vmax.f32 %v3815_v35, %v3818_v32  ;;  %v2367_v62 = vrot.slane %v2366_v10, 2 }
  0xed   :  { %v2378_v29 = vrot.slane %v2377_v56, 2  ;;  %v660_v34 = vadd.f32 %v3667_v30, %v3581_v31  ;;  %v661_v20 = vadd.f32 %v3672_v63, %v3584_v26  ;;  %v740_v60 = vmul.f32 %v2755_v12, %v3780_v53  ;;  %v2757_v26 = vld [vmem:[%s4637_s1 + $0xd0] sm:$0xff] }
  0xee   :  { %v2073_v17 = vrot.slane %v2072_v47, 4  ;;  %v2080_v46 = vrot.slane %v2079_v38, 4  ;;  %v741_v1 = vmul.f32 %v2756_v51, %v719_v33  ;;  %vm2368_vm0 = vcmp.lt.s32.totalorder %v2366_v10, %v2367_v62 }
  0xef   :  { %vm2379_vm1 = vcmp.lt.s32.totalorder %v2377_v56, %v2378_v29  ;;  %v662_v31 = vadd.f32 %v3677_v50, %v3637_v44  ;;  %v742_v30 = vmul.f32 %v2757_v26, %v3780_v53  ;;  %v2369_v63 = vsel %vm2368_vm0, %v2366_v10, %v2367_v62 }
  0xf0   :  { %v2380_v41 = vsel %vm2379_vm1, %v2377_v56, %v2378_v29  ;;  %v2074_v49 = vmax.f32 %v2072_v47, %v2073_v17  ;;  %v2081_v19 = vmax.f32 %v2079_v38, %v2080_v46  ;;  %v2370_v2 = vrot.slane %v2369_v63, 1 }
  0xf1   :  { %v2381_v55 = vrot.slane %v2380_v41, 1  ;;  %v743_v16 = vmul.f32 %v2758_v58, %v719_v33  ;;  %v784_v44 = vcombine.high %v4773_v3, %v4773_v3  ;;  %v756_v48 = vadd.f32 %v740_v60, %v3710_v45 }
  0xf2   :  { %v2075_v50 = vrot.slane %v2074_v49, 2  ;;  %v2082_v8 = vrot.slane %v2081_v19, 2  ;;  %v757_v57 = vadd.f32 %v741_v1, %v660_v34  ;;  %vm2371_vm3 = vcmp.lt.s32.totalorder %v2369_v63, %v2370_v2 }
  0xf3   :  { %vm2382_vm4 = vcmp.lt.s32.totalorder %v2380_v41, %v2381_v55  ;;  %v812_v53 = vrot.slane %v784_v44, %v2846_v22  ;;  %v816_v10 = vrot.slane %v784_v44, %v2849_v23  ;;  %v3849_v56 = vsel %vm2371_vm3, %v2369_v63, %v2370_v2 }
  0xf4   :  { %v3851_v47 = vsel %vm2382_vm4, %v2380_v41, %v2381_v55  ;;  %v2076_v38 = vmax.f32 %v2074_v49, %v2075_v50  ;;  %v2083_v33 = vmax.f32 %v2081_v19, %v2082_v8  ;;  %vm2432_vm5 = vcmp.eq.s32.totalorder %v4751_v52, %v3849_v56  ;;  %v2761_v41 = vld [vmem:[%s4637_s1 + $0xf0] sm:$0xff] }
  0xf5   :  { %vm2433_vm6 = vcmp.eq.s32.totalorder %v4751_v52, %v3851_v47  ;;  %vm2434_vm7 = vcmp.eq.s32.totalorder %v3390_v9, %v3849_v56  ;;  %vm2435_vm8 = vcmp.eq.s32.totalorder %v3390_v9, %v3851_v47  ;;  %v3862_v45 = vsel %vm2432_vm5, -inf, %v3743_v36 }
  0xf6   :  { %v3865_v62 = vsel %vm2433_vm6, -inf, %v3746_v37  ;;  %v3868_v29 = vsel %vm2434_vm7, -inf, %v3754_v61  ;;  %v3871_v34 = vsel %vm2435_vm8, -inf, %v3757_v40  ;;  %v758_v12 = vadd.f32 %v742_v30, %v661_v20  ;;  %v2759_v37 = vld [vmem:[%s4637_s1 + $0xe0] sm:$0xff]  ;;  %v2760_v61 = vld [vmem:[%s4637_s1 + $0xe8] sm:$0xff] }
  0xf7   :  { %v2474_v17 = vmax.f32 %v3862_v45, %v3868_v29  ;;  %v2481_v46 = vmax.f32 %v3865_v62, %v3871_v34  ;;  %v759_v60 = vadd.f32 %v743_v16, %v662_v31  ;;  %v2077_v51 = vrot.slane %v2076_v38, 1  ;;  %v2762_v31 = vld [vmem:[%s4637_s1 + $0xf8] sm:$0xff] }
  0xf8   :  { %v2084_v36 = vrot.slane %v2083_v33, 1  ;;  %v837_v1 = vmul.f32 %v2759_v37, %v812_v53  ;;  %v838_v40 = vmul.f32 %v2760_v61, %v816_v10  ;;  %v839_v20 = vmul.f32 %v2761_v41, %v812_v53 }
  0xf9   :  { %v2475_v26 = vrot.slane %v2474_v17, 4  ;;  %v2482_v63 = vrot.slane %v2481_v46, 4  ;;  %v840_v30 = vmul.f32 %v2762_v31, %v816_v10  ;;  %v2078_v49 = vmax.f32 %v2076_v38, %v2077_v51 }
  0xfa   :  { %v2085_v19 = vmax.f32 %v2083_v33, %v2084_v36  ;;  %v3889_v2 = vadd.f32 %v837_v1, %v756_v48  ;;  %v3891_v55 = vadd.f32 %v838_v40, %v757_v57  ;;  %v3893_v3 = vadd.f32 %v839_v20, %v758_v12 }
  0xfb   :  { %v2476_v58 = vmax.f32 %v2474_v17, %v2475_v26  ;;  %v2483_v16 = vmax.f32 %v2481_v46, %v2482_v63  ;;  %v3895_v44 = vadd.f32 %v840_v30, %v759_v60  ;;  %vm2108_vm9 = vcmp.eq.f32.partialorder %v3803_v18, %v2078_v49 }
  0xfc   :  { %vm2109_vm12 = vcmp.eq.f32.partialorder %v3815_v35, %v2085_v19  ;;  %vm2110_vm13 = vcmp.eq.f32.partialorder %v3810_v59, %v2078_v49  ;;  %vm2111_vm14 = vcmp.eq.f32.partialorder %v3818_v32, %v2085_v19  ;;  %v2124_v48 = vsel %vm2108_vm9, %v4751_v52, 16 }
  0xfd   :  { %v2477_v50 = vrot.slane %v2476_v58, 2  ;;  %v2484_v8 = vrot.slane %v2483_v16, 2  ;;  %v2125_v57 = vsel %vm2109_vm12, %v4751_v52, 16  ;;  %v2126_v53 = vsel %vm2110_vm13, %v3390_v9, 16 }
  0xfe   :  { %v2127_v10 = vsel %vm2111_vm14, %v3390_v9, 16  ;;  %v899_v38 = vmax.f32 %v3889_v2, %v3893_v3  ;;  %v906_v33 = vmax.f32 %v3891_v55, %v3895_v44  ;;  %vm2176_vm15 = vcmp.lt.s32.totalorder %v2124_v48, %v2126_v53 }
  0xff   :  { %v2478_v17 = vmax.f32 %v2476_v58, %v2477_v50  ;;  %v2485_v46 = vmax.f32 %v2483_v16, %v2484_v8  ;;  %vm2187_vm0 = vcmp.lt.s32.totalorder %v2125_v57, %v2127_v10  ;;  %v2177_v12 = vsel %vm2176_vm15, %v2124_v48, %v2126_v53 }
 0x100   :  { %v2188_v60 = vsel %vm2187_vm0, %v2125_v57, %v2127_v10  ;;  %v900_v51 = vrot.slane %v899_v38, 4  ;;  %v907_v36 = vrot.slane %v906_v33, 4  ;;  %v2178_v61 = vrot.slane %v2177_v12, 4 }
 0x101   :  { %v2479_v37 = vrot.slane %v2478_v17, 1  ;;  %v2486_v1 = vrot.slane %v2485_v46, 1  ;;  %v2189_v40 = vrot.slane %v2188_v60, 4  ;;  %v2639_v26 = vsel %vm2636_vm10, %v3586_v7, %v3730_v15 }
 0x102   :  { %v2640_v63 = vsel %vm2636_vm10, %v3588_v39, %v3732_v11  ;;  %v901_v41 = vmax.f32 %v899_v38, %v900_v51  ;;  %v908_v20 = vmax.f32 %v906_v33, %v907_v36  ;;  %vm2179_vm1 = vcmp.lt.s32.totalorder %v2177_v12, %v2178_v61 }
 0x103   :  { %v2480_v31 = vmax.f32 %v2478_v17, %v2479_v37  ;;  %v2487_v30 = vmax.f32 %v2485_v46, %v2486_v1  ;;  %vm2190_vm3 = vcmp.lt.s32.totalorder %v2188_v60, %v2189_v40  ;;  %v2180_v49 = vsel %vm2179_vm1, %v2177_v12, %v2178_v61 }
 0x104   :  { %v2191_v19 = vsel %vm2190_vm3, %v2188_v60, %v2189_v40  ;;  %v902_v58 = vrot.slane %v901_v41, 2  ;;  %v909_v16 = vrot.slane %v908_v20, 2  ;;  %v2181_v50 = vrot.slane %v2180_v49, 2 }
 0x105   :  { %vm2520_vm4 = vcmp.eq.f32.partialorder %v3862_v45, %v2480_v31  ;;  %vm2521_vm5 = vcmp.eq.f32.partialorder %v3865_v62, %v2487_v30  ;;  %vm2522_vm6 = vcmp.eq.f32.partialorder %v3868_v29, %v2480_v31  ;;  %vm2523_vm7 = vcmp.eq.f32.partialorder %v3871_v34, %v2487_v30 }
 0x106   :  { %v2536_v7 = vsel %vm2520_vm4, %v4751_v52, 16  ;;  %v2537_v39 = vsel %vm2521_vm5, %v4751_v52, 16  ;;  %v2538_v15 = vsel %vm2522_vm6, %v3390_v9, 16  ;;  %v2539_v11 = vsel %vm2523_vm7, %v3390_v9, 16 }
 0x107   :  { %vm2570_vm8 = vcmp.lt.s32.totalorder %v2536_v7, %v2538_v15  ;;  %vm2581_vm9 = vcmp.lt.s32.totalorder %v2537_v39, %v2539_v11  ;;  %v2192_v8 = vrot.slane %v2191_v19, 2  ;;  %v903_v57 = vmax.f32 %v901_v41, %v902_v58 }
 0x108   :  { %v2571_v48 = vsel %vm2570_vm8, %v2536_v7, %v2538_v15  ;;  %v2582_v45 = vsel %vm2581_vm9, %v2537_v39, %v2539_v11  ;;  %v910_v62 = vmax.f32 %v908_v20, %v909_v16  ;;  %vm2182_vm12 = vcmp.lt.s32.totalorder %v2180_v49, %v2181_v50 }
 0x109   :  { %v2572_v53 = vrot.slane %v2571_v48, 4  ;;  %v2583_v29 = vrot.slane %v2582_v45, 4  ;;  %vm2193_vm13 = vcmp.lt.s32.totalorder %v2191_v19, %v2192_v8  ;;  %v2183_v34 = vsel %vm2182_vm12, %v2180_v49, %v2181_v50 }
 0x10a   :  { %v2194_v10 = vsel %vm2193_vm13, %v2191_v19, %v2192_v8  ;;  %v904_v38 = vrot.slane %v903_v57, 1  ;;  %v911_v33 = vrot.slane %v910_v62, 1  ;;  %v2184_v17 = vrot.slane %v2183_v34, 1 }
 0x10b   :  { %vm2573_vm14 = vcmp.lt.s32.totalorder %v2571_v48, %v2572_v53  ;;  %vm2584_vm15 = vcmp.lt.s32.totalorder %v2582_v45, %v2583_v29  ;;  %v2195_v46 = vrot.slane %v2194_v10, 1  ;;  %v2648_v51 = vsel %vm2645_vm11, %v2639_v26, %v3849_v56 }
 0x10c   :  { %v2574_v12 = vsel %vm2573_vm14, %v2571_v48, %v2572_v53  ;;  %v2585_v60 = vsel %vm2584_vm15, %v2582_v45, %v2583_v29  ;;  %v2649_v36 = vsel %vm2645_vm11, %v2640_v63, %v3851_v47  ;;  %vm2185_vm0 = vcmp.lt.s32.totalorder %v2183_v34, %v2184_v17 }
 0x10d   :  { %v2575_v37 = vrot.slane %v2574_v12, 2  ;;  %v2586_v1 = vrot.slane %v2585_v60, 2  ;;  %vm2196_vm1 = vcmp.lt.s32.totalorder %v2194_v10, %v2195_v46  ;;  %v3927_v61 = vsel %vm2185_vm0, %v2183_v34, %v2184_v17 }
 0x10e   :  { %v3929_v40 = vsel %vm2196_vm1, %v2194_v10, %v2195_v46  ;;  %v905_v41 = vmax.f32 %v903_v57, %v904_v38  ;;  %v912_v20 = vmax.f32 %v910_v62, %v911_v33  ;;  %vm2228_vm5 = vcmp.eq.s32.totalorder %v4751_v52, %v3927_v61 }
 0x10f   :  { %vm2576_vm3 = vcmp.lt.s32.totalorder %v2574_v12, %v2575_v37  ;;  %vm2587_vm4 = vcmp.lt.s32.totalorder %v2585_v60, %v2586_v1  ;;  %vm2229_vm6 = vcmp.eq.s32.totalorder %v4751_v52, %v3929_v40  ;;  %vm2230_vm7 = vcmp.eq.s32.totalorder %v3390_v9, %v3927_v61 }
 0x110   :  { %v2577_v56 = vsel %vm2576_vm3, %v2574_v12, %v2575_v37  ;;  %v2588_v47 = vsel %vm2587_vm4, %v2585_v60, %v2586_v1  ;;  %vm2231_vm8 = vcmp.eq.s32.totalorder %v3390_v9, %v3929_v40  ;;  %v3940_v31 = vsel %vm2228_vm5, -inf, %v3803_v18 }
 0x111   :  { %v2578_v26 = vrot.slane %v2577_v56, 1  ;;  %v2589_v63 = vrot.slane %v2588_v47, 1  ;;  %v3943_v30 = vsel %vm2229_vm6, -inf, %v3815_v35  ;;  %v3946_v49 = vsel %vm2230_vm7, -inf, %v3810_v59 }
 0x112   :  { %v3949_v19 = vsel %vm2231_vm8, -inf, %v3818_v32  ;;  %v925_v58 = vsub.f32 %v3889_v2, %v905_v41  ;;  %v926_v16 = vsub.f32 %v3891_v55, %v912_v20  ;;  %v2280_v7 = vmax.f32 %v3940_v31, %v3946_v49 }
 0x113   :  { %vm2579_vm9 = vcmp.lt.s32.totalorder %v2577_v56, %v2578_v26  ;;  %vm2590_vm12 = vcmp.lt.s32.totalorder %v2588_v47, %v2589_v63  ;;  %v2287_v18 = vmax.f32 %v3943_v30, %v3949_v19  ;;  %v927_v59 = vsub.f32 %v3893_v3, %v905_v41 }
 0x114   :  { %v2580_v35 = vsel %vm2579_vm9, %v2577_v56, %v2578_v26  ;;  %v2591_v39 = vsel %vm2590_vm12, %v2588_v47, %v2589_v63  ;;  %v928_v15 = vsub.f32 %v3895_v44, %v912_v20  ;;  %v2281_v11 = vrot.slane %v2280_v7, 4 }
 0x115   :  { %v2657_v32 = vsel %vm2654_vm2, %v2648_v51, %v2580_v35  ;;  %v2658_v2 = vsel %vm2654_vm2, %v2649_v36, %v2591_v39  ;;  %v2288_v55 = vrot.slane %v2287_v18, 4  ;;  %v953_v8 = vmul.f32 1.442695, %v925_v58 }
 0x116   :  { %v2664_v50 = vcombine.low %v2657_v32, %v2658_v2  ;;  %v955_v48 = vmul.f32 1.442695, %v926_v16  ;;  %v957_v45 = vmul.f32 1.442695, %v927_v59  ;;  %v2282_v57 = vmax.f32 %v2280_v7, %v2281_v11 }
 0x117   :  { %v2289_v62 = vmax.f32 %v2287_v18, %v2288_v55  ;;  %v959_v53 = vmul.f32 1.442695, %v928_v15  ;;  %2731 = vpow2.f32 %v953_v8  ;;  %v2641_v32 = vsel %vm2636_vm10, %v3784_v25, %v3927_v61  ;;  %v3992_v25 = vld [vmem:[%s4638_s2] sm:$0xff] }
 0x118   :  { %2668 = vst [vmem:[#allocation2 + $0x8] sm:$0xff] %v2664_v50  ;;  %v2283_v29 = vrot.slane %v2282_v57, 2  ;;  %2733 = vpow2.f32 %v955_v48  ;;  %v2642_v11 = vsel %vm2636_vm10, %v3800_v54, %v3929_v40  ;;  %v1072_v61 = vrot.slane %v3372_v4, %v2846_v22 }
 0x119   :  { %v2290_v34 = vrot.slane %v2289_v62, 2  ;;  %2735 = vpow2.f32 %v957_v45  ;;  %v1068_v45 = vrot.slane %v3364_v27, %v2846_v22  ;;  %v1076_v54 = vrot.slane %v3450_v28, %v2846_v22 }
 0x11a   :  { %v2284_v3 = vmax.f32 %v2282_v57, %v2283_v29  ;;  %2737 = vpow2.f32 %v959_v53  ;;  %v1080_v40 = vrot.slane %v3464_v14, %v2846_v22 }
 0x11b   :  { %v2291_v44 = vmax.f32 %v2289_v62, %v2290_v34  ;;  %v1084_v34 = vrot.slane %v3591_v43, %v2846_v22 }
 0x11c   :  { %v2285_v10 = vrot.slane %v2284_v3, 1 }
 0x11d   :  { %v2292_v38 = vrot.slane %v2291_v44, 1 }
 0x11e   :  { %v2286_v33 = vmax.f32 %v2284_v3, %v2285_v10 }
 0x11f   :  { %v2293_v17 = vmax.f32 %v2291_v44, %v2292_v38  ;;  %v1088_v44 = vrot.slane %v3621_v24, %v2846_v22 }
 0x120   :  { %vm2316_vm13 = vcmp.eq.f32.partialorder %v3940_v31, %v2286_v33  ;;  %vm2318_vm15 = vcmp.eq.f32.partialorder %v3946_v49, %v2286_v33 }
 0x121   :  { %vm2317_vm14 = vcmp.eq.f32.partialorder %v3943_v30, %v2293_v17  ;;  %vm2319_vm0 = vcmp.eq.f32.partialorder %v3949_v19, %v2293_v17  ;;  %v3965_v46 = vpop.eup %2731  ;;  %v2332_v12 = vsel %vm2316_vm13, %v4751_v52, 16  ;;  %v2334_v51 = vsel %vm2318_vm15, %v3390_v9, 16 }
 0x122   :  { %v2333_v60 = vsel %vm2317_vm14, %v4751_v52, 16  ;;  %v2335_v36 = vsel %vm2319_vm0, %v3390_v9, 16  ;;  %v3971_v37 = vpop.eup %2733  ;;  %vm2384_vm1 = vcmp.lt.s32.totalorder %v2332_v12, %v2334_v51  ;;  %v1097_v17 = vmul.f32 %v1068_v45, %v3992_v25 }
 0x123   :  { %vm2395_vm3 = vcmp.lt.s32.totalorder %v2333_v60, %v2335_v36  ;;  %v3973_v1 = vpop.eup %2735  ;;  %v2385_v41 = vsel %vm2384_vm1, %v2332_v12, %v2334_v51  ;;  %v4012_v12 = vld [vmem:[%s4638_s2 + $0x8] sm:$0xff] }
 0x124   :  { %v2396_v20 = vsel %vm2395_vm3, %v2333_v60, %v2335_v36  ;;  %v3975_v56 = vpop.eup %2737  ;;  %v2386_v47 = vrot.slane %v2385_v41, 4  ;;  %v1003_v63 = vadd.f32 %v3973_v1, %v3965_v46 }
 0x125   :  { %v2397_v26 = vrot.slane %v2396_v20, 4  ;;  %v1010_v58 = vadd.f32 %v3975_v56, %v3971_v37 }
 0x126   :  { %vm2387_vm4 = vcmp.lt.s32.totalorder %v2385_v41, %v2386_v47  ;;  %v1004_v16 = vrot.slane %v1003_v63, 4 }
 0x127   :  { %vm2398_vm5 = vcmp.lt.s32.totalorder %v2396_v20, %v2397_v26  ;;  %v2388_v7 = vsel %vm2387_vm4, %v2385_v41, %v2386_v47  ;;  %v1011_v35 = vrot.slane %v1010_v58, 4 }
 0x128   :  { %v2399_v18 = vsel %vm2398_vm5, %v2396_v20, %v2397_v26  ;;  %v2389_v39 = vrot.slane %v2388_v7, 2  ;;  %v1005_v15 = vadd.f32 %v1004_v16, %v1003_v63 }
 0x129   :  { %v2400_v59 = vrot.slane %v2399_v18, 2  ;;  %v1012_v2 = vadd.f32 %v1011_v35, %v1010_v58  ;;  %v1101_v35 = vmul.f32 %v1084_v34, %v3992_v25 }
 0x12a   :  { %vm2390_vm6 = vcmp.lt.s32.totalorder %v2388_v7, %v2389_v39  ;;  %v1006_v55 = vrot.slane %v1005_v15, 2 }
 0x12b   :  { %vm2401_vm7 = vcmp.lt.s32.totalorder %v2399_v18, %v2400_v59  ;;  %v2391_v50 = vsel %vm2390_vm6, %v2388_v7, %v2389_v39  ;;  %v1013_v48 = vrot.slane %v1012_v2, 2  ;;  %v4045_v7 = vld [vmem:[%s4638_s2 + $0x10] sm:$0xff]  ;;  %v4053_v39 = vld [vmem:[%s4638_s2 + $0x18] sm:$0xff] }
 0x12c   :  { %v2402_v8 = vsel %vm2401_vm7, %v2399_v18, %v2400_v59  ;;  %v2392_v57 = vrot.slane %v2391_v50, 1  ;;  %v1007_v53 = vadd.f32 %v1006_v55, %v1005_v15  ;;  %v1100_v18 = vmul.f32 %v1080_v40, %v4012_v12 }
 0x12d   :  { %v2403_v62 = vrot.slane %v2402_v8, 1  ;;  %v1014_v29 = vadd.f32 %v1013_v48, %v1012_v2  ;;  %v1102_v59 = vmul.f32 %v1088_v44, %v4012_v12  ;;  %v1108_v15 = vrot.slane %v3364_v27, %v2849_v23 }
 0x12e   :  { %vm2393_vm8 = vcmp.lt.s32.totalorder %v2391_v50, %v2392_v57  ;;  %v1008_v3 = vrot.slane %v1007_v53, 1  ;;  %v1116_v55 = vrot.slane %v3450_v28, %v2849_v23  ;;  %v1128_v48 = vrot.slane %v3621_v24, %v2849_v23 }
 0x12f   :  { %vm2404_vm9 = vcmp.lt.s32.totalorder %v2402_v8, %v2403_v62  ;;  %v2394_v10 = vsel %vm2393_vm8, %v2391_v50, %v2392_v57  ;;  %v1015_v33 = vrot.slane %v1014_v29, 1  ;;  %v1120_v50 = vrot.slane %v3464_v14, %v2849_v23 }
 0x130   :  { %v2405_v38 = vsel %vm2404_vm9, %v2402_v8, %v2403_v62  ;;  %vm2436_vm12 = vcmp.eq.s32.totalorder %v4751_v52, %v2394_v10  ;;  %vm2438_vm14 = vcmp.eq.s32.totalorder %v3390_v9, %v2394_v10  ;;  %v4031_v26 = vsel %vm2645_vm11, %v2641_v32, %v2394_v10 }
 0x131   :  { %vm2437_vm13 = vcmp.eq.s32.totalorder %v4751_v52, %v2405_v38  ;;  %vm2439_vm15 = vcmp.eq.s32.totalorder %v3390_v9, %v2405_v38  ;;  %v4015_v60 = vsel %vm2436_vm12, -inf, %v3940_v31  ;;  %v4021_v36 = vsel %vm2438_vm14, -inf, %v3946_v49 }
 0x132   :  { %v4018_v51 = vsel %vm2437_vm13, -inf, %v3943_v30  ;;  %v4024_v41 = vsel %vm2439_vm15, -inf, %v3949_v19  ;;  %v2488_v20 = vmax.f32 %v4015_v60, %v4021_v36  ;;  %v4034_v31 = vsel %vm2645_vm11, %v2642_v11, %v2405_v38 }
 0x133   :  { %v2495_v47 = vmax.f32 %v4018_v51, %v4024_v41  ;;  %v4036_v30 = vadd.f32 %v1008_v3, %v1007_v53  ;;  %v4038_v63 = vadd.f32 %v1015_v33, %v1014_v29  ;;  %v1098_v49 = vmul.f32 %v1072_v61, %v4012_v12 }
 0x134   :  { %v1099_v19 = vmul.f32 %v1076_v54, %v3992_v25  ;;  %v2489_v58 = vrot.slane %v2488_v20, 4  ;;  %v1112_v32 = vrot.slane %v3372_v4, %v2849_v23  ;;  %v1124_v8 = vrot.slane %v3591_v43, %v2849_v23 }
 0x135   :  { %v2496_v16 = vrot.slane %v2495_v47, 4  ;;  %2739 = vrcp.f32 %v4036_v30  ;;  %v1137_v45 = vmul.f32 %v1108_v15, %v4045_v7  ;;  %v1139_v61 = vmul.f32 %v1116_v55, %v4045_v7 }
 0x136   :  { %v2490_v2 = vmax.f32 %v2488_v20, %v2489_v58  ;;  %2741 = vrcp.f32 %v4038_v63  ;;  %v1138_v53 = vmul.f32 %v1112_v32, %v4053_v39  ;;  %v1140_v29 = vmul.f32 %v1120_v50, %v4053_v39  ;;  %v4081_v32 = vld [vmem:[%s4638_s2 + $0x20] sm:$0xff] }
 0x137   :  { %v2497_v11 = vmax.f32 %v2495_v47, %v2496_v16  ;;  %v1141_v54 = vmul.f32 %v1124_v8, %v4045_v7  ;;  %v1142_v40 = vmul.f32 %v1128_v48, %v4053_v39  ;;  %v1145_v34 = vadd.f32 %v1137_v45, %v1097_v17  ;;  %v4086_v17 = vld [vmem:[%s4638_s2 + $0x28] sm:$0xff] }
 0x138   :  { %v2491_v57 = vrot.slane %v2490_v2, 2  ;;  %v1146_v10 = vadd.f32 %v1138_v53, %v1098_v49  ;;  %v1147_v38 = vadd.f32 %v1139_v61, %v1099_v19  ;;  %v1148_v33 = vadd.f32 %v1140_v29, %v1100_v18 }
 0x139   :  { %v2498_v62 = vrot.slane %v2497_v11, 2  ;;  %v1149_v20 = vadd.f32 %v1141_v54, %v1101_v35  ;;  %v1150_v47 = vadd.f32 %v1142_v40, %v1102_v59  ;;  %v4076_v58 = vsub.s32 2, %v4751_v52 }
 0x13a   :  { %v2492_v3 = vmax.f32 %v2490_v2, %v2491_v57  ;;  %v4089_v49 = vsub.s32 3, %v4751_v52  ;;  %v4092_v19 = vsub.s32 4, %v4751_v52 }
 0x13b   :  { %v2499_v44 = vmax.f32 %v2497_v11, %v2498_v62  ;;  %4774 = vst [vmem:[#allocation11_spill] sm:$0xff] %v4076_v58  ;;  %v1156_v18 = vrot.slane %v3364_v27, %v4076_v58  ;;  %v1160_v35 = vrot.slane %v3372_v4, %v4076_v58  ;;  %v1164_v59 = vrot.slane %v3450_v28, %v4076_v58 }
 0x13c   :  { %v2493_v16 = vrot.slane %v2492_v3, 1  ;;  %4775 = vst [vmem:[#allocation12_spill] sm:$0xff] %v4089_v49  ;;  %4776 = vst [vmem:[#allocation13_spill] sm:$0xff] %v4092_v19  ;;  %v1168_v2 = vrot.slane %v3464_v14, %v4076_v58  ;;  %v1172_v50 = vrot.slane %v3591_v43, %v4076_v58  ;;  %v1176_v8 = vrot.slane %v3621_v24, %v4076_v58 }
 0x13d   :  { %v2500_v15 = vrot.slane %v2499_v44, 1  ;;  %v1185_v45 = vmul.f32 %v1156_v18, %v4081_v32  ;;  %v1186_v57 = vmul.f32 %v1160_v35, %v4086_v17  ;;  %v1187_v62 = vmul.f32 %v1164_v59, %v4081_v32 }
 0x13e   :  { %v2494_v11 = vmax.f32 %v2492_v3, %v2493_v16  ;;  %v1188_v53 = vmul.f32 %v1168_v2, %v4086_v17 }
 0x13f   :  { %v2501_v55 = vmax.f32 %v2499_v44, %v2500_v15  ;;  %v2740_v48 = vpop.eup %2739  ;;  %v4122_v2 = vadd.f32 %v1185_v45, %v1145_v34 }
 0x140   :  { %v2742_v61 = vpop.eup %2741  ;;  %vm2524_vm0 = vcmp.eq.f32.partialorder %v4015_v60, %v2494_v11  ;;  %vm2526_vm3 = vcmp.eq.f32.partialorder %v4021_v36, %v2494_v11  ;;  %v1031_v44 = vmul.f32 %v2740_v48, %v4036_v30  ;;  %v1189_v36 = vmul.f32 %v1172_v50, %v4081_v32 }
 0x141   :  { %vm2525_vm1 = vcmp.eq.f32.partialorder %v4018_v51, %v2501_v55  ;;  %vm2527_vm4 = vcmp.eq.f32.partialorder %v4024_v41, %v2501_v55  ;;  %v2540_v29 = vsel %vm2524_vm0, %v4751_v52, 16  ;;  %v2542_v40 = vsel %vm2526_vm3, %v3390_v9, 16 }
 0x142   :  { %v2541_v54 = vsel %vm2525_vm1, %v4751_v52, 16  ;;  %v2543_v3 = vsel %vm2527_vm4, %v3390_v9, 16  ;;  %vm2592_vm5 = vcmp.lt.s32.totalorder %v2540_v29, %v2542_v40  ;;  %v1032_v60 = vmul.f32 %v2742_v61, %v4038_v63 }
 0x143   :  { %vm2603_vm6 = vcmp.lt.s32.totalorder %v2541_v54, %v2543_v3  ;;  %v2593_v16 = vsel %vm2592_vm5, %v2540_v29, %v2542_v40  ;;  %v1190_v41 = vmul.f32 %v1176_v8, %v4086_v17  ;;  %v1039_v35 = vsub.f32 2.0, %v1031_v44 }
 0x144   :  { %v2604_v51 = vsel %vm2603_vm6, %v2541_v54, %v2543_v3  ;;  %v2594_v15 = vrot.slane %v2593_v16, 4  ;;  %v1040_v59 = vsub.f32 2.0, %v1032_v60  ;;  %v4124_v11 = vadd.f32 %v1186_v57, %v1146_v10 }
 0x145   :  { %v2605_v18 = vrot.slane %v2604_v51, 4  ;;  %v4126_v55 = vadd.f32 %v1187_v62, %v1147_v38  ;;  %v4128_v21 = vadd.f32 %v1188_v53, %v1148_v33  ;;  %v1047_v30 = vmul.f32 %v2740_v48, %v1039_v35 }
 0x146   :  { %vm2595_vm7 = vcmp.lt.s32.totalorder %v2593_v16, %v2594_v15  ;;  %v1048_v63 = vmul.f32 %v2742_v61, %v1040_v59  ;;  %v4130_v54 = vadd.f32 %v1189_v36, %v1149_v20  ;;  %v4132_v8 = vadd.f32 %v1190_v41, %v1150_v47 }
 0x147   :  { %vm2606_vm8 = vcmp.lt.s32.totalorder %v2604_v51, %v2605_v18  ;;  %v2596_v29 = vsel %vm2595_vm7, %v2593_v16, %v2594_v15  ;;  %v4135_v34 = vmul.f32 %v3965_v46, %v1047_v30  ;;  %v4141_v38 = vmul.f32 %v3973_v1, %v1047_v30 }
 0x148   :  { %v2607_v50 = vsel %vm2606_vm8, %v2604_v51, %v2605_v18  ;;  %v2597_v40 = vrot.slane %v2596_v29, 2  ;;  %v4138_v10 = vmul.f32 %v3971_v37, %v1048_v63  ;;  %v4144_v33 = vmul.f32 %v3975_v56, %v1048_v63 }
 0x149   :  { %v2608_v3 = vrot.slane %v2607_v50, 2  ;;  %4777 = vst [vmem:[#allocation14_spill] sm:$0xff] %v4141_v38  ;;  %v1204_v20 = vrot.slane %v3364_v27, %v4089_v49  ;;  %v1208_v47 = vrot.slane %v3372_v4, %v4089_v49  ;;  %v1092_v46 = vrot.slane %v4135_v34, %v2846_v22 }
 0x14a   :  { %4778 = vst [vmem:[#allocation18_spill] sm:$0xff] %v4144_v33  ;;  %vm2598_vm9 = vcmp.lt.s32.totalorder %v2596_v29, %v2597_v40  ;;  %v1096_v37 = vrot.slane %v4138_v10, %v2846_v22  ;;  %v1878_v56 = vmax.f32 %v4135_v34, %v4141_v38  ;;  %v1885_v45 = vmax.f32 %v4138_v10, %v4144_v33 }
 0x14b   :  { %vm2609_vm12 = vcmp.lt.s32.totalorder %v2607_v50, %v2608_v3  ;;  %v2599_v48 = vsel %vm2598_vm9, %v2596_v29, %v2597_v40  ;;  %v1103_v53 = vmul.f32 %v1092_v46, %v3992_v25  ;;  %v1132_v16 = vrot.slane %v4135_v34, %v2849_v23  ;;  %v71_v46 = vld [vmem:[%s4638_s2 + $0x30] sm:$0xff] }
 0x14c   :  { %v2610_v1 = vsel %vm2609_vm12, %v2607_v50, %v2608_v3  ;;  %v2600_v57 = vrot.slane %v2599_v48, 1  ;;  %v1104_v61 = vmul.f32 %v1096_v37, %v4012_v12  ;;  %v1879_v44 = vrot.slane %v1878_v56, 4 }
 0x14d   :  { %v2611_v62 = vrot.slane %v2610_v1, 1  ;;  %v1886_v60 = vrot.slane %v1885_v45, 4  ;;  %v1136_v51 = vrot.slane %v4138_v10, %v2849_v23  ;;  %v1180_v36 = vrot.slane %v4135_v34, %v4076_v58 }
 0x14e   :  { %vm2601_vm13 = vcmp.lt.s32.totalorder %v2599_v48, %v2600_v57  ;;  %v1184_v41 = vrot.slane %v4138_v10, %v4076_v58  ;;  %v1880_v18 = vmax.f32 %v1878_v56, %v1879_v44  ;;  %v1143_v30 = vmul.f32 %v1132_v16, %v4045_v7 }
 0x14f   :  { %vm2612_vm14 = vcmp.lt.s32.totalorder %v2610_v1, %v2611_v62  ;;  %v2602_v15 = vsel %vm2601_vm13, %v2599_v48, %v2600_v57  ;;  %v1887_v12 = vmax.f32 %v1885_v45, %v1886_v60  ;;  %v1144_v63 = vmul.f32 %v1136_v51, %v4053_v39  ;;  %v72_v39 = vld [vmem:[%s4638_s2 + $0x38] sm:$0xff] }
 0x150   :  { %v2613_v25 = vsel %vm2612_vm14, %v2610_v1, %v2611_v62  ;;  %v2659_v35 = vsel %vm2654_vm2, %v4031_v26, %v2602_v15  ;;  %v1881_v50 = vrot.slane %v1880_v18, 2  ;;  %v1191_v3 = vmul.f32 %v1180_v36, %v4081_v32 }
 0x151   :  { %v2660_v59 = vsel %vm2654_vm2, %v4034_v31, %v2613_v25  ;;  %v1888_v40 = vrot.slane %v1887_v12, 2  ;;  %v1151_v37 = vadd.f32 %v1143_v30, %v1103_v53  ;;  %v1152_v48 = vadd.f32 %v1144_v63, %v1104_v61 }
 0x152   :  { %v2665_v29 = vcombine.low %v2659_v35, %v2660_v59  ;;  %v1192_v26 = vmul.f32 %v1184_v41, %v4086_v17  ;;  %v1212_v31 = vrot.slane %v3450_v28, %v4089_v49  ;;  %v1882_v7 = vmax.f32 %v1880_v18, %v1881_v50 }
 0x153   :  { %v1889_v1 = vmax.f32 %v1887_v12, %v1888_v40  ;;  %v1216_v32 = vrot.slane %v3464_v14, %v4089_v49  ;;  %v1220_v56 = vrot.slane %v3591_v43, %v4089_v49  ;;  %v1199_v45 = vadd.f32 %v1191_v3, %v1151_v37 }
 0x154   :  { %2669 = vst [vmem:[#allocation2 + $0x10] sm:$0xff] %v2665_v29  ;;  %v1200_v57 = vadd.f32 %v1192_v26, %v1152_v48  ;;  %v1224_v17 = vrot.slane %v3621_v24, %v4089_v49  ;;  %v1228_v62 = vrot.slane %v4135_v34, %v4089_v49  ;;  %v1883_v53 = vrot.slane %v1882_v7, 1  ;;  %v73_v26 = vld [vmem:[%s4638_s2 + $0x40] sm:$0xff] }
 0x155   :  { %v1890_v61 = vrot.slane %v1889_v1, 1  ;;  %v1232_v44 = vrot.slane %v4138_v10, %v4089_v49  ;;  %v1233_v60 = vmul.f32 %v1204_v20, %v71_v46  ;;  %v1234_v16 = vmul.f32 %v1208_v47, %v72_v39 }
 0x156   :  { %v1235_v51 = vmul.f32 %v1212_v31, %v71_v46  ;;  %v1236_v36 = vmul.f32 %v1216_v32, %v72_v39  ;;  %v1237_v41 = vmul.f32 %v1220_v56, %v71_v46  ;;  %v1884_v15 = vmax.f32 %v1882_v7, %v1883_v53 }
 0x157   :  { %v1891_v25 = vmax.f32 %v1889_v1, %v1890_v61  ;;  %v1238_v18 = vmul.f32 %v1224_v17, %v72_v39  ;;  %v1239_v12 = vmul.f32 %v1228_v62, %v71_v46  ;;  %v1240_v35 = vmul.f32 %v1232_v44, %v72_v39 }
 0x158   :  { %v1241_v59 = vadd.f32 %v1233_v60, %v4122_v2  ;;  %v1242_v30 = vadd.f32 %v1234_v16, %v4124_v11  ;;  %v1243_v63 = vadd.f32 %v1235_v51, %v4126_v55  ;;  %vm1904_vm15 = vcmp.eq.f32.partialorder %v4135_v34, %v1884_v15 }
 0x159   :  { %vm1905_vm0 = vcmp.eq.f32.partialorder %v4138_v10, %v1891_v25  ;;  %vm1906_vm1 = vcmp.eq.f32.partialorder %v4141_v38, %v1884_v15  ;;  %vm1907_vm3 = vcmp.eq.f32.partialorder %v4144_v33, %v1891_v25  ;;  %v1920_v20 = vsel %vm1904_vm15, %v4751_v52, 16 }
 0x15a   :  { %v1921_v47 = vsel %vm1905_vm0, %v4751_v52, 16  ;;  %v1922_v29 = vsel %vm1906_vm1, %v3390_v9, 16  ;;  %v1923_v2 = vsel %vm1907_vm3, %v3390_v9, 16  ;;  %v1244_v11 = vadd.f32 %v1236_v36, %v4128_v21  ;;  %v74_v21 = vld [vmem:[%s4638_s2 + $0x48] sm:$0xff] }
 0x15b   :  { %vm1990_vm4 = vcmp.lt.s32.totalorder %v1920_v20, %v1922_v29  ;;  %vm2001_vm5 = vcmp.lt.s32.totalorder %v1921_v47, %v1923_v2  ;;  %v1245_v55 = vadd.f32 %v1237_v41, %v4130_v54  ;;  %v1246_v3 = vadd.f32 %v1238_v18, %v4132_v8 }
 0x15c   :  { %v1991_v50 = vsel %vm1990_vm4, %v1920_v20, %v1922_v29  ;;  %v2002_v40 = vsel %vm2001_vm5, %v1921_v47, %v1923_v2  ;;  %v1247_v46 = vadd.f32 %v1239_v12, %v1199_v45  ;;  %v1248_v31 = vadd.f32 %v1240_v35, %v1200_v57 }
 0x15d   :  { %v1992_v37 = vrot.slane %v1991_v50, 4  ;;  %v2003_v48 = vrot.slane %v2002_v40, 4  ;;  %v1252_v7 = vrot.slane %v3364_v27, %v4092_v19  ;;  %v1256_v54 = vrot.slane %v3372_v4, %v4092_v19 }
 0x15e   :  { %v1260_v8 = vrot.slane %v3450_v28, %v4092_v19  ;;  %v1264_v1 = vrot.slane %v3464_v14, %v4092_v19  ;;  %v1268_v39 = vrot.slane %v3591_v43, %v4092_v19  ;;  %v1272_v32 = vrot.slane %v3621_v24, %v4092_v19 }
 0x15f   :  { %vm1993_vm6 = vcmp.lt.s32.totalorder %v1991_v50, %v1992_v37  ;;  %vm2004_vm7 = vcmp.lt.s32.totalorder %v2002_v40, %v2003_v48  ;;  %v1276_v56 = vrot.slane %v4135_v34, %v4092_v19  ;;  %v1280_v17 = vrot.slane %v4138_v10, %v4092_v19 }
 0x160   :  { %v1994_v45 = vsel %vm1993_vm6, %v1991_v50, %v1992_v37  ;;  %v2005_v57 = vsel %vm2004_vm7, %v2002_v40, %v2003_v48  ;;  %v1281_v62 = vmul.f32 %v1252_v7, %v73_v26  ;;  %v1282_v44 = vmul.f32 %v1256_v54, %v74_v21  ;;  %v75_v54 = vld [vmem:[%s4638_s2 + $0x50] sm:$0xff] }
 0x161   :  { %v1995_v53 = vrot.slane %v1994_v45, 2  ;;  %v2006_v61 = vrot.slane %v2005_v57, 2  ;;  %v1283_v60 = vmul.f32 %v1260_v8, %v73_v26  ;;  %v1284_v16 = vmul.f32 %v1264_v1, %v74_v21  ;;  %v76_v8 = vld [vmem:[%s4638_s2 + $0x58] sm:$0xff] }
 0x162   :  { %v1285_v51 = vmul.f32 %v1268_v39, %v73_v26  ;;  %v1286_v36 = vmul.f32 %v1272_v32, %v74_v21  ;;  %v1287_v41 = vmul.f32 %v1276_v56, %v73_v26  ;;  %v1288_v15 = vmul.f32 %v1280_v17, %v74_v21 }
 0x163   :  { %vm1996_vm8 = vcmp.lt.s32.totalorder %v1994_v45, %v1995_v53  ;;  %vm2007_vm9 = vcmp.lt.s32.totalorder %v2005_v57, %v2006_v61  ;;  %v1289_v25 = vadd.f32 %v1281_v62, %v1241_v59  ;;  %v1290_v35 = vadd.f32 %v1282_v44, %v1242_v30 }
 0x164   :  { %v1997_v18 = vsel %vm1996_vm8, %v1994_v45, %v1995_v53  ;;  %v2008_v12 = vsel %vm2007_vm9, %v2005_v57, %v2006_v61  ;;  %v1291_v20 = vadd.f32 %v1283_v60, %v1243_v63  ;;  %v1292_v2 = vadd.f32 %v1284_v16, %v1244_v11 }
 0x165   :  { %v1998_v47 = vrot.slane %v1997_v18, 1  ;;  %v2009_v29 = vrot.slane %v2008_v12, 1  ;;  %v1293_v50 = vadd.f32 %v1285_v51, %v1245_v55  ;;  %v1294_v40 = vadd.f32 %v1286_v36, %v1246_v3 }
 0x166   :  { %v1295_v37 = vadd.f32 %v1287_v41, %v1247_v46  ;;  %v1296_v48 = vadd.f32 %v1288_v15, %v1248_v31  ;;  %v4231_v7 = vsub.s32 5, %v4751_v52  ;;  %v4234_v26 = vsub.s32 6, %v4751_v52 }
 0x167   :  { %vm1999_vm12 = vcmp.lt.s32.totalorder %v1997_v18, %v1998_v47  ;;  %vm2010_vm13 = vcmp.lt.s32.totalorder %v2008_v12, %v2009_v29  ;;  %v4237_v59 = vsub.s32 7, %v4751_v52 }
 0x168   :  { %4779 = vst [vmem:[#allocation19_spill] sm:$0xff] %v4231_v7  ;;  %v4239_v30 = vsel %vm1999_vm12, %v1997_v18, %v1998_v47  ;;  %v4241_v63 = vsel %vm2010_vm13, %v2008_v12, %v2009_v29  ;;  %v1300_v11 = vrot.slane %v3364_v27, %v4231_v7  ;;  %v1304_v55 = vrot.slane %v3372_v4, %v4231_v7 }
 0x169   :  { %vm2024_vm14 = vcmp.eq.s32.totalorder %v4751_v52, %v4239_v30  ;;  %vm2025_vm15 = vcmp.eq.s32.totalorder %v4751_v52, %v4241_v63  ;;  %vm2026_vm0 = vcmp.eq.s32.totalorder %v3390_v9, %v4239_v30  ;;  %vm2027_vm1 = vcmp.eq.s32.totalorder %v3390_v9, %v4241_v63 }
 0x16a   :  { %v4256_v3 = vsel %vm2024_vm14, -inf, %v4135_v34  ;;  %v4259_v46 = vsel %vm2025_vm15, -inf, %v4138_v10  ;;  %v4262_v31 = vsel %vm2026_vm0, -inf, %v4141_v38  ;;  %v4265_v21 = vsel %vm2027_vm1, -inf, %v4144_v33 }
 0x16b   :  { %v2086_v1 = vmax.f32 %v4256_v3, %v4262_v31  ;;  %v2093_v39 = vmax.f32 %v4259_v46, %v4265_v21  ;;  %v1308_v32 = vrot.slane %v3450_v28, %v4231_v7  ;;  %v1312_v56 = vrot.slane %v3464_v14, %v4231_v7 }
 0x16c   :  { %v1316_v45 = vrot.slane %v3591_v43, %v4231_v7  ;;  %v1320_v57 = vrot.slane %v3621_v24, %v4231_v7  ;;  %v1324_v17 = vrot.slane %v4135_v34, %v4231_v7  ;;  %v1328_v62 = vrot.slane %v4138_v10, %v4231_v7 }
 0x16d   :  { %v2087_v53 = vrot.slane %v2086_v1, 4  ;;  %v2094_v61 = vrot.slane %v2093_v39, 4  ;;  %v1329_v44 = vmul.f32 %v1300_v11, %v75_v54  ;;  %v1330_v60 = vmul.f32 %v1304_v55, %v76_v8  ;;  %v77_v11 = vld [vmem:[%s4638_s2 + $0x60] sm:$0xff]  ;;  %v78_v55 = vld [vmem:[%s4638_s2 + $0x68] sm:$0xff] }
 0x16e   :  { %v1331_v16 = vmul.f32 %v1308_v32, %v75_v54  ;;  %v1332_v51 = vmul.f32 %v1312_v56, %v76_v8  ;;  %v1333_v36 = vmul.f32 %v1316_v45, %v75_v54  ;;  %v1334_v41 = vmul.f32 %v1320_v57, %v76_v8 }
 0x16f   :  { %v2088_v15 = vmax.f32 %v2086_v1, %v2087_v53  ;;  %v2095_v18 = vmax.f32 %v2093_v39, %v2094_v61  ;;  %v1335_v12 = vmul.f32 %v1324_v17, %v75_v54  ;;  %v1336_v47 = vmul.f32 %v1328_v62, %v76_v8 }
 0x170   :  { %v1337_v29 = vadd.f32 %v1329_v44, %v1289_v25  ;;  %v1338_v19 = vadd.f32 %v1330_v60, %v1290_v35  ;;  %v1339_v49 = vadd.f32 %v1331_v16, %v1291_v20  ;;  %v1340_v58 = vadd.f32 %v1332_v51, %v1292_v2 }
 0x171   :  { %v2089_v23 = vrot.slane %v2088_v15, 2  ;;  %v2096_v33 = vrot.slane %v2095_v18, 2  ;;  %v1341_v38 = vadd.f32 %v1333_v36, %v1293_v50  ;;  %v1342_v7 = vadd.f32 %v1334_v41, %v1294_v40 }
 0x172   :  { %v1343_v1 = vadd.f32 %v1335_v12, %v1295_v37  ;;  %v1344_v39 = vadd.f32 %v1336_v47, %v1296_v48  ;;  %v1348_v25 = vrot.slane %v3364_v27, %v4234_v26  ;;  %v1352_v35 = vrot.slane %v3372_v4, %v4234_v26 }
 0x173   :  { %v2090_v20 = vmax.f32 %v2088_v15, %v2089_v23  ;;  %v2097_v2 = vmax.f32 %v2095_v18, %v2096_v33  ;;  %v1356_v50 = vrot.slane %v3450_v28, %v4234_v26  ;;  %v1360_v40 = vrot.slane %v3464_v14, %v4234_v26 }
 0x174   :  { %v1364_v54 = vrot.slane %v3591_v43, %v4234_v26  ;;  %v1368_v37 = vrot.slane %v3621_v24, %v4234_v26  ;;  %v1372_v48 = vrot.slane %v4135_v34, %v4234_v26  ;;  %v1376_v8 = vrot.slane %v4138_v10, %v4234_v26 }
 0x175   :  { %v2091_v23 = vrot.slane %v2090_v20, 1  ;;  %v2098_v33 = vrot.slane %v2097_v2, 1  ;;  %v1377_v32 = vmul.f32 %v1348_v25, %v77_v11  ;;  %v1378_v56 = vmul.f32 %v1352_v35, %v78_v55 }
 0x176   :  { %v1379_v45 = vmul.f32 %v1356_v50, %v77_v11  ;;  %v1380_v57 = vmul.f32 %v1360_v40, %v78_v55  ;;  %v1381_v17 = vmul.f32 %v1364_v54, %v77_v11  ;;  %v1382_v62 = vmul.f32 %v1368_v37, %v78_v55 }
 0x177   :  { %v2092_v53 = vmax.f32 %v2090_v20, %v2091_v23  ;;  %v2099_v61 = vmax.f32 %v2097_v2, %v2098_v33  ;;  %v1383_v44 = vmul.f32 %v1372_v48, %v77_v11  ;;  %v1384_v60 = vmul.f32 %v1376_v8, %v78_v55  ;;  %v79_v20 = vld [vmem:[%s4638_s2 + $0x70] sm:$0xff]  ;;  %v80_v2 = vld [vmem:[%s4638_s2 + $0x78] sm:$0xff] }
 0x178   :  { %v1385_v16 = vadd.f32 %v1377_v32, %v1337_v29  ;;  %v1386_v51 = vadd.f32 %v1378_v56, %v1338_v19  ;;  %v1387_v36 = vadd.f32 %v1379_v45, %v1339_v49  ;;  %v1388_v41 = vadd.f32 %v1380_v57, %v1340_v58 }
 0x179   :  { %vm2112_vm3 = vcmp.eq.f32.partialorder %v4256_v3, %v2092_v53  ;;  %vm2113_vm4 = vcmp.eq.f32.partialorder %v4259_v46, %v2099_v61  ;;  %vm2114_vm5 = vcmp.eq.f32.partialorder %v4262_v31, %v2092_v53  ;;  %vm2115_vm6 = vcmp.eq.f32.partialorder %v4265_v21, %v2099_v61 }
 0x17a   :  { %v2128_v15 = vsel %vm2112_vm3, %v4751_v52, 16  ;;  %v2129_v18 = vsel %vm2113_vm4, %v4751_v52, 16  ;;  %v2130_v12 = vsel %vm2114_vm5, %v3390_v9, 16  ;;  %v2131_v47 = vsel %vm2115_vm6, %v3390_v9, 16 }
 0x17b   :  { %vm2198_vm7 = vcmp.lt.s32.totalorder %v2128_v15, %v2130_v12  ;;  %vm2209_vm8 = vcmp.lt.s32.totalorder %v2129_v18, %v2131_v47  ;;  %v1389_v49 = vadd.f32 %v1381_v17, %v1341_v38  ;;  %v1390_v58 = vadd.f32 %v1382_v62, %v1342_v7 }
 0x17c   :  { %v2199_v19 = vsel %vm2198_vm7, %v2128_v15, %v2130_v12  ;;  %v2210_v29 = vsel %vm2209_vm8, %v2129_v18, %v2131_v47  ;;  %v1391_v11 = vadd.f32 %v1383_v44, %v1343_v1  ;;  %v1392_v55 = vadd.f32 %v1384_v60, %v1344_v39 }
 0x17d   :  { %v2200_v25 = vrot.slane %v2199_v19, 4  ;;  %v2211_v35 = vrot.slane %v2210_v29, 4  ;;  %v1396_v50 = vrot.slane %v3364_v27, %v4237_v59  ;;  %v1400_v38 = vrot.slane %v3372_v4, %v4237_v59 }
 0x17e   :  { %v1404_v7 = vrot.slane %v3450_v28, %v4237_v59  ;;  %v1408_v1 = vrot.slane %v3464_v14, %v4237_v59  ;;  %v1412_v39 = vrot.slane %v3591_v43, %v4237_v59  ;;  %v1416_v40 = vrot.slane %v3621_v24, %v4237_v59 }
 0x17f   :  { %vm2201_vm9 = vcmp.lt.s32.totalorder %v2199_v19, %v2200_v25  ;;  %vm2212_vm12 = vcmp.lt.s32.totalorder %v2210_v29, %v2211_v35  ;;  %v1420_v27 = vrot.slane %v4135_v34, %v4237_v59  ;;  %v1424_v4 = vrot.slane %v4138_v10, %v4237_v59 }
 0x180   :  { %v2202_v54 = vsel %vm2201_vm9, %v2199_v19, %v2200_v25  ;;  %v2213_v37 = vsel %vm2212_vm12, %v2210_v29, %v2211_v35  ;;  %v1425_v28 = vmul.f32 %v1396_v50, %v79_v20  ;;  %v1426_v48 = vmul.f32 %v1400_v38, %v80_v2  ;;  %v81_v29 = vld [vmem:[%s4638_s2 + $0x80] sm:$0xff] }
 0x181   :  { %v2203_v8 = vrot.slane %v2202_v54, 2  ;;  %v2214_v14 = vrot.slane %v2213_v37, 2  ;;  %v1427_v23 = vmul.f32 %v1404_v7, %v79_v20  ;;  %v1428_v33 = vmul.f32 %v1408_v1, %v80_v2 }
 0x182   :  { %v1429_v43 = vmul.f32 %v1412_v39, %v79_v20  ;;  %v1430_v32 = vmul.f32 %v1416_v40, %v80_v2  ;;  %v1431_v56 = vmul.f32 %v1420_v27, %v79_v20  ;;  %v1432_v24 = vmul.f32 %v1424_v4, %v80_v2 }
 0x183   :  { %vm2204_vm13 = vcmp.lt.s32.totalorder %v2202_v54, %v2203_v8  ;;  %vm2215_vm14 = vcmp.lt.s32.totalorder %v2213_v37, %v2214_v14  ;;  %v1433_v45 = vadd.f32 %v1425_v28, %v1385_v16  ;;  %v1434_v57 = vadd.f32 %v1426_v48, %v1386_v51 }
 0x184   :  { %v2205_v34 = vsel %vm2204_vm13, %v2202_v54, %v2203_v8  ;;  %v2216_v17 = vsel %vm2215_vm14, %v2213_v37, %v2214_v14  ;;  %v1435_v62 = vadd.f32 %v1427_v23, %v1387_v36  ;;  %v1436_v10 = vadd.f32 %v1428_v33, %v1388_v41 }
 0x185   :  { %v2206_v53 = vrot.slane %v2205_v34, 1  ;;  %v2217_v61 = vrot.slane %v2216_v17, 1  ;;  %v1437_v44 = vadd.f32 %v1429_v43, %v1389_v49  ;;  %v1438_v60 = vadd.f32 %v1430_v32, %v1390_v58  ;;  %v4780_v58 = vld [vmem:[#allocation29_spill] sm:$0xff] }
 0x186   :  { %v1439_v15 = vadd.f32 %v1431_v56, %v1391_v11  ;;  %v1440_v18 = vadd.f32 %v1432_v24, %v1392_v55  ;;  %v1444_v12 = vrot.slane %v3367_v6, %v2846_v22  ;;  %v1448_v47 = vrot.slane %v3375_v5, %v2846_v22  ;;  %v82_v11 = vld [vmem:[%s4638_s2 + $0x88] sm:$0xff] }
 0x187   :  { %vm2207_vm15 = vcmp.lt.s32.totalorder %v2205_v34, %v2206_v53  ;;  %vm2218_vm0 = vcmp.lt.s32.totalorder %v2216_v17, %v2217_v61  ;;  %v1452_v16 = vrot.slane %v3453_v13, %v2846_v22  ;;  %v1456_v51 = vrot.slane %v3485_v0, %v2846_v22 }
 0x188   :  { %v2208_v36 = vsel %vm2207_vm15, %v2205_v34, %v2206_v53  ;;  %v2219_v41 = vsel %vm2218_vm0, %v2216_v17, %v2217_v61  ;;  %v1460_v49 = vrot.slane %v3618_v42, %v2846_v22  ;;  %v1464_v19 = vrot.slane %v4780_v58, %v2846_v22  ;;  %v83_v34 = vld [vmem:[%s4638_s2 + $0x90] sm:$0xff]  ;;  %v84_v17 = vld [vmem:[%s4638_s2 + $0x98] sm:$0xff] }
 0x189   :  { %vm2232_vm1 = vcmp.eq.s32.totalorder %v4751_v52, %v2208_v36  ;;  %vm2233_vm3 = vcmp.eq.s32.totalorder %v4751_v52, %v2219_v41  ;;  %vm2234_vm4 = vcmp.eq.s32.totalorder %v3390_v9, %v2208_v36  ;;  %vm2235_vm5 = vcmp.eq.s32.totalorder %v3390_v9, %v2219_v41 }
 0x18a   :  { %v4364_v55 = vsel %vm2232_vm1, -inf, %v4256_v3  ;;  %v4367_v25 = vsel %vm2233_vm3, -inf, %v4259_v46  ;;  %v4370_v35 = vsel %vm2234_vm4, -inf, %v4262_v31  ;;  %v4373_v20 = vsel %vm2235_vm5, -inf, %v4265_v21  ;;  %v4781_v46 = vld [vmem:[#allocation14_spill] sm:$0xff] }
 0x18b   :  { %v2294_v2 = vmax.f32 %v4364_v55, %v4370_v35  ;;  %v2301_v50 = vmax.f32 %v4367_v25, %v4373_v20  ;;  %v4381_v38 = vsel %vm2636_vm10, %v4239_v30, %v2208_v36  ;;  %v4385_v3 = vsel %vm2636_vm10, %v4241_v63, %v2219_v41  ;;  %v4782_v21 = vld [vmem:[#allocation18_spill] sm:$0xff] }
 0x18c   :  { %v1468_v31 = vrot.slane %v4781_v46, %v2846_v22  ;;  %v1472_v7 = vrot.slane %v4782_v21, %v2846_v22  ;;  %v1473_v1 = vmul.f32 %v1444_v12, %v81_v29  ;;  %v1474_v39 = vmul.f32 %v1448_v47, %v82_v11  ;;  %v4783_v12 = vld [vmem:[#allocation6_spill] sm:$0xff] }
 0x18d   :  { %v2295_v40 = vrot.slane %v2294_v2, 4  ;;  %v2302_v27 = vrot.slane %v2301_v50, 4  ;;  %v1475_v4 = vmul.f32 %v1452_v16, %v81_v29  ;;  %v1476_v54 = vmul.f32 %v1456_v51, %v82_v11 }
 0x18e   :  { %v1477_v37 = vmul.f32 %v1460_v49, %v81_v29  ;;  %v1478_v28 = vmul.f32 %v1464_v19, %v82_v11  ;;  %v1479_v30 = vmul.f32 %v1468_v31, %v81_v29  ;;  %v1480_v48 = vmul.f32 %v1472_v7, %v82_v11 }
 0x18f   :  { %v2296_v8 = vmax.f32 %v2294_v2, %v2295_v40  ;;  %v2303_v14 = vmax.f32 %v2301_v50, %v2302_v27  ;;  %v1481_v63 = vadd.f32 %v1473_v1, %v1433_v45  ;;  %v1482_v23 = vadd.f32 %v1474_v39, %v1434_v57 }
 0x190   :  { %v1483_v33 = vadd.f32 %v1475_v4, %v1435_v62  ;;  %v1484_v43 = vadd.f32 %v1476_v54, %v1436_v10  ;;  %v1485_v32 = vadd.f32 %v1477_v37, %v1437_v44  ;;  %v1486_v56 = vadd.f32 %v1478_v28, %v1438_v60 }
 0x191   :  { %v2297_v24 = vrot.slane %v2296_v8, 2  ;;  %v2304_v22 = vrot.slane %v2303_v14, 2  ;;  %v1487_v53 = vadd.f32 %v1479_v30, %v1439_v15  ;;  %v1488_v61 = vadd.f32 %v1480_v48, %v1440_v18 }
 0x192   :  { %v1492_v45 = vrot.slane %v3367_v6, %v4783_v12  ;;  %v1496_v57 = vrot.slane %v3375_v5, %v4783_v12  ;;  %v1500_v62 = vrot.slane %v3453_v13, %v4783_v12  ;;  %v1504_v10 = vrot.slane %v3485_v0, %v4783_v12 }
 0x193   :  { %v2298_v44 = vmax.f32 %v2296_v8, %v2297_v24  ;;  %v2305_v60 = vmax.f32 %v2303_v14, %v2304_v22  ;;  %v1508_v47 = vrot.slane %v3618_v42, %v4783_v12  ;;  %v1512_v15 = vrot.slane %v4780_v58, %v4783_v12 }
 0x194   :  { %v1516_v18 = vrot.slane %v4781_v46, %v4783_v12  ;;  %v1520_v16 = vrot.slane %v4782_v21, %v4783_v12  ;;  %v1521_v51 = vmul.f32 %v1492_v45, %v83_v34  ;;  %v1522_v36 = vmul.f32 %v1496_v57, %v84_v17 }
 0x195   :  { %v2299_v41 = vrot.slane %v2298_v44, 1  ;;  %v2306_v49 = vrot.slane %v2305_v60, 1  ;;  %v1523_v19 = vmul.f32 %v1500_v62, %v83_v34  ;;  %v1524_v29 = vmul.f32 %v1504_v10, %v84_v17 }
 0x196   :  { %v1525_v11 = vmul.f32 %v1508_v47, %v83_v34  ;;  %v1526_v2 = vmul.f32 %v1512_v15, %v84_v17  ;;  %v1527_v50 = vmul.f32 %v1516_v18, %v83_v34  ;;  %v1528_v31 = vmul.f32 %v1520_v16, %v84_v17 }
 0x197   :  { %v2300_v7 = vmax.f32 %v2298_v44, %v2299_v41  ;;  %v2307_v1 = vmax.f32 %v2305_v60, %v2306_v49  ;;  %v1529_v39 = vadd.f32 %v1521_v51, %v1481_v63  ;;  %v1530_v40 = vadd.f32 %v1522_v36, %v1482_v23 }
 0x198   :  { %v1531_v27 = vadd.f32 %v1523_v19, %v1483_v33  ;;  %v1532_v4 = vadd.f32 %v1524_v29, %v1484_v43  ;;  %v1533_v54 = vadd.f32 %v1525_v11, %v1485_v32  ;;  %v1534_v37 = vadd.f32 %v1526_v2, %v1486_v56  ;;  %v85_v43 = vld [vmem:[%s4638_s2 + $0xa0] sm:$0xff]  ;;  %v86_v32 = vld [vmem:[%s4638_s2 + $0xa8] sm:$0xff]  ;;  %v4784_v56 = vld [vmem:[#allocation11_spill] sm:$0xff] }
 0x199   :  { %vm2320_vm10 = vcmp.eq.f32.partialorder %v4364_v55, %v2300_v7  ;;  %vm2321_vm6 = vcmp.eq.f32.partialorder %v4367_v25, %v2307_v1  ;;  %vm2322_vm7 = vcmp.eq.f32.partialorder %v4370_v35, %v2300_v7  ;;  %vm2323_vm8 = vcmp.eq.f32.partialorder %v4373_v20, %v2307_v1 }
 0x19a   :  { %v2336_v28 = vsel %vm2320_vm10, %v4751_v52, 16  ;;  %v2337_v30 = vsel %vm2321_vm6, %v4751_v52, 16  ;;  %v2338_v48 = vsel %vm2322_vm7, %v3390_v9, 16  ;;  %v2339_v8 = vsel %vm2323_vm8, %v3390_v9, 16 }
 0x19b   :  { %vm2406_vm9 = vcmp.lt.s32.totalorder %v2336_v28, %v2338_v48  ;;  %vm2417_vm12 = vcmp.lt.s32.totalorder %v2337_v30, %v2339_v8  ;;  %v1535_v14 = vadd.f32 %v1527_v50, %v1487_v53  ;;  %v1536_v63 = vadd.f32 %v1528_v31, %v1488_v61 }
 0x19c   :  { %v2407_v23 = vsel %vm2406_vm9, %v2336_v28, %v2338_v48  ;;  %v2418_v33 = vsel %vm2417_vm12, %v2337_v30, %v2339_v8  ;;  %v1540_v24 = vrot.slane %v3367_v6, %v4784_v56  ;;  %v1544_v22 = vrot.slane %v3375_v5, %v4784_v56 }
 0x19d   :  { %v2408_v34 = vrot.slane %v2407_v23, 4  ;;  %v2419_v17 = vrot.slane %v2418_v33, 4  ;;  %v1548_v53 = vrot.slane %v3453_v13, %v4784_v56  ;;  %v1552_v61 = vrot.slane %v3485_v0, %v4784_v56 }
 0x19e   :  { %v1556_v12 = vrot.slane %v3618_v42, %v4784_v56  ;;  %v1560_v45 = vrot.slane %v4780_v58, %v4784_v56  ;;  %v1564_v57 = vrot.slane %v4781_v46, %v4784_v56  ;;  %v1568_v62 = vrot.slane %v4782_v21, %v4784_v56 }
 0x19f   :  { %vm2409_vm13 = vcmp.lt.s32.totalorder %v2407_v23, %v2408_v34  ;;  %vm2420_vm14 = vcmp.lt.s32.totalorder %v2418_v33, %v2419_v17  ;;  %v1569_v10 = vmul.f32 %v1540_v24, %v85_v43  ;;  %v1570_v44 = vmul.f32 %v1544_v22, %v86_v32  ;;  %v88_v24 = vld [vmem:[%s4638_s2 + $0xb8] sm:$0xff] }
 0x1a0   :  { %v2410_v60 = vsel %vm2409_vm13, %v2407_v23, %v2408_v34  ;;  %v2421_v47 = vsel %vm2420_vm14, %v2418_v33, %v2419_v17  ;;  %v1571_v15 = vmul.f32 %v1548_v53, %v85_v43  ;;  %v1572_v18 = vmul.f32 %v1552_v61, %v86_v32  ;;  %v4785_v33 = vld [vmem:[#allocation12_spill] sm:$0xff] }
 0x1a1   :  { %v2411_v16 = vrot.slane %v2410_v60, 2  ;;  %v2422_v51 = vrot.slane %v2421_v47, 2  ;;  %v1573_v36 = vmul.f32 %v1556_v12, %v85_v43  ;;  %v1574_v41 = vmul.f32 %v1560_v45, %v86_v32 }
 0x1a2   :  { %v1575_v49 = vmul.f32 %v1564_v57, %v85_v43  ;;  %v1576_v19 = vmul.f32 %v1568_v62, %v86_v32  ;;  %v1577_v29 = vadd.f32 %v1569_v10, %v1529_v39  ;;  %v1578_v11 = vadd.f32 %v1570_v44, %v1530_v40  ;;  %v87_v32 = vld [vmem:[%s4638_s2 + $0xb0] sm:$0xff] }
 0x1a3   :  { %vm2412_vm15 = vcmp.lt.s32.totalorder %v2410_v60, %v2411_v16  ;;  %vm2423_vm0 = vcmp.lt.s32.totalorder %v2421_v47, %v2422_v51  ;;  %v1579_v2 = vadd.f32 %v1571_v15, %v1531_v27  ;;  %v1580_v50 = vadd.f32 %v1572_v18, %v1532_v4 }
 0x1a4   :  { %v2413_v31 = vsel %vm2412_vm15, %v2410_v60, %v2411_v16  ;;  %v2424_v7 = vsel %vm2423_vm0, %v2421_v47, %v2422_v51  ;;  %v1581_v1 = vadd.f32 %v1573_v36, %v1533_v54  ;;  %v1582_v28 = vadd.f32 %v1574_v41, %v1534_v37 }
 0x1a5   :  { %v2414_v30 = vrot.slane %v2413_v31, 1  ;;  %v2425_v48 = vrot.slane %v2424_v7, 1  ;;  %v1583_v8 = vadd.f32 %v1575_v49, %v1535_v14  ;;  %v1584_v23 = vadd.f32 %v1576_v19, %v1536_v63 }
 0x1a6   :  { %v1588_v56 = vrot.slane %v3367_v6, %v4785_v33  ;;  %v1592_v43 = vrot.slane %v3375_v5, %v4785_v33  ;;  %v1596_v39 = vrot.slane %v3453_v13, %v4785_v33  ;;  %v1600_v40 = vrot.slane %v3485_v0, %v4785_v33 }
 0x1a7   :  { %vm2415_vm1 = vcmp.lt.s32.totalorder %v2413_v31, %v2414_v30  ;;  %vm2426_vm3 = vcmp.lt.s32.totalorder %v2424_v7, %v2425_v48  ;;  %v1604_v27 = vrot.slane %v3618_v42, %v4785_v33  ;;  %v1608_v4 = vrot.slane %v4780_v58, %v4785_v33 }
 0x1a8   :  { %v2416_v54 = vsel %vm2415_vm1, %v2413_v31, %v2414_v30  ;;  %v2427_v37 = vsel %vm2426_vm3, %v2424_v7, %v2425_v48  ;;  %v1612_v14 = vrot.slane %v4781_v46, %v4785_v33  ;;  %v1616_v63 = vrot.slane %v4782_v21, %v4785_v33  ;;  %v89_v48 = vld [vmem:[%s4638_s2 + $0xc0] sm:$0xff]  ;;  %v90_v33 = vld [vmem:[%s4638_s2 + $0xc8] sm:$0xff] }
 0x1a9   :  { %vm2440_vm4 = vcmp.eq.s32.totalorder %v4751_v52, %v2416_v54  ;;  %vm2441_vm5 = vcmp.eq.s32.totalorder %v4751_v52, %v2427_v37  ;;  %vm2442_vm10 = vcmp.eq.s32.totalorder %v3390_v9, %v2416_v54  ;;  %vm2443_vm6 = vcmp.eq.s32.totalorder %v3390_v9, %v2427_v37 }
 0x1aa   :  { %v4470_v22 = vsel %vm2440_vm4, -inf, %v4364_v55  ;;  %v4473_v34 = vsel %vm2441_vm5, -inf, %v4367_v25  ;;  %v4476_v17 = vsel %vm2442_vm10, -inf, %v4370_v35  ;;  %v4479_v53 = vsel %vm2443_vm6, -inf, %v4373_v20 }
 0x1ab   :  { %v2502_v61 = vmax.f32 %v4470_v22, %v4476_v17  ;;  %v2509_v12 = vmax.f32 %v4473_v34, %v4479_v53  ;;  %v4487_v45 = vsel %vm2645_vm11, %v4381_v38, %v2416_v54  ;;  %v4491_v55 = vsel %vm2645_vm11, %v4385_v3, %v2427_v37 }
 0x1ac   :  { %v1617_v25 = vmul.f32 %v1588_v56, %v87_v32  ;;  %v1618_v35 = vmul.f32 %v1592_v43, %v88_v24  ;;  %v1619_v57 = vmul.f32 %v1596_v39, %v87_v32  ;;  %v1620_v62 = vmul.f32 %v1600_v40, %v88_v24 }
 0x1ad   :  { %v2503_v20 = vrot.slane %v2502_v61, 4  ;;  %v2510_v10 = vrot.slane %v2509_v12, 4  ;;  %v1621_v44 = vmul.f32 %v1604_v27, %v87_v32  ;;  %v1622_v60 = vmul.f32 %v1608_v4, %v88_v24 }
 0x1ae   :  { %v1623_v47 = vmul.f32 %v1612_v14, %v87_v32  ;;  %v1624_v15 = vmul.f32 %v1616_v63, %v88_v24  ;;  %v1625_v18 = vadd.f32 %v1617_v25, %v1577_v29  ;;  %v1626_v16 = vadd.f32 %v1618_v35, %v1578_v11  ;;  %v4786_v29 = vld [vmem:[#allocation13_spill] sm:$0xff] }
 0x1af   :  { %v2504_v51 = vmax.f32 %v2502_v61, %v2503_v20  ;;  %v2511_v36 = vmax.f32 %v2509_v12, %v2510_v10  ;;  %v1627_v38 = vadd.f32 %v1619_v57, %v1579_v2  ;;  %v1628_v41 = vadd.f32 %v1620_v62, %v1580_v50 }
 0x1b0   :  { %v1629_v49 = vadd.f32 %v1621_v44, %v1581_v1  ;;  %v1630_v19 = vadd.f32 %v1622_v60, %v1582_v28  ;;  %v1631_v3 = vadd.f32 %v1623_v47, %v1583_v8  ;;  %v1632_v31 = vadd.f32 %v1624_v15, %v1584_v23 }
 0x1b1   :  { %v2505_v7 = vrot.slane %v2504_v51, 2  ;;  %v2512_v30 = vrot.slane %v2511_v36, 2  ;;  %v1636_v11 = vrot.slane %v3367_v6, %v4786_v29  ;;  %v1640_v2 = vrot.slane %v3375_v5, %v4786_v29 }
 0x1b2   :  { %v1644_v50 = vrot.slane %v3453_v13, %v4786_v29  ;;  %v1648_v1 = vrot.slane %v3485_v0, %v4786_v29  ;;  %v1652_v28 = vrot.slane %v3618_v42, %v4786_v29  ;;  %v1656_v8 = vrot.slane %v4780_v58, %v4786_v29 }
 0x1b3   :  { %v2506_v23 = vmax.f32 %v2504_v51, %v2505_v7  ;;  %v2513_v56 = vmax.f32 %v2511_v36, %v2512_v30  ;;  %v1660_v43 = vrot.slane %v4781_v46, %v4786_v29  ;;  %v1664_v39 = vrot.slane %v4782_v21, %v4786_v29 }
 0x1b4   :  { %v1665_v40 = vmul.f32 %v1636_v11, %v89_v48  ;;  %v1666_v27 = vmul.f32 %v1640_v2, %v90_v33  ;;  %v1667_v4 = vmul.f32 %v1644_v50, %v89_v48  ;;  %v1668_v54 = vmul.f32 %v1648_v1, %v90_v33 }
 0x1b5   :  { %v2507_v37 = vrot.slane %v2506_v23, 1  ;;  %v2514_v14 = vrot.slane %v2513_v56, 1  ;;  %v1669_v63 = vmul.f32 %v1652_v28, %v89_v48  ;;  %v1670_v32 = vmul.f32 %v1656_v8, %v90_v33 }
 0x1b6   :  { %v1671_v24 = vmul.f32 %v1660_v43, %v89_v48  ;;  %v1672_v61 = vmul.f32 %v1664_v39, %v90_v33  ;;  %v1673_v12 = vadd.f32 %v1665_v40, %v1625_v18  ;;  %v1674_v25 = vadd.f32 %v1666_v27, %v1626_v16 }
 0x1b7   :  { %v2508_v35 = vmax.f32 %v2506_v23, %v2507_v37  ;;  %v2515_v57 = vmax.f32 %v2513_v56, %v2514_v14  ;;  %v1675_v62 = vadd.f32 %v1667_v4, %v1627_v38  ;;  %v1676_v20 = vadd.f32 %v1668_v54, %v1628_v41 }
 0x1b8   :  { %v1677_v10 = vadd.f32 %v1669_v63, %v1629_v49  ;;  %v1678_v44 = vadd.f32 %v1670_v32, %v1630_v19  ;;  %v1679_v60 = vadd.f32 %v1671_v24, %v1631_v3  ;;  %v1680_v47 = vadd.f32 %v1672_v61, %v1632_v31 }
 0x1b9   :  { %vm2528_vm11 = vcmp.eq.f32.partialorder %v4470_v22, %v2508_v35  ;;  %vm2529_vm7 = vcmp.eq.f32.partialorder %v4473_v34, %v2515_v57  ;;  %vm2530_vm8 = vcmp.eq.f32.partialorder %v4476_v17, %v2508_v35  ;;  %vm2531_vm9 = vcmp.eq.f32.partialorder %v4479_v53, %v2515_v57  ;;  %v91_v22 = vld [vmem:[%s4638_s2 + $0xd0] sm:$0xff]  ;;  %v92_v34 = vld [vmem:[%s4638_s2 + $0xd8] sm:$0xff]  ;;  %v93_v57 = vld [vmem:[%s4638_s2 + $0xe0] sm:$0xff] }
 0x1ba   :  { %v2544_v15 = vsel %vm2528_vm11, %v4751_v52, 16  ;;  %v2545_v18 = vsel %vm2529_vm7, %v4751_v52, 16  ;;  %v2546_v16 = vsel %vm2530_vm8, %v3390_v9, 16  ;;  %v2547_v51 = vsel %vm2531_vm9, %v3390_v9, 16  ;;  %v4787_v17 = vld [vmem:[#allocation19_spill] sm:$0xff] }
 0x1bb   :  { %vm2614_vm12 = vcmp.lt.s32.totalorder %v2544_v15, %v2546_v16  ;;  %vm2625_vm13 = vcmp.lt.s32.totalorder %v2545_v18, %v2547_v51  ;;  %v1684_v53 = vrot.slane %v3367_v6, %v4787_v17  ;;  %v1688_v52 = vrot.slane %v3375_v5, %v4787_v17 }
 0x1bc   :  { %v2615_v36 = vsel %vm2614_vm12, %v2544_v15, %v2546_v16  ;;  %v2626_v38 = vsel %vm2625_vm13, %v2545_v18, %v2547_v51  ;;  %v1692_v9 = vrot.slane %v3453_v13, %v4787_v17  ;;  %v1696_v41 = vrot.slane %v3485_v0, %v4787_v17 }
 0x1bd   :  { %v2616_v49 = vrot.slane %v2615_v36, 4  ;;  %v2627_v19 = vrot.slane %v2626_v38, 4  ;;  %v1700_v3 = vrot.slane %v3618_v42, %v4787_v17  ;;  %v1704_v31 = vrot.slane %v4780_v58, %v4787_v17 }
 0x1be   :  { %v1708_v7 = vrot.slane %v4781_v46, %v4787_v17  ;;  %v1712_v30 = vrot.slane %v4782_v21, %v4787_v17  ;;  %v1713_v48 = vmul.f32 %v1684_v53, %v91_v22  ;;  %v1714_v33 = vmul.f32 %v1688_v52, %v92_v34 }
 0x1bf   :  { %vm2617_vm14 = vcmp.lt.s32.totalorder %v2615_v36, %v2616_v49  ;;  %vm2628_vm15 = vcmp.lt.s32.totalorder %v2626_v38, %v2627_v19  ;;  %v1715_v29 = vmul.f32 %v1692_v9, %v91_v22  ;;  %v1716_v11 = vmul.f32 %v1696_v41, %v92_v34 }
 0x1c0   :  { %v2618_v2 = vsel %vm2617_vm14, %v2615_v36, %v2616_v49  ;;  %v2629_v50 = vsel %vm2628_vm15, %v2626_v38, %v2627_v19  ;;  %v1717_v1 = vmul.f32 %v1700_v3, %v91_v22  ;;  %v1718_v28 = vmul.f32 %v1704_v31, %v92_v34 }
 0x1c1   :  { %v2619_v8 = vrot.slane %v2618_v2, 2  ;;  %v2630_v23 = vrot.slane %v2629_v50, 2  ;;  %v1719_v56 = vmul.f32 %v1708_v7, %v91_v22  ;;  %v1720_v43 = vmul.f32 %v1712_v30, %v92_v34 }
 0x1c2   :  { %v1721_v39 = vadd.f32 %v1713_v48, %v1673_v12  ;;  %v1722_v40 = vadd.f32 %v1714_v33, %v1674_v25  ;;  %v1723_v27 = vadd.f32 %v1715_v29, %v1675_v62  ;;  %v1724_v4 = vadd.f32 %v1716_v11, %v1676_v20  ;;  %v94_v12 = vld [vmem:[%s4638_s2 + $0xe8] sm:$0xff] }
 0x1c3   :  { %vm2620_vm0 = vcmp.lt.s32.totalorder %v2618_v2, %v2619_v8  ;;  %vm2631_vm1 = vcmp.lt.s32.totalorder %v2629_v50, %v2630_v23  ;;  %v1725_v54 = vadd.f32 %v1717_v1, %v1677_v10  ;;  %v1726_v37 = vadd.f32 %v1718_v28, %v1678_v44 }
 0x1c4   :  { %v2621_v14 = vsel %vm2620_vm0, %v2618_v2, %v2619_v8  ;;  %v2632_v63 = vsel %vm2631_vm1, %v2629_v50, %v2630_v23  ;;  %v1727_v32 = vadd.f32 %v1719_v56, %v1679_v60  ;;  %v1728_v24 = vadd.f32 %v1720_v43, %v1680_v47 }
 0x1c5   :  { %v2622_v61 = vrot.slane %v2621_v14, 1  ;;  %v2633_v35 = vrot.slane %v2632_v63, 1  ;;  %v1732_v25 = vrot.slane %v3367_v6, %v4234_v26  ;;  %v1736_v62 = vrot.slane %v3375_v5, %v4234_v26 }
 0x1c6   :  { %v1740_v20 = vrot.slane %v3453_v13, %v4234_v26  ;;  %v1744_v10 = vrot.slane %v3485_v0, %v4234_v26  ;;  %v1748_v44 = vrot.slane %v3618_v42, %v4234_v26  ;;  %v1752_v60 = vrot.slane %v4780_v58, %v4234_v26 }
 0x1c7   :  { %vm2623_vm3 = vcmp.lt.s32.totalorder %v2621_v14, %v2622_v61  ;;  %vm2634_vm4 = vcmp.lt.s32.totalorder %v2632_v63, %v2633_v35  ;;  %v1756_v47 = vrot.slane %v4781_v46, %v4234_v26  ;;  %v1760_v15 = vrot.slane %v4782_v21, %v4234_v26 }
 0x1c8   :  { %v2624_v18 = vsel %vm2623_vm3, %v2621_v14, %v2622_v61  ;;  %v2635_v16 = vsel %vm2634_vm4, %v2632_v63, %v2633_v35  ;;  %v1761_v51 = vmul.f32 %v1732_v25, %v93_v57  ;;  %v1762_v22 = vmul.f32 %v1736_v62, %v94_v12 }
 0x1c9   :  { %v2661_v34 = vsel %vm2654_vm2, %v4487_v45, %v2624_v18  ;;  %v2662_v17 = vsel %vm2654_vm2, %v4491_v55, %v2635_v16  ;;  %v1763_v53 = vmul.f32 %v1740_v20, %v93_v57  ;;  %v1764_v52 = vmul.f32 %v1744_v10, %v94_v12  ;;  %v95_v45 = vld [vmem:[%s4638_s2 + $0xf0] sm:$0xff]  ;;  %v96_v55 = vld [vmem:[%s4638_s2 + $0xf8] sm:$0xff] }
 0x1ca   :  { %v2666_v36 = vcombine.low %v2661_v34, %v2662_v17  ;;  %v1765_v38 = vmul.f32 %v1748_v44, %v93_v57  ;;  %v1766_v9 = vmul.f32 %v1752_v60, %v94_v12  ;;  %v1767_v41 = vmul.f32 %v1756_v47, %v93_v57 }
 0x1cb   :  { %v1768_v26 = vmul.f32 %v1760_v15, %v94_v12  ;;  %v1769_v49 = vadd.f32 %v1761_v51, %v1721_v39  ;;  %v1770_v19 = vadd.f32 %v1762_v22, %v1722_v40  ;;  %v1771_v3 = vadd.f32 %v1763_v53, %v1723_v27 }
 0x1cc   :  { %2670 = vst [vmem:[#allocation2 + $0x18] sm:$0xff] %v2666_v36  ;;  %v1772_v31 = vadd.f32 %v1764_v52, %v1724_v4  ;;  %v1773_v7 = vadd.f32 %v1765_v38, %v1725_v54  ;;  %v1774_v30 = vadd.f32 %v1766_v9, %v1726_v37  ;;  %v1775_v48 = vadd.f32 %v1767_v41, %v1727_v32 }
 0x1cd   :  { %v1776_v33 = vadd.f32 %v1768_v26, %v1728_v24  ;;  %v1780_v29 = vrot.slane %v3367_v6, %v4237_v59  ;;  %v1784_v11 = vrot.slane %v3375_v5, %v4237_v59  ;;  %v1788_v2 = vrot.slane %v3453_v13, %v4237_v59 }
 0x1ce   :  { %2774 = shalt.err (!%p2771_p4)
}
 0x1cf   :  { %s2775_s11 = scalar_lea.hbm %s4640_s4, 512 }
 0x1d0   :  { %p2776_p5 = scmp.ne.s32.totalorder %s4640_s4, %s2775_s11  ;;  %p2779_p6 = scmp.lt.u32.totalorder %s2775_s11, %s4640_s4 }
 0x1d2   :  { %p2781_p7 = pnand %p2779_p6, %p2776_p5 }
 0x1d4   :  { %2784 = shalt.err (!%p2781_p7)
}
 0x1d5   :  { %s2789_s16 = smov 128   ;;  %s2790_s17 = smov 8   ;;  %v1792_v6 = vrot.slane %v3485_v0, %v4237_v59  ;;  %v1796_v5 = vrot.slane %v3618_v42, %v4237_v59  ;;  %v1800_v13 = vrot.slane %v4780_v58, %v4237_v59  ;;  %v1804_v50 = vrot.slane %v4781_v46, %v4237_v59 }
 0x1d6   :  { %2684 = dma.vmem_to_hbm [thread:$0]  %s4571_s0, 512, %s4640_s4, [#allocation3], %s2789_s16, %s2789_s16, %s2790_s17   ;;  %v1808_v1 = vrot.slane %v4782_v21, %v4237_v59  ;;  %v1809_v28 = vmul.f32 %v1780_v29, %v95_v45  ;;  %v1810_v8 = vmul.f32 %v1784_v11, %v96_v55  ;;  %v1811_v23 = vmul.f32 %v1788_v2, %v95_v45 }
 0x1d7   :  { %v1812_v56 = vmul.f32 %v1792_v6, %v96_v55  ;;  %v1813_v43 = vmul.f32 %v1796_v5, %v95_v45  ;;  %v1814_v39 = vmul.f32 %v1800_v13, %v96_v55  ;;  %v1815_v40 = vmul.f32 %v1804_v50, %v95_v45 }
 0x1d8   :  { %v1816_v0 = vmul.f32 %v1808_v1, %v96_v55  ;;  %v1817_v27 = vadd.f32 %v1809_v28, %v1769_v49  ;;  %v1818_v4 = vadd.f32 %v1810_v8, %v1770_v19  ;;  %v1819_v42 = vadd.f32 %v1811_v23, %v1771_v3 }
 0x1d9   :  { %v1820_v54 = vadd.f32 %v1812_v56, %v1772_v31  ;;  %v1821_v37 = vadd.f32 %v1813_v43, %v1773_v7  ;;  %v1822_v58 = vadd.f32 %v1814_v39, %v1774_v30  ;;  %v1823_v14 = vadd.f32 %v1815_v40, %v1775_v48 }
 0x1da   :  { %v1824_v63 = vadd.f32 %v1816_v0, %v1776_v33  ;;  %1825 = vst [vmem:[%s4639_s3] sm:$0xff] %v1817_v27  ;;  %1826 = vst [vmem:[%s4639_s3 + $0x8] sm:$0xff] %v1818_v4 }
 0x1db   :  { %1827 = vst [vmem:[%s4639_s3 + $0x10] sm:$0xff] %v1819_v42  ;;  %1828 = vst [vmem:[%s4639_s3 + $0x18] sm:$0xff] %v1820_v54 }
 0x1dc   :  { %1829 = vst [vmem:[%s4639_s3 + $0x20] sm:$0xff] %v1821_v37  ;;  %1830 = vst [vmem:[%s4639_s3 + $0x28] sm:$0xff] %v1822_v58 }
 0x1dd   :  { %1831 = vst [vmem:[%s4639_s3 + $0x30] sm:$0xff] %v1823_v14  ;;  %1832 = vst [vmem:[%s4639_s3 + $0x38] sm:$0xff] %v1824_v63 }
 0x1de   :  { %2785 = dma.done.wait [#allocation3], 512  }
 0x1df   :  { %2786 = vsyncadd [#allocation3], 4294966784 }
 0x1e0   :  { %2690 = vsyncpa [#allocation3], 1 }

</bundles_post_ra>
